<compile_context>
chip_gen: v5e
topology: v5e:2x2
jax: 0.10.0
libtpu: 0.0.40
codegen_flags: <defaults>
</compile_context>

<pallas_src>
import jax
import jax.numpy as jnp
from jax.experimental import pallas as pl
from jax.experimental.pallas import tpu as pltpu

IN_DIM = 28 * 28   # 784
HID = 1200         # logical hidden width (matches the PyTorch module)
HID_PAD = 1280     # hidden width zero-padded to a multiple of 128 lanes
OUT_DIM = 10


def _teacher_mlp_kernel(x_ref, w1_ref, b1_ref, w2_ref, b2_ref, w3_ref, b3_ref, out_ref):
    # Layer 1: (BM, 784) @ (784, 1280) -> bias + ReLU in f32, bf16 feed for next MXU.
    x_bf = x_ref[...].astype(jnp.bfloat16)
    h1 = jnp.dot(x_bf, w1_ref[...], preferred_element_type=jnp.float32)
    h1 = jnp.maximum(h1 + b1_ref[...], 0.0)

    # Layer 2: (BM, 1280) @ (1280, 1280)
    h2 = jnp.dot(h1.astype(jnp.bfloat16), w2_ref[...], preferred_element_type=jnp.float32)
    h2 = jnp.maximum(h2 + b2_ref[...], 0.0)

    # Layer 3: (BM, 1280) @ (1280, 10) -> logits
    logits = jnp.dot(h2.astype(jnp.bfloat16), w3_ref[...], preferred_element_type=jnp.float32)
    out_ref[...] = (logits + b3_ref[...]).astype(out_ref.dtype)


def prepare_params(params):
    """f32 (in,out)-layout params -> kernel format: bf16 weights, hidden dim padded 1200->1280.

    Padding is numerically exact: extra hidden units get zero weights and zero bias,
    ReLU(0) = 0, and the matching zero rows of the next weight contribute nothing.
    """
    w1, b1, w2, b2, w3, b3 = params
    bf = jnp.bfloat16
    w1p = jnp.zeros((IN_DIM, HID_PAD), bf).at[:, :HID].set(w1.astype(bf))
    b1p = jnp.zeros((1, HID_PAD), jnp.float32).at[:, :HID].set(b1)
    w2p = jnp.zeros((HID_PAD, HID_PAD), bf).at[:HID, :HID].set(w2.astype(bf))
    b2p = jnp.zeros((1, HID_PAD), jnp.float32).at[:, :HID].set(b2)
    w3p = jnp.zeros((HID_PAD, OUT_DIM), bf).at[:HID, :].set(w3.astype(bf))
    b3p = b3.astype(jnp.float32)
    return (w1p, b1p, w2p, b2p, w3p, b3p)


@jax.jit
def teacher_forward(x, kparams):
    """x: (B,1,28,28) / (B,28,28) / (B,784) float32 -> logits (B, 10) float32."""
    w1p, b1p, w2p, b2p, w3p, b3p = kparams
    B = x.shape[0]
    x_flat = x.reshape(B, -1).astype(jnp.float32)        # nn.Flatten()
    assert x_flat.shape[1] == IN_DIM, f"expected {IN_DIM} features, got {x_flat.shape[1]}"

    # Batch tiling: single step at small B; pipelined + megacore-parallel at large B
    # (weights stay VMEM-resident across batch tiles).
    BM = 128 if (B > 128 and B % 128 == 0) else B
    nb = B // BM

    flops = 2 * B * (IN_DIM * HID + HID * HID + HID * OUT_DIM)
    bytes_accessed = (
        2 * (IN_DIM * HID_PAD + HID_PAD * HID_PAD + HID_PAD * OUT_DIM)  # bf16 weights
        + 4 * (2 * HID_PAD + OUT_DIM)                                   # f32 biases
        + 4 * B * IN_DIM + 4 * B * OUT_DIM)                             # activations

    out = pl.pallas_call(
        _teacher_mlp_kernel,
        out_shape=jax.ShapeDtypeStruct((B, OUT_DIM), jnp.float32),
        grid_spec=pltpu.PrefetchScalarGridSpec(
            num_scalar_prefetch=0,
            grid=(nb,),
            in_specs=[
                pl.BlockSpec((BM, IN_DIM), lambda i: (i, 0)),          # x (per batch tile)
                pl.BlockSpec((IN_DIM, HID_PAD), lambda i: (0, 0)),     # w1 (resident)
                pl.BlockSpec((1, HID_PAD), lambda i: (0, 0)),          # b1 (resident)
                pl.BlockSpec((HID_PAD, HID_PAD), lambda i: (0, 0)),    # w2 (resident)
                pl.BlockSpec((1, HID_PAD), lambda i: (0, 0)),          # b2 (resident)
                pl.BlockSpec((HID_PAD, OUT_DIM), lambda i: (0, 0)),    # w3 (resident)
                pl.BlockSpec((1, OUT_DIM), lambda i: (0, 0)),          # b3 (resident)
            ],
            out_specs=pl.BlockSpec((BM, OUT_DIM), lambda i: (i, 0)),
        ),
        compiler_params=pltpu.CompilerParams(
            dimension_semantics=("parallel",),    # batch tiles are independent
            vmem_limit_bytes=32 << 20,            # ~11 MiB used (double-buffered)
        ),
        cost_estimate=pl.CostEstimate(
            flops=flops, transcendentals=0, bytes_accessed=bytes_accessed),
    )(x_flat, w1p, b1p, w2p, b2p, w3p, b3p)
    return out


def init_params(key):
    """Deterministic init matching the Teacher module's Linear shapes.

    Weights as (in_features, out_features); biases as (1, out_features).
    """
    ks = jax.random.split(key, 6)

    def linear(kw, kb, fan_in, fan_out):
        bound = 1.0 / jnp.sqrt(fan_in)
        w = jax.random.uniform(kw, (fan_in, fan_out), jnp.float32, -bound, bound)
        b = jax.random.uniform(kb, (1, fan_out), jnp.float32, -bound, bound)
        return w, b

    w1, b1 = linear(ks[0], ks[1], IN_DIM, HID)
    w2, b2 = linear(ks[2], ks[3], HID, HID)
    w3, b3 = linear(ks[4], ks[5], HID, OUT_DIM)
    return (w1, b1, w2, b2, w3, b3)


def _reference(x, params):
    """Plain-JAX reference mirroring the kernel's bf16-weight / f32-accumulate math."""
    w1, b1, w2, b2, w3, b3 = params
    bf, f32 = jnp.bfloat16, jnp.float32
    h = x.reshape(x.shape[0], -1).astype(bf)
    h = jnp.maximum(jnp.dot(h, w1.astype(bf), preferred_element_type=f32) + b1, 0.0).astype(bf)
    h = jnp.maximum(jnp.dot(h, w2.astype(bf), preferred_element_type=f32) + b2, 0.0).astype(bf)
    return jnp.dot(h, w3.astype(bf), preferred_element_type=f32) + b3


if __name__ == "__main__":
    key = jax.random.PRNGKey(0)
    k_params, k_x = jax.random.split(key)

    params = init_params(k_params)
    kparams = prepare_params(params)

    # MNIST-like input batch (B, C=1, H=28, W=28)
    x = jax.random.normal(k_x, (8, 1, 28, 28), jnp.float32)

    logits = jax.block_until_ready(teacher_forward(x, kparams))
    ref = _reference(x, params)

    assert logits.shape == (8, OUT_DIM)
    assert jnp.allclose(logits, ref, atol=1e-2, rtol=1e-2), (
        f"mismatch vs reference: max abs err {jnp.max(jnp.abs(logits - ref))}")

    print("KERNEL_OK")
</pallas_src>

<mosaic_0001>
module attributes {stable_mosaic.version = 11 : i64} {
  func.func @_teacher_mlp_kernel(%arg0: i32, %arg1: memref<8x784xf32, #tpu.memory_space<vmem>>, %arg2: memref<784x1280xbf16, #tpu.memory_space<vmem>>, %arg3: memref<1x1280xf32, #tpu.memory_space<vmem>>, %arg4: memref<1280x1280xbf16, #tpu.memory_space<vmem>>, %arg5: memref<1x1280xf32, #tpu.memory_space<vmem>>, %arg6: memref<1280x10xbf16, #tpu.memory_space<vmem>>, %arg7: memref<1x10xf32, #tpu.memory_space<vmem>>, %arg8: memref<8x10xf32, #tpu.memory_space<vmem>>) attributes {dimension_semantics = [#tpu.dimension_semantics<parallel>], iteration_bounds = array<i64: 1>, scalar_prefetch = 0 : i64, scratch_operands = 0 : i64, tpu.core_type = #tpu.core_type<tc>, window_params = [{transform_indices = @transform_0, window_bounds = array<i64: 8, 784>}, {pipeline_mode = #tpu.pipeline_mode<synchronous>, transform_indices = @transform_1, window_bounds = array<i64: 784, 1280>}, {pipeline_mode = #tpu.pipeline_mode<synchronous>, transform_indices = @transform_2, window_bounds = array<i64: 1, 1280>}, {pipeline_mode = #tpu.pipeline_mode<synchronous>, transform_indices = @transform_3, window_bounds = array<i64: 1280, 1280>}, {pipeline_mode = #tpu.pipeline_mode<synchronous>, transform_indices = @transform_4, window_bounds = array<i64: 1, 1280>}, {pipeline_mode = #tpu.pipeline_mode<synchronous>, transform_indices = @transform_5, window_bounds = array<i64: 1280, 10>}, {pipeline_mode = #tpu.pipeline_mode<synchronous>, transform_indices = @transform_6, window_bounds = array<i64: 1, 10>}, {transform_indices = @transform_7, window_bounds = array<i64: 8, 10>}]} {
    %c0 = arith.constant 0 : index
    %c0_0 = arith.constant 0 : index
    %0 = vector.load %arg1[%c0, %c0_0] : memref<8x784xf32, #tpu.memory_space<vmem>>, vector<8x784xf32>
    %1 = arith.truncf %0 : vector<8x784xf32> to vector<8x784xbf16>
    %c0_1 = arith.constant 0 : index
    %c0_2 = arith.constant 0 : index
    %2 = vector.load %arg2[%c0_1, %c0_2] : memref<784x1280xbf16, #tpu.memory_space<vmem>>, vector<784x1280xbf16>
    %cst = arith.constant dense<0.000000e+00> : vector<8x1280xf32>
    %3 = tpu.matmul %1, %2, %cst {dimension_numbers = #tpu.dot_dimension_numbers<[1], [0], [0], [1], [0, 0, 1, 1], [], []>} : vector<8x784xbf16>, vector<784x1280xbf16>, vector<8x1280xf32> -> vector<8x1280xf32>
    %c0_3 = arith.constant 0 : index
    %c0_4 = arith.constant 0 : index
    %4 = vector.load %arg3[%c0_3, %c0_4] : memref<1x1280xf32, #tpu.memory_space<vmem>>, vector<1x1280xf32>
    %5 = vector.broadcast %4 : vector<1x1280xf32> to vector<8x1280xf32>
    %6 = arith.addf %3, %5 : vector<8x1280xf32>
    %cst_5 = arith.constant 0.000000e+00 : f32
    %7 = vector.broadcast %cst_5 : f32 to vector<8x1280xf32>
    %8 = arith.maximumf %6, %7 : vector<8x1280xf32>
    %9 = arith.truncf %8 : vector<8x1280xf32> to vector<8x1280xbf16>
    %c0_6 = arith.constant 0 : index
    %c0_7 = arith.constant 0 : index
    %10 = vector.load %arg4[%c0_6, %c0_7] : memref<1280x1280xbf16, #tpu.memory_space<vmem>>, vector<1280x1280xbf16>
    %cst_8 = arith.constant dense<0.000000e+00> : vector<8x1280xf32>
    %11 = tpu.matmul %9, %10, %cst_8 {dimension_numbers = #tpu.dot_dimension_numbers<[1], [0], [0], [1], [0, 0, 1, 1], [], []>} : vector<8x1280xbf16>, vector<1280x1280xbf16>, vector<8x1280xf32> -> vector<8x1280xf32>
    %c0_9 = arith.constant 0 : index
    %c0_10 = arith.constant 0 : index
    %12 = vector.load %arg5[%c0_9, %c0_10] : memref<1x1280xf32, #tpu.memory_space<vmem>>, vector<1x1280xf32>
    %13 = vector.broadcast %12 : vector<1x1280xf32> to vector<8x1280xf32>
    %14 = arith.addf %11, %13 : vector<8x1280xf32>
    %cst_11 = arith.constant 0.000000e+00 : f32
    %15 = vector.broadcast %cst_11 : f32 to vector<8x1280xf32>
    %16 = arith.maximumf %14, %15 : vector<8x1280xf32>
    %17 = arith.truncf %16 : vector<8x1280xf32> to vector<8x1280xbf16>
    %c0_12 = arith.constant 0 : index
    %c0_13 = arith.constant 0 : index
    %18 = vector.load %arg6[%c0_12, %c0_13] : memref<1280x10xbf16, #tpu.memory_space<vmem>>, vector<1280x10xbf16>
    %cst_14 = arith.constant dense<0.000000e+00> : vector<8x10xf32>
    %19 = tpu.matmul %17, %18, %cst_14 {dimension_numbers = #tpu.dot_dimension_numbers<[1], [0], [0], [1], [0, 0, 1, 1], [], []>} : vector<8x1280xbf16>, vector<1280x10xbf16>, vector<8x10xf32> -> vector<8x10xf32>
    %c0_15 = arith.constant 0 : index
    %c0_16 = arith.constant 0 : index
    %20 = vector.load %arg7[%c0_15, %c0_16] : memref<1x10xf32, #tpu.memory_space<vmem>>, vector<1x10xf32>
    %21 = vector.broadcast %20 : vector<1x10xf32> to vector<8x10xf32>
    %22 = arith.addf %19, %21 : vector<8x10xf32>
    %c0_17 = arith.constant 0 : index
    %c0_18 = arith.constant 0 : index
    %23 = vector.load %arg8[%c0_17, %c0_18] : memref<8x10xf32, #tpu.memory_space<vmem>>, vector<8x10xf32>
    tpu.vector_store %arg8[%c0_17, %c0_18], %22 {strides = array<i32>} : memref<8x10xf32, #tpu.memory_space<vmem>>, vector<8x10xf32>,
    return
  }
  func.func @transform_0(%arg0: i32) -> (i32, i32) {
    %c0_i32 = arith.constant 0 : i32
    %c0_i32_0 = arith.constant 0 : i32
    return %arg0, %c0_i32 : i32, i32
  }
  func.func @transform_1(%arg0: i32) -> (i32, i32) {
    %c0_i32 = arith.constant 0 : i32
    %c0_i32_0 = arith.constant 0 : i32
    %c0_i32_1 = arith.constant 0 : i32
    return %c0_i32, %c0_i32_0 : i32, i32
  }
  func.func @transform_2(%arg0: i32) -> (i32, i32) {
    %c0_i32 = arith.constant 0 : i32
    %c0_i32_0 = arith.constant 0 : i32
    %c0_i32_1 = arith.constant 0 : i32
    return %c0_i32, %c0_i32_0 : i32, i32
  }
  func.func @transform_3(%arg0: i32) -> (i32, i32) {
    %c0_i32 = arith.constant 0 : i32
    %c0_i32_0 = arith.constant 0 : i32
    %c0_i32_1 = arith.constant 0 : i32
    return %c0_i32, %c0_i32_0 : i32, i32
  }
  func.func @transform_4(%arg0: i32) -> (i32, i32) {
    %c0_i32 = arith.constant 0 : i32
    %c0_i32_0 = arith.constant 0 : i32
    %c0_i32_1 = arith.constant 0 : i32
    return %c0_i32, %c0_i32_0 : i32, i32
  }
  func.func @transform_5(%arg0: i32) -> (i32, i32) {
    %c0_i32 = arith.constant 0 : i32
    %c0_i32_0 = arith.constant 0 : i32
    %c0_i32_1 = arith.constant 0 : i32
    return %c0_i32, %c0_i32_0 : i32, i32
  }
  func.func @transform_6(%arg0: i32) -> (i32, i32) {
    %c0_i32 = arith.constant 0 : i32
    %c0_i32_0 = arith.constant 0 : i32
    %c0_i32_1 = arith.constant 0 : i32
    return %c0_i32, %c0_i32_0 : i32, i32
  }
  func.func @transform_7(%arg0: i32) -> (i32, i32) {
    %c0_i32 = arith.constant 0 : i32
    %c0_i32_0 = arith.constant 0 : i32
    return %arg0, %c0_i32 : i32, i32
  }
}

</mosaic_0001>

<bundles_post_ra>
// kernel: teacher_forward.1
= control target key start
LH: loop header
LB: loop body
LE: loop exit
PB: predicated region body
PF: predicated region fallthrough
CT: control target
= control target key end

     0   :  { %12 = vsyncpa [#allocation3], 0  ;;  %s18864_s0 = inlined_call_operand.vmem [shape: f32[8,784], index: 0, kind: input, shape index: {}]   ;;  %s18865_s1 = inlined_call_operand.hbm [shape: bf16[784,1280], index: 1, kind: input, shape index: {}]   ;;  %s18866_s2 = inlined_call_operand.hbm [shape: f32[1,1280], index: 2, kind: input, shape index: {}]   ;;  %s18867_s3 = inlined_call_operand.hbm [shape: bf16[1280,1280], index: 3, kind: input, shape index: {}]   ;;  %s18868_s4 = inlined_call_operand.hbm [shape: f32[1,1280], index: 4, kind: input, shape index: {}]   ;;  %s18869_s5 = inlined_call_operand.vmem [shape: bf16[1280,10], index: 5, kind: input, shape index: {}]   ;;  %s18870_s6 = inlined_call_operand.hbm [shape: f32[1,10], index: 6, kind: input, shape index: {}]   ;;  %s18871_s7 = inlined_call_operand.hbm [shape: f32[8,10], index: 7, kind: output, shape index: {}]  }
   0x1   :  { %13 = vsyncpa [#allocation6], 0 }
   0x2   :  { %14 = vsyncpa [#allocation9], 0  ;;  %s36_s26 = sshll.u32 %s18866_s2, 4  ;;  %s37_s26 = int_to_ptr.hbm [resolvable:$true] %s36_s26 }
   0x3   :  { %15 = vsyncpa [#allocation4], 0  ;;  %s17977_s27 = smov [#allocation5]   ;;  %s60_s8 = sshll.u32 %s18868_s4, 4  ;;  %s61_s8 = int_to_ptr.hbm [resolvable:$true] %s60_s8 }
   0x4   :  { %s38_s28 = sshll.u32 %s17977_s27, 4  ;;  %s17978_s9 = smov [#allocation8]   ;;  %s39_s28 = int_to_ptr.vmem [resolvable:$true] %s38_s28 }
   0x5   :  { %41 = dma.hbm_to_vmem [thread:$0]  %s37_s26, 160, %s39_s28, [#allocation6]  }
   0x6   :  { %s62_s10 = sshll.u32 %s17978_s9, 4  ;;  %s22_s13 = sshll.u32 %s18865_s1, 4  ;;  %s63_s10 = int_to_ptr.vmem [resolvable:$true] %s62_s10  ;;  %s23_s13 = int_to_ptr.hbm [resolvable:$true] %s22_s13 }
   0x7   :  { %65 = dma.hbm_to_vmem [thread:$0]  %s61_s8, 160, %s63_s10, [#allocation9]  }
   0x8   :  { %s17979_s2 = smov [#allocation2]   ;;  %s46_s17 = sshll.u32 %s18867_s3, 4  ;;  %s47_s17 = int_to_ptr.hbm [resolvable:$true] %s46_s17 }
   0x9   :  { %s24_s14 = sshll.u32 %s17979_s2, 4  ;;  %s17980_s18 = smov 640   ;;  %s25_s14 = int_to_ptr.vmem [resolvable:$true] %s24_s14 }
   0xa   :  { %s17981_s4 = smov 40   ;;  %s17982_s19 = smov [#allocation7]  }
   0xb   :  { %30 = dma.hbm_to_vmem [thread:$0]  %s23_s13, 62720, %s25_s14, [#allocation3], %s17980_s18, %s17980_s18, %s17981_s4  }
   0xc   :  { %s48_s20 = sshll.u32 %s17982_s19, 4  ;;  %s73_s1 = sshll.u32 %s18870_s6, 4  ;;  %s49_s20 = int_to_ptr.vmem [resolvable:$true] %s48_s20  ;;  %s74_s1 = int_to_ptr.hbm [resolvable:$true] %s73_s1 }
   0xd   :  { %54 = dma.hbm_to_vmem [thread:$0]  %s47_s17, 102400, %s49_s20, [#allocation6], %s17980_s18, %s17980_s18, %s17981_s4  }
   0xe   :  { %s17983_s23 = smov [#allocation10]  }
   0xf   :  { %s75_s24 = sshll.u32 %s17983_s23, 4  ;;  %s76_s24 = int_to_ptr.vmem [resolvable:$true] %s75_s24 }
  0x10   :  { %78 = dma.hbm_to_vmem [thread:$0]  %s74_s1, 16, %s76_s24, [#allocation9]  }
  0x11   :  { %17969 = dma.done.wait [#allocation3], 62720  }
  0x12   :  { %17970 = vsyncadd [#allocation3], 4294904576 }
  0x13   :  { %17971 = dma.done.wait [#allocation6], 102560  }
  0x14   :  { %17972 = vsyncadd [#allocation6], 4294864736 }
  0x15   :  { %17973 = dma.done.wait [#allocation9], 176  }
  0x16   :  { %17974 = vsyncadd [#allocation9], 4294967120  ;;  %v11233_v0 = vld [vmem:[#allocation2 + $0x230] sm:$0xf]  ;;  %v16516_v1 = vld [vmem:[#allocation2 + $0x254] sm:$0xf0] }
  0x17   :  { %v11553_v2 = vld [vmem:[#allocation2 + $0x4b0] sm:$0xf]  ;;  %v11234_v3 = vor.u32 %v16516_v1, %v11233_v0  ;;  %v16596_v4 = vld [vmem:[#allocation2 + $0x4d4] sm:$0xf0]  ;;  %v11193_v11 = vld [vmem:[#allocation2 + $0x1e0] sm:$0xf] }
  0x18   :  { %v11873_v5 = vld [vmem:[#allocation2 + $0x730] sm:$0xf]  ;;  %v16676_v6 = vld [vmem:[#allocation2 + $0x754] sm:$0xf0]  ;;  %v11554_v7 = vor.u32 %v16596_v4, %v11553_v2  ;;  %v16506_v13 = vld [vmem:[#allocation2 + $0x204] sm:$0xf0] }
  0x19   :  { %v11874_v8 = vor.u32 %v16676_v6, %v11873_v5  ;;  %v12193_v9 = vld [vmem:[#allocation2 + $0x9b0] sm:$0xf]  ;;  %v16756_v10 = vld [vmem:[#allocation2 + $0x9d4] sm:$0xf0]  ;;  %3082 = vmatpush.bf16.msra.mxu0 %v11234_v3  ;;  %v11513_v14 = vld [vmem:[#allocation2 + $0x460] sm:$0xf]  ;;  %v11194_v16 = vor.u32 %v16506_v13, %v11193_v11 }
  0x1a   :  { %v12194_v12 = vor.u32 %v16756_v10, %v12193_v9  ;;  %v16586_v15 = vld [vmem:[#allocation2 + $0x484] sm:$0xf0]  ;;  %3095 = vmatpush.bf16.msra.mxu1 %v11554_v7  ;;  %v11833_v18 = vld [vmem:[#allocation2 + $0x6e0] sm:$0xf]  ;;  %v11153_v23 = vld [vmem:[#allocation2 + $0x190] sm:$0xf] }
  0x1b   :  { %3108 = vmatpush.bf16.msra.mxu2 %v11874_v8  ;;  %v11514_v17 = vor.u32 %v16586_v15, %v11513_v14  ;;  %v16666_v19 = vld [vmem:[#allocation2 + $0x704] sm:$0xf0]  ;;  %v12153_v20 = vld [vmem:[#allocation2 + $0x960] sm:$0xf]  ;;  %v16496_v24 = vld [vmem:[#allocation2 + $0x1b4] sm:$0xf0] }
  0x1c   :  { %3121 = vmatpush.bf16.msra.mxu3 %v12194_v12  ;;  %v11834_v21 = vor.u32 %v16666_v19, %v11833_v18  ;;  %v16746_v22 = vld [vmem:[#allocation2 + $0x984] sm:$0xf0]  ;;  %v11473_v26 = vld [vmem:[#allocation2 + $0x410] sm:$0xf]  ;;  %v16576_v27 = vld [vmem:[#allocation2 + $0x434] sm:$0xf0]  ;;  %v11154_v29 = vor.u32 %v16496_v24, %v11153_v23 }
  0x1d   :  { %v12154_v25 = vor.u32 %v16746_v22, %v12153_v20  ;;  %v11793_v28 = vld [vmem:[#allocation2 + $0x690] sm:$0xf]  ;;  %3083 = vmatpush.bf16.msra.mxu0 %v11194_v16  ;;  %v16656_v30 = vld [vmem:[#allocation2 + $0x6b4] sm:$0xf0]  ;;  %v11474_v33 = vor.u32 %v16576_v27, %v11473_v26  ;;  %v11113_v35 = vld [vmem:[#allocation2 + $0x140] sm:$0xf] }
  0x1e   :  { %v12113_v31 = vld [vmem:[#allocation2 + $0x910] sm:$0xf]  ;;  %v16736_v32 = vld [vmem:[#allocation2 + $0x934] sm:$0xf0]  ;;  %3096 = vmatpush.bf16.msra.mxu1 %v11514_v17  ;;  %v11794_v34 = vor.u32 %v16656_v30, %v11793_v28  ;;  %v16486_v36 = vld [vmem:[#allocation2 + $0x164] sm:$0xf0] }
  0x1f   :  { %3109 = vmatpush.bf16.msra.mxu2 %v11834_v21  ;;  %v11433_v37 = vld [vmem:[#allocation2 + $0x3c0] sm:$0xf]  ;;  %v12114_v38 = vor.u32 %v16736_v32, %v12113_v31  ;;  %v16566_v39 = vld [vmem:[#allocation2 + $0x3e4] sm:$0xf0]  ;;  %v11114_v44 = vor.u32 %v16486_v36, %v11113_v35  ;;  %v11073_v47 = vld [vmem:[#allocation2 + $0xf0] sm:$0xf] }
  0x20   :  { %3122 = vmatpush.bf16.msra.mxu3 %v12154_v25  ;;  %v11753_v40 = vld [vmem:[#allocation2 + $0x640] sm:$0xf]  ;;  %v16646_v41 = vld [vmem:[#allocation2 + $0x664] sm:$0xf0]  ;;  %v11434_v45 = vor.u32 %v16566_v39, %v11433_v37  ;;  %v16476_v48 = vld [vmem:[#allocation2 + $0x114] sm:$0xf0] }
  0x21   :  { %v12073_v42 = vld [vmem:[#allocation2 + $0x8c0] sm:$0xf]  ;;  %v16726_v43 = vld [vmem:[#allocation2 + $0x8e4] sm:$0xf0]  ;;  %3084 = vmatpush.bf16.msra.mxu0 %v11154_v29  ;;  %v11754_v46 = vor.u32 %v16646_v41, %v11753_v40  ;;  %v11393_v49 = vld [vmem:[#allocation2 + $0x370] sm:$0xf]  ;;  %v11074_v56 = vor.u32 %v16476_v48, %v11073_v47 }
  0x22   :  { %3097 = vmatpush.bf16.msra.mxu1 %v11474_v33  ;;  %v12074_v50 = vor.u32 %v16726_v43, %v12073_v42  ;;  %v16556_v51 = vld [vmem:[#allocation2 + $0x394] sm:$0xf0]  ;;  %v11713_v52 = vld [vmem:[#allocation2 + $0x5f0] sm:$0xf]  ;;  %v11033_v59 = vld [vmem:[#allocation2 + $0xa0] sm:$0xf] }
  0x23   :  { %3110 = vmatpush.bf16.msra.mxu2 %v11794_v34  ;;  %v16636_v53 = vld [vmem:[#allocation2 + $0x614] sm:$0xf0]  ;;  %v12033_v54 = vld [vmem:[#allocation2 + $0x870] sm:$0xf]  ;;  %v11394_v57 = vor.u32 %v16556_v51, %v11393_v49  ;;  %v16466_v60 = vld [vmem:[#allocation2 + $0xc4] sm:$0xf0] }
  0x24   :  { %3123 = vmatpush.bf16.msra.mxu3 %v12114_v38  ;;  %v16716_v55 = vld [vmem:[#allocation2 + $0x894] sm:$0xf0]  ;;  %v11714_v58 = vor.u32 %v16636_v53, %v11713_v52  ;;  %v11353_v61 = vld [vmem:[#allocation2 + $0x320] sm:$0xf]  ;;  %v16546_v63 = vld [vmem:[#allocation2 + $0x344] sm:$0xf0]  ;;  %v11034_v4 = vor.u32 %v16466_v60, %v11033_v59 }
  0x25   :  { %3085 = vmatpush.bf16.msra.mxu0 %v11114_v44  ;;  %v12034_v62 = vor.u32 %v16716_v55, %v12033_v54  ;;  %v11673_v0 = vld [vmem:[#allocation2 + $0x5a0] sm:$0xf]  ;;  %v16626_v1 = vld [vmem:[#allocation2 + $0x5c4] sm:$0xf0]  ;;  %v11354_v5 = vor.u32 %v16546_v63, %v11353_v61  ;;  %v10993_v7 = vld [vmem:[#allocation2 + $0x50] sm:$0xf] }
  0x26   :  { %3098 = vmatpush.bf16.msra.mxu1 %v11434_v45  ;;  %v11993_v2 = vld [vmem:[#allocation2 + $0x820] sm:$0xf]  ;;  %v16706_v3 = vld [vmem:[#allocation2 + $0x844] sm:$0xf0]  ;;  %v11674_v6 = vor.u32 %v16626_v1, %v11673_v0  ;;  %v16456_v8 = vld [vmem:[#allocation2 + $0x74] sm:$0xf0] }
  0x27   :  { %3111 = vmatpush.bf16.msra.mxu2 %v11754_v46  ;;  %v11313_v9 = vld [vmem:[#allocation2 + $0x2d0] sm:$0xf]  ;;  %v11994_v10 = vor.u32 %v16706_v3, %v11993_v2  ;;  %v16536_v11 = vld [vmem:[#allocation2 + $0x2f4] sm:$0xf0]  ;;  %v10994_v16 = vor.u32 %v16456_v8, %v10993_v7  ;;  %v10953_v17 = vld [vmem:[#allocation2] sm:$0xf] }
  0x28   :  { %3124 = vmatpush.bf16.msra.mxu3 %v12074_v50  ;;  %v11633_v12 = vld [vmem:[#allocation2 + $0x550] sm:$0xf]  ;;  %v16616_v13 = vld [vmem:[#allocation2 + $0x574] sm:$0xf0]  ;;  %v16446_v18 = vld [vmem:[#allocation2 + $0x24] sm:$0xf0]  ;;  %v11314_v19 = vor.u32 %v16536_v11, %v11313_v9 }
  0x29   :  { %3086 = vmatpush.bf16.msra.mxu0 %v11074_v56  ;;  %v11953_v14 = vld [vmem:[#allocation2 + $0x7d0] sm:$0xf]  ;;  %v16696_v15 = vld [vmem:[#allocation2 + $0x7f4] sm:$0xf0]  ;;  %v11634_v20 = vor.u32 %v16616_v13, %v11633_v12  ;;  %v11273_v21 = vld [vmem:[#allocation2 + $0x280] sm:$0xf]  ;;  %v10954_v31 = vor.u32 %v16446_v18, %v10953_v17 }
  0x2a   :  { %3099 = vmatpush.bf16.msra.mxu1 %v11394_v57  ;;  %v16526_v22 = vld [vmem:[#allocation2 + $0x2a4] sm:$0xf0]  ;;  %v11593_v23 = vld [vmem:[#allocation2 + $0x500] sm:$0xf]  ;;  %v11954_v24 = vor.u32 %v16696_v15, %v11953_v14  ;;  %v12513_v28 = vld [vmem:[#allocation2 + $0xc30] sm:$0xf] }
  0x2b   :  { %3112 = vmatpush.bf16.msra.mxu2 %v11714_v58  ;;  %v16606_v25 = vld [vmem:[#allocation2 + $0x524] sm:$0xf0]  ;;  %v11913_v26 = vld [vmem:[#allocation2 + $0x780] sm:$0xf]  ;;  %v16836_v29 = vld [vmem:[#allocation2 + $0xc54] sm:$0xf0]  ;;  %v11274_v35 = vor.u32 %v16526_v22, %v11273_v21 }
  0x2c   :  { %3125 = vmatpush.bf16.msra.mxu3 %v12034_v62  ;;  %v16686_v27 = vld [vmem:[#allocation2 + $0x7a4] sm:$0xf0]  ;;  %v12833_v30 = vld [vmem:[#allocation2 + $0xeb0] sm:$0xf]  ;;  %v16916_v32 = vld [vmem:[#allocation2 + $0xed4] sm:$0xf0]  ;;  %v11594_v36 = vor.u32 %v16606_v25, %v11593_v23  ;;  %v12514_v40 = vor.u32 %v16836_v29, %v12513_v28 }
  0x2d   :  { %3087 = vmatpush.bf16.msra.mxu0 %v11034_v4  ;;  %v16511_v33 = vld [vmem:[#allocation2 + $0x234] sm:$0xf]  ;;  %v11235_v34 = vld [vmem:[#allocation2 + $0x258] sm:$0xf0]  ;;  %v12873_v37 = vld [vmem:[#allocation2 + $0xf00] sm:$0xf]  ;;  %v11914_v39 = vor.u32 %v16686_v27, %v11913_v26  ;;  %v12834_v44 = vor.u32 %v16916_v32, %v12833_v30 }
  0x2e   :  { %3100 = vmatpush.bf16.msra.mxu1 %v11354_v5  ;;  %v16926_v38 = vld [vmem:[#allocation2 + $0xf24] sm:$0xf0]  ;;  %v102_v41 = vld [vmem:[%s18864_s0 + $0x10] sm:$0xff]  ;;  %v11555_v43 = vld [vmem:[#allocation2 + $0x4d8] sm:$0xf0]  ;;  %v11238_v45 = vor.u32 %v16511_v33, %v11235_v34  ;;  %vm3078_vm0 = vcmask 130048  }
  0x2f   :  { %3113 = vmatpush.bf16.msra.mxu2 %v11674_v6  ;;  %v16591_v42 = vld [vmem:[#allocation2 + $0x4b4] sm:$0xf]  ;;  %v12473_v46 = vld [vmem:[#allocation2 + $0xbe0] sm:$0xf]  ;;  %v16826_v47 = vld [vmem:[#allocation2 + $0xc04] sm:$0xf0]  ;;  %v12874_v49 = vor.u32 %v16926_v38, %v12873_v37  ;;  %v18043_v53 = vpack.c.bf16 %v102_v41, %v102_v41 }
  0x30   :  { %3126 = vmatpush.bf16.msra.mxu3 %v11994_v10  ;;  %v12793_v48 = vld [vmem:[#allocation2 + $0xe60] sm:$0xf]  ;;  %v16906_v50 = vld [vmem:[#allocation2 + $0xe84] sm:$0xf0]  ;;  %v16501_v51 = vld [vmem:[#allocation2 + $0x1e4] sm:$0xf]  ;;  %v11558_v54 = vor.u32 %v16591_v42, %v11555_v43  ;;  %v12474_v57 = vor.u32 %v16826_v47, %v12473_v46 }
  0x31   :  { %3088 = vmatpush.bf16.msra.mxu0 %v10994_v16  ;;  %v11195_v52 = vld [vmem:[#allocation2 + $0x208] sm:$0xf0]  ;;  %v100_v55 = vld [vmem:[%s18864_s0] sm:$0xff]  ;;  %v103_v56 = vld [vmem:[%s18864_s0 + $0x18] sm:$0xff]  ;;  %v12794_v63 = vor.u32 %v16906_v50, %v12793_v48  ;;  %s10939_s26 = sshll.u32 %s18871_s7, 4  ;;  %vm10930_vm1 = vcmask 80896   ;;  %s10940_s26 = int_to_ptr.hbm [resolvable:$true] %s10939_s26 }
  0x32   :  { %3101 = vmatpush.bf16.msra.mxu1 %v11314_v19  ;;  %v16581_v58 = vld [vmem:[#allocation2 + $0x464] sm:$0xf]  ;;  %v11515_v59 = vld [vmem:[#allocation2 + $0x488] sm:$0xf0]  ;;  %v18051_v60 = vpack.c.bf16 %v100_v55, %v100_v55  ;;  %v18053_v61 = vpack.c.bf16 %v103_v56, %v103_v56  ;;  %v11198_v0 = vor.u32 %v16501_v51, %v11195_v52  ;;  %v12433_v1 = vld [vmem:[#allocation2 + $0xb90] sm:$0xf] }
  0x33   :  { %3114 = vmatpush.bf16.msra.mxu2 %v11634_v20  ;;  %v101_v62 = vld [vmem:[%s18864_s0 + $0x8] sm:$0xff]  ;;  %v16816_v2 = vld [vmem:[#allocation2 + $0xbb4] sm:$0xf0]  ;;  %v12753_v3 = vld [vmem:[#allocation2 + $0xe10] sm:$0xf]  ;;  %v11518_v8 = vor.u32 %v16581_v58, %v11515_v59 }
  0x34   :  { %3127 = vmatpush.bf16.msra.mxu3 %v11954_v24  ;;  %v16896_v4 = vld [vmem:[#allocation2 + $0xe34] sm:$0xf0]  ;;  %v16491_v5 = vld [vmem:[#allocation2 + $0x194] sm:$0xf]  ;;  %v11155_v6 = vld [vmem:[#allocation2 + $0x1b8] sm:$0xf0]  ;;  %v18059_v7 = vpack.c.bf16 %v101_v62, %v101_v62  ;;  %v12434_v9 = vor.u32 %v16816_v2, %v12433_v1 }
  0x35   :  { %3089 = vmatpush.bf16.msra.mxu0 %v10954_v31  ;;  %v16571_v10 = vld [vmem:[#allocation2 + $0x414] sm:$0xf]  ;;  %v11475_v11 = vld [vmem:[#allocation2 + $0x438] sm:$0xf0]  ;;  %v12754_v12 = vor.u32 %v16896_v4, %v12753_v3  ;;  %v11158_v13 = vor.u32 %v16491_v5, %v11155_v6  ;;  %v12393_v14 = vld [vmem:[#allocation2 + $0xb40] sm:$0xf] }
  0x36   :  { %3102 = vmatpush.bf16.msra.mxu1 %v11274_v35  ;;  %v16806_v15 = vld [vmem:[#allocation2 + $0xb64] sm:$0xf0]  ;;  %v12713_v16 = vld [vmem:[#allocation2 + $0xdc0] sm:$0xf]  ;;  %v16481_v18 = vld [vmem:[#allocation2 + $0x144] sm:$0xf]  ;;  %v11478_v20 = vor.u32 %v16571_v10, %v11475_v11 }
  0x37   :  { %3115 = vmatpush.bf16.msra.mxu2 %v11594_v36  ;;  %v16886_v17 = vld [vmem:[#allocation2 + $0xde4] sm:$0xf0]  ;;  %v11115_v19 = vld [vmem:[#allocation2 + $0x168] sm:$0xf0]  ;;  %v12394_v21 = vor.u32 %v16806_v15, %v12393_v14  ;;  %v16561_v22 = vld [vmem:[#allocation2 + $0x3c4] sm:$0xf] }
  0x38   :  { %3128 = vmatpush.bf16.msra.mxu3 %v11914_v39  ;;  %3090 = vmatmul.bf16.vlgmr.msra.gmra.mxu0 %v18051_v60  ;;  %v11435_v23 = vld [vmem:[#allocation2 + $0x3e8] sm:$0xf0]  ;;  %v12714_v24 = vor.u32 %v16886_v17, %v12713_v16  ;;  %v11118_v25 = vor.u32 %v16481_v18, %v11115_v19  ;;  %v12353_v26 = vld [vmem:[#allocation2 + $0xaf0] sm:$0xf]  ;;  %v16796_v27 = vld [vmem:[#allocation2 + $0xb14] sm:$0xf0] }
  0x39   :  { %3134 = vmatpush.bf16.msrb.mxu0 %v12514_v40  ;;  %3103 = vmatmul.bf16.vlgmr.msra.gmra.mxu1 %v18059_v7  ;;  %v12673_v28 = vld [vmem:[#allocation2 + $0xd70] sm:$0xf]  ;;  %v16876_v29 = vld [vmem:[#allocation2 + $0xd94] sm:$0xf0]  ;;  %v16471_v30 = vld [vmem:[#allocation2 + $0xf4] sm:$0xf]  ;;  %v11438_v32 = vor.u32 %v16561_v22, %v11435_v23  ;;  %v12354_v33 = vor.u32 %v16796_v27, %v12353_v26 }
  0x3a   :  { %3147 = vmatpush.bf16.msrb.mxu1 %v12834_v44  ;;  %3116 = vmatmul.bf16.vlgmr.msra.gmra.mxu2 %v18043_v53  ;;  %v11075_v31 = vld [vmem:[#allocation2 + $0x118] sm:$0xf0]  ;;  %v16551_v34 = vld [vmem:[#allocation2 + $0x374] sm:$0xf]  ;;  %v12674_v37 = vor.u32 %v16876_v29, %v12673_v28  ;;  %v12313_v39 = vld [vmem:[#allocation2 + $0xaa0] sm:$0xf] }
  0x3b   :  { %3167 = vmatpush.bf16.msrb.mxu2 %v12874_v49  ;;  %3129 = vmatmul.bf16.vlgmr.msra.gmra.mxu3 %v18053_v61  ;;  %v11395_v35 = vld [vmem:[#allocation2 + $0x398] sm:$0xf0]  ;;  %v106_v36 = vld [vmem:[%s18864_s0 + $0x30] sm:$0xff]  ;;  %v11078_v38 = vor.u32 %v16471_v30, %v11075_v31  ;;  %v16786_v40 = vld [vmem:[#allocation2 + $0xac4] sm:$0xf0] }
  0x3c   :  { %3173 = vmatpush.bf16.msrb.mxu3 %v11238_v45  ;;  %v12633_v41 = vld [vmem:[#allocation2 + $0xd20] sm:$0xf]  ;;  %v16866_v42 = vld [vmem:[#allocation2 + $0xd44] sm:$0xf0]  ;;  %v16461_v43 = vld [vmem:[#allocation2 + $0xa4] sm:$0xf]  ;;  %v18067_v45 = vpack.c.bf16 %v106_v36, %v106_v36  ;;  %v11398_v46 = vor.u32 %v16551_v34, %v11395_v35  ;;  %v12314_v47 = vor.u32 %v16786_v40, %v12313_v39 }
  0x3d   :  { %3135 = vmatpush.bf16.msrb.mxu0 %v12474_v57  ;;  %v11035_v44 = vld [vmem:[#allocation2 + $0xc8] sm:$0xf0]  ;;  %v16541_v48 = vld [vmem:[#allocation2 + $0x324] sm:$0xf]  ;;  %v12634_v50 = vor.u32 %v16866_v42, %v12633_v41  ;;  %v12273_v52 = vld [vmem:[#allocation2 + $0xa50] sm:$0xf] }
  0x3e   :  { %3148 = vmatpush.bf16.msrb.mxu1 %v12794_v63  ;;  %v11355_v49 = vld [vmem:[#allocation2 + $0x348] sm:$0xf0]  ;;  %v11038_v51 = vor.u32 %v16461_v43, %v11035_v44  ;;  %v12593_v55 = vld [vmem:[#allocation2 + $0xcd0] sm:$0xf]  ;;  %v16856_v56 = vld [vmem:[#allocation2 + $0xcf4] sm:$0xf0] }
  0x3f   :  { %3186 = vmatpush.bf16.msra.mxu2 %v11558_v54  ;;  %v16776_v54 = vld [vmem:[#allocation2 + $0xa74] sm:$0xf0]  ;;  %v16451_v57 = vld [vmem:[#allocation2 + $0x54] sm:$0xf]  ;;  %v10995_v58 = vld [vmem:[#allocation2 + $0x78] sm:$0xf0]  ;;  %v11358_v59 = vor.u32 %v16541_v48, %v11355_v49  ;;  %v12594_v2 = vor.u32 %v16856_v56, %v12593_v55 }
  0x40   :  { %3174 = vmatpush.bf16.msrb.mxu3 %v11198_v0  ;;  %v12274_v62 = vor.u32 %v16776_v54, %v12273_v52  ;;  %v16531_v63 = vld [vmem:[#allocation2 + $0x2d4] sm:$0xf]  ;;  %v11315_v0 = vld [vmem:[#allocation2 + $0x2f8] sm:$0xf0]  ;;  %v12233_v1 = vld [vmem:[#allocation2 + $0xa00] sm:$0xf]  ;;  %v10998_v3 = vor.u32 %v16451_v57, %v10995_v58 }
  0x41   :  { %3136 = vmatpush.bf16.msrb.mxu0 %v12434_v9  ;;  %v16766_v4 = vld [vmem:[#allocation2 + $0xa24] sm:$0xf0]  ;;  %v12553_v5 = vld [vmem:[#allocation2 + $0xc80] sm:$0xf]  ;;  %v10955_v9 = vld [vmem:[#allocation2 + $0x28] sm:$0xf0]  ;;  %v11318_v14 = vor.u32 %v16531_v63, %v11315_v0 }
  0x42   :  { %3149 = vmatpush.bf16.msrb.mxu1 %v12754_v12  ;;  %v16846_v6 = vld [vmem:[#allocation2 + $0xca4] sm:$0xf0]  ;;  %v16671_v10 = vld [vmem:[#allocation2 + $0x734] sm:$0xf]  ;;  %v11875_v11 = vld [vmem:[#allocation2 + $0x758] sm:$0xf0]  ;;  %v12234_v15 = vor.u32 %v16766_v4, %v12233_v1 }
  0x43   :  { %3187 = vmatpush.bf16.msra.mxu2 %v11518_v8  ;;  %v16441_v8 = vld [vmem:[#allocation2 + $0x4] sm:$0xf]  ;;  %v16751_v12 = vld [vmem:[#allocation2 + $0x9b4] sm:$0xf]  ;;  %v12515_v17 = vld [vmem:[#allocation2 + $0xc58] sm:$0xf0]  ;;  %v12554_v19 = vor.u32 %v16846_v6, %v12553_v5 }
  0x44   :  { %3175 = vmatpush.bf16.msrb.mxu3 %v11158_v13  ;;  %v12195_v13 = vld [vmem:[#allocation2 + $0x9d8] sm:$0xf0]  ;;  %v16831_v16 = vld [vmem:[#allocation2 + $0xc34] sm:$0xf]  ;;  %v104_v18 = vld [vmem:[%s18864_s0 + $0x20] sm:$0xff] }
  0x45   :  { %3137 = vmatpush.bf16.msrb.mxu0 %v12394_v21  ;;  %v16521_v21 = vld [vmem:[#allocation2 + $0x284] sm:$0xf]  ;;  %v11275_v22 = vld [vmem:[#allocation2 + $0x2a8] sm:$0xf0]  ;;  %v16911_v26 = vld [vmem:[#allocation2 + $0xeb4] sm:$0xf]  ;;  %v12518_v29 = vor.u32 %v16831_v16, %v12515_v17  ;;  %v18077_v30 = vpack.c.bf16 %v104_v18, %v104_v18 }
  0x46   :  { %3150 = vmatpush.bf16.msrb.mxu1 %v12714_v24  ;;  %v105_v23 = vld [vmem:[%s18864_s0 + $0x28] sm:$0xff]  ;;  %v11878_v24 = vor.u32 %v16671_v10, %v11875_v11  ;;  %v12835_v27 = vld [vmem:[#allocation2 + $0xed8] sm:$0xf0]  ;;  %v16661_v28 = vld [vmem:[#allocation2 + $0x6e4] sm:$0xf]  ;;  %v11278_v34 = vor.u32 %v16521_v21, %v11275_v22 }
  0x47   :  { %3188 = vmatpush.bf16.msra.mxu2 %v11478_v20  ;;  %v10958_v20 = vor.u32 %v16441_v8, %v10955_v9  ;;  %v11835_v31 = vld [vmem:[#allocation2 + $0x708] sm:$0xf0]  ;;  %v18079_v35 = vpack.c.bf16 %v105_v23, %v105_v23  ;;  %v16821_v36 = vld [vmem:[#allocation2 + $0xbe4] sm:$0xf]  ;;  %v16651_v43 = vld [vmem:[#allocation2 + $0x694] sm:$0xf] }
  0x48   :  { %3176 = vmatpush.bf16.msrb.mxu3 %v11118_v25  ;;  %v12198_v25 = vor.u32 %v16751_v12, %v12195_v13  ;;  %v11838_v39 = vor.u32 %v16661_v28, %v11835_v31  ;;  %v16901_v41 = vld [vmem:[#allocation2 + $0xe64] sm:$0xf]  ;;  %v12795_v42 = vld [vmem:[#allocation2 + $0xe88] sm:$0xf0]  ;;  %v12115_v48 = vld [vmem:[#allocation2 + $0x938] sm:$0xf0] }
  0x49   :  { %3138 = vmatpush.bf16.msrb.mxu0 %v12354_v33  ;;  %v12155_v33 = vld [vmem:[#allocation2 + $0x988] sm:$0xf0]  ;;  %v16811_v49 = vld [vmem:[#allocation2 + $0xb94] sm:$0xf]  ;;  %v12755_v56 = vld [vmem:[#allocation2 + $0xe38] sm:$0xf0] }
  0x4a   :  { %3151 = vmatpush.bf16.msrb.mxu1 %v12674_v37  ;;  %12911 = vmatmul.msk.bf16.vlgmr.msrb.gmra.mxu2 %vm3078_vm0, %v18067_v45  ;;  %v12475_v37 = vld [vmem:[#allocation2 + $0xc08] sm:$0xf0]  ;;  %v16891_v55 = vld [vmem:[#allocation2 + $0xe14] sm:$0xf]  ;;  %v16641_v57 = vld [vmem:[#allocation2 + $0x644] sm:$0xf] }
  0x4b   :  { %3189 = vmatpush.bf16.msra.mxu2 %v11438_v32  ;;  %v16741_v32 = vld [vmem:[#allocation2 + $0x964] sm:$0xf]  ;;  %v12478_v44 = vor.u32 %v16821_v36, %v12475_v37  ;;  %v12075_v63 = vld [vmem:[#allocation2 + $0x8e8] sm:$0xf0]  ;;  %v16631_v8 = vld [vmem:[#allocation2 + $0x5f4] sm:$0xf] }
  0x4c   :  { %3177 = vmatpush.bf16.msrb.mxu3 %v11078_v38  ;;  %v12838_v38 = vor.u32 %v16911_v26, %v12835_v27  ;;  %v12158_v40 = vor.u32 %v16741_v32, %v12155_v33  ;;  %v16801_v0 = vld [vmem:[#allocation2 + $0xb44] sm:$0xf]  ;;  %v12395_v1 = vld [vmem:[#allocation2 + $0xb68] sm:$0xf0]  ;;  %v11715_v10 = vld [vmem:[#allocation2 + $0x618] sm:$0xf0] }
  0x4d   :  { %3139 = vmatpush.bf16.msrb.mxu0 %v12314_v47  ;;  %v16731_v47 = vld [vmem:[#allocation2 + $0x914] sm:$0xf]  ;;  %v16881_v5 = vld [vmem:[#allocation2 + $0xdc4] sm:$0xf]  ;;  %v12715_v6 = vld [vmem:[#allocation2 + $0xde8] sm:$0xf0]  ;;  %v12398_v9 = vor.u32 %v16801_v0, %v12395_v1  ;;  %v11718_v16 = vor.u32 %v16631_v8, %v11715_v10 }
  0x4e   :  { %3152 = vmatpush.bf16.msrb.mxu1 %v12634_v50  ;;  %v12435_v50 = vld [vmem:[#allocation2 + $0xbb8] sm:$0xf0]  ;;  %v12118_v54 = vor.u32 %v16731_v47, %v12115_v48  ;;  %v16711_v11 = vld [vmem:[#allocation2 + $0x874] sm:$0xf]  ;;  %v11675_v22 = vld [vmem:[#allocation2 + $0x5c8] sm:$0xf0] }
  0x4f   :  { %3190 = vmatpush.bf16.msra.mxu2 %v11398_v46  ;;  %v11795_v46 = vld [vmem:[#allocation2 + $0x6b8] sm:$0xf0]  ;;  %v12438_v58 = vor.u32 %v16811_v49, %v12435_v50  ;;  %v16791_v13 = vld [vmem:[#allocation2 + $0xaf4] sm:$0xf]  ;;  %v16701_v23 = vld [vmem:[#allocation2 + $0x824] sm:$0xf] }
  0x50   :  { %3178 = vmatpush.bf16.msrb.mxu3 %v11038_v51  ;;  %v12798_v51 = vor.u32 %v16901_v41, %v12795_v42  ;;  %v11798_v52 = vor.u32 %v16651_v43, %v11795_v46  ;;  %v12035_v12 = vld [vmem:[#allocation2 + $0x898] sm:$0xf0]  ;;  %v16871_v18 = vld [vmem:[#allocation2 + $0xd74] sm:$0xf]  ;;  %v12315_v26 = vld [vmem:[#allocation2 + $0xac8] sm:$0xf0] }
  0x51   :  { %3140 = vmatpush.bf16.msrb.mxu0 %v12274_v62  ;;  %v16721_v62 = vld [vmem:[#allocation2 + $0x8c4] sm:$0xf]  ;;  %v12038_v17 = vor.u32 %v16711_v11, %v12035_v12  ;;  %v12635_v32 = vld [vmem:[#allocation2 + $0xd48] sm:$0xf0]  ;;  %v16611_v33 = vld [vmem:[#allocation2 + $0x554] sm:$0xf] }
  0x52   :  { %3153 = vmatpush.bf16.msrb.mxu1 %v12594_v2  ;;  %v12758_v2 = vor.u32 %v16891_v55, %v12755_v56  ;;  %v12078_v4 = vor.u32 %v16721_v62, %v12075_v63  ;;  %v16861_v31 = vld [vmem:[#allocation2 + $0xd24] sm:$0xf]  ;;  %v11635_v36 = vld [vmem:[#allocation2 + $0x578] sm:$0xf0]  ;;  %v16691_v37 = vld [vmem:[#allocation2 + $0x7d4] sm:$0xf] }
  0x53   :  { %3191 = vmatpush.bf16.msra.mxu2 %v11358_v59  ;;  %v11755_v59 = vld [vmem:[#allocation2 + $0x668] sm:$0xf0]  ;;  %v12638_v41 = vor.u32 %v16861_v31, %v12635_v32  ;;  %v16851_v42 = vld [vmem:[#allocation2 + $0xcd4] sm:$0xf]  ;;  %v12595_v43 = vld [vmem:[#allocation2 + $0xcf8] sm:$0xf0] }
  0x54   :  { %3179 = vmatpush.bf16.msrb.mxu3 %v10998_v3  ;;  %v11758_v3 = vor.u32 %v16641_v57, %v11755_v59  ;;  %v16601_v47 = vld [vmem:[#allocation2 + $0x504] sm:$0xf]  ;;  %v11595_v48 = vld [vmem:[#allocation2 + $0x528] sm:$0xf0]  ;;  %v11241_v55 = vld [vmem:[#allocation2 + $0x238] sm:$0xf] }
  0x55   :  { %3141 = vmatpush.bf16.msrb.mxu0 %v12234_v15  ;;  %v12718_v15 = vor.u32 %v16881_v5, %v12715_v6  ;;  %v16681_v49 = vld [vmem:[#allocation2 + $0x784] sm:$0xf]  ;;  %v16517_v56 = vld [vmem:[#allocation2 + $0x25c] sm:$0xf0]  ;;  %v11561_v57 = vld [vmem:[#allocation2 + $0x4b8] sm:$0xf]  ;;  %v11598_v0 = vor.u32 %v16601_v47, %v11595_v48 }
  0x56   :  { %3154 = vmatpush.bf16.msrb.mxu1 %v12554_v19  ;;  %v12675_v19 = vld [vmem:[#allocation2 + $0xd98] sm:$0xf0]  ;;  %v16597_v59 = vld [vmem:[#allocation2 + $0x4dc] sm:$0xf0]  ;;  %v16921_v62 = vld [vmem:[#allocation2 + $0xf04] sm:$0xf]  ;;  %v11242_v6 = vor.u32 %v16517_v56, %v11241_v55 }
  0x57   :  { %3192 = vmatpush.bf16.msra.mxu2 %v11318_v14  ;;  %v12355_v14 = vld [vmem:[#allocation2 + $0xb18] sm:$0xf0]  ;;  %v12678_v27 = vor.u32 %v16871_v18, %v12675_v19  ;;  %v12875_v63 = vld [vmem:[#allocation2 + $0xf28] sm:$0xf0]  ;;  %v16677_v8 = vld [vmem:[#allocation2 + $0x75c] sm:$0xf0]  ;;  %v11562_v11 = vor.u32 %v16597_v59, %v11561_v57 }
  0x58   :  { %3180 = vmatpush.bf16.msrb.mxu3 %v10958_v20  ;;  %3142 = vmatmul.bf16.vlgmr.msrb.gmra.mxu0 %v18077_v30  ;;  %v16621_v20 = vld [vmem:[#allocation2 + $0x5a4] sm:$0xf]  ;;  %v12358_v21 = vor.u32 %v16791_v13, %v12355_v14  ;;  %v16757_v10 = vld [vmem:[#allocation2 + $0x9dc] sm:$0xf0]  ;;  %v12878_v12 = vor.u32 %v16921_v62, %v12875_v63  ;;  %v11201_v13 = vld [vmem:[#allocation2 + $0x1e8] sm:$0xf] }
  0x59   :  { %3199 = vmatpush.bf16.msra.mxu0 %v11878_v24  ;;  %3155 = vmatmul.bf16.vlgmr.msrb.gmra.mxu1 %v18079_v35  ;;  %v11995_v24 = vld [vmem:[#allocation2 + $0x848] sm:$0xf0]  ;;  %v11678_v28 = vor.u32 %v16621_v20, %v11675_v22  ;;  %v16507_v14 = vld [vmem:[#allocation2 + $0x20c] sm:$0xf0]  ;;  %v11841_v20 = vld [vmem:[#allocation2 + $0x6e8] sm:$0xf] }
  0x5a   :  { %3212 = vmatpush.bf16.msra.mxu1 %v12198_v25  ;;  %v16781_v25 = vld [vmem:[#allocation2 + $0xaa4] sm:$0xf]  ;;  %v16667_v22 = vld [vmem:[#allocation2 + $0x70c] sm:$0xf0]  ;;  %v11761_v47 = vld [vmem:[#allocation2 + $0x648] sm:$0xf] }
  0x5b   :  { %3193 = vmatpush.bf16.msra.mxu2 %v11278_v34  ;;  %3181 = vmatmul.bf16.vlgmr.msrb.gmra.mxu3 %v18051_v60  ;;  %v12318_v34 = vor.u32 %v16781_v25, %v12315_v26  ;;  %v11161_v26 = vld [vmem:[#allocation2 + $0x198] sm:$0xf]  ;;  %v11842_v31 = vor.u32 %v16667_v22, %v11841_v20  ;;  %v16477_v55 = vld [vmem:[#allocation2 + $0x11c] sm:$0xf0] }
  0x5c   :  { %3225 = vmatpush.bf16.msra.mxu3 %v12518_v29  ;;  %v11998_v29 = vor.u32 %v16701_v23, %v11995_v24  ;;  %v12161_v23 = vld [vmem:[#allocation2 + $0x968] sm:$0xf]  ;;  %v16747_v24 = vld [vmem:[#allocation2 + $0x98c] sm:$0xf0]  ;;  %v11401_v56 = vld [vmem:[#allocation2 + $0x378] sm:$0xf] }
  0x5d   :  { %3200 = vmatpush.bf16.msra.mxu0 %v11838_v39  ;;  %v16771_v39 = vld [vmem:[#allocation2 + $0xa54] sm:$0xf]  ;;  %v12162_v32 = vor.u32 %v16747_v24, %v12161_v23  ;;  %v16557_v57 = vld [vmem:[#allocation2 + $0x39c] sm:$0xf0]  ;;  %v11721_v62 = vld [vmem:[#allocation2 + $0x5f8] sm:$0xf] }
  0x5e   :  { %3213 = vmatpush.bf16.msra.mxu1 %v12158_v40  ;;  %3194 = vmatmul.bf16.vlgmr.msra.gmra.mxu2 %v18059_v7  ;;  %v12275_v40 = vld [vmem:[#allocation2 + $0xa78] sm:$0xf0]  ;;  %v16537_v20 = vld [vmem:[#allocation2 + $0x2fc] sm:$0xf0]  ;;  %v11641_v23 = vld [vmem:[#allocation2 + $0x558] sm:$0xf] }
  0x5f   :  { %3238 = vmatpush.bf16.msrb.mxu2 %v12838_v38  ;;  %v11955_v38 = vld [vmem:[#allocation2 + $0x7f8] sm:$0xf0]  ;;  %v12278_v50 = vor.u32 %v16771_v39, %v12275_v40  ;;  %v11121_v40 = vld [vmem:[#allocation2 + $0x148] sm:$0xf]  ;;  %v16617_v24 = vld [vmem:[#allocation2 + $0x57c] sm:$0xf0] }
  0x60   :  { %3226 = vmatpush.bf16.msra.mxu3 %v12478_v44  ;;  %v11638_v44 = vor.u32 %v16611_v33, %v11635_v36  ;;  %v11958_v46 = vor.u32 %v16691_v37, %v11955_v38  ;;  %v11801_v33 = vld [vmem:[#allocation2 + $0x698] sm:$0xf]  ;;  %v16657_v36 = vld [vmem:[#allocation2 + $0x6bc] sm:$0xf0] }
  0x61   :  { %3201 = vmatpush.bf16.msra.mxu0 %v11798_v52  ;;  %v16761_v52 = vld [vmem:[#allocation2 + $0xa04] sm:$0xf]  ;;  %v12121_v37 = vld [vmem:[#allocation2 + $0x918] sm:$0xf]  ;;  %v16737_v38 = vld [vmem:[#allocation2 + $0x93c] sm:$0xf0] }
  0x62   :  { %3214 = vmatpush.bf16.msra.mxu1 %v12118_v54  ;;  %v12235_v54 = vld [vmem:[#allocation2 + $0xa28] sm:$0xf0] }
  0x63   :  { %3239 = vmatpush.bf16.msrb.mxu2 %v12798_v51  ;;  %v11915_v51 = vld [vmem:[#allocation2 + $0x7a8] sm:$0xf0]  ;;  %v12238_v5 = vor.u32 %v16761_v52, %v12235_v54  ;;  %v11081_v54 = vld [vmem:[#allocation2 + $0xf8] sm:$0xf] }
  0x64   :  { %3227 = vmatpush.bf16.msra.mxu3 %v12438_v58  ;;  %v12598_v58 = vor.u32 %v16851_v42, %v12595_v43  ;;  %v11918_v1 = vor.u32 %v16681_v49, %v11915_v51  ;;  %v11441_v42 = vld [vmem:[#allocation2 + $0x3c8] sm:$0xf]  ;;  %v16567_v43 = vld [vmem:[#allocation2 + $0x3ec] sm:$0xf0]  ;;  %v11082_v63 = vor.u32 %v16477_v55, %v11081_v54 }
  0x65   :  { %3202 = vmatpush.bf16.msra.mxu0 %v11758_v3  ;;  %v12555_v3 = vld [vmem:[#allocation2 + $0xca8] sm:$0xf0]  ;;  %v16647_v49 = vld [vmem:[#allocation2 + $0x66c] sm:$0xf0]  ;;  %v11442_v52 = vor.u32 %v16567_v43, %v11441_v42  ;;  %v12481_v55 = vld [vmem:[#allocation2 + $0xbe8] sm:$0xf] }
  0x66   :  { %3215 = vmatpush.bf16.msra.mxu1 %v12078_v4  ;;  %v11881_v4 = vld [vmem:[#allocation2 + $0x738] sm:$0xf]  ;;  %v16727_v51 = vld [vmem:[#allocation2 + $0x8ec] sm:$0xf0] }
  0x67   :  { %3240 = vmatpush.bf16.msrb.mxu2 %v12758_v2  ;;  %v16841_v2 = vld [vmem:[#allocation2 + $0xc84] sm:$0xf]  ;;  %v11882_v18 = vor.u32 %v16677_v8, %v11881_v4  ;;  %v11041_v4 = vld [vmem:[#allocation2 + $0xa8] sm:$0xf]  ;;  %v16547_v8 = vld [vmem:[#allocation2 + $0x34c] sm:$0xf0] }
  0x68   :  { %3228 = vmatpush.bf16.msra.mxu3 %v12398_v9  ;;  %v12201_v9 = vld [vmem:[#allocation2 + $0x9b8] sm:$0xf]  ;;  %v16607_v42 = vld [vmem:[#allocation2 + $0x52c] sm:$0xf0] }
  0x69   :  { %3203 = vmatpush.bf16.msra.mxu0 %v11718_v16  ;;  %v11521_v16 = vld [vmem:[#allocation2 + $0x468] sm:$0xf]  ;;  %v12202_v19 = vor.u32 %v16757_v10, %v12201_v9 }
  0x6a   :  { %3216 = vmatpush.bf16.msra.mxu1 %v12038_v17  ;;  %v16587_v17 = vld [vmem:[#allocation2 + $0x48c] sm:$0xf0] }
  0x6b   :  { %3241 = vmatpush.bf16.msrb.mxu2 %v12718_v15  ;;  %v12558_v15 = vor.u32 %v16841_v2, %v12555_v3  ;;  %v11522_v25 = vor.u32 %v16587_v17, %v11521_v16  ;;  %v16717_v2 = vld [vmem:[#allocation2 + $0x89c] sm:$0xf0]  ;;  %v11402_v3 = vor.u32 %v16557_v57, %v11401_v56  ;;  %v11001_v17 = vld [vmem:[#allocation2 + $0x58] sm:$0xf]  ;;  %v16827_v56 = vld [vmem:[#allocation2 + $0xc0c] sm:$0xf0] }
  0x6c   :  { %3229 = vmatpush.bf16.msra.mxu3 %v12358_v21  ;;  %v11202_v21 = vor.u32 %v16507_v14, %v11201_v13  ;;  %v16627_v13 = vld [vmem:[#allocation2 + $0x5cc] sm:$0xf0]  ;;  %v12001_v14 = vld [vmem:[#allocation2 + $0x828] sm:$0xf] }
  0x6d   :  { %3204 = vmatpush.bf16.msra.mxu0 %v11678_v28  ;;  %v11481_v28 = vld [vmem:[#allocation2 + $0x418] sm:$0xf] }
  0x6e   :  { %3217 = vmatpush.bf16.msra.mxu1 %v11998_v29  ;;  %v16577_v29 = vld [vmem:[#allocation2 + $0x43c] sm:$0xf0] }
  0x6f   :  { %3242 = vmatpush.bf16.msrb.mxu2 %v12678_v27  ;;  %v16497_v27 = vld [vmem:[#allocation2 + $0x1bc] sm:$0xf0]  ;;  %v11482_v39 = vor.u32 %v16577_v29, %v11481_v28  ;;  %v10961_v28 = vld [vmem:[#allocation2 + $0x8] sm:$0xf] }
  0x70   :  { %3230 = vmatpush.bf16.msra.mxu3 %v12318_v34  ;;  %v11162_v34 = vor.u32 %v16497_v27, %v11161_v26  ;;  %v11961_v26 = vld [vmem:[#allocation2 + $0x7d8] sm:$0xf]  ;;  %v16697_v27 = vld [vmem:[#allocation2 + $0x7fc] sm:$0xf0] }
  0x71   :  { %3205 = vmatpush.bf16.msra.mxu0 %v11638_v44  ;;  %v11802_v44 = vor.u32 %v16657_v36, %v11801_v33  ;;  %v16527_v33 = vld [vmem:[#allocation2 + $0x2ac] sm:$0xf0]  ;;  %v16837_v36 = vld [vmem:[#allocation2 + $0xc5c] sm:$0xf0] }
  0x72   :  { %3218 = vmatpush.bf16.msra.mxu1 %v11958_v46  ;;  %v12122_v46 = vor.u32 %v16737_v38, %v12121_v37  ;;  %v12841_v37 = vld [vmem:[#allocation2 + $0xeb8] sm:$0xf]  ;;  %v11642_v38 = vor.u32 %v16617_v24, %v11641_v23  ;;  %v12721_v23 = vld [vmem:[#allocation2 + $0xdc8] sm:$0xf]  ;;  %v16887_v24 = vld [vmem:[#allocation2 + $0xdec] sm:$0xf0] }
  0x73   :  { %3243 = vmatpush.bf16.msrb.mxu2 %v12638_v41  ;;  %v16487_v41 = vld [vmem:[#allocation2 + $0x16c] sm:$0xf0] }
  0x74   :  { %3231 = vmatpush.bf16.msra.mxu3 %v12278_v50  ;;  %v11122_v48 = vor.u32 %v16487_v41, %v11121_v40  ;;  %v12081_v50 = vld [vmem:[#allocation2 + $0x8c8] sm:$0xf]  ;;  %v16917_v40 = vld [vmem:[#allocation2 + $0xedc] sm:$0xf0] }
  0x75   :  { %3206 = vmatpush.bf16.msra.mxu0 %v11598_v0  ;;  %v12082_v59 = vor.u32 %v16727_v51, %v12081_v50  ;;  %v16637_v0 = vld [vmem:[#allocation2 + $0x61c] sm:$0xf0]  ;;  %v11601_v41 = vld [vmem:[#allocation2 + $0x508] sm:$0xf]  ;;  %v11243_v50 = vld [vmem:[#allocation2 + $0x260] sm:$0xf0]  ;;  %v12842_v54 = vor.u32 %v16917_v40, %v12841_v37 }
  0x76   :  { %3219 = vmatpush.bf16.msra.mxu1 %v11918_v1  ;;  %v12041_v1 = vld [vmem:[#allocation2 + $0x878] sm:$0xf]  ;;  %v11722_v9 = vor.u32 %v16637_v0, %v11721_v62  ;;  %v12881_v51 = vld [vmem:[#allocation2 + $0xf08] sm:$0xf]  ;;  %v11602_v57 = vor.u32 %v16607_v42, %v11601_v41  ;;  %v16907_v62 = vld [vmem:[#allocation2 + $0xe8c] sm:$0xf0] }
  0x77   :  { %3244 = vmatpush.bf16.msrb.mxu2 %v12598_v58  ;;  %v11762_v58 = vor.u32 %v16647_v49, %v11761_v47  ;;  %v12042_v10 = vor.u32 %v16717_v2, %v12041_v1  ;;  %v16512_v47 = vld [vmem:[#allocation2 + $0x23c] sm:$0xf]  ;;  %v11563_v2 = vld [vmem:[#allocation2 + $0x4e0] sm:$0xf0]  ;;  %v12681_v37 = vld [vmem:[#allocation2 + $0xd78] sm:$0xf] }
  0x78   :  { %3232 = vmatpush.bf16.msra.mxu3 %v12238_v5  ;;  %3207 = vmatmul.bf16.vlgmr.msra.gmra.mxu0 %v18043_v53  ;;  %v16467_v5 = vld [vmem:[#allocation2 + $0xcc] sm:$0xf0]  ;;  %v16592_v1 = vld [vmem:[#allocation2 + $0x4bc] sm:$0xf]  ;;  %v16562_v40 = vld [vmem:[#allocation2 + $0x3cc] sm:$0xf] }
  0x79   :  { %3258 = vmatpush.bf16.msrb.mxu0 %v12878_v12  ;;  %3220 = vmatmul.bf16.vlgmr.msra.gmra.mxu1 %v18053_v61  ;;  %v11042_v12 = vor.u32 %v16467_v5, %v11041_v4  ;;  %v16502_v4 = vld [vmem:[#allocation2 + $0x1ec] sm:$0xf]  ;;  %v11203_v5 = vld [vmem:[#allocation2 + $0x210] sm:$0xf0] }
  0x7a   :  { %3264 = vmatpush.bf16.msrb.mxu1 %v11242_v6  ;;  %v11361_v6 = vld [vmem:[#allocation2 + $0x328] sm:$0xf]  ;;  %v11443_v41 = vld [vmem:[#allocation2 + $0x3f0] sm:$0xf0] }
  0x7b   :  { %3245 = vmatpush.bf16.msrb.mxu2 %v12558_v15  ;;  %3233 = vmatmul.bf16.vlgmr.msra.gmra.mxu3 %v18077_v30  ;;  %v16707_v15 = vld [vmem:[#allocation2 + $0x84c] sm:$0xf0]  ;;  %v11362_v16 = vor.u32 %v16547_v8, %v11361_v6  ;;  %v12441_v8 = vld [vmem:[#allocation2 + $0xb98] sm:$0xf] }
  0x7c   :  { %3277 = vmatpush.bf16.msrb.mxu3 %v11562_v11  ;;  %v11681_v11 = vld [vmem:[#allocation2 + $0x5a8] sm:$0xf]  ;;  %v12002_v22 = vor.u32 %v16707_v15, %v12001_v14  ;;  %v16582_v14 = vld [vmem:[#allocation2 + $0x46c] sm:$0xf]  ;;  %v11523_v15 = vld [vmem:[#allocation2 + $0x490] sm:$0xf0] }
  0x7d   :  { %3290 = vmatpush.bf16.msra.mxu0 %v11882_v18  ;;  %v16457_v18 = vld [vmem:[#allocation2 + $0x7c] sm:$0xf0] }
  0x7e   :  { %3265 = vmatpush.bf16.msrb.mxu1 %v11202_v21  ;;  %3246 = vmatmul.bf16.vlgmr.msrb.gmra.mxu2 %v18079_v35  ;;  %v11682_v21 = vor.u32 %v16627_v13, %v11681_v11  ;;  %v12761_v11 = vld [vmem:[#allocation2 + $0xe18] sm:$0xf]  ;;  %v11206_v13 = vor.u32 %v16502_v4, %v11203_v5  ;;  %v16542_v4 = vld [vmem:[#allocation2 + $0x32c] sm:$0xf]  ;;  %v11363_v5 = vld [vmem:[#allocation2 + $0x350] sm:$0xf0] }
  0x7f   :  { %3303 = vmatpush.bf16.msra.mxu2 %v12202_v19  ;;  %v11321_v19 = vld [vmem:[#allocation2 + $0x2d8] sm:$0xf] }
  0x80   :  { %3278 = vmatpush.bf16.msrb.mxu3 %v11522_v25  ;;  %v11002_v25 = vor.u32 %v16457_v18, %v11001_v17  ;;  %v11322_v29 = vor.u32 %v16537_v20, %v11321_v19  ;;  %v16492_v17 = vld [vmem:[#allocation2 + $0x19c] sm:$0xf]  ;;  %v11163_v18 = vld [vmem:[#allocation2 + $0x1c0] sm:$0xf0]  ;;  %v12401_v20 = vld [vmem:[#allocation2 + $0xb48] sm:$0xf] }
  0x81   :  { %3291 = vmatpush.bf16.msra.mxu0 %v11842_v31  ;;  %v16447_v31 = vld [vmem:[#allocation2 + $0x2c] sm:$0xf0] }
  0x82   :  { %3266 = vmatpush.bf16.msrb.mxu1 %v11162_v34  ;;  %v12521_v34 = vld [vmem:[#allocation2 + $0xc38] sm:$0xf]  ;;  %v10962_v43 = vor.u32 %v16447_v31, %v10961_v28  ;;  %v11123_v31 = vld [vmem:[#allocation2 + $0x170] sm:$0xf0] }
  0x83   :  { %3304 = vmatpush.bf16.msra.mxu2 %v12162_v32  ;;  %v11281_v32 = vld [vmem:[#allocation2 + $0x288] sm:$0xf]  ;;  %v12522_v49 = vor.u32 %v16837_v36, %v12521_v34  ;;  %v16797_v34 = vld [vmem:[#allocation2 + $0xb1c] sm:$0xf0] }
  0x84   :  { %3279 = vmatpush.bf16.msrb.mxu3 %v11482_v39  ;;  %v11962_v39 = vor.u32 %v16697_v27, %v11961_v26  ;;  %v16572_v26 = vld [vmem:[#allocation2 + $0x41c] sm:$0xf]  ;;  %v11483_v27 = vld [vmem:[#allocation2 + $0x440] sm:$0xf0] }
  0x85   :  { %3292 = vmatpush.bf16.msra.mxu0 %v11802_v44  ;;  %v11921_v44 = vld [vmem:[#allocation2 + $0x788] sm:$0xf]  ;;  %v11486_v36 = vor.u32 %v16572_v26, %v11483_v27 }
  0x86   :  { %3267 = vmatpush.bf16.msrb.mxu1 %v11122_v48  ;;  %v11282_v48 = vor.u32 %v16527_v33, %v11281_v32  ;;  %v12722_v32 = vor.u32 %v16887_v24, %v12721_v23  ;;  %v12361_v33 = vld [vmem:[#allocation2 + $0xaf8] sm:$0xf]  ;;  %v16442_v24 = vld [vmem:[#allocation2 + $0xc] sm:$0xf] }
  0x87   :  { %3305 = vmatpush.bf16.msra.mxu2 %v12122_v46  ;;  %v16687_v46 = vld [vmem:[#allocation2 + $0x7ac] sm:$0xf0]  ;;  %v12362_v42 = vor.u32 %v16797_v34, %v12361_v33  ;;  %v16662_v33 = vld [vmem:[#allocation2 + $0x6ec] sm:$0xf]  ;;  %v11843_v34 = vld [vmem:[#allocation2 + $0x710] sm:$0xf0] }
  0x88   :  { %3280 = vmatpush.bf16.msrb.mxu3 %v11442_v52  ;;  %12912 = vmatmul.msk.bf16.vlgmr.msrb.gmra.mxu0 %vm3078_vm0, %v18067_v45  ;;  %v16927_v52 = vld [vmem:[#allocation2 + $0xf2c] sm:$0xf0] }
  0x89   :  { %3293 = vmatpush.bf16.msra.mxu0 %v11762_v58  ;;  %v11922_v58 = vor.u32 %v16687_v46, %v11921_v44  ;;  %v12882_v0 = vor.u32 %v16927_v52, %v12881_v51  ;;  %v11083_v44 = vld [vmem:[#allocation2 + $0x120] sm:$0xf0]  ;;  %v16867_v51 = vld [vmem:[#allocation2 + $0xd4c] sm:$0xf0] }
  0x8a   :  { %3268 = vmatpush.bf16.msrb.mxu1 %v11082_v63  ;;  %v11246_v63 = vor.u32 %v16512_v47, %v11243_v50  ;;  %v12321_v47 = vld [vmem:[#allocation2 + $0xaa8] sm:$0xf] }
  0x8b   :  { %3306 = vmatpush.bf16.msra.mxu2 %v12082_v59  ;;  %v12801_v59 = vld [vmem:[#allocation2 + $0xe68] sm:$0xf] }
  0x8c   :  { %3281 = vmatpush.bf16.msrb.mxu3 %v11402_v3  ;;  %v12482_v3 = vor.u32 %v16827_v56, %v12481_v55  ;;  %v12802_v6 = vor.u32 %v16907_v62, %v12801_v59  ;;  %v12641_v50 = vld [vmem:[#allocation2 + $0xd28] sm:$0xf]  ;;  %v11403_v55 = vld [vmem:[#allocation2 + $0x3a0] sm:$0xf0]  ;;  %v12281_v62 = vld [vmem:[#allocation2 + $0xa58] sm:$0xf] }
  0x8d   :  { %3294 = vmatpush.bf16.msra.mxu0 %v11722_v9  ;;  %v16817_v9 = vld [vmem:[#allocation2 + $0xbbc] sm:$0xf0]  ;;  %v12642_v59 = vor.u32 %v16867_v51, %v12641_v50  ;;  %v16652_v50 = vld [vmem:[#allocation2 + $0x69c] sm:$0xf]  ;;  %v11803_v51 = vld [vmem:[#allocation2 + $0x6c0] sm:$0xf0] }
  0x8e   :  { %3269 = vmatpush.bf16.msrb.mxu1 %v11042_v12  ;;  %v16897_v12 = vld [vmem:[#allocation2 + $0xe3c] sm:$0xf0] }
  0x8f   :  { %3307 = vmatpush.bf16.msra.mxu2 %v12042_v10  ;;  %v11566_v10 = vor.u32 %v16592_v1, %v11563_v2  ;;  %v12762_v19 = vor.u32 %v16897_v12, %v12761_v11  ;;  %v12601_v1 = vld [vmem:[#allocation2 + $0xcd8] sm:$0xf]  ;;  %v16857_v2 = vld [vmem:[#allocation2 + $0xcfc] sm:$0xf0]  ;;  %v16767_v12 = vld [vmem:[#allocation2 + $0xa2c] sm:$0xf0] }
  0x90   :  { %3282 = vmatpush.bf16.msrb.mxu3 %v11362_v16  ;;  %v12442_v16 = vor.u32 %v16817_v9, %v12441_v8  ;;  %v16452_v8 = vld [vmem:[#allocation2 + $0x5c] sm:$0xf]  ;;  %v11003_v9 = vld [vmem:[#allocation2 + $0x80] sm:$0xf0]  ;;  %v12602_v11 = vor.u32 %v16857_v2, %v12601_v1  ;;  %v16642_v2 = vld [vmem:[#allocation2 + $0x64c] sm:$0xf] }
  0x91   :  { %3295 = vmatpush.bf16.msra.mxu0 %v11682_v21  ;;  %v16807_v21 = vld [vmem:[#allocation2 + $0xb6c] sm:$0xf0] }
  0x92   :  { %3270 = vmatpush.bf16.msrb.mxu1 %v11002_v25  ;;  %v11166_v25 = vor.u32 %v16492_v17, %v11163_v18  ;;  %v12402_v28 = vor.u32 %v16807_v21, %v12401_v20  ;;  %v11883_v17 = vld [vmem:[#allocation2 + $0x760] sm:$0xf0]  ;;  %v16752_v18 = vld [vmem:[#allocation2 + $0x9bc] sm:$0xf] }
  0x93   :  { %3308 = vmatpush.bf16.msra.mxu2 %v12002_v22  ;;  %v11526_v22 = vor.u32 %v16582_v14, %v11523_v15  ;;  %v16847_v14 = vld [vmem:[#allocation2 + $0xcac] sm:$0xf0]  ;;  %v11366_v15 = vor.u32 %v16542_v4, %v11363_v5  ;;  %v12203_v20 = vld [vmem:[#allocation2 + $0x9e0] sm:$0xf0]  ;;  %v16532_v21 = vld [vmem:[#allocation2 + $0x2dc] sm:$0xf] }
  0x94   :  { %3283 = vmatpush.bf16.msrb.mxu3 %v11322_v29  ;;  %v16482_v29 = vld [vmem:[#allocation2 + $0x14c] sm:$0xf] }
  0x95   :  { %3296 = vmatpush.bf16.msra.mxu0 %v11642_v38  ;;  %v16877_v38 = vld [vmem:[#allocation2 + $0xd9c] sm:$0xf0]  ;;  %v16722_v5 = vld [vmem:[#allocation2 + $0x8cc] sm:$0xf] }
  0x96   :  { %3271 = vmatpush.bf16.msrb.mxu1 %v10962_v43  ;;  %v16472_v43 = vld [vmem:[#allocation2 + $0xfc] sm:$0xf]  ;;  %v12682_v46 = vor.u32 %v16877_v38, %v12681_v37  ;;  %v12163_v38 = vld [vmem:[#allocation2 + $0x990] sm:$0xf0] }
  0x97   :  { %3309 = vmatpush.bf16.msra.mxu2 %v11962_v39  ;;  %v11126_v39 = vor.u32 %v16482_v29, %v11123_v31  ;;  %v11086_v52 = vor.u32 %v16472_v43, %v11083_v44  ;;  %v12523_v29 = vld [vmem:[#allocation2 + $0xc60] sm:$0xf0]  ;;  %v12206_v31 = vor.u32 %v16752_v18, %v12203_v20  ;;  %v11846_v44 = vor.u32 %v16662_v33, %v11843_v34  ;;  %v16702_v34 = vld [vmem:[#allocation2 + $0x82c] sm:$0xf] }
  0x98   :  { %3284 = vmatpush.bf16.msrb.mxu3 %v11282_v48  ;;  %v16787_v48 = vld [vmem:[#allocation2 + $0xacc] sm:$0xf0]  ;;  %v12843_v43 = vld [vmem:[#allocation2 + $0xee0] sm:$0xf0] }
  0x99   :  { %3297 = vmatpush.bf16.msra.mxu0 %v11602_v57  ;;  %3272 = vmatmul.bf16.vlgmr.msrb.gmra.mxu1 %v18051_v60  ;;  %v12322_v56 = vor.u32 %v16787_v48, %v12321_v47  ;;  %v16462_v57 = vld [vmem:[#allocation2 + $0xac] sm:$0xf]  ;;  %v12483_v47 = vld [vmem:[#allocation2 + $0xc10] sm:$0xf0]  ;;  %v12043_v20 = vld [vmem:[#allocation2 + $0x8a0] sm:$0xf0] }
  0x9a   :  { %3316 = vmatpush.bf16.msra.mxu1 %v12522_v49  ;;  %v11446_v49 = vor.u32 %v16562_v40, %v11443_v41  ;;  %v11283_v40 = vld [vmem:[#allocation2 + $0x2b0] sm:$0xf0] }
  0x9b   :  { %3310 = vmatpush.bf16.msra.mxu2 %v11922_v58  ;;  %3285 = vmatmul.bf16.vlgmr.msrb.gmra.mxu3 %v18059_v7  ;;  %v11043_v58 = vld [vmem:[#allocation2 + $0xd0] sm:$0xf0] }
  0x9c   :  { %3329 = vmatpush.bf16.msra.mxu3 %v12842_v54  ;;  %3298 = vmatmul.bf16.vlgmr.msra.gmra.mxu0 %v18043_v53  ;;  %v16552_v54 = vld [vmem:[#allocation2 + $0x37c] sm:$0xf] }
  0x9d   :  { %3349 = vmatpush.bf16.msrb.mxu0 %v12882_v0  ;;  %v11406_v0 = vor.u32 %v16552_v54, %v11403_v55  ;;  %v16732_v54 = vld [vmem:[#allocation2 + $0x91c] sm:$0xf]  ;;  %v12123_v55 = vld [vmem:[#allocation2 + $0x940] sm:$0xf0] }
  0x9e   :  { %3317 = vmatpush.bf16.msra.mxu1 %v12482_v3  ;;  %3311 = vmatmul.bf16.vlgmr.msra.gmra.mxu2 %v18053_v61  ;;  %v11046_v3 = vor.u32 %v16462_v57, %v11043_v58  ;;  %v16902_v57 = vld [vmem:[#allocation2 + $0xe6c] sm:$0xf]  ;;  %v12803_v58 = vld [vmem:[#allocation2 + $0xe90] sm:$0xf0]  ;;  %v12126_v1 = vor.u32 %v16732_v54, %v12123_v55  ;;  %v11963_v54 = vld [vmem:[#allocation2 + $0x800] sm:$0xf0] }
  0x9f   :  { %3355 = vmatpush.bf16.msrb.mxu2 %v11246_v63  ;;  %v16777_v63 = vld [vmem:[#allocation2 + $0xa7c] sm:$0xf0]  ;;  %v12806_v4 = vor.u32 %v16902_v57, %v12803_v58  ;;  %v16862_v58 = vld [vmem:[#allocation2 + $0xd2c] sm:$0xf] }
  0xa0   :  { %3330 = vmatpush.bf16.msra.mxu3 %v12802_v6  ;;  %v12282_v6 = vor.u32 %v16777_v63, %v12281_v62  ;;  %v16812_v62 = vld [vmem:[#allocation2 + $0xb9c] sm:$0xf]  ;;  %v12443_v63 = vld [vmem:[#allocation2 + $0xbc0] sm:$0xf0] }
  0xa1   :  { %3368 = vmatpush.bf16.msra.mxu0 %v11566_v10  ;;  %v12241_v10 = vld [vmem:[#allocation2 + $0xa08] sm:$0xf] }
  0xa2   :  { %3318 = vmatpush.bf16.msra.mxu1 %v12442_v16  ;;  %v16672_v16 = vld [vmem:[#allocation2 + $0x73c] sm:$0xf]  ;;  %v12242_v23 = vor.u32 %v16767_v12, %v12241_v10  ;;  %v12763_v10 = vld [vmem:[#allocation2 + $0xe40] sm:$0xf0] }
  0xa3   :  { %3356 = vmatpush.bf16.msrb.mxu2 %v11206_v13  ;;  %v12561_v13 = vld [vmem:[#allocation2 + $0xc88] sm:$0xf]  ;;  %v11886_v27 = vor.u32 %v16672_v16, %v11883_v17  ;;  %v16632_v16 = vld [vmem:[#allocation2 + $0x5fc] sm:$0xf]  ;;  %v11723_v17 = vld [vmem:[#allocation2 + $0x620] sm:$0xf0] }
  0xa4   :  { %3331 = vmatpush.bf16.msra.mxu3 %v12762_v19  ;;  %v11006_v19 = vor.u32 %v16452_v8, %v11003_v9  ;;  %v12562_v26 = vor.u32 %v16847_v14, %v12561_v13  ;;  %v12446_v8 = vor.u32 %v16812_v62, %v12443_v63  ;;  %v16892_v9 = vld [vmem:[#allocation2 + $0xe1c] sm:$0xf]  ;;  %v16802_v13 = vld [vmem:[#allocation2 + $0xb4c] sm:$0xf]  ;;  %v12403_v14 = vld [vmem:[#allocation2 + $0xb70] sm:$0xf0] }
  0xa5   :  { %3369 = vmatpush.bf16.msra.mxu0 %v11526_v22  ;;  %v11323_v22 = vld [vmem:[#allocation2 + $0x300] sm:$0xf0]  ;;  %v12766_v18 = vor.u32 %v16892_v9, %v12763_v10  ;;  %v16772_v63 = vld [vmem:[#allocation2 + $0xa5c] sm:$0xf]  ;;  %v11249_v10 = vld [vmem:[#allocation2 + $0x240] sm:$0xf] }
  0xa6   :  { %3319 = vmatpush.bf16.msra.mxu1 %v12402_v28  ;;  %v16832_v28 = vld [vmem:[#allocation2 + $0xc3c] sm:$0xf] }
  0xa7   :  { %3357 = vmatpush.bf16.msrb.mxu2 %v11166_v25  ;;  %v10963_v25 = vld [vmem:[#allocation2 + $0x30] sm:$0xf0]  ;;  %v12526_v41 = vor.u32 %v16832_v28, %v12523_v29  ;;  %v12363_v28 = vld [vmem:[#allocation2 + $0xb20] sm:$0xf0] }
  0xa8   :  { %3332 = vmatpush.bf16.msra.mxu3 %v12722_v32  ;;  %v11326_v32 = vor.u32 %v16532_v21, %v11323_v22  ;;  %v10966_v37 = vor.u32 %v16442_v24, %v10963_v25  ;;  %v12406_v22 = vor.u32 %v16802_v13, %v12403_v14  ;;  %v12723_v24 = vld [vmem:[#allocation2 + $0xdf0] sm:$0xf0] }
  0xa9   :  { %3370 = vmatpush.bf16.msra.mxu0 %v11486_v36  ;;  %v16742_v36 = vld [vmem:[#allocation2 + $0x96c] sm:$0xf] }
  0xaa   :  { %3320 = vmatpush.bf16.msra.mxu1 %v12362_v42  ;;  %v16912_v42 = vld [vmem:[#allocation2 + $0xebc] sm:$0xf]  ;;  %v12166_v48 = vor.u32 %v16742_v36, %v12163_v38  ;;  %v12003_v36 = vld [vmem:[#allocation2 + $0x850] sm:$0xf0] }
  0xab   :  { %3358 = vmatpush.bf16.msrb.mxu2 %v11126_v39  ;;  %v16522_v39 = vld [vmem:[#allocation2 + $0x28c] sm:$0xf] }
  0xac   :  { %3333 = vmatpush.bf16.msra.mxu3 %v12682_v46  ;;  %12913 = vmatmul.msk.bf16.vlgmr.msrb.gmra.mxu0 %vm3078_vm0, %v18067_v45  ;;  %v16822_v46 = vld [vmem:[#allocation2 + $0xbec] sm:$0xf] }
  0xad   :  { %3371 = vmatpush.bf16.msra.mxu0 %v11446_v49  ;;  %v11286_v49 = vor.u32 %v16522_v39, %v11283_v40  ;;  %v16872_v39 = vld [vmem:[#allocation2 + $0xd7c] sm:$0xf]  ;;  %v12683_v40 = vld [vmem:[#allocation2 + $0xda0] sm:$0xf0] }
  0xae   :  { %3321 = vmatpush.bf16.msra.mxu1 %v12322_v56  ;;  %v12486_v56 = vor.u32 %v16822_v46, %v12483_v47  ;;  %v12006_v47 = vor.u32 %v16702_v34, %v12003_v36  ;;  %v16508_v34 = vld [vmem:[#allocation2 + $0x214] sm:$0xf0]  ;;  %v16842_v36 = vld [vmem:[#allocation2 + $0xc8c] sm:$0xf] }
  0xaf   :  { %3359 = vmatpush.bf16.msrb.mxu2 %v11086_v52  ;;  %v12846_v52 = vor.u32 %v16912_v42, %v12843_v43  ;;  %v16782_v43 = vld [vmem:[#allocation2 + $0xaac] sm:$0xf] }
  0xb0   :  { %3334 = vmatpush.bf16.msra.mxu3 %v12642_v59  ;;  %v11806_v59 = vor.u32 %v16652_v50, %v11803_v51  ;;  %v12686_v51 = vor.u32 %v16872_v39, %v12683_v40  ;;  %v12209_v40 = vld [vmem:[#allocation2 + $0x9c0] sm:$0xf] }
  0xb1   :  { %3372 = vmatpush.bf16.msra.mxu0 %v11406_v0  ;;  %v18099_v0 = vld [vmem:[#allocation5] sm:$0xff] }
  0xb2   :  { %3322 = vmatpush.bf16.msra.mxu1 %v12282_v6  ;;  %v12083_v6 = vld [vmem:[#allocation2 + $0x8f0] sm:$0xf0] }
  0xb3   :  { %3360 = vmatpush.bf16.msrb.mxu2 %v11046_v3  ;;  %v11763_v3 = vld [vmem:[#allocation2 + $0x670] sm:$0xf0] }
  0xb4   :  { %3335 = vmatpush.bf16.msra.mxu3 %v12602_v11  ;;  %v608_v11 = vperm.slane %v18099_v0, 0  ;;  %v11766_v12 = vor.u32 %v16642_v2, %v11763_v3  ;;  %v16602_v3 = vld [vmem:[#allocation2 + $0x50c] sm:$0xf] }
  0xb5   :  { %3373 = vmatpush.bf16.msra.mxu0 %v11366_v15  ;;  %v12086_v15 = vor.u32 %v16722_v5, %v12083_v6  ;;  %v3091_v21 = vpop.f32.mrf.mxu0  ;;  %v11603_v5 = vld [vmem:[#allocation2 + $0x530] sm:$0xf0]  ;;  %v16682_v6 = vld [vmem:[#allocation2 + $0x78c] sm:$0xf] }
  0xb6   :  { %3323 = vmatpush.bf16.msra.mxu1 %v12242_v23  ;;  %v16882_v23 = vld [vmem:[#allocation2 + $0xdcc] sm:$0xf]  ;;  %v3092_v25 = vadd.f32 %v3091_v21, %v608_v11  ;;  %v11569_v21 = vld [vmem:[#allocation2 + $0x4c0] sm:$0xf] }
  0xb7   :  { %3361 = vmatpush.bf16.msrb.mxu2 %v11006_v19  ;;  %v16712_v19 = vld [vmem:[#allocation2 + $0x87c] sm:$0xf]  ;;  %v12726_v33 = vor.u32 %v16882_v23, %v12723_v24  ;;  %v16922_v11 = vld [vmem:[#allocation2 + $0xf0c] sm:$0xf] }
  0xb8   :  { %3336 = vmatpush.bf16.msra.mxu3 %v12562_v26  ;;  %v11726_v26 = vor.u32 %v16632_v16, %v11723_v17  ;;  %v12046_v29 = vor.u32 %v16712_v19, %v12043_v20  ;;  %v16852_v16 = vld [vmem:[#allocation2 + $0xcdc] sm:$0xf]  ;;  %v12603_v17 = vld [vmem:[#allocation2 + $0xd00] sm:$0xf0]  ;;  %v16762_v19 = vld [vmem:[#allocation2 + $0xa0c] sm:$0xf] }
  0xb9   :  { %3374 = vmatpush.bf16.msra.mxu0 %v11326_v32  ;;  %3324 = vmatmul.bf16.vlgmr.msra.gmra.mxu1 %v18077_v30  ;;  %v11683_v32 = vld [vmem:[#allocation2 + $0x5d0] sm:$0xf0] }
  0xba   :  { %3381 = vmatpush.bf16.msrb.mxu1 %v11886_v27  ;;  %v16792_v27 = vld [vmem:[#allocation2 + $0xafc] sm:$0xf]  ;;  %v12243_v20 = vld [vmem:[#allocation2 + $0xa30] sm:$0xf0] }
  0xbb   :  { %3362 = vmatpush.bf16.msrb.mxu2 %v10966_v37  ;;  %3337 = vmatmul.bf16.vlgmr.msra.gmra.mxu3 %v18079_v35  ;;  %v3104_v37 = vpop.f32.mrf.mxu1  ;;  %v12366_v38 = vor.u32 %v16792_v27, %v12363_v28  ;;  %v16678_v27 = vld [vmem:[#allocation2 + $0x764] sm:$0xf0] }
  0xbc   :  { %3394 = vmatpush.bf16.msrb.mxu3 %v12206_v31  ;;  %v16622_v31 = vld [vmem:[#allocation2 + $0x5ac] sm:$0xf] }
  0xbd   :  { %3375 = vmatpush.bf16.msra.mxu0 %v11286_v49  ;;  %v11686_v42 = vor.u32 %v16622_v31, %v11683_v32  ;;  %v3117_v46 = vpop.f32.mrf.mxu2  ;;  %v11643_v49 = vld [vmem:[#allocation2 + $0x580] sm:$0xf0]  ;;  %v12606_v31 = vor.u32 %v16852_v16, %v12603_v17  ;;  %v11209_v32 = vld [vmem:[#allocation2 + $0x1f0] sm:$0xf] }
  0xbe   :  { %3382 = vmatpush.bf16.msrb.mxu1 %v11846_v44  ;;  %3363 = vmatmul.bf16.vlgmr.msrb.gmra.mxu2 %v18051_v60  ;;  %v12323_v44 = vld [vmem:[#allocation2 + $0xad0] sm:$0xf0]  ;;  %v3130_v50 = vpop.f32.mrf.mxu3 }
  0xbf   :  { %3407 = vmatpush.bf16.msra.mxu2 %v12526_v41  ;;  %v3105_v41 = vadd.f32 %v3104_v37, %v3092_v25  ;;  %v12326_v57 = vor.u32 %v16782_v43, %v12323_v44  ;;  %v16598_v25 = vld [vmem:[#allocation2 + $0x4e4] sm:$0xf0]  ;;  %v12563_v37 = vld [vmem:[#allocation2 + $0xcb0] sm:$0xf0]  ;;  %v16588_v43 = vld [vmem:[#allocation2 + $0x494] sm:$0xf0] }
  0xc0   :  { %3395 = vmatpush.bf16.msrb.mxu3 %v12166_v48  ;;  %3376 = vmatmul.bf16.vlgmr.msra.gmra.mxu0 %v18059_v7  ;;  %v16612_v48 = vld [vmem:[#allocation2 + $0x55c] sm:$0xf]  ;;  %v11849_v44 = vld [vmem:[#allocation2 + $0x6f0] sm:$0xf] }
  0xc1   :  { %3420 = vmatpush.bf16.msrb.mxu0 %v12846_v52  ;;  %v16692_v52 = vld [vmem:[#allocation2 + $0x7dc] sm:$0xf]  ;;  %v3118_v55 = vadd.f32 %v3117_v46, %v3105_v41  ;;  %v11646_v62 = vor.u32 %v16612_v48, %v11643_v49  ;;  %v16758_v41 = vld [vmem:[#allocation2 + $0x9e4] sm:$0xf0]  ;;  %v16668_v46 = vld [vmem:[#allocation2 + $0x714] sm:$0xf0]  ;;  %v12566_v48 = vor.u32 %v16842_v36, %v12563_v37 }
  0xc2   :  { %3383 = vmatpush.bf16.msrb.mxu1 %v11806_v59  ;;  %v12643_v59 = vld [vmem:[#allocation2 + $0xd50] sm:$0xf0]  ;;  %v12210_v49 = vor.u32 %v16758_v41, %v12209_v40  ;;  %v11049_v36 = vld [vmem:[#allocation2 + $0xb0] sm:$0xf]  ;;  %v16468_v37 = vld [vmem:[#allocation2 + $0xd4] sm:$0xf0] }
  0xc3   :  { %3408 = vmatpush.bf16.msra.mxu2 %v12486_v56  ;;  %v3093_v56 = vpop.f32.mrf.mxu0  ;;  %v18104_v2 = vadd.f32 %v3130_v50, %v3118_v55  ;;  %v12646_v9 = vor.u32 %v16862_v58, %v12643_v59  ;;  %v3106_v13 = vpop.f32.mrf.mxu1  ;;  %v11169_v50 = vld [vmem:[#allocation2 + $0x1a0] sm:$0xf]  ;;  %v12169_v55 = vld [vmem:[#allocation2 + $0x970] sm:$0xf]  ;;  %v16578_v58 = vld [vmem:[#allocation2 + $0x444] sm:$0xf0] }
  0xc4   :  { %3396 = vmatpush.bf16.msrb.mxu3 %v12126_v1  ;;  %v12283_v1 = vld [vmem:[#allocation2 + $0xa80] sm:$0xf0]  ;;  %v16748_v56 = vld [vmem:[#allocation2 + $0x994] sm:$0xf0]  ;;  %v11809_v59 = vld [vmem:[#allocation2 + $0x6a0] sm:$0xf] }
  0xc5   :  { %3421 = vmatpush.bf16.msrb.mxu0 %v12806_v4  ;;  %v11966_v4 = vor.u32 %v16692_v52, %v11963_v54  ;;  %v12286_v14 = vor.u32 %v16772_v63, %v12283_v1  ;;  %v11850_v54 = vor.u32 %v16668_v46, %v11849_v44  ;;  %v11769_v13 = vld [vmem:[#allocation2 + $0x650] sm:$0xf]  ;;  %v16718_v41 = vld [vmem:[#allocation2 + $0x8a4] sm:$0xf0]  ;;  %v16548_v44 = vld [vmem:[#allocation2 + $0x354] sm:$0xf0] }
  0xc6   :  { %3384 = vmatpush.bf16.msrb.mxu1 %v11766_v12  ;;  %v12883_v12 = vld [vmem:[#allocation2 + $0xf30] sm:$0xf0]  ;;  %v3132_v28 = vpop.f32.mrf.mxu3  ;;  %v11689_v46 = vld [vmem:[#allocation2 + $0x5b0] sm:$0xf] }
  0xc7   :  { %3409 = vmatpush.bf16.msra.mxu2 %v12446_v8  ;;  %v11923_v8 = vld [vmem:[#allocation2 + $0x7b0] sm:$0xf0]  ;;  %v12886_v24 = vor.u32 %v16922_v11, %v12883_v12  ;;  %v11449_v11 = vld [vmem:[#allocation2 + $0x3d0] sm:$0xf]  ;;  %v16568_v12 = vld [vmem:[#allocation2 + $0x3f4] sm:$0xf0] }
  0xc8   :  { %3397 = vmatpush.bf16.msrb.mxu3 %v12086_v15  ;;  %v16518_v15 = vld [vmem:[#allocation2 + $0x264] sm:$0xf0]  ;;  %v11926_v23 = vor.u32 %v16682_v6, %v11923_v8  ;;  %v11729_v28 = vld [vmem:[#allocation2 + $0x600] sm:$0xf] }
  0xc9   :  { %3422 = vmatpush.bf16.msrb.mxu0 %v12766_v18  ;;  %v11606_v18 = vor.u32 %v16602_v3, %v11603_v5  ;;  %v12170_v3 = vor.u32 %v16748_v56, %v12169_v55  ;;  %v16488_v5 = vld [vmem:[#allocation2 + $0x174] sm:$0xf0] }
  0xca   :  { %3385 = vmatpush.bf16.msrb.mxu1 %v11726_v26  ;;  %v11889_v26 = vld [vmem:[#allocation2 + $0x740] sm:$0xf] }
  0xcb   :  { %3410 = vmatpush.bf16.msra.mxu2 %v12406_v22  ;;  %v3119_v22 = vpop.f32.mrf.mxu2  ;;  %v11890_v39 = vor.u32 %v16678_v27, %v11889_v26  ;;  %v11409_v26 = vld [vmem:[#allocation2 + $0x380] sm:$0xf]  ;;  %v16558_v27 = vld [vmem:[#allocation2 + $0x3a4] sm:$0xf0] }
  0xcc   :  { %3398 = vmatpush.bf16.msrb.mxu3 %v12046_v29  ;;  %v11250_v29 = vor.u32 %v16518_v15, %v11249_v10  ;;  %v16738_v10 = vld [vmem:[#allocation2 + $0x944] sm:$0xf0]  ;;  %v11450_v22 = vor.u32 %v16568_v12, %v11449_v11  ;;  %v12529_v12 = vld [vmem:[#allocation2 + $0xc40] sm:$0xf] }
  0xcd   :  { %3423 = vmatpush.bf16.msrb.mxu0 %v12726_v33  ;;  %v12246_v33 = vor.u32 %v16762_v19, %v12243_v20  ;;  %v16478_v19 = vld [vmem:[#allocation2 + $0x124] sm:$0xf0] }
  0xce   :  { %3386 = vmatpush.bf16.msrb.mxu1 %v11686_v42  ;;  %v11529_v42 = vld [vmem:[#allocation2 + $0x470] sm:$0xf] }
  0xcf   :  { %3411 = vmatpush.bf16.msra.mxu2 %v12366_v38  ;;  %v11570_v38 = vor.u32 %v16598_v25, %v11569_v21  ;;  %v11530_v52 = vor.u32 %v16588_v43, %v11529_v42  ;;  %v16728_v25 = vld [vmem:[#allocation2 + $0x8f4] sm:$0xf0]  ;;  %v11369_v42 = vld [vmem:[#allocation2 + $0x330] sm:$0xf]  ;;  %v609_v43 = vperm.slane %v18099_v0, 1 }
  0xd0   :  { %3399 = vmatpush.bf16.msrb.mxu3 %v12006_v47  ;;  %v11210_v47 = vor.u32 %v16508_v34, %v11209_v32  ;;  %v11370_v55 = vor.u32 %v16548_v44, %v11369_v42  ;;  %v16593_v42 = vld [vmem:[#allocation2 + $0x4c4] sm:$0xf]  ;;  %v11571_v44 = vld [vmem:[#allocation2 + $0x4e8] sm:$0xf0] }
  0xd1   :  { %3424 = vmatpush.bf16.msrb.mxu0 %v12686_v51  ;;  %v16498_v51 = vld [vmem:[#allocation2 + $0x1c4] sm:$0xf0] }
  0xd2   :  { %3387 = vmatpush.bf16.msrb.mxu1 %v11646_v62  ;;  %v16658_v62 = vld [vmem:[#allocation2 + $0x6c4] sm:$0xf0]  ;;  %v11170_v1 = vor.u32 %v16498_v51, %v11169_v50  ;;  %v11009_v50 = vld [vmem:[#allocation2 + $0x60] sm:$0xf] }
  0xd3   :  { %3412 = vmatpush.bf16.msra.mxu2 %v12326_v57  ;;  %v11489_v57 = vld [vmem:[#allocation2 + $0x420] sm:$0xf]  ;;  %v3169_v63 = vpop.f32.mrf.mxu2  ;;  %v11810_v8 = vor.u32 %v16658_v62, %v11809_v59  ;;  %v16458_v51 = vld [vmem:[#allocation2 + $0x84] sm:$0xf0] }
  0xd4   :  { %3400 = vmatpush.bf16.msrb.mxu3 %v11966_v4  ;;  %v11129_v4 = vld [vmem:[#allocation2 + $0x150] sm:$0xf]  ;;  %v11490_v6 = vor.u32 %v16578_v58, %v11489_v57  ;;  %v16708_v58 = vld [vmem:[#allocation2 + $0x854] sm:$0xf0]  ;;  %v11329_v59 = vld [vmem:[#allocation2 + $0x2e0] sm:$0xf] }
  0xd5   :  { %3425 = vmatpush.bf16.msrb.mxu0 %v12646_v9  ;;  %v12129_v9 = vld [vmem:[#allocation2 + $0x920] sm:$0xf]  ;;  %v11130_v15 = vor.u32 %v16488_v5, %v11129_v4  ;;  %v3143_v16 = vpop.f32.mrf.mxu0  ;;  %v12009_v57 = vld [vmem:[#allocation2 + $0x830] sm:$0xf]  ;;  %v16618_v4 = vld [vmem:[#allocation2 + $0x584] sm:$0xf0] }
  0xd6   :  { %3388 = vmatpush.bf16.msrb.mxu1 %v11606_v18  ;;  %v12130_v17 = vor.u32 %v16738_v10, %v12129_v9  ;;  %v11089_v18 = vld [vmem:[#allocation2 + $0x100] sm:$0xf]  ;;  %v3144_v20 = vadd.f32 %v3143_v16, %v18104_v2  ;;  %v3156_v21 = vpop.f32.mrf.mxu1  ;;  %v16448_v9 = vld [vmem:[#allocation2 + $0x34] sm:$0xf0]  ;;  %v12010_v11 = vor.u32 %v16708_v58, %v12009_v57  ;;  %v11211_v57 = vld [vmem:[#allocation2 + $0x218] sm:$0xf0] }
  0xd7   :  { %3413 = vmatpush.bf16.msra.mxu2 %v12286_v14  ;;  %v16648_v14 = vld [vmem:[#allocation2 + $0x674] sm:$0xf0]  ;;  %v12049_v2 = vld [vmem:[#allocation2 + $0x880] sm:$0xf]  ;;  %v16583_v58 = vld [vmem:[#allocation2 + $0x474] sm:$0xf] }
  0xd8   :  { %3401 = vmatpush.bf16.msrb.mxu3 %v11926_v23  ;;  %v11770_v23 = vor.u32 %v16648_v14, %v11769_v13  ;;  %v3157_v32 = vadd.f32 %v3156_v21, %v3144_v20  ;;  %v16838_v13 = vld [vmem:[#allocation2 + $0xc64] sm:$0xf0]  ;;  %v11969_v14 = vld [vmem:[#allocation2 + $0x7e0] sm:$0xf]  ;;  %v11609_v20 = vld [vmem:[#allocation2 + $0x510] sm:$0xf] }
  0xd9   :  { %3426 = vmatpush.bf16.msrb.mxu0 %v12606_v31  ;;  %3389 = vmatmul.bf16.vlgmr.msrb.gmra.mxu1 %v18043_v53  ;;  %v16608_v21 = vld [vmem:[#allocation2 + $0x534] sm:$0xf0] }
  0xda   :  { %3440 = vmatpush.bf16.msra.mxu1 %v12886_v24  ;;  %v12089_v24 = vld [vmem:[#allocation2 + $0x8d0] sm:$0xf] }
  0xdb   :  { %3414 = vmatpush.bf16.msra.mxu2 %v12246_v33  ;;  %3402 = vmatmul.bf16.vlgmr.msrb.gmra.mxu3 %v18053_v61  ;;  %v3171_v31 = vpop.f32.mrf.mxu2  ;;  %v11090_v33 = vor.u32 %v16478_v19, %v11089_v18  ;;  %v12090_v34 = vor.u32 %v16728_v25, %v12089_v24  ;;  %v11289_v18 = vld [vmem:[#allocation2 + $0x290] sm:$0xf]  ;;  %v16528_v19 = vld [vmem:[#allocation2 + $0x2b4] sm:$0xf0]  ;;  %v16918_v24 = vld [vmem:[#allocation2 + $0xee4] sm:$0xf0] }
  0xdc   :  { %3446 = vmatpush.bf16.msra.mxu3 %v11250_v29  ;;  %v16638_v29 = vld [vmem:[#allocation2 + $0x624] sm:$0xf0]  ;;  %v12889_v25 = vld [vmem:[#allocation2 + $0xf10] sm:$0xf] }
  0xdd   :  { %3427 = vmatpush.bf16.msrb.mxu0 %v12566_v48  ;;  %v11730_v40 = vor.u32 %v16638_v29, %v11729_v28  ;;  %v11050_v48 = vor.u32 %v16468_v37, %v11049_v36  ;;  %v12489_v29 = vld [vmem:[#allocation2 + $0xbf0] sm:$0xf]  ;;  %v16688_v37 = vld [vmem:[#allocation2 + $0x7b4] sm:$0xf0] }
  0xde   :  { %3459 = vmatpush.bf16.msrb.mxu1 %v11570_v38  ;;  %3415 = vmatmul.bf16.vlgmr.msra.gmra.mxu2 %v18077_v30  ;;  %v18111_v38 = vadd.f32 %v3169_v63, %v3157_v32  ;;  %v3158_v63 = vpop.f32.mrf.mxu1  ;;  %v11290_v32 = vor.u32 %v16528_v19, %v11289_v18  ;;  %v11929_v36 = vld [vmem:[#allocation2 + $0x790] sm:$0xf]  ;;  %v12369_v18 = vld [vmem:[#allocation2 + $0xb00] sm:$0xf]  ;;  %v16798_v19 = vld [vmem:[#allocation2 + $0xb24] sm:$0xf0] }
  0xdf   :  { %3472 = vmatpush.bf16.msrb.mxu2 %v11890_v39  ;;  %v11410_v39 = vor.u32 %v16558_v27, %v11409_v26  ;;  %v16928_v26 = vld [vmem:[#allocation2 + $0xf34] sm:$0xf0]  ;;  %v12530_v27 = vor.u32 %v16838_v13, %v12529_v12  ;;  %v16898_v63 = vld [vmem:[#allocation2 + $0xe44] sm:$0xf0]  ;;  %v16573_v12 = vld [vmem:[#allocation2 + $0x424] sm:$0xf] }
  0xe0   :  { %3447 = vmatpush.bf16.msra.mxu3 %v11210_v47  ;;  %3428 = vmatmul.bf16.vlgmr.msrb.gmra.mxu0 %v18079_v35  ;;  %v16628_v47 = vld [vmem:[#allocation2 + $0x5d4] sm:$0xf0]  ;;  %v11491_v13 = vld [vmem:[#allocation2 + $0x448] sm:$0xf0] }
  0xe1   :  { %3485 = vmatpush.bf16.msra.mxu0 %v12210_v49  ;;  %v12050_v49 = vor.u32 %v16718_v41, %v12049_v2  ;;  %v11690_v56 = vor.u32 %v16628_v47, %v11689_v46  ;;  %v11251_v41 = vld [vmem:[#allocation2 + $0x268] sm:$0xf0]  ;;  %v12809_v46 = vld [vmem:[#allocation2 + $0xe70] sm:$0xf]  ;;  %v16908_v47 = vld [vmem:[#allocation2 + $0xe94] sm:$0xf0] }
  0xe2   :  { %3460 = vmatpush.bf16.msrb.mxu1 %v11530_v52  ;;  %v3145_v52 = vpop.f32.mrf.mxu0 }
  0xe3   :  { %3473 = vmatpush.bf16.msrb.mxu2 %v11850_v54  ;;  %v3182_v54 = vpop.f32.mrf.mxu3  ;;  %v3195_v5 = vpop.f32.mrf.mxu2  ;;  %v16818_v52 = vld [vmem:[#allocation2 + $0xbc4] sm:$0xf0] }
  0xe4   :  { %3448 = vmatpush.bf16.msra.mxu3 %v11170_v1  ;;  %v3183_v62 = vadd.f32 %v3182_v54, %v609_v43  ;;  %v16538_v1 = vld [vmem:[#allocation2 + $0x304] sm:$0xf0]  ;;  %v11574_v54 = vor.u32 %v16593_v42, %v11571_v44  ;;  %v16868_v44 = vld [vmem:[#allocation2 + $0xd54] sm:$0xf0] }
  0xe5   :  { %3486 = vmatpush.bf16.msra.mxu0 %v12170_v3  ;;  %v11649_v3 = vld [vmem:[#allocation2 + $0x560] sm:$0xf] }
  0xe6   :  { %3461 = vmatpush.bf16.msrb.mxu1 %v11490_v6  ;;  %v11010_v6 = vor.u32 %v16458_v51, %v11009_v50  ;;  %v18116_v10 = vadd.f32 %v3195_v5, %v3183_v62  ;;  %v11650_v16 = vor.u32 %v16618_v4, %v11649_v3  ;;  %v12449_v51 = vld [vmem:[#allocation2 + $0xba0] sm:$0xf]  ;;  %v12409_v4 = vld [vmem:[#allocation2 + $0xb50] sm:$0xf]  ;;  %v16808_v5 = vld [vmem:[#allocation2 + $0xb74] sm:$0xf0] }
  0xe7   :  { %3474 = vmatpush.bf16.msrb.mxu2 %v11810_v8  ;;  %v10969_v8 = vld [vmem:[#allocation2 + $0x10] sm:$0xf]  ;;  %v12769_v62 = vld [vmem:[#allocation2 + $0xe20] sm:$0xf] }
  0xe8   :  { %3449 = vmatpush.bf16.msra.mxu3 %v11130_v15  ;;  %v11330_v15 = vor.u32 %v16538_v1, %v11329_v59  ;;  %v11531_v59 = vld [vmem:[#allocation2 + $0x498] sm:$0xf0]  ;;  %v12450_v1 = vor.u32 %v16818_v52, %v12449_v51 }
  0xe9   :  { %3487 = vmatpush.bf16.msra.mxu0 %v12130_v17  ;;  %12914 = vmatmul.msk.bf16.vlgmr.msra.gmra.mxu1 %vm3078_vm0, %v18067_v45  ;;  %v16698_v17 = vld [vmem:[#allocation2 + $0x804] sm:$0xf0] }
  0xea   :  { %3462 = vmatpush.bf16.msrb.mxu1 %v11450_v22  ;;  %v12849_v22 = vld [vmem:[#allocation2 + $0xec0] sm:$0xf]  ;;  %v11970_v28 = vor.u32 %v16698_v17, %v11969_v14  ;;  %v12729_v14 = vld [vmem:[#allocation2 + $0xdd0] sm:$0xf] }
  0xeb   :  { %3475 = vmatpush.bf16.msrb.mxu2 %v11770_v23  ;;  %v10970_v23 = vor.u32 %v16448_v9, %v10969_v8  ;;  %v3184_v31 = vpop.f32.mrf.mxu3  ;;  %v12850_v2 = vor.u32 %v16918_v24, %v12849_v22  ;;  %v3197_v43 = vpop.f32.mrf.mxu2  ;;  %v12770_v8 = vor.u32 %v16898_v63, %v12769_v62  ;;  %v16493_v9 = vld [vmem:[#allocation2 + $0x1a4] sm:$0xf]  ;;  %v11131_v24 = vld [vmem:[#allocation2 + $0x178] sm:$0xf0]  ;;  %v12609_v63 = vld [vmem:[#allocation2 + $0xce0] sm:$0xf] }
  0xec   :  { %3450 = vmatpush.bf16.msra.mxu3 %v11090_v33  ;;  %v11610_v33 = vor.u32 %v16608_v21, %v11609_v20  ;;  %v11494_v21 = vor.u32 %v16573_v12, %v11491_v13  ;;  %v12370_v31 = vor.u32 %v16798_v19, %v12369_v18  ;;  %v11411_v43 = vld [vmem:[#allocation2 + $0x3a8] sm:$0xf0]  ;;  %v11371_v62 = vld [vmem:[#allocation2 + $0x358] sm:$0xf0]  ;;  %v12569_v19 = vld [vmem:[#allocation2 + $0xc90] sm:$0xf] }
  0xed   :  { %3488 = vmatpush.bf16.msra.mxu0 %v12090_v34  ;;  %v16828_v34 = vld [vmem:[#allocation2 + $0xc14] sm:$0xf0]  ;;  %v11331_v18 = vld [vmem:[#allocation2 + $0x308] sm:$0xf0] }
  0xee   :  { %3463 = vmatpush.bf16.msrb.mxu1 %v11410_v39  ;;  %v12890_v39 = vor.u32 %v16928_v26, %v12889_v25  ;;  %v16563_v25 = vld [vmem:[#allocation2 + $0x3d4] sm:$0xf] }
  0xef   :  { %3476 = vmatpush.bf16.msrb.mxu2 %v11730_v40  ;;  %v16513_v40 = vld [vmem:[#allocation2 + $0x244] sm:$0xf] }
  0xf0   :  { %3451 = vmatpush.bf16.msra.mxu3 %v11050_v48  ;;  %v12490_v48 = vor.u32 %v16828_v34, %v12489_v29  ;;  %v11254_v50 = vor.u32 %v16513_v40, %v11251_v41  ;;  %v16878_v29 = vld [vmem:[#allocation2 + $0xda4] sm:$0xf0]  ;;  %v16788_v34 = vld [vmem:[#allocation2 + $0xad4] sm:$0xf0]  ;;  %v11091_v40 = vld [vmem:[#allocation2 + $0x128] sm:$0xf0] }
  0xf1   :  { %3489 = vmatpush.bf16.msra.mxu0 %v12050_v49  ;;  %v11930_v49 = vor.u32 %v16688_v37, %v11929_v36  ;;  %v16553_v41 = vld [vmem:[#allocation2 + $0x384] sm:$0xf] }
  0xf2   :  { %3464 = vmatpush.bf16.msrb.mxu1 %v11370_v55  ;;  %v12810_v55 = vor.u32 %v16908_v47, %v12809_v46  ;;  %v11414_v51 = vor.u32 %v16553_v41, %v11411_v43  ;;  %v12531_v41 = vld [vmem:[#allocation2 + $0xc68] sm:$0xf0] }
  0xf3   :  { %3477 = vmatpush.bf16.msrb.mxu2 %v11690_v56  ;;  %v16503_v56 = vld [vmem:[#allocation2 + $0x1f4] sm:$0xf] }
  0xf4   :  { %3452 = vmatpush.bf16.msra.mxu3 %v11010_v6  ;;  %v11214_v3 = vor.u32 %v16503_v56, %v11211_v57  ;;  %v11534_v6 = vor.u32 %v16583_v58, %v11531_v59  ;;  %v11051_v56 = vld [vmem:[#allocation2 + $0xd8] sm:$0xf0]  ;;  %v16543_v57 = vld [vmem:[#allocation2 + $0x334] sm:$0xf] }
  0xf5   :  { %3490 = vmatpush.bf16.msra.mxu0 %v12010_v11  ;;  %v11171_v11 = vld [vmem:[#allocation2 + $0x1c8] sm:$0xf0]  ;;  %v3208_v20 = vpop.f32.mrf.mxu0  ;;  %v11374_v12 = vor.u32 %v16543_v57, %v11371_v62  ;;  %v12491_v57 = vld [vmem:[#allocation2 + $0xc18] sm:$0xf0]  ;;  %v16733_v62 = vld [vmem:[#allocation2 + $0x924] sm:$0xf] }
  0xf6   :  { %3465 = vmatpush.bf16.msrb.mxu1 %v11330_v15  ;;  %v16888_v15 = vld [vmem:[#allocation2 + $0xdf4] sm:$0xf0]  ;;  %v11174_v17 = vor.u32 %v16493_v9, %v11171_v11  ;;  %v3209_v26 = vadd.f32 %v3208_v20, %v18116_v10  ;;  %v12649_v10 = vld [vmem:[#allocation2 + $0xd30] sm:$0xf]  ;;  %v16673_v9 = vld [vmem:[#allocation2 + $0x744] sm:$0xf] }
  0xf7   :  { %3478 = vmatpush.bf16.msrb.mxu2 %v11650_v16  ;;  %v12410_v16 = vor.u32 %v16808_v5, %v12409_v4  ;;  %v12730_v22 = vor.u32 %v16888_v15, %v12729_v14  ;;  %v12249_v4 = vld [vmem:[#allocation2 + $0xa10] sm:$0xf]  ;;  %v11891_v11 = vld [vmem:[#allocation2 + $0x768] sm:$0xf0]  ;;  %v16453_v14 = vld [vmem:[#allocation2 + $0x64] sm:$0xf] }
  0xf8   :  { %3453 = vmatpush.bf16.msra.mxu3 %v10970_v23  ;;  %v16483_v23 = vld [vmem:[#allocation2 + $0x154] sm:$0xf]  ;;  %v11011_v15 = vld [vmem:[#allocation2 + $0x88] sm:$0xf0]  ;;  %v16848_v20 = vld [vmem:[#allocation2 + $0xcb4] sm:$0xf0] }
  0xf9   :  { %3491 = vmatpush.bf16.msra.mxu0 %v11970_v28  ;;  %v12689_v28 = vld [vmem:[#allocation2 + $0xd80] sm:$0xf] }
  0xfa   :  { %3466 = vmatpush.bf16.msrb.mxu1 %v11290_v32  ;;  %v11134_v32 = vor.u32 %v16483_v23, %v11131_v24  ;;  %v12690_v37 = vor.u32 %v16878_v29, %v12689_v28  ;;  %v12211_v23 = vld [vmem:[#allocation2 + $0x9e8] sm:$0xf0]  ;;  %v11894_v24 = vor.u32 %v16673_v9, %v11891_v11  ;;  %v16443_v28 = vld [vmem:[#allocation2 + $0x14] sm:$0xf]  ;;  %v16813_v11 = vld [vmem:[#allocation2 + $0xba4] sm:$0xf] }
  0xfb   :  { %3479 = vmatpush.bf16.msrb.mxu2 %v11610_v33  ;;  %3454 = vmatmul.bf16.vlgmr.msra.gmra.mxu3 %v18051_v60  ;;  %v12329_v33 = vld [vmem:[#allocation2 + $0xab0] sm:$0xf] }
  0xfc   :  { %3498 = vmatpush.bf16.msrb.mxu3 %v12530_v27  ;;  %v11451_v27 = vld [vmem:[#allocation2 + $0x3f8] sm:$0xf0]  ;;  %v12330_v46 = vor.u32 %v16788_v34, %v12329_v33  ;;  %v16523_v34 = vld [vmem:[#allocation2 + $0x294] sm:$0xf] }
  0xfd   :  { %3492 = vmatpush.bf16.msra.mxu0 %v11930_v49  ;;  %3467 = vmatmul.bf16.vlgmr.msrb.gmra.mxu1 %v18059_v7  ;;  %v11454_v36 = vor.u32 %v16563_v25, %v11451_v27  ;;  %v16778_v49 = vld [vmem:[#allocation2 + $0xa84] sm:$0xf0]  ;;  %v11014_v25 = vor.u32 %v16453_v14, %v11011_v15  ;;  %v11851_v27 = vld [vmem:[#allocation2 + $0x718] sm:$0xf0]  ;;  %v12771_v14 = vld [vmem:[#allocation2 + $0xe48] sm:$0xf0] }
  0xfe   :  { %3511 = vmatpush.bf16.msra.mxu1 %v12850_v2  ;;  %3480 = vmatmul.bf16.vlgmr.msrb.gmra.mxu2 %v18043_v53  ;;  %v3221_v2 = vpop.f32.mrf.mxu1  ;;  %v3234_v52 = vpop.f32.mrf.mxu3  ;;  %v10971_v33 = vld [vmem:[#allocation2 + $0x38] sm:$0xf0]  ;;  %v16723_v15 = vld [vmem:[#allocation2 + $0x8d4] sm:$0xf] }
  0xff   :  { %3531 = vmatpush.bf16.msra.mxu2 %v12890_v39  ;;  %v16473_v39 = vld [vmem:[#allocation2 + $0x104] sm:$0xf]  ;;  %v3222_v42 = vadd.f32 %v3221_v2, %v3209_v26  ;;  %v16663_v26 = vld [vmem:[#allocation2 + $0x6f4] sm:$0xf] }
 0x100   :  { %3499 = vmatpush.bf16.msrb.mxu3 %v12490_v48  ;;  %3493 = vmatmul.bf16.vlgmr.msra.gmra.mxu0 %v18053_v61  ;;  %v11094_v47 = vor.u32 %v16473_v39, %v11091_v40  ;;  %v12289_v48 = vld [vmem:[#allocation2 + $0xa60] sm:$0xf]  ;;  %v16833_v40 = vld [vmem:[#allocation2 + $0xc44] sm:$0xf] }
 0x101   :  { %3537 = vmatpush.bf16.msrb.mxu0 %v11254_v50  ;;  %v3210_v50 = vpop.f32.mrf.mxu0  ;;  %v3235_v58 = vadd.f32 %v3234_v52, %v3222_v42  ;;  %v3247_v59 = vpop.f32.mrf.mxu2  ;;  %v16913_v42 = vld [vmem:[#allocation2 + $0xec4] sm:$0xf]  ;;  %v11811_v52 = vld [vmem:[#allocation2 + $0x6c8] sm:$0xf0] }
 0x102   :  { %3512 = vmatpush.bf16.msra.mxu1 %v12810_v55  ;;  %v16463_v55 = vld [vmem:[#allocation2 + $0xb4] sm:$0xf]  ;;  %v12534_v50 = vor.u32 %v16833_v40, %v12531_v41  ;;  %v16793_v40 = vld [vmem:[#allocation2 + $0xb04] sm:$0xf]  ;;  %v12371_v41 = vld [vmem:[#allocation2 + $0xb28] sm:$0xf0] }
 0x103   :  { %3550 = vmatpush.bf16.msrb.mxu2 %v11574_v54  ;;  %v12650_v54 = vor.u32 %v16868_v44, %v12649_v10  ;;  %v3248_v5 = vadd.f32 %v3247_v59, %v3235_v58  ;;  %v12851_v10 = vld [vmem:[#allocation2 + $0xee8] sm:$0xf0]  ;;  %v16743_v44 = vld [vmem:[#allocation2 + $0x974] sm:$0xf]  ;;  %v12811_v59 = vld [vmem:[#allocation2 + $0xe98] sm:$0xf0] }
 0x104   :  { %3500 = vmatpush.bf16.msrb.mxu3 %v12450_v1  ;;  %v16858_v1 = vld [vmem:[#allocation2 + $0xd04] sm:$0xf0]  ;;  %v16903_v58 = vld [vmem:[#allocation2 + $0xe74] sm:$0xf] }
 0x105   :  { %3538 = vmatpush.bf16.msrb.mxu0 %v11214_v3  ;;  %v12290_v3 = vor.u32 %v16778_v49, %v12289_v48  ;;  %v12610_v13 = vor.u32 %v16858_v1, %v12609_v63  ;;  %v10974_v48 = vor.u32 %v16443_v28, %v10971_v33  ;;  %v12131_v63 = vld [vmem:[#allocation2 + $0x948] sm:$0xf0] }
 0x106   :  { %3513 = vmatpush.bf16.msra.mxu1 %v12770_v8  ;;  %v16768_v8 = vld [vmem:[#allocation2 + $0xa34] sm:$0xf0]  ;;  %v12134_v9 = vor.u32 %v16733_v62, %v12131_v63  ;;  %v12051_v28 = vld [vmem:[#allocation2 + $0x8a8] sm:$0xf0]  ;;  %v16693_v62 = vld [vmem:[#allocation2 + $0x7e4] sm:$0xf] }
 0x107   :  { %3551 = vmatpush.bf16.msrb.mxu2 %v11534_v6  ;;  %v11054_v6 = vor.u32 %v16463_v55, %v11051_v56  ;;  %v16823_v56 = vld [vmem:[#allocation2 + $0xbf4] sm:$0xf]  ;;  %v11971_v63 = vld [vmem:[#allocation2 + $0x808] sm:$0xf0] }
 0x108   :  { %3501 = vmatpush.bf16.msrb.mxu3 %v12410_v16  ;;  %v16533_v16 = vld [vmem:[#allocation2 + $0x2e4] sm:$0xf] }
 0x109   :  { %3539 = vmatpush.bf16.msrb.mxu0 %v11174_v17  ;;  %v3223_v17 = vpop.f32.mrf.mxu1  ;;  %v3260_v29 = vpop.f32.mrf.mxu0 }
 0x10a   :  { %3514 = vmatpush.bf16.msra.mxu1 %v12730_v22  ;;  %v16753_v22 = vld [vmem:[#allocation2 + $0x9c4] sm:$0xf]  ;;  %v18125_v2 = vadd.f32 %v3260_v29, %v3248_v5  ;;  %v3249_v43 = vpop.f32.mrf.mxu2  ;;  %v16643_v5 = vld [vmem:[#allocation2 + $0x654] sm:$0xf]  ;;  %v610_v29 = vperm.slane %v18099_v0, 2 }
 0x10b   :  { %3552 = vmatpush.bf16.msrb.mxu2 %v11494_v21  ;;  %v12250_v21 = vor.u32 %v16768_v8, %v12249_v4  ;;  %v12214_v39 = vor.u32 %v16753_v22, %v12211_v23  ;;  %v12814_v8 = vor.u32 %v16903_v58, %v12811_v59  ;;  %v12651_v59 = vld [vmem:[#allocation2 + $0xd58] sm:$0xf0] }
 0x10c   :  { %3502 = vmatpush.bf16.msrb.mxu3 %v12370_v31  ;;  %v11334_v31 = vor.u32 %v16533_v16, %v11331_v18  ;;  %v12091_v16 = vld [vmem:[#allocation2 + $0x8f8] sm:$0xf0] }
 0x10d   :  { %3540 = vmatpush.bf16.msrb.mxu0 %v11134_v32  ;;  %v12570_v32 = vor.u32 %v16848_v20, %v12569_v19  ;;  %v16633_v19 = vld [vmem:[#allocation2 + $0x604] sm:$0xf]  ;;  %v11731_v20 = vld [vmem:[#allocation2 + $0x628] sm:$0xf0]  ;;  %v12094_v23 = vor.u32 %v16723_v15, %v12091_v16  ;;  %v16923_v16 = vld [vmem:[#allocation2 + $0xf14] sm:$0xf] }
 0x10e   :  { %3515 = vmatpush.bf16.msra.mxu1 %v12690_v37  ;;  %12915 = vmatmul.msk.bf16.vlgmr.msra.gmra.mxu2 %vm3078_vm0, %v18067_v45  ;;  %v3236_v37 = vpop.f32.mrf.mxu3  ;;  %v16853_v15 = vld [vmem:[#allocation2 + $0xce4] sm:$0xf] }
 0x10f   :  { %3553 = vmatpush.bf16.msrb.mxu2 %v11454_v36  ;;  %v11291_v36 = vld [vmem:[#allocation2 + $0x2b8] sm:$0xf0] }
 0x110   :  { %3503 = vmatpush.bf16.msrb.mxu3 %v12330_v46  ;;  %v12171_v46 = vld [vmem:[#allocation2 + $0x998] sm:$0xf0]  ;;  %v11294_v49 = vor.u32 %v16523_v34, %v11291_v36  ;;  %v16623_v34 = vld [vmem:[#allocation2 + $0x5b4] sm:$0xf] }
 0x111   :  { %3541 = vmatpush.bf16.msrb.mxu0 %v11094_v47  ;;  %v11854_v47 = vor.u32 %v16663_v26, %v11851_v27  ;;  %v12174_v55 = vor.u32 %v16743_v44, %v12171_v46  ;;  %v3262_v4 = vpop.f32.mrf.mxu0  ;;  %v12731_v26 = vld [vmem:[#allocation2 + $0xdf8] sm:$0xf0]  ;;  %v16713_v27 = vld [vmem:[#allocation2 + $0x884] sm:$0xf]  ;;  %v16703_v46 = vld [vmem:[#allocation2 + $0x834] sm:$0xf] }
 0x112   :  { %3516 = vmatpush.bf16.msra.mxu1 %v12650_v54  ;;  %v12854_v54 = vor.u32 %v16913_v42, %v12851_v10  ;;  %v11691_v36 = vld [vmem:[#allocation2 + $0x5d8] sm:$0xf0]  ;;  %v16873_v42 = vld [vmem:[#allocation2 + $0xd84] sm:$0xf]  ;;  %v12691_v10 = vld [vmem:[#allocation2 + $0xda8] sm:$0xf0] }
 0x113   :  { %3554 = vmatpush.bf16.msrb.mxu2 %v11414_v51  ;;  %v16653_v51 = vld [vmem:[#allocation2 + $0x6a4] sm:$0xf]  ;;  %v11694_v0 = vor.u32 %v16623_v34, %v11691_v36  ;;  %v12251_v34 = vld [vmem:[#allocation2 + $0xa38] sm:$0xf0]  ;;  %v16843_v36 = vld [vmem:[#allocation2 + $0xc94] sm:$0xf] }
 0x114   :  { %3504 = vmatpush.bf16.msrb.mxu3 %v12290_v3  ;;  %v11814_v1 = vor.u32 %v16653_v51, %v11811_v52  ;;  %v12494_v3 = vor.u32 %v16823_v56, %v12491_v57  ;;  %v12694_v51 = vor.u32 %v16873_v42, %v12691_v10  ;;  %v12331_v56 = vld [vmem:[#allocation2 + $0xad8] sm:$0xf0]  ;;  %v16863_v57 = vld [vmem:[#allocation2 + $0xd34] sm:$0xf]  ;;  %v16679_v42 = vld [vmem:[#allocation2 + $0x76c] sm:$0xf0] }
 0x115   :  { %3542 = vmatpush.bf16.msrb.mxu0 %v11054_v6  ;;  %v11771_v6 = vld [vmem:[#allocation2 + $0x678] sm:$0xf0] }
 0x116   :  { %3517 = vmatpush.bf16.msra.mxu1 %v12610_v13  ;;  %v16893_v13 = vld [vmem:[#allocation2 + $0xe24] sm:$0xf]  ;;  %v11774_v17 = vor.u32 %v16643_v5, %v11771_v6  ;;  %v3273_v43 = vpop.f32.mrf.mxu1  ;;  %v11611_v6 = vld [vmem:[#allocation2 + $0x538] sm:$0xf0] }
 0x117   :  { %3555 = vmatpush.bf16.msrb.mxu2 %v11374_v12  ;;  %v12451_v12 = vld [vmem:[#allocation2 + $0xbc8] sm:$0xf0]  ;;  %v12774_v22 = vor.u32 %v16893_v13, %v12771_v14  ;;  %v3274_v44 = vadd.f32 %v3273_v43, %v610_v29  ;;  %v11974_v13 = vor.u32 %v16693_v62, %v11971_v63  ;;  %v16599_v29 = vld [vmem:[#allocation2 + $0x4ec] sm:$0xf0]  ;;  %v12217_v43 = vld [vmem:[#allocation2 + $0x9c8] sm:$0xf] }
 0x118   :  { %3505 = vmatpush.bf16.msrb.mxu3 %v12250_v21  ;;  %v12454_v18 = vor.u32 %v16813_v11, %v12451_v12  ;;  %v16803_v21 = vld [vmem:[#allocation2 + $0xb54] sm:$0xf]  ;;  %v12291_v11 = vld [vmem:[#allocation2 + $0xa88] sm:$0xf0]  ;;  %v12654_v12 = vor.u32 %v16863_v57, %v12651_v59  ;;  %v11857_v57 = vld [vmem:[#allocation2 + $0x6f8] sm:$0xf] }
 0x119   :  { %3543 = vmatpush.bf16.msrb.mxu0 %v11014_v25  ;;  %v16883_v25 = vld [vmem:[#allocation2 + $0xdd4] sm:$0xf]  ;;  %v3299_v33 = vpop.f32.mrf.mxu0  ;;  %v12177_v59 = vld [vmem:[#allocation2 + $0x978] sm:$0xf]  ;;  %v16749_v63 = vld [vmem:[#allocation2 + $0x99c] sm:$0xf0] }
 0x11a   :  { %3518 = vmatpush.bf16.msra.mxu1 %v12570_v32  ;;  %v12734_v37 = vor.u32 %v16883_v25, %v12731_v26  ;;  %v16519_v25 = vld [vmem:[#allocation2 + $0x26c] sm:$0xf0] }
 0x11b   :  { %3556 = vmatpush.bf16.msrb.mxu2 %v11334_v31  ;;  %3506 = vmatmul.bf16.vlgmr.msrb.gmra.mxu3 %v18077_v30  ;;  %v11734_v31 = vor.u32 %v16633_v19, %v11731_v20  ;;  %v12611_v20 = vld [vmem:[#allocation2 + $0xd08] sm:$0xf0] }
 0x11c   :  { %3563 = vmatpush.bf16.msra.mxu3 %v11894_v24  ;;  %v12411_v24 = vld [vmem:[#allocation2 + $0xb78] sm:$0xf0] }
 0x11d   :  { %3544 = vmatpush.bf16.msrb.mxu0 %v10974_v48  ;;  %3519 = vmatmul.bf16.vlgmr.msra.gmra.mxu1 %v18079_v35  ;;  %v12414_v32 = vor.u32 %v16803_v21, %v12411_v24  ;;  %v12374_v48 = vor.u32 %v16793_v40, %v12371_v41  ;;  %v16683_v21 = vld [vmem:[#allocation2 + $0x794] sm:$0xf]  ;;  %v11257_v24 = vld [vmem:[#allocation2 + $0x248] sm:$0xf] }
 0x11e   :  { %3576 = vmatpush.bf16.msrb.mxu1 %v12214_v39  ;;  %v12054_v39 = vor.u32 %v16713_v27, %v12051_v28  ;;  %v11577_v28 = vld [vmem:[#allocation2 + $0x4c8] sm:$0xf]  ;;  %v11258_v40 = vor.u32 %v16519_v25, %v11257_v24 }
 0x11f   :  { %3557 = vmatpush.bf16.msrb.mxu2 %v11294_v49  ;;  %v16613_v49 = vld [vmem:[#allocation2 + $0x564] sm:$0xf]  ;;  %v11897_v41 = vld [vmem:[#allocation2 + $0x748] sm:$0xf]  ;;  %v11578_v10 = vor.u32 %v16599_v29, %v11577_v28 }
 0x120   :  { %3564 = vmatpush.bf16.msra.mxu3 %v11854_v47  ;;  %3545 = vmatmul.bf16.vlgmr.msrb.gmra.mxu0 %v18051_v60  ;;  %v12011_v47 = vld [vmem:[#allocation2 + $0x858] sm:$0xf0] }
 0x121   :  { %3589 = vmatpush.bf16.msra.mxu0 %v12534_v50  ;;  %v11651_v50 = vld [vmem:[#allocation2 + $0x588] sm:$0xf0]  ;;  %v12014_v52 = vor.u32 %v16703_v46, %v12011_v47  ;;  %v3301_v5 = vpop.f32.mrf.mxu0  ;;  %v3312_v14 = vpop.f32.mrf.mxu2  ;;  %v11217_v46 = vld [vmem:[#allocation2 + $0x1f8] sm:$0xf]  ;;  %v16509_v47 = vld [vmem:[#allocation2 + $0x21c] sm:$0xf0] }
 0x122   :  { %3577 = vmatpush.bf16.msrb.mxu1 %v12174_v55  ;;  %3558 = vmatmul.bf16.vlgmr.msrb.gmra.mxu2 %v18059_v7  ;;  %v16783_v55 = vld [vmem:[#allocation2 + $0xab4] sm:$0xf]  ;;  %v16579_v5 = vld [vmem:[#allocation2 + $0x44c] sm:$0xf0] }
 0x123   :  { %3602 = vmatpush.bf16.msra.mxu2 %v12854_v54  ;;  %v3286_v54 = vpop.f32.mrf.mxu3  ;;  %v12334_v4 = vor.u32 %v16783_v55, %v12331_v56  ;;  %v11218_v56 = vor.u32 %v16509_v47, %v11217_v46  ;;  %v11057_v46 = vld [vmem:[#allocation2 + $0xb8] sm:$0xf]  ;;  %v16469_v47 = vld [vmem:[#allocation2 + $0xdc] sm:$0xf0] }
 0x124   :  { %3565 = vmatpush.bf16.msra.mxu3 %v11814_v1  ;;  %v3287_v58 = vadd.f32 %v3286_v54, %v3274_v44  ;;  %v11654_v1 = vor.u32 %v16613_v49, %v11651_v50  ;;  %v16759_v44 = vld [vmem:[#allocation2 + $0x9ec] sm:$0xf0]  ;;  %v16589_v49 = vld [vmem:[#allocation2 + $0x49c] sm:$0xf0] }
 0x125   :  { %3590 = vmatpush.bf16.msra.mxu0 %v12494_v3  ;;  %v16603_v3 = vld [vmem:[#allocation2 + $0x514] sm:$0xf]  ;;  %v12218_v55 = vor.u32 %v16759_v44, %v12217_v43  ;;  %v12057_v44 = vld [vmem:[#allocation2 + $0x888] sm:$0xf] }
 0x126   :  { %3578 = vmatpush.bf16.msrb.mxu1 %v12134_v9  ;;  %v16773_v9 = vld [vmem:[#allocation2 + $0xa64] sm:$0xf] }
 0x127   :  { %3603 = vmatpush.bf16.msra.mxu2 %v12814_v8  ;;  %v3300_v8 = vadd.f32 %v3299_v33, %v3287_v58  ;;  %v12294_v26 = vor.u32 %v16773_v9, %v12291_v11  ;;  %v16669_v58 = vld [vmem:[#allocation2 + $0x71c] sm:$0xf0]  ;;  %v11817_v11 = vld [vmem:[#allocation2 + $0x6a8] sm:$0xf] }
 0x128   :  { %3566 = vmatpush.bf16.msra.mxu3 %v11774_v17  ;;  %v12891_v17 = vld [vmem:[#allocation2 + $0xf38] sm:$0xf0] }
 0x129   :  { %3591 = vmatpush.bf16.msra.mxu0 %v12454_v18  ;;  %v3275_v18 = vpop.f32.mrf.mxu1  ;;  %v18132_v19 = vadd.f32 %v3312_v14, %v3300_v8  ;;  %v12894_v27 = vor.u32 %v16923_v16, %v12891_v17  ;;  %v18134_v50 = vpop.f32.mrf.mxu0  ;;  %v12178_v8 = vor.u32 %v16749_v63, %v12177_v59  ;;  %v11137_v16 = vld [vmem:[#allocation2 + $0x158] sm:$0xf]  ;;  %v16489_v17 = vld [vmem:[#allocation2 + $0x17c] sm:$0xf0]  ;;  %v11058_v63 = vor.u32 %v16469_v47, %v11057_v46  ;;  %v16514_v47 = vld [vmem:[#allocation2 + $0x24c] sm:$0xf] }
 0x12a   :  { %3579 = vmatpush.bf16.msrb.mxu1 %v12094_v23  ;;  %v11614_v23 = vor.u32 %v16603_v3, %v11611_v6  ;;  %v3314_v54 = vpop.f32.mrf.mxu2  ;;  %v16499_v3 = vld [vmem:[#allocation2 + $0x1cc] sm:$0xf0]  ;;  %v11858_v6 = vor.u32 %v16669_v58, %v11857_v57  ;;  %v11457_v18 = vld [vmem:[#allocation2 + $0x3d8] sm:$0xf]  ;;  %v11138_v25 = vor.u32 %v16489_v17, %v11137_v16  ;;  %v16629_v59 = vld [vmem:[#allocation2 + $0x5dc] sm:$0xf0] }
 0x12b   :  { %3604 = vmatpush.bf16.msra.mxu2 %v12774_v22  ;;  %v11931_v22 = vld [vmem:[#allocation2 + $0x7b8] sm:$0xf0]  ;;  %v18141_v54 = vld [vmem:[#allocation5] sm:$0xff]  ;;  %v11697_v58 = vld [vmem:[#allocation2 + $0x5b8] sm:$0xf] }
 0x12c   :  { %3567 = vmatpush.bf16.msra.mxu3 %v11734_v31  ;;  %v16763_v31 = vld [vmem:[#allocation2 + $0xa14] sm:$0xf]  ;;  %v11934_v33 = vor.u32 %v16683_v21, %v11931_v22  ;;  %v11657_v16 = vld [vmem:[#allocation2 + $0x568] sm:$0xf]  ;;  %v16619_v17 = vld [vmem:[#allocation2 + $0x58c] sm:$0xf0] }
 0x12d   :  { %3592 = vmatpush.bf16.msra.mxu0 %v12414_v32  ;;  %v12614_v32 = vor.u32 %v16853_v15, %v12611_v20  ;;  %v16739_v15 = vld [vmem:[#allocation2 + $0x94c] sm:$0xf0]  ;;  %v16569_v20 = vld [vmem:[#allocation2 + $0x3fc] sm:$0xf0] }
 0x12e   :  { %3580 = vmatpush.bf16.msrb.mxu1 %v12054_v39  ;;  %v3288_v39 = vpop.f32.mrf.mxu3  ;;  %v11458_v29 = vor.u32 %v16569_v20, %v11457_v18  ;;  %v11977_v18 = vld [vmem:[#allocation2 + $0x7e8] sm:$0xf] }
 0x12f   :  { %3605 = vmatpush.bf16.msra.mxu2 %v12734_v37  ;;  %v12571_v37 = vld [vmem:[#allocation2 + $0xcb8] sm:$0xf0] }
 0x130   :  { %3568 = vmatpush.bf16.msra.mxu3 %v11694_v0  ;;  %v12254_v0 = vor.u32 %v16763_v31, %v12251_v34  ;;  %v12097_v31 = vld [vmem:[#allocation2 + $0x8d8] sm:$0xf]  ;;  %v16479_v34 = vld [vmem:[#allocation2 + $0x12c] sm:$0xf0] }
 0x131   :  { %3593 = vmatpush.bf16.msra.mxu0 %v12374_v48  ;;  %v11537_v48 = vld [vmem:[#allocation2 + $0x478] sm:$0xf]  ;;  %v3353_v21 = vpop.f32.mrf.mxu0 }
 0x132   :  { %3581 = vmatpush.bf16.msrb.mxu1 %v12014_v52  ;;  %v11898_v52 = vor.u32 %v16679_v42, %v11897_v41  ;;  %v11538_v62 = vor.u32 %v16589_v49, %v11537_v48  ;;  %v11737_v41 = vld [vmem:[#allocation2 + $0x608] sm:$0xf]  ;;  %v16639_v42 = vld [vmem:[#allocation2 + $0x62c] sm:$0xf0]  ;;  %v16549_v48 = vld [vmem:[#allocation2 + $0x35c] sm:$0xf0] }
 0x133   :  { %3606 = vmatpush.bf16.msra.mxu2 %v12694_v51  ;;  %v12574_v51 = vor.u32 %v16843_v36, %v12571_v37  ;;  %v11417_v36 = vld [vmem:[#allocation2 + $0x388] sm:$0xf]  ;;  %v16559_v37 = vld [vmem:[#allocation2 + $0x3ac] sm:$0xf0] }
 0x134   :  { %3569 = vmatpush.bf16.msra.mxu3 %v11654_v1  ;;  %v11177_v1 = vld [vmem:[#allocation2 + $0x1a8] sm:$0xf] }
 0x135   :  { %3594 = vmatpush.bf16.msra.mxu0 %v12334_v4  ;;  %v11497_v4 = vld [vmem:[#allocation2 + $0x428] sm:$0xf]  ;;  %v11178_v9 = vor.u32 %v16499_v3, %v11177_v1  ;;  %v12017_v3 = vld [vmem:[#allocation2 + $0x838] sm:$0xf] }
 0x136   :  { %3582 = vmatpush.bf16.msrb.mxu1 %v11974_v13  ;;  %v12137_v13 = vld [vmem:[#allocation2 + $0x928] sm:$0xf]  ;;  %v11498_v14 = vor.u32 %v16579_v5, %v11497_v4  ;;  %v16709_v4 = vld [vmem:[#allocation2 + $0x85c] sm:$0xf0] }
 0x137   :  { %3607 = vmatpush.bf16.msra.mxu2 %v12654_v12  ;;  %v16659_v12 = vld [vmem:[#allocation2 + $0x6cc] sm:$0xf0]  ;;  %v12138_v24 = vor.u32 %v16739_v15, %v12137_v13  ;;  %v11017_v5 = vld [vmem:[#allocation2 + $0x68] sm:$0xf]  ;;  %v11698_v13 = vor.u32 %v16629_v59, %v11697_v58  ;;  %v12018_v15 = vor.u32 %v16709_v4, %v12017_v3  ;;  %v16504_v4 = vld [vmem:[#allocation2 + $0x1fc] sm:$0xf] }
 0x138   :  { %3570 = vmatpush.bf16.msra.mxu3 %v11614_v23  ;;  %v11818_v22 = vor.u32 %v16659_v12, %v11817_v11  ;;  %v3325_v23 = vpop.f32.mrf.mxu1  ;;  %v16539_v11 = vld [vmem:[#allocation2 + $0x30c] sm:$0xf0] }
 0x139   :  { %3595 = vmatpush.bf16.msra.mxu0 %v12294_v26  ;;  %v11777_v26 = vld [vmem:[#allocation2 + $0x658] sm:$0xf]  ;;  %v3326_v28 = vadd.f32 %v3325_v23, %v18132_v19  ;;  %v16719_v19 = vld [vmem:[#allocation2 + $0x8ac] sm:$0xf0] }
 0x13a   :  { %3583 = vmatpush.bf16.msrb.mxu1 %v11934_v33  ;;  %v11097_v33 = vld [vmem:[#allocation2 + $0x108] sm:$0xf]  ;;  %v12058_v57 = vor.u32 %v16719_v19, %v12057_v44  ;;  %v10977_v23 = vld [vmem:[#allocation2 + $0x18] sm:$0xf]  ;;  %v16929_v44 = vld [vmem:[#allocation2 + $0xf3c] sm:$0xf0] }
 0x13b   :  { %3608 = vmatpush.bf16.msra.mxu2 %v12614_v32  ;;  %3571 = vmatmul.bf16.vlgmr.msra.gmra.mxu3 %v18043_v53  ;;  %v16729_v32 = vld [vmem:[#allocation2 + $0x8fc] sm:$0xf0]  ;;  %v11098_v43 = vor.u32 %v16479_v34, %v11097_v33  ;;  %v16919_v33 = vld [vmem:[#allocation2 + $0xeec] sm:$0xf0] }
 0x13c   :  { %3622 = vmatpush.bf16.msrb.mxu3 %v12894_v27  ;;  %v16649_v27 = vld [vmem:[#allocation2 + $0x67c] sm:$0xf0] }
 0x13d   :  { %3596 = vmatpush.bf16.msra.mxu0 %v12254_v0  ;;  %3584 = vmatmul.bf16.vlgmr.msrb.gmra.mxu1 %v18053_v61  ;;  %v11778_v39 = vor.u32 %v16649_v27, %v11777_v26  ;;  %v11377_v0 = vld [vmem:[#allocation2 + $0x338] sm:$0xf]  ;;  %v3377_v49 = vpop.f32.mrf.mxu0  ;;  %v16529_v26 = vld [vmem:[#allocation2 + $0x2bc] sm:$0xf0]  ;;  %v12537_v27 = vld [vmem:[#allocation2 + $0xc48] sm:$0xf] }
 0x13e   :  { %3628 = vmatpush.bf16.msra.mxu1 %v11258_v40  ;;  %v12098_v40 = vor.u32 %v16729_v32, %v12097_v31  ;;  %v11378_v1 = vor.u32 %v16549_v48, %v11377_v0  ;;  %v16839_v31 = vld [vmem:[#allocation2 + $0xc6c] sm:$0xf0]  ;;  %v12857_v32 = vld [vmem:[#allocation2 + $0xec8] sm:$0xf]  ;;  %v11259_v0 = vld [vmem:[#allocation2 + $0x270] sm:$0xf0] }
 0x13f   :  { %3609 = vmatpush.bf16.msra.mxu2 %v12574_v51  ;;  %v3338_v51 = vpop.f32.mrf.mxu3  ;;  %v12538_v19 = vor.u32 %v16839_v31, %v12537_v27  ;;  %v12858_v46 = vor.u32 %v16919_v33, %v12857_v32  ;;  %v12497_v48 = vld [vmem:[#allocation2 + $0xbf8] sm:$0xf]  ;;  %v11262_v59 = vor.u32 %v16514_v47, %v11259_v0  ;;  %v11499_v31 = vld [vmem:[#allocation2 + $0x450] sm:$0xf0]  ;;  %v16474_v0 = vld [vmem:[#allocation2 + $0x10c] sm:$0xf] }
 0x140   :  { %3641 = vmatpush.bf16.msra.mxu3 %v11578_v10  ;;  %3597 = vmatmul.bf16.vlgmr.msra.gmra.mxu0 %v18077_v30  ;;  %v11418_v10 = vor.u32 %v16559_v37, %v11417_v36  ;;  %v11617_v37 = vld [vmem:[#allocation2 + $0x518] sm:$0xf] }
 0x141   :  { %3654 = vmatpush.bf16.msrb.mxu0 %v11898_v52  ;;  %v11738_v52 = vor.u32 %v16639_v42, %v11737_v41  ;;  %v3364_v12 = vpop.f32.mrf.mxu2 }
 0x142   :  { %3629 = vmatpush.bf16.msra.mxu1 %v11218_v56  ;;  %3610 = vmatmul.bf16.vlgmr.msra.gmra.mxu2 %v18079_v35  ;;  %v3339_v56 = vadd.f32 %v3338_v51, %v3326_v28 }
 0x143   :  { %3667 = vmatpush.bf16.msrb.mxu2 %v12218_v55  ;;  %v611_v55 = vperm.slane %v18141_v54, 3 }
 0x144   :  { %3642 = vmatpush.bf16.msra.mxu3 %v11538_v62  ;;  %v3327_v62 = vpop.f32.mrf.mxu1 }
 0x145   :  { %3655 = vmatpush.bf16.msrb.mxu0 %v11858_v6  ;;  %v18147_v6 = vadd.f32 %v18134_v50, %v3339_v56  ;;  %v16449_v50 = vld [vmem:[#allocation2 + $0x3c] sm:$0xf0]  ;;  %v3379_v28 = vpop.f32.mrf.mxu0  ;;  %v16594_v62 = vld [vmem:[#allocation2 + $0x4cc] sm:$0xf] }
 0x146   :  { %3630 = vmatpush.bf16.msra.mxu1 %v11178_v9  ;;  %v11337_v9 = vld [vmem:[#allocation2 + $0x2e8] sm:$0xf]  ;;  %v10978_v41 = vor.u32 %v16449_v50, %v10977_v23  ;;  %v16909_v56 = vld [vmem:[#allocation2 + $0xe9c] sm:$0xf0]  ;;  %v12737_v50 = vld [vmem:[#allocation2 + $0xdd8] sm:$0xf] }
 0x147   :  { %3668 = vmatpush.bf16.msrb.mxu2 %v12178_v8  ;;  %v16459_v8 = vld [vmem:[#allocation2 + $0x8c] sm:$0xf0]  ;;  %v11338_v21 = vor.u32 %v16539_v11, %v11337_v9  ;;  %v3340_v34 = vpop.f32.mrf.mxu3  ;;  %v12777_v11 = vld [vmem:[#allocation2 + $0xe28] sm:$0xf]  ;;  %v16809_v23 = vld [vmem:[#allocation2 + $0xb7c] sm:$0xf0] }
 0x148   :  { %3643 = vmatpush.bf16.msra.mxu3 %v11498_v14  ;;  %v3365_v14 = vadd.f32 %v3364_v12, %v611_v55  ;;  %v11018_v20 = vor.u32 %v16459_v8, %v11017_v5  ;;  %v12817_v55 = vld [vmem:[#allocation2 + $0xe78] sm:$0xf]  ;;  %v11219_v5 = vld [vmem:[#allocation2 + $0x220] sm:$0xf0]  ;;  %v12457_v8 = vld [vmem:[#allocation2 + $0xba8] sm:$0xf] }
 0x149   :  { %3656 = vmatpush.bf16.msrb.mxu0 %v11818_v22  ;;  %v16699_v22 = vld [vmem:[#allocation2 + $0x80c] sm:$0xf0]  ;;  %v12818_v3 = vor.u32 %v16909_v56, %v12817_v55 }
 0x14a   :  { %3631 = vmatpush.bf16.msra.mxu1 %v11138_v25  ;;  %v11297_v25 = vld [vmem:[#allocation2 + $0x298] sm:$0xf]  ;;  %v11978_v36 = vor.u32 %v16699_v22, %v11977_v18  ;;  %v16819_v9 = vld [vmem:[#allocation2 + $0xbcc] sm:$0xf0] }
 0x14b   :  { %3669 = vmatpush.bf16.msrb.mxu2 %v12138_v24  ;;  %12916 = vmatmul.msk.bf16.vlgmr.msrb.gmra.mxu3 %vm3078_vm0, %v18067_v45  ;;  %v18149_v24 = vadd.f32 %v3377_v49, %v3365_v14  ;;  %v11298_v42 = vor.u32 %v16529_v26, %v11297_v25  ;;  %v3366_v49 = vpop.f32.mrf.mxu2  ;;  %v16899_v12 = vld [vmem:[#allocation2 + $0xe4c] sm:$0xf0]  ;;  %v11222_v14 = vor.u32 %v16504_v4, %v11219_v5  ;;  %v12417_v22 = vld [vmem:[#allocation2 + $0xb58] sm:$0xf]  ;;  %v16889_v25 = vld [vmem:[#allocation2 + $0xdfc] sm:$0xf0] }
 0x14c   :  { %3644 = vmatpush.bf16.msra.mxu3 %v11458_v29  ;;  %v11658_v29 = vor.u32 %v16619_v17, %v11657_v16  ;;  %v11539_v16 = vld [vmem:[#allocation2 + $0x4a0] sm:$0xf0]  ;;  %v12458_v17 = vor.u32 %v16819_v9, %v12457_v8  ;;  %v12778_v18 = vor.u32 %v16899_v12, %v12777_v11  ;;  %v12418_v32 = vor.u32 %v16809_v23, %v12417_v22  ;;  %v12337_v49 = vld [vmem:[#allocation2 + $0xab8] sm:$0xf]  ;;  %v16464_v4 = vld [vmem:[#allocation2 + $0xbc] sm:$0xf] }
 0x14d   :  { %3657 = vmatpush.bf16.msrb.mxu0 %v11778_v39  ;;  %v16609_v39 = vld [vmem:[#allocation2 + $0x53c] sm:$0xf0]  ;;  %v12738_v33 = vor.u32 %v16889_v25, %v12737_v50  ;;  %v11059_v5 = vld [vmem:[#allocation2 + $0xe0] sm:$0xf0]  ;;  %v12297_v9 = vld [vmem:[#allocation2 + $0xa68] sm:$0xf] }
 0x14e   :  { %3632 = vmatpush.bf16.msra.mxu1 %v11098_v43  ;;  %v16689_v43 = vld [vmem:[#allocation2 + $0x7bc] sm:$0xf0]  ;;  %v11618_v51 = vor.u32 %v16609_v39, %v11617_v37  ;;  %v11139_v37 = vld [vmem:[#allocation2 + $0x180] sm:$0xf0]  ;;  %v12377_v39 = vld [vmem:[#allocation2 + $0xb08] sm:$0xf] }
 0x14f   :  { %3670 = vmatpush.bf16.msrb.mxu2 %v12098_v40  ;;  %v11937_v40 = vld [vmem:[#allocation2 + $0x798] sm:$0xf]  ;;  %v16779_v11 = vld [vmem:[#allocation2 + $0xa8c] sm:$0xf0]  ;;  %v12617_v12 = vld [vmem:[#allocation2 + $0xce8] sm:$0xf] }
 0x150   :  { %3645 = vmatpush.bf16.msra.mxu3 %v11418_v10  ;;  %v12897_v10 = vld [vmem:[#allocation2 + $0xf18] sm:$0xf]  ;;  %v12298_v22 = vor.u32 %v16779_v11, %v12297_v9  ;;  %v11019_v50 = vld [vmem:[#allocation2 + $0x90] sm:$0xf0] }
 0x151   :  { %3658 = vmatpush.bf16.msrb.mxu0 %v11738_v52  ;;  %v16829_v52 = vld [vmem:[#allocation2 + $0xc1c] sm:$0xf0]  ;;  %v12898_v58 = vor.u32 %v16929_v44, %v12897_v10  ;;  %v16564_v44 = vld [vmem:[#allocation2 + $0x3dc] sm:$0xf] }
 0x152   :  { %3633 = vmatpush.bf16.msra.mxu1 %v11058_v63  ;;  %v11579_v63 = vld [vmem:[#allocation2 + $0x4f0] sm:$0xf0] }
 0x153   :  { %3671 = vmatpush.bf16.msrb.mxu2 %v12058_v57  ;;  %v11938_v57 = vor.u32 %v16689_v43, %v11937_v40  ;;  %v16799_v40 = vld [vmem:[#allocation2 + $0xb2c] sm:$0xf0] }
 0x154   :  { %3646 = vmatpush.bf16.msra.mxu3 %v11378_v1  ;;  %v12498_v1 = vor.u32 %v16829_v52, %v12497_v48  ;;  %v11099_v48 = vld [vmem:[#allocation2 + $0x130] sm:$0xf0]  ;;  %v16869_v52 = vld [vmem:[#allocation2 + $0xd5c] sm:$0xf0] }
 0x155   :  { %3659 = vmatpush.bf16.msrb.mxu0 %v11698_v13  ;;  %v11582_v13 = vor.u32 %v16594_v62, %v11579_v63  ;;  %v11419_v62 = vld [vmem:[#allocation2 + $0x3b0] sm:$0xf0] }
 0x156   :  { %3634 = vmatpush.bf16.msra.mxu1 %v11018_v20  ;;  %v16494_v20 = vld [vmem:[#allocation2 + $0x1ac] sm:$0xf]  ;;  %v3390_v28 = vpop.f32.mrf.mxu1 }
 0x157   :  { %3672 = vmatpush.bf16.msrb.mxu2 %v12018_v15  ;;  %v16584_v15 = vld [vmem:[#allocation2 + $0x47c] sm:$0xf]  ;;  %v3391_v34 = vadd.f32 %v3390_v28, %v18149_v24  ;;  %v16789_v24 = vld [vmem:[#allocation2 + $0xadc] sm:$0xf0]  ;;  %v12577_v28 = vld [vmem:[#allocation2 + $0xc98] sm:$0xf] }
 0x158   :  { %3647 = vmatpush.bf16.msra.mxu3 %v11338_v21  ;;  %v11179_v21 = vld [vmem:[#allocation2 + $0x1d0] sm:$0xf0]  ;;  %v11542_v26 = vor.u32 %v16584_v15, %v11539_v16 }
 0x159   :  { %3660 = vmatpush.bf16.msrb.mxu0 %v11658_v29  ;;  %v11182_v27 = vor.u32 %v16494_v20, %v11179_v21  ;;  %v16574_v29 = vld [vmem:[#allocation2 + $0x42c] sm:$0xf]  ;;  %v11379_v20 = vld [vmem:[#allocation2 + $0x360] sm:$0xf0] }
 0x15a   :  { %3635 = vmatpush.bf16.msra.mxu1 %v10978_v41  ;;  %v12697_v41 = vld [vmem:[#allocation2 + $0xd88] sm:$0xf]  ;;  %v11502_v43 = vor.u32 %v16574_v29, %v11499_v31  ;;  %v16454_v21 = vld [vmem:[#allocation2 + $0x6c] sm:$0xf]  ;;  %v16849_v29 = vld [vmem:[#allocation2 + $0xcbc] sm:$0xf0] }
 0x15b   :  { %3673 = vmatpush.bf16.msrb.mxu2 %v11978_v36  ;;  %v16484_v36 = vld [vmem:[#allocation2 + $0x15c] sm:$0xf]  ;;  %v16674_v31 = vld [vmem:[#allocation2 + $0x74c] sm:$0xf] }
 0x15c   :  { %3648 = vmatpush.bf16.msra.mxu3 %v11298_v42  ;;  %v16879_v42 = vld [vmem:[#allocation2 + $0xdac] sm:$0xf0]  ;;  %v11142_v10 = vor.u32 %v16484_v36, %v11139_v37  ;;  %v16754_v36 = vld [vmem:[#allocation2 + $0x9cc] sm:$0xf]  ;;  %v12219_v37 = vld [vmem:[#allocation2 + $0x9f0] sm:$0xf0] }
 0x15d   :  { %3661 = vmatpush.bf16.msrb.mxu0 %v11618_v51  ;;  %3636 = vmatmul.bf16.vlgmr.msra.gmra.mxu1 %v18051_v60  ;;  %v12698_v47 = vor.u32 %v16879_v42, %v12697_v41  ;;  %v12657_v51 = vld [vmem:[#allocation2 + $0xd38] sm:$0xf]  ;;  %v3429_v55 = vpop.f32.mrf.mxu0  ;;  %v16534_v41 = vld [vmem:[#allocation2 + $0x2ec] sm:$0xf]  ;;  %v11339_v42 = vld [vmem:[#allocation2 + $0x310] sm:$0xf0] }
 0x15e   :  { %3680 = vmatpush.bf16.msrb.mxu1 %v12538_v19  ;;  %v11459_v19 = vld [vmem:[#allocation2 + $0x400] sm:$0xf0]  ;;  %v3403_v63 = vpop.f32.mrf.mxu3 }
 0x15f   :  { %3674 = vmatpush.bf16.msrb.mxu2 %v11938_v57  ;;  %3649 = vmatmul.bf16.vlgmr.msra.gmra.mxu3 %v18059_v7  ;;  %v11462_v56 = vor.u32 %v16564_v44, %v11459_v19  ;;  %v11102_v57 = vor.u32 %v16474_v0, %v11099_v48  ;;  %v3404_v8 = vadd.f32 %v3403_v63, %v3391_v34  ;;  %v11899_v34 = vld [vmem:[#allocation2 + $0x770] sm:$0xf0]  ;;  %v10979_v48 = vld [vmem:[#allocation2 + $0x40] sm:$0xf0] }
 0x160   :  { %3693 = vmatpush.bf16.msrb.mxu3 %v12858_v46  ;;  %3662 = vmatmul.bf16.vlgmr.msrb.gmra.mxu0 %v18043_v53  ;;  %v12378_v46 = vor.u32 %v16799_v40, %v12377_v39  ;;  %v11022_v39 = vor.u32 %v16454_v21, %v11019_v50  ;;  %v12578_v44 = vor.u32 %v16849_v29, %v12577_v28  ;;  %v12819_v21 = vld [vmem:[#allocation2 + $0xea0] sm:$0xf0]  ;;  %v16814_v50 = vld [vmem:[#allocation2 + $0xbac] sm:$0xf] }
 0x161   :  { %3713 = vmatpush.bf16.msra.mxu0 %v12898_v58  ;;  %v3392_v58 = vpop.f32.mrf.mxu1  ;;  %v12222_v0 = vor.u32 %v16754_v36, %v12219_v37  ;;  %v11779_v28 = vld [vmem:[#allocation2 + $0x680] sm:$0xf0] }
 0x162   :  { %3681 = vmatpush.bf16.msrb.mxu1 %v12498_v1  ;;  %3675 = vmatmul.bf16.vlgmr.msrb.gmra.mxu2 %v18053_v61  ;;  %v12338_v1 = vor.u32 %v16789_v24, %v12337_v49  ;;  %v16834_v49 = vld [vmem:[#allocation2 + $0xc4c] sm:$0xf]  ;;  %v12539_v24 = vld [vmem:[#allocation2 + $0xc70] sm:$0xf0]  ;;  %v12179_v58 = vld [vmem:[#allocation2 + $0x9a0] sm:$0xf0] }
 0x163   :  { %3719 = vmatpush.bf16.msra.mxu2 %v11262_v59  ;;  %v16554_v59 = vld [vmem:[#allocation2 + $0x38c] sm:$0xf] }
 0x164   :  { %3694 = vmatpush.bf16.msrb.mxu3 %v12818_v3  ;;  %v12658_v3 = vor.u32 %v16869_v52, %v12657_v51  ;;  %v11422_v15 = vor.u32 %v16554_v59, %v11419_v62  ;;  %v11342_v52 = vor.u32 %v16534_v41, %v11339_v42  ;;  %v16524_v59 = vld [vmem:[#allocation2 + $0x29c] sm:$0xf]  ;;  %v11299_v62 = vld [vmem:[#allocation2 + $0x2c0] sm:$0xf0]  ;;  %v16634_v42 = vld [vmem:[#allocation2 + $0x60c] sm:$0xf] }
 0x165   :  { %3732 = vmatpush.bf16.msrb.mxu0 %v11582_v13  ;;  %v16859_v13 = vld [vmem:[#allocation2 + $0xd0c] sm:$0xf0]  ;;  %v11302_v11 = vor.u32 %v16524_v59, %v11299_v62  ;;  %v12419_v41 = vld [vmem:[#allocation2 + $0xb80] sm:$0xf0] }
 0x166   :  { %3682 = vmatpush.bf16.msrb.mxu1 %v12458_v17  ;;  %v11062_v17 = vor.u32 %v16464_v4, %v11059_v5  ;;  %v12618_v23 = vor.u32 %v16859_v13, %v12617_v12  ;;  %v12542_v4 = vor.u32 %v16834_v49, %v12539_v24  ;;  %v12499_v12 = vld [vmem:[#allocation2 + $0xc20] sm:$0xf0]  ;;  %v16654_v13 = vld [vmem:[#allocation2 + $0x6ac] sm:$0xf] }
 0x167   :  { %3720 = vmatpush.bf16.msra.mxu2 %v11222_v14  ;;  %v3416_v14 = vpop.f32.mrf.mxu2  ;;  %v16794_v24 = vld [vmem:[#allocation2 + $0xb0c] sm:$0xf] }
 0x168   :  { %3695 = vmatpush.bf16.msrb.mxu3 %v12778_v18  ;;  %v3417_v16 = vadd.f32 %v3416_v14, %v3404_v8  ;;  %v16544_v18 = vld [vmem:[#allocation2 + $0x33c] sm:$0xf]  ;;  %v11819_v14 = vld [vmem:[#allocation2 + $0x6d0] sm:$0xf0] }
 0x169   :  { %3733 = vmatpush.bf16.msrb.mxu0 %v11542_v26  ;;  %v12257_v26 = vld [vmem:[#allocation2 + $0xa18] sm:$0xf]  ;;  %v3442_v40 = vpop.f32.mrf.mxu1  ;;  %v16824_v8 = vld [vmem:[#allocation2 + $0xbfc] sm:$0xf] }
 0x16a   :  { %3683 = vmatpush.bf16.msrb.mxu1 %v12418_v32  ;;  %v3430_v25 = vadd.f32 %v3429_v55, %v3417_v16  ;;  %v3431_v32 = vpop.f32.mrf.mxu0  ;;  %v16664_v55 = vld [vmem:[#allocation2 + $0x6fc] sm:$0xf]  ;;  %v16734_v16 = vld [vmem:[#allocation2 + $0x92c] sm:$0xf] }
 0x16b   :  { %3721 = vmatpush.bf16.msra.mxu2 %v11182_v27  ;;  %v16769_v27 = vld [vmem:[#allocation2 + $0xa3c] sm:$0xf0]  ;;  %v12099_v32 = vld [vmem:[#allocation2 + $0x900] sm:$0xf0] }
 0x16c   :  { %3696 = vmatpush.bf16.msrb.mxu3 %v12738_v33  ;;  %v11382_v33 = vor.u32 %v16544_v18, %v11379_v20  ;;  %v18158_v19 = vadd.f32 %v3442_v40, %v3430_v25  ;;  %v16904_v20 = vld [vmem:[#allocation2 + $0xe7c] sm:$0xf] }
 0x16d   :  { %3734 = vmatpush.bf16.msrb.mxu0 %v11502_v43  ;;  %v3405_v43 = vpop.f32.mrf.mxu3  ;;  %v12822_v29 = vor.u32 %v16904_v20, %v12819_v21  ;;  %v16694_v21 = vld [vmem:[#allocation2 + $0x7ec] sm:$0xf] }
 0x16e   :  { %3684 = vmatpush.bf16.msrb.mxu1 %v12378_v46  ;;  %v16444_v46 = vld [vmem:[#allocation2 + $0x1c] sm:$0xf]  ;;  %v11739_v43 = vld [vmem:[#allocation2 + $0x630] sm:$0xf0] }
 0x16f   :  { %3722 = vmatpush.bf16.msra.mxu2 %v11142_v10  ;;  %v12258_v10 = vor.u32 %v16769_v27, %v12257_v26  ;;  %v3418_v51 = vpop.f32.mrf.mxu2  ;;  %v10982_v63 = vor.u32 %v16444_v46, %v10979_v48  ;;  %v12459_v26 = vld [vmem:[#allocation2 + $0xbd0] sm:$0xf0]  ;;  %v16644_v27 = vld [vmem:[#allocation2 + $0x65c] sm:$0xf]  ;;  %v11742_v49 = vor.u32 %v16634_v42, %v11739_v43  ;;  %v11265_v42 = vld [vmem:[#allocation2 + $0x250] sm:$0xf] }
 0x170   :  { %3697 = vmatpush.bf16.msrb.mxu3 %v12698_v47  ;;  %12917 = vmatmul.msk.bf16.vlgmr.msra.gmra.mxu0 %vm3078_vm0, %v18067_v45  ;;  %v11902_v47 = vor.u32 %v16674_v31, %v11899_v34  ;;  %v16724_v31 = vld [vmem:[#allocation2 + $0x8dc] sm:$0xf]  ;;  %v12779_v34 = vld [vmem:[#allocation2 + $0xe50] sm:$0xf0]  ;;  %v12462_v36 = vor.u32 %v16814_v50, %v12459_v26  ;;  %v11782_v37 = vor.u32 %v16644_v27, %v11779_v28  ;;  %v612_v51 = vperm.slane %v18141_v54, 4 }
 0x171   :  { %3735 = vmatpush.bf16.msrb.mxu0 %v11462_v56  ;;  %v11859_v56 = vld [vmem:[#allocation2 + $0x720] sm:$0xf0]  ;;  %v3444_v18 = vpop.f32.mrf.mxu1  ;;  %v12102_v40 = vor.u32 %v16724_v31, %v12099_v32  ;;  %v12059_v46 = vld [vmem:[#allocation2 + $0x8b0] sm:$0xf0]  ;;  %v16774_v27 = vld [vmem:[#allocation2 + $0xa6c] sm:$0xf] }
 0x172   :  { %3685 = vmatpush.bf16.msrb.mxu1 %v12338_v1  ;;  %v16914_v1 = vld [vmem:[#allocation2 + $0xecc] sm:$0xf]  ;;  %v11862_v5 = vor.u32 %v16664_v55, %v11859_v56  ;;  %v12379_v55 = vld [vmem:[#allocation2 + $0xb30] sm:$0xf0]  ;;  %v16624_v56 = vld [vmem:[#allocation2 + $0x5bc] sm:$0xf] }
 0x173   :  { %3723 = vmatpush.bf16.msra.mxu2 %v11102_v57  ;;  %v16744_v57 = vld [vmem:[#allocation2 + $0x97c] sm:$0xf]  ;;  %v12659_v50 = vld [vmem:[#allocation2 + $0xd60] sm:$0xf0]  ;;  %v12299_v28 = vld [vmem:[#allocation2 + $0xa90] sm:$0xf0] }
 0x174   :  { %3698 = vmatpush.bf16.msrb.mxu3 %v12658_v3  ;;  %v12859_v3 = vld [vmem:[#allocation2 + $0xef0] sm:$0xf0]  ;;  %v12182_v9 = vor.u32 %v16744_v57, %v12179_v58  ;;  %v11699_v57 = vld [vmem:[#allocation2 + $0x5e0] sm:$0xf0]  ;;  %v16604_v31 = vld [vmem:[#allocation2 + $0x51c] sm:$0xf] }
 0x175   :  { %3736 = vmatpush.bf16.msrb.mxu0 %v11422_v15  ;;  %v12862_v15 = vor.u32 %v16914_v1, %v12859_v3  ;;  %v12019_v1 = vld [vmem:[#allocation2 + $0x860] sm:$0xf0]  ;;  %v16924_v43 = vld [vmem:[#allocation2 + $0xf1c] sm:$0xf] }
 0x176   :  { %3686 = vmatpush.bf16.msrb.mxu1 %v12298_v22  ;;  %v12502_v22 = vor.u32 %v16824_v8, %v12499_v12  ;;  %v12382_v8 = vor.u32 %v16794_v24, %v12379_v55  ;;  %v16784_v12 = vld [vmem:[#allocation2 + $0xabc] sm:$0xf]  ;;  %v12259_v55 = vld [vmem:[#allocation2 + $0xa40] sm:$0xf0] }
 0x177   :  { %3724 = vmatpush.bf16.msra.mxu2 %v11062_v17  ;;  %v12139_v17 = vld [vmem:[#allocation2 + $0x950] sm:$0xf0]  ;;  %v16764_v24 = vld [vmem:[#allocation2 + $0xa1c] sm:$0xf] }
 0x178   :  { %3699 = vmatpush.bf16.msrb.mxu3 %v12618_v23  ;;  %v11822_v23 = vor.u32 %v16654_v13, %v11819_v14  ;;  %v12142_v25 = vor.u32 %v16734_v16, %v12139_v17  ;;  %v16614_v16 = vld [vmem:[#allocation2 + $0x56c] sm:$0xf]  ;;  %v11659_v17 = vld [vmem:[#allocation2 + $0x590] sm:$0xf0] }
 0x179   :  { %3737 = vmatpush.bf16.msrb.mxu0 %v11382_v33  ;;  %v16894_v33 = vld [vmem:[#allocation2 + $0xe2c] sm:$0xf]  ;;  %v11662_v26 = vor.u32 %v16614_v16, %v11659_v17  ;;  %v16590_v16 = vld [vmem:[#allocation2 + $0x4a4] sm:$0xf0] }
 0x17a   :  { %3687 = vmatpush.bf16.msrb.mxu1 %v12258_v10  ;;  %v12782_v10 = vor.u32 %v16894_v33, %v12779_v34  ;;  %v3468_v58 = vpop.f32.mrf.mxu1  ;;  %v11619_v33 = vld [vmem:[#allocation2 + $0x540] sm:$0xf0]  ;;  %v16684_v34 = vld [vmem:[#allocation2 + $0x79c] sm:$0xf] }
 0x17b   :  { %3725 = vmatpush.bf16.msra.mxu2 %v11022_v39  ;;  %v16804_v39 = vld [vmem:[#allocation2 + $0xb5c] sm:$0xf] }
 0x17c   :  { %3700 = vmatpush.bf16.msrb.mxu3 %v12578_v44  ;;  %v16714_v44 = vld [vmem:[#allocation2 + $0x88c] sm:$0xf]  ;;  %v12422_v48 = vor.u32 %v16804_v39, %v12419_v41 }
 0x17d   :  { %3738 = vmatpush.bf16.msrb.mxu0 %v11342_v52  ;;  %3688 = vmatmul.bf16.vlgmr.msrb.gmra.mxu1 %v18077_v30  ;;  %v12062_v52 = vor.u32 %v16714_v44, %v12059_v46  ;;  %v3494_v59 = vpop.f32.mrf.mxu0  ;;  %v16520_v44 = vld [vmem:[#allocation2 + $0x274] sm:$0xf0]  ;;  %v16854_v46 = vld [vmem:[#allocation2 + $0xcec] sm:$0xf] }
 0x17e   :  { %3745 = vmatpush.bf16.msra.mxu1 %v11902_v47  ;;  %v16884_v47 = vld [vmem:[#allocation2 + $0xddc] sm:$0xf]  ;;  %v3455_v3 = vpop.f32.mrf.mxu3 }
 0x17f   :  { %3701 = vmatmul.bf16.vlgmr.msrb.gmra.mxu3 %v18079_v35  ;;  %3726 = vmatpush.bf16.msra.mxu2 %v10982_v63  ;;  %v16704_v63 = vld [vmem:[#allocation2 + $0x83c] sm:$0xf] }
 0x180   :  { %3758 = vmatpush.bf16.msra.mxu3 %v12222_v0  ;;  %v12739_v0 = vld [vmem:[#allocation2 + $0xe00] sm:$0xf0]  ;;  %v12022_v14 = vor.u32 %v16704_v63, %v12019_v1  ;;  %v11905_v63 = vld [vmem:[#allocation2 + $0x750] sm:$0xf]  ;;  %v16680_v1 = vld [vmem:[#allocation2 + $0x774] sm:$0xf0] }
 0x181   :  { %3739 = vmatpush.bf16.msrb.mxu0 %v11302_v11  ;;  %v12742_v62 = vor.u32 %v16884_v47, %v12739_v0  ;;  %v3456_v11 = vadd.f32 %v3455_v3, %v612_v51  ;;  %v3481_v13 = vpop.f32.mrf.mxu2  ;;  %v12619_v47 = vld [vmem:[#allocation2 + $0xd10] sm:$0xf0]  ;;  %v11225_v3 = vld [vmem:[#allocation2 + $0x200] sm:$0xf] }
 0x182   :  { %3746 = vmatpush.bf16.msra.mxu1 %v11862_v5  ;;  %3727 = vmatmul.bf16.vlgmr.msra.gmra.mxu2 %v18051_v60  ;;  %v12699_v5 = vld [vmem:[#allocation2 + $0xdb0] sm:$0xf0] }
 0x183   :  { %3771 = vmatpush.bf16.msrb.mxu2 %v12542_v4  ;;  %v16874_v4 = vld [vmem:[#allocation2 + $0xd8c] sm:$0xf]  ;;  %v3469_v20 = vadd.f32 %v3468_v58, %v3456_v11  ;;  %v16600_v58 = vld [vmem:[#allocation2 + $0x4f4] sm:$0xf0] }
 0x184   :  { %3759 = vmatpush.bf16.msra.mxu3 %v12182_v9  ;;  %3740 = vmatmul.bf16.vlgmr.msrb.gmra.mxu0 %v18059_v7  ;;  %v11702_v9 = vor.u32 %v16624_v56, %v11699_v57  ;;  %v12702_v18 = vor.u32 %v16874_v4, %v12699_v5  ;;  %v11585_v57 = vld [vmem:[#allocation2 + $0x4d0] sm:$0xf]  ;;  %v16510_v4 = vld [vmem:[#allocation2 + $0x224] sm:$0xf0]  ;;  %v16844_v5 = vld [vmem:[#allocation2 + $0xc9c] sm:$0xf] }
 0x185   :  { %3784 = vmatpush.bf16.msra.mxu0 %v12862_v15  ;;  %v12339_v15 = vld [vmem:[#allocation2 + $0xae0] sm:$0xf0]  ;;  %v3496_v39 = vpop.f32.mrf.mxu0  ;;  %v11586_v11 = vor.u32 %v16600_v58, %v11585_v57  ;;  %v11226_v17 = vor.u32 %v16510_v4, %v11225_v3  ;;  %v16730_v57 = vld [vmem:[#allocation2 + $0x904] sm:$0xf0]  ;;  %v11745_v4 = vld [vmem:[#allocation2 + $0x610] sm:$0xf] }
 0x186   :  { %3747 = vmatpush.bf16.msra.mxu1 %v11822_v23  ;;  %v16864_v23 = vld [vmem:[#allocation2 + $0xd3c] sm:$0xf]  ;;  %v3457_v0 = vpop.f32.mrf.mxu3  ;;  %v11145_v39 = vld [vmem:[#allocation2 + $0x160] sm:$0xf] }
 0x187   :  { %3772 = vmatpush.bf16.msrb.mxu2 %v12502_v22  ;;  %v11979_v22 = vld [vmem:[#allocation2 + $0x810] sm:$0xf0] }
 0x188   :  { %3760 = vmatpush.bf16.msra.mxu3 %v12142_v25  ;;  %v12342_v25 = vor.u32 %v16784_v12, %v12339_v15  ;;  %v11982_v32 = vor.u32 %v16694_v21, %v11979_v22  ;;  %v12225_v12 = vld [vmem:[#allocation2 + $0x9d0] sm:$0xf]  ;;  %v11545_v15 = vld [vmem:[#allocation2 + $0x480] sm:$0xf]  ;;  %v16670_v21 = vld [vmem:[#allocation2 + $0x724] sm:$0xf0] }
 0x189   :  { %3785 = vmatpush.bf16.msra.mxu0 %v12822_v29  ;;  %v3482_v29 = vadd.f32 %v3481_v13, %v3469_v20  ;;  %v3483_v51 = vpop.f32.mrf.mxu2  ;;  %v16760_v13 = vld [vmem:[#allocation2 + $0x9f4] sm:$0xf0]  ;;  %v11865_v20 = vld [vmem:[#allocation2 + $0x700] sm:$0xf] }
 0x18a   :  { %3748 = vmatpush.bf16.msra.mxu1 %v11782_v37  ;;  %v3470_v37 = vpop.f32.mrf.mxu1  ;;  %v12226_v22 = vor.u32 %v16760_v13, %v12225_v12  ;;  %v11105_v51 = vld [vmem:[#allocation2 + $0x110] sm:$0xf]  ;;  %v11065_v13 = vld [vmem:[#allocation2 + $0xc0] sm:$0xf] }
 0x18b   :  { %3773 = vmatpush.bf16.msrb.mxu2 %v12462_v36  ;;  %v11939_v36 = vld [vmem:[#allocation2 + $0x7c0] sm:$0xf0]  ;;  %v18165_v41 = vadd.f32 %v3494_v59, %v3482_v29  ;;  %v11266_v59 = vor.u32 %v16520_v44, %v11265_v42  ;;  %v11505_v29 = vld [vmem:[#allocation2 + $0x430] sm:$0xf] }
 0x18c   :  { %3761 = vmatpush.bf16.msra.mxu3 %v12102_v40  ;;  %v12662_v40 = vor.u32 %v16864_v23, %v12659_v50  ;;  %v11185_v23 = vld [vmem:[#allocation2 + $0x1b0] sm:$0xf]  ;;  %v16500_v50 = vld [vmem:[#allocation2 + $0x1d4] sm:$0xf0] }
 0x18d   :  { %3786 = vmatpush.bf16.msra.mxu0 %v12782_v10  ;;  %v12899_v10 = vld [vmem:[#allocation2 + $0xf40] sm:$0xf0] }
 0x18e   :  { %3749 = vmatpush.bf16.msra.mxu1 %v11742_v49  ;;  %v11622_v49 = vor.u32 %v16604_v31, %v11619_v33  ;;  %v12902_v56 = vor.u32 %v16924_v43, %v12899_v10  ;;  %v16580_v31 = vld [vmem:[#allocation2 + $0x454] sm:$0xf0]  ;;  %v11186_v33 = vor.u32 %v16500_v50, %v11185_v23  ;;  %v12145_v43 = vld [vmem:[#allocation2 + $0x930] sm:$0xf] }
 0x18f   :  { %3774 = vmatpush.bf16.msrb.mxu2 %v12422_v48  ;;  %v12302_v48 = vor.u32 %v16774_v27, %v12299_v28  ;;  %v16750_v27 = vld [vmem:[#allocation2 + $0x9a4] sm:$0xf0]  ;;  %v11866_v28 = vor.u32 %v16670_v21, %v11865_v20  ;;  %v11506_v42 = vor.u32 %v16580_v31, %v11505_v29  ;;  %v16740_v10 = vld [vmem:[#allocation2 + $0x954] sm:$0xf0]  ;;  %v11385_v21 = vld [vmem:[#allocation2 + $0x340] sm:$0xf] }
 0x190   :  { %3762 = vmatpush.bf16.msra.mxu3 %v12062_v52  ;;  %v11942_v52 = vor.u32 %v16684_v34, %v11939_v36  ;;  %v11825_v34 = vld [vmem:[#allocation2 + $0x6b0] sm:$0xf]  ;;  %v16660_v36 = vld [vmem:[#allocation2 + $0x6d4] sm:$0xf0] }
 0x191   :  { %3787 = vmatpush.bf16.msra.mxu0 %v12742_v62  ;;  %v12622_v62 = vor.u32 %v16854_v46, %v12619_v47  ;;  %v11826_v44 = vor.u32 %v16660_v36, %v11825_v34  ;;  %v11465_v46 = vld [vmem:[#allocation2 + $0x3e0] sm:$0xf]  ;;  %v16570_v47 = vld [vmem:[#allocation2 + $0x404] sm:$0xf0] }
 0x192   :  { %3750 = vmatpush.bf16.msra.mxu1 %v11702_v9  ;;  %v12262_v9 = vor.u32 %v16764_v24, %v12259_v55  ;;  %v12146_v24 = vor.u32 %v16740_v10, %v12145_v43  ;;  %v11466_v55 = vor.u32 %v16570_v47, %v11465_v46  ;;  %v16710_v34 = vld [vmem:[#allocation2 + $0x864] sm:$0xf0]  ;;  %v11665_v43 = vld [vmem:[#allocation2 + $0x570] sm:$0xf]  ;;  %v16620_v10 = vld [vmem:[#allocation2 + $0x594] sm:$0xf0] }
 0x193   :  { %3775 = vmatpush.bf16.msrb.mxu2 %v12382_v8  ;;  %v12579_v8 = vld [vmem:[#allocation2 + $0xcc0] sm:$0xf0] }
 0x194   :  { %3763 = vmatpush.bf16.msra.mxu3 %v12022_v14  ;;  %v11906_v14 = vor.u32 %v16680_v1, %v11905_v63 }
 0x195   :  { %3788 = vmatpush.bf16.msra.mxu0 %v12702_v18  ;;  %v12582_v18 = vor.u32 %v16844_v5, %v12579_v8  ;;  %v16640_v5 = vld [vmem:[#allocation2 + $0x634] sm:$0xf0]  ;;  %v613_v8 = vperm.slane %v18141_v54, 5  ;;  %v11705_v54 = vld [vmem:[#allocation2 + $0x5c0] sm:$0xf] }
 0x196   :  { %3751 = vmatpush.bf16.msra.mxu1 %v11662_v26  ;;  %v12185_v26 = vld [vmem:[#allocation2 + $0x980] sm:$0xf]  ;;  %v11746_v20 = vor.u32 %v16640_v5, %v11745_v4  ;;  %v16920_v4 = vld [vmem:[#allocation2 + $0xef4] sm:$0xf0] }
 0x197   :  { %3776 = vmatpush.bf16.msrb.mxu2 %v12342_v25  ;;  %v11546_v25 = vor.u32 %v16590_v16, %v11545_v15  ;;  %v12186_v37 = vor.u32 %v16750_v27, %v12185_v26 }
 0x198   :  { %3764 = vmatpush.bf16.msra.mxu3 %v11982_v32  ;;  %v18169_v32 = vpop.f32.mrf.mxu2 }
 0x199   :  { %3789 = vmatpush.bf16.msra.mxu0 %v12662_v40  ;;  %v16490_v40 = vld [vmem:[#allocation2 + $0x184] sm:$0xf0] }
 0x19a   :  { %3752 = vmatpush.bf16.msra.mxu1 %v11622_v49  ;;  %v11146_v0 = vor.u32 %v16490_v40, %v11145_v39  ;;  %v16650_v49 = vld [vmem:[#allocation2 + $0x684] sm:$0xf0]  ;;  %v3520_v1 = vpop.f32.mrf.mxu1  ;;  %v16540_v39 = vld [vmem:[#allocation2 + $0x314] sm:$0xf0] }
 0x19b   :  { %3777 = vmatpush.bf16.msrb.mxu2 %v12302_v48  ;;  %v11785_v48 = vld [vmem:[#allocation2 + $0x660] sm:$0xf] }
 0x19c   :  { %3765 = vmatpush.bf16.msra.mxu3 %v11942_v52  ;;  %v16480_v52 = vld [vmem:[#allocation2 + $0x134] sm:$0xf0]  ;;  %v11786_v58 = vor.u32 %v16650_v49, %v11785_v48  ;;  %v10985_v48 = vld [vmem:[#allocation2 + $0x20] sm:$0xf]  ;;  %v16450_v49 = vld [vmem:[#allocation2 + $0x44] sm:$0xf0] }
 0x19d   :  { %3790 = vmatpush.bf16.msra.mxu0 %v12622_v62  ;;  %3753 = vmatmul.bf16.vlgmr.msra.gmra.mxu1 %v18043_v53  ;;  %v16560_v62 = vld [vmem:[#allocation2 + $0x3b4] sm:$0xf0]  ;;  %v11106_v3 = vor.u32 %v16480_v52, %v11105_v51 }
 0x19e   :  { %3804 = vmatpush.bf16.msrb.mxu1 %v12902_v56  ;;  %v12105_v56 = vld [vmem:[#allocation2 + $0x8e0] sm:$0xf]  ;;  %v16840_v52 = vld [vmem:[#allocation2 + $0xc74] sm:$0xf0] }
 0x19f   :  { %3778 = vmatpush.bf16.msrb.mxu2 %v12262_v9  ;;  %3766 = vmatmul.bf16.vlgmr.msra.gmra.mxu3 %v18053_v61  ;;  %v3546_v9 = vpop.f32.mrf.mxu0  ;;  %v12106_v12 = vor.u32 %v16730_v57, %v12105_v56  ;;  %v16700_v56 = vld [vmem:[#allocation2 + $0x814] sm:$0xf0]  ;;  %v11666_v57 = vor.u32 %v16620_v10, %v11665_v43  ;;  %v12785_v43 = vld [vmem:[#allocation2 + $0xe30] sm:$0xf] }
 0x1a0   :  { %3810 = vmatpush.bf16.msrb.mxu3 %v11266_v59  ;;  %v11425_v59 = vld [vmem:[#allocation2 + $0x390] sm:$0xf]  ;;  %v3535_v63 = vpop.f32.mrf.mxu2  ;;  %v3547_v26 = vadd.f32 %v3546_v9, %v613_v8  ;;  %v12505_v9 = vld [vmem:[#allocation2 + $0xc00] sm:$0xf]  ;;  %v16900_v10 = vld [vmem:[#allocation2 + $0xe54] sm:$0xf0] }
 0x1a1   :  { %3791 = vmatpush.bf16.msra.mxu0 %v12582_v18  ;;  %v11426_v16 = vor.u32 %v16560_v62, %v11425_v59  ;;  %v16720_v18 = vld [vmem:[#allocation2 + $0x8b4] sm:$0xf0]  ;;  %v16530_v59 = vld [vmem:[#allocation2 + $0x2c4] sm:$0xf0]  ;;  %v11625_v62 = vld [vmem:[#allocation2 + $0x520] sm:$0xf]  ;;  %v10986_v63 = vor.u32 %v16450_v49, %v10985_v48  ;;  %v12786_v49 = vor.u32 %v16900_v10, %v12785_v43 }
 0x1a2   :  { %3823 = vmatpush.bf16.msra.mxu1 %v11586_v11  ;;  %3779 = vmatmul.bf16.vlgmr.msrb.gmra.mxu2 %v18077_v30  ;;  %v3507_v11 = vpop.f32.mrf.mxu3  ;;  %v3522_v46 = vpop.f32.mrf.mxu1  ;;  %v11067_v43 = vld [vmem:[#allocation2 + $0xe8] sm:$0xf0]  ;;  %v16545_v10 = vld [vmem:[#allocation2 + $0x344] sm:$0xf] }
 0x1a3   :  { %3836 = vmatpush.bf16.msra.mxu2 %v11906_v14  ;;  %v16470_v14 = vld [vmem:[#allocation2 + $0xe4] sm:$0xf0]  ;;  %v3508_v15 = vadd.f32 %v3507_v11, %v18165_v41  ;;  %v11025_v41 = vld [vmem:[#allocation2 + $0x70] sm:$0xf]  ;;  %v12905_v11 = vld [vmem:[#allocation2 + $0xf20] sm:$0xf] }
 0x1a4   :  { %3811 = vmatpush.bf16.msrb.mxu3 %v11226_v17  ;;  %3792 = vmatmul.bf16.vlgmr.msra.gmra.mxu0 %v18079_v35  ;;  %v12065_v17 = vld [vmem:[#allocation2 + $0x890] sm:$0xf]  ;;  %v11066_v50 = vor.u32 %v16470_v14, %v11065_v13  ;;  %v16830_v14 = vld [vmem:[#allocation2 + $0xc24] sm:$0xf0] }
 0x1a5   :  { %3849 = vmatpush.bf16.msrb.mxu0 %v12226_v22  ;;  %v16550_v22 = vld [vmem:[#allocation2 + $0x364] sm:$0xf0]  ;;  %v3521_v23 = vadd.f32 %v3520_v1, %v3508_v15  ;;  %v12066_v27 = vor.u32 %v16720_v18, %v12065_v17  ;;  %v11945_v15 = vld [vmem:[#allocation2 + $0x7a0] sm:$0xf] }
 0x1a6   :  { %3824 = vmatpush.bf16.msra.mxu1 %v11546_v25  ;;  %v16630_v25 = vld [vmem:[#allocation2 + $0x5e4] sm:$0xf0]  ;;  %v11386_v31 = vor.u32 %v16550_v22, %v11385_v21  ;;  %v11267_v21 = vld [vmem:[#allocation2 + $0x278] sm:$0xf0]  ;;  %v16595_v22 = vld [vmem:[#allocation2 + $0x4d4] sm:$0xf] }
 0x1a7   :  { %3837 = vmatpush.bf16.msra.mxu2 %v11866_v28  ;;  %v16460_v28 = vld [vmem:[#allocation2 + $0x94] sm:$0xf0]  ;;  %v18178_v29 = vadd.f32 %v18169_v32, %v3521_v23  ;;  %v11706_v36 = vor.u32 %v16630_v25, %v11705_v54  ;;  %v3548_v47 = vpop.f32.mrf.mxu0  ;;  %v16610_v1 = vld [vmem:[#allocation2 + $0x544] sm:$0xf0]  ;;  %v11587_v54 = vld [vmem:[#allocation2 + $0x4f8] sm:$0xf0] }
 0x1a8   :  { %3812 = vmatpush.bf16.msrb.mxu3 %v11186_v33  ;;  %v12025_v33 = vld [vmem:[#allocation2 + $0x840] sm:$0xf]  ;;  %v3559_v40 = vpop.f32.mrf.mxu2  ;;  %v11626_v17 = vor.u32 %v16610_v1, %v11625_v62  ;;  %v12385_v62 = vld [vmem:[#allocation2 + $0xb10] sm:$0xf] }
 0x1a9   :  { %3850 = vmatpush.bf16.msrb.mxu0 %v12186_v37  ;;  %v11345_v37 = vld [vmem:[#allocation2 + $0x2f0] sm:$0xf]  ;;  %v12026_v32 = vor.u32 %v16710_v34, %v12025_v33  ;;  %v12825_v25 = vld [vmem:[#allocation2 + $0xe80] sm:$0xf]  ;;  %v16820_v33 = vld [vmem:[#allocation2 + $0xbd4] sm:$0xf0]  ;;  %v11590_v34 = vor.u32 %v16595_v22, %v11587_v54 }
 0x1aa   :  { %3825 = vmatpush.bf16.msra.mxu1 %v11506_v42  ;;  %v11026_v42 = vor.u32 %v16460_v28, %v11025_v41  ;;  %v11346_v51 = vor.u32 %v16540_v39, %v11345_v37  ;;  %v16505_v37 = vld [vmem:[#allocation2 + $0x204] sm:$0xf]  ;;  %v11227_v39 = vld [vmem:[#allocation2 + $0x228] sm:$0xf0]  ;;  %v11107_v54 = vld [vmem:[#allocation2 + $0x138] sm:$0xf0] }
 0x1ab   :  { %3838 = vmatpush.bf16.msra.mxu2 %v11826_v44  ;;  %v18180_v44 = vadd.f32 %v3559_v40, %v3547_v26  ;;  %v16910_v26 = vld [vmem:[#allocation2 + $0xea4] sm:$0xf0]  ;;  %v16585_v40 = vld [vmem:[#allocation2 + $0x484] sm:$0xf]  ;;  %v11230_v47 = vor.u32 %v16505_v37, %v11227_v39 }
 0x1ac   :  { %3813 = vmatpush.bf16.msrb.mxu3 %v11146_v0  ;;  %v3509_v0 = vpop.f32.mrf.mxu3 }
 0x1ad   :  { %3851 = vmatpush.bf16.msrb.mxu0 %v12146_v24  ;;  %12918 = vmatmul.msk.bf16.vlgmr.msrb.gmra.mxu1 %vm3078_vm0, %v18067_v45  ;;  %v12545_v24 = vld [vmem:[#allocation2 + $0xc50] sm:$0xf]  ;;  %v16810_v0 = vld [vmem:[#allocation2 + $0xb84] sm:$0xf0] }
 0x1ae   :  { %3826 = vmatpush.bf16.msra.mxu1 %v11466_v55  ;;  %v11985_v55 = vld [vmem:[#allocation2 + $0x7f0] sm:$0xf]  ;;  %v12546_v5 = vor.u32 %v16840_v52, %v12545_v24  ;;  %v16495_v24 = vld [vmem:[#allocation2 + $0x1b4] sm:$0xf] }
 0x1af   :  { %3839 = vmatpush.bf16.msra.mxu2 %v11786_v58  ;;  %v11305_v58 = vld [vmem:[#allocation2 + $0x2a0] sm:$0xf]  ;;  %v11986_v8 = vor.u32 %v16700_v56, %v11985_v55  ;;  %v16575_v52 = vld [vmem:[#allocation2 + $0x434] sm:$0xf]  ;;  %v11507_v55 = vld [vmem:[#allocation2 + $0x458] sm:$0xf0] }
 0x1b0   :  { %3814 = vmatpush.bf16.msrb.mxu3 %v11106_v3  ;;  %v12865_v3 = vld [vmem:[#allocation2 + $0xed0] sm:$0xf]  ;;  %v11306_v13 = vor.u32 %v16530_v59, %v11305_v58  ;;  %v3561_v23 = vpop.f32.mrf.mxu2  ;;  %v12745_v56 = vld [vmem:[#allocation2 + $0xde0] sm:$0xf] }
 0x1b1   :  { %3852 = vmatpush.bf16.msrb.mxu0 %v12106_v12  ;;  %v16930_v12 = vld [vmem:[#allocation2 + $0xf44] sm:$0xf0]  ;;  %v12866_v18 = vor.u32 %v16920_v4, %v12865_v3  ;;  %v11510_v3 = vor.u32 %v16575_v52, %v11507_v55 }
 0x1b2   :  { %3827 = vmatpush.bf16.msra.mxu1 %v11426_v16  ;;  %v16690_v16 = vld [vmem:[#allocation2 + $0x7c4] sm:$0xf0] }
 0x1b3   :  { %3840 = vmatpush.bf16.msra.mxu2 %v11746_v20  ;;  %v16515_v20 = vld [vmem:[#allocation2 + $0x254] sm:$0xf]  ;;  %v11946_v41 = vor.u32 %v16690_v16, %v11945_v15 }
 0x1b4   :  { %3815 = vmatpush.bf16.msrb.mxu3 %v11066_v50  ;;  %v12906_v50 = vor.u32 %v16930_v12, %v12905_v11  ;;  %v11270_v28 = vor.u32 %v16515_v20, %v11267_v21  ;;  %v11467_v11 = vld [vmem:[#allocation2 + $0x408] sm:$0xf0]  ;;  %v12705_v12 = vld [vmem:[#allocation2 + $0xd90] sm:$0xf]  ;;  %v16790_v20 = vld [vmem:[#allocation2 + $0xae4] sm:$0xf0] }
 0x1b5   :  { %3853 = vmatpush.bf16.msrb.mxu0 %v12066_v27  ;;  %v12506_v27 = vor.u32 %v16830_v14, %v12505_v9  ;;  %v16565_v9 = vld [vmem:[#allocation2 + $0x3e4] sm:$0xf] }
 0x1b6   :  { %3828 = vmatpush.bf16.msra.mxu1 %v11386_v31  ;;  %v12465_v31 = vld [vmem:[#allocation2 + $0xbb0] sm:$0xf]  ;;  %v11470_v22 = vor.u32 %v16565_v9, %v11467_v11  ;;  %v16755_v11 = vld [vmem:[#allocation2 + $0x9d4] sm:$0xf] }
 0x1b7   :  { %3841 = vmatpush.bf16.msra.mxu2 %v11706_v36  ;;  %v12826_v36 = vor.u32 %v16910_v26, %v12825_v25  ;;  %v12466_v46 = vor.u32 %v16820_v33, %v12465_v31  ;;  %v16555_v25 = vld [vmem:[#allocation2 + $0x394] sm:$0xf]  ;;  %v11427_v26 = vld [vmem:[#allocation2 + $0x3b8] sm:$0xf0] }
 0x1b8   :  { %3816 = vmatpush.bf16.msrb.mxu3 %v11026_v42  ;;  %v11547_v42 = vld [vmem:[#allocation2 + $0x4a8] sm:$0xf0]  ;;  %v11430_v39 = vor.u32 %v16555_v25, %v11427_v26  ;;  %v12547_v25 = vld [vmem:[#allocation2 + $0xc78] sm:$0xf0]  ;;  %v16915_v26 = vld [vmem:[#allocation2 + $0xed4] sm:$0xf] }
 0x1b9   :  { %3854 = vmatpush.bf16.msrb.mxu0 %v12026_v32  ;;  %v12425_v32 = vld [vmem:[#allocation2 + $0xb60] sm:$0xf]  ;;  %v11550_v48 = vor.u32 %v16585_v40, %v11547_v42  ;;  %v16465_v42 = vld [vmem:[#allocation2 + $0xc4] sm:$0xf] }
 0x1ba   :  { %3829 = vmatpush.bf16.msra.mxu1 %v11346_v51  ;;  %v11187_v51 = vld [vmem:[#allocation2 + $0x1d8] sm:$0xf0]  ;;  %v12426_v58 = vor.u32 %v16810_v0, %v12425_v32  ;;  %v3585_v1 = vpop.f32.mrf.mxu1  ;;  %v12625_v32 = vld [vmem:[#allocation2 + $0xcf0] sm:$0xf]  ;;  %v16860_v0 = vld [vmem:[#allocation2 + $0xd14] sm:$0xf0]  ;;  %v11070_v55 = vor.u32 %v16465_v42, %v11067_v43 }
 0x1bb   :  { %3842 = vmatpush.bf16.msra.mxu2 %v11666_v57  ;;  %v16890_v57 = vld [vmem:[#allocation2 + $0xe04] sm:$0xf0]  ;;  %v11190_v59 = vor.u32 %v16495_v24, %v11187_v51  ;;  %v12265_v24 = vld [vmem:[#allocation2 + $0xa20] sm:$0xf]  ;;  %v11827_v42 = vld [vmem:[#allocation2 + $0x6d8] sm:$0xf0] }
 0x1bc   :  { %3817 = vmatpush.bf16.msrb.mxu3 %v10986_v63  ;;  %v16800_v63 = vld [vmem:[#allocation2 + $0xb34] sm:$0xf0]  ;;  %v12746_v4 = vor.u32 %v16890_v57, %v12745_v56  ;;  %v16770_v56 = vld [vmem:[#allocation2 + $0xa44] sm:$0xf0]  ;;  %v16675_v57 = vld [vmem:[#allocation2 + $0x754] sm:$0xf] }
 0x1bd   :  { %3855 = vmatpush.bf16.msrb.mxu0 %v11986_v8  ;;  %v11147_v8 = vld [vmem:[#allocation2 + $0x188] sm:$0xf0]  ;;  %v12386_v14 = vor.u32 %v16800_v63, %v12385_v62  ;;  %v3598_v15 = vpop.f32.mrf.mxu0  ;;  %v12626_v62 = vor.u32 %v16860_v0, %v12625_v32  ;;  %v16455_v63 = vld [vmem:[#allocation2 + $0x74] sm:$0xf]  ;;  %v12266_v9 = vor.u32 %v16770_v56, %v12265_v24  ;;  %v16905_v32 = vld [vmem:[#allocation2 + $0xe84] sm:$0xf] }
 0x1be   :  { %3830 = vmatpush.bf16.msra.mxu1 %v11306_v13  ;;  %v16880_v13 = vld [vmem:[#allocation2 + $0xdb4] sm:$0xf0]  ;;  %v3572_v16 = vpop.f32.mrf.mxu3  ;;  %v12827_v0 = vld [vmem:[#allocation2 + $0xea8] sm:$0xf0]  ;;  %v12147_v24 = vld [vmem:[#allocation2 + $0x958] sm:$0xf0] }
 0x1bf   :  { %3843 = vmatpush.bf16.msra.mxu2 %v11626_v17  ;;  %3818 = vmatmul.bf16.vlgmr.msrb.gmra.mxu3 %v18051_v60  ;;  %v3573_v21 = vadd.f32 %v3572_v16, %v18180_v44  ;;  %v12706_v23 = vor.u32 %v16880_v13, %v12705_v12  ;;  %v12227_v12 = vld [vmem:[#allocation2 + $0x9f8] sm:$0xf0]  ;;  %v11867_v16 = vld [vmem:[#allocation2 + $0x728] sm:$0xf0]  ;;  %v12830_v56 = vor.u32 %v16905_v32, %v12827_v0  ;;  %v16695_v0 = vld [vmem:[#allocation2 + $0x7f4] sm:$0xf] }
 0x1c0   :  { %3862 = vmatpush.bf16.msra.mxu3 %v12546_v5  ;;  %v16485_v5 = vld [vmem:[#allocation2 + $0x164] sm:$0xf]  ;;  %v12667_v32 = vld [vmem:[#allocation2 + $0xd68] sm:$0xf0] }
 0x1c1   :  { %3856 = vmatpush.bf16.msrb.mxu0 %v11946_v41  ;;  %3831 = vmatmul.bf16.vlgmr.msra.gmra.mxu1 %v18059_v7  ;;  %v11150_v17 = vor.u32 %v16485_v5, %v11147_v8  ;;  %v16870_v41 = vld [vmem:[#allocation2 + $0xd64] sm:$0xf0]  ;;  %v12585_v5 = vld [vmem:[#allocation2 + $0xca0] sm:$0xf] }
 0x1c2   :  { %3875 = vmatpush.bf16.msrb.mxu1 %v12866_v18  ;;  %3844 = vmatmul.bf16.vlgmr.msra.gmra.mxu2 %v18043_v53  ;;  %v12345_v18 = vld [vmem:[#allocation2 + $0xac0] sm:$0xf]  ;;  %v3587_v37 = vpop.f32.mrf.mxu1  ;;  %v16850_v8 = vld [vmem:[#allocation2 + $0xcc4] sm:$0xf0] }
 0x1c3   :  { %3895 = vmatpush.bf16.msrb.mxu2 %v12906_v50  ;;  %v16475_v50 = vld [vmem:[#allocation2 + $0x114] sm:$0xf]  ;;  %v12346_v31 = vor.u32 %v16790_v20, %v12345_v18  ;;  %v12586_v20 = vor.u32 %v16850_v8, %v12585_v5 }
 0x1c4   :  { %3863 = vmatpush.bf16.msra.mxu3 %v12506_v27  ;;  %3857 = vmatmul.bf16.vlgmr.msrb.gmra.mxu0 %v18053_v61  ;;  %v12665_v27 = vld [vmem:[#allocation2 + $0xd40] sm:$0xf]  ;;  %v11110_v33 = vor.u32 %v16475_v50, %v11107_v54  ;;  %v12230_v50 = vor.u32 %v16755_v11, %v12227_v12  ;;  %v16835_v54 = vld [vmem:[#allocation2 + $0xc54] sm:$0xf]  ;;  %v11747_v11 = vld [vmem:[#allocation2 + $0x638] sm:$0xf0] }
 0x1c5   :  { %3901 = vmatpush.bf16.msra.mxu0 %v11270_v28  ;;  %v3586_v28 = vadd.f32 %v3585_v1, %v3573_v21  ;;  %v12666_v40 = vor.u32 %v16870_v41, %v12665_v27  ;;  %v3600_v51 = vpop.f32.mrf.mxu0  ;;  %v11027_v1 = vld [vmem:[#allocation2 + $0x98] sm:$0xf0]  ;;  %v10987_v21 = vld [vmem:[#allocation2 + $0x48] sm:$0xf0] }
 0x1c6   :  { %3876 = vmatpush.bf16.msrb.mxu1 %v12826_v36  ;;  %v16780_v36 = vld [vmem:[#allocation2 + $0xa94] sm:$0xf0]  ;;  %v3574_v52 = vpop.f32.mrf.mxu3  ;;  %v12867_v41 = vld [vmem:[#allocation2 + $0xef8] sm:$0xf0] }
 0x1c7   :  { %3914 = vmatpush.bf16.msra.mxu2 %v11590_v34  ;;  %v12305_v34 = vld [vmem:[#allocation2 + $0xa70] sm:$0xf]  ;;  %v3599_v44 = vadd.f32 %v3598_v15, %v3586_v28  ;;  %v16665_v15 = vld [vmem:[#allocation2 + $0x704] sm:$0xf]  ;;  %v12870_v43 = vor.u32 %v16915_v26, %v12867_v41  ;;  %v16795_v26 = vld [vmem:[#allocation2 + $0xb14] sm:$0xf] }
 0x1c8   :  { %3864 = vmatpush.bf16.msra.mxu3 %v12466_v46  ;;  %v3611_v46 = vpop.f32.mrf.mxu2  ;;  %v16745_v28 = vld [vmem:[#allocation2 + $0x984] sm:$0xf]  ;;  %v16875_v41 = vld [vmem:[#allocation2 + $0xd94] sm:$0xf] }
 0x1c9   :  { %3902 = vmatpush.bf16.msra.mxu0 %v11230_v47  ;;  %v11387_v47 = vld [vmem:[#allocation2 + $0x368] sm:$0xf0]  ;;  %v16645_v52 = vld [vmem:[#allocation2 + $0x664] sm:$0xf] }
 0x1ca   :  { %3877 = vmatpush.bf16.msrb.mxu1 %v12786_v49  ;;  %v12306_v49 = vor.u32 %v16780_v36, %v12305_v34  ;;  %v11870_v34 = vor.u32 %v16665_v15, %v11867_v16  ;;  %v12427_v15 = vld [vmem:[#allocation2 + $0xb88] sm:$0xf0]  ;;  %v16885_v16 = vld [vmem:[#allocation2 + $0xde4] sm:$0xf] }
 0x1cb   :  { %3915 = vmatpush.bf16.msra.mxu2 %v11550_v48  ;;  %v3612_v48 = vadd.f32 %v3611_v46, %v3599_v44  ;;  %v16825_v46 = vld [vmem:[#allocation2 + $0xc04] sm:$0xf] }
 0x1cc   :  { %3865 = vmatpush.bf16.msra.mxu3 %v12426_v58  ;;  %v11907_v58 = vld [vmem:[#allocation2 + $0x778] sm:$0xf0] }
 0x1cd   :  { %3903 = vmatpush.bf16.msra.mxu0 %v11190_v59  ;;  %v11390_v59 = vor.u32 %v16545_v10, %v11387_v47  ;;  %v11910_v13 = vor.u32 %v16675_v57, %v11907_v58  ;;  %v12507_v47 = vld [vmem:[#allocation2 + $0xc28] sm:$0xf0]  ;;  %v16815_v58 = vld [vmem:[#allocation2 + $0xbb4] sm:$0xf] }
 0x1ce   :  { %3878 = vmatpush.bf16.msrb.mxu1 %v12746_v4  ;;  %v11347_v4 = vld [vmem:[#allocation2 + $0x318] sm:$0xf0]  ;;  %v12510_v51 = vor.u32 %v16825_v46, %v12507_v47  ;;  %v12347_v46 = vld [vmem:[#allocation2 + $0xae8] sm:$0xf0]  ;;  %v16865_v47 = vld [vmem:[#allocation2 + $0xd44] sm:$0xf] }
 0x1cf   :  { %3916 = vmatpush.bf16.msra.mxu2 %v11510_v3  ;;  %v16535_v3 = vld [vmem:[#allocation2 + $0x2f4] sm:$0xf] }
 0x1d0   :  { %3866 = vmatpush.bf16.msra.mxu3 %v12386_v14  ;;  %v11030_v14 = vor.u32 %v16455_v63, %v11027_v1  ;;  %v11350_v18 = vor.u32 %v16535_v3, %v11347_v4  ;;  %v3613_v27 = vpop.f32.mrf.mxu2  ;;  %v12787_v63 = vld [vmem:[#allocation2 + $0xe58] sm:$0xf0]  ;;  %v16725_v1 = vld [vmem:[#allocation2 + $0x8e4] sm:$0xf]  ;;  %v12107_v3 = vld [vmem:[#allocation2 + $0x908] sm:$0xf0] }
 0x1d1   :  { %3904 = vmatpush.bf16.msra.mxu0 %v11150_v17  ;;  %v16445_v17 = vld [vmem:[#allocation2 + $0x24] sm:$0xf]  ;;  %v12387_v27 = vld [vmem:[#allocation2 + $0xb38] sm:$0xf0] }
 0x1d2   :  { %3879 = vmatpush.bf16.msrb.mxu1 %v12706_v23  ;;  %12919 = vmatmul.msk.bf16.vlgmr.msrb.gmra.mxu2 %vm3078_vm0, %v18067_v45  ;;  %v11307_v23 = vld [vmem:[#allocation2 + $0x2c8] sm:$0xf0]  ;;  %v10990_v36 = vor.u32 %v16445_v17, %v10987_v21 }
 0x1d3   :  { %3917 = vmatpush.bf16.msra.mxu2 %v11470_v22  ;;  %v16525_v22 = vld [vmem:[#allocation2 + $0x2a4] sm:$0xf]  ;;  %v12747_v17 = vld [vmem:[#allocation2 + $0xe08] sm:$0xf0] }
 0x1d4   :  { %3867 = vmatpush.bf16.msra.mxu3 %v12346_v31  ;;  %v12187_v31 = vld [vmem:[#allocation2 + $0x9a8] sm:$0xf0]  ;;  %v11310_v44 = vor.u32 %v16525_v22, %v11307_v23 }
 0x1d5   :  { %3905 = vmatpush.bf16.msra.mxu0 %v11110_v33  ;;  %v3624_v33 = vpop.f32.mrf.mxu3  ;;  %v12190_v10 = vor.u32 %v16745_v28, %v12187_v31  ;;  %v11707_v23 = vld [vmem:[#allocation2 + $0x5e8] sm:$0xf0]  ;;  %v12707_v28 = vld [vmem:[#allocation2 + $0xdb8] sm:$0xf0]  ;;  %v16705_v31 = vld [vmem:[#allocation2 + $0x844] sm:$0xf] }
 0x1d6   :  { %3880 = vmatpush.bf16.msrb.mxu1 %v12666_v40  ;;  %v18189_v37 = vadd.f32 %v3624_v33, %v3612_v48  ;;  %v16655_v40 = vld [vmem:[#allocation2 + $0x6b4] sm:$0xf]  ;;  %v12027_v33 = vld [vmem:[#allocation2 + $0x868] sm:$0xf0] }
 0x1d7   :  { %3918 = vmatpush.bf16.msra.mxu2 %v11430_v39  ;;  %v12550_v39 = vor.u32 %v16835_v54, %v12547_v25  ;;  %v11830_v48 = vor.u32 %v16655_v40, %v11827_v42  ;;  %v12750_v54 = vor.u32 %v16885_v16, %v12747_v17  ;;  %v12710_v42 = vor.u32 %v16875_v41, %v12707_v28  ;;  %v13523_v16 = vld [vmem:[#allocation7 + $0x4b0] sm:$0xf]  ;;  %v17086_v17 = vld [vmem:[#allocation7 + $0x4d4] sm:$0xf0] }
 0x1d8   :  { %3868 = vmatpush.bf16.msra.mxu3 %v12306_v49  ;;  %v16735_v49 = vld [vmem:[#allocation2 + $0x934] sm:$0xf]  ;;  %v14163_v41 = vld [vmem:[#allocation7 + $0x9b0] sm:$0xf]  ;;  %v13524_v28 = vor.u32 %v17086_v17, %v13523_v16  ;;  %v13723_v17 = vld [vmem:[#allocation7 + $0x640] sm:$0xf] }
 0x1d9   :  { %3906 = vmatpush.bf16.msra.mxu0 %v11070_v55  ;;  %v11787_v55 = vld [vmem:[#allocation2 + $0x688] sm:$0xf0]  ;;  %v12150_v57 = vor.u32 %v16735_v49, %v12147_v24  ;;  %v11987_v49 = vld [vmem:[#allocation2 + $0x818] sm:$0xf0] }
 0x1da   :  { %3881 = vmatpush.bf16.msrb.mxu1 %v12626_v62  ;;  %v16895_v62 = vld [vmem:[#allocation2 + $0xe34] sm:$0xf]  ;;  %v11790_v4 = vor.u32 %v16645_v52, %v11787_v55 }
 0x1db   :  { %3919 = vmatpush.bf16.msra.mxu2 %v11390_v59  ;;  %v12467_v59 = vld [vmem:[#allocation2 + $0xbd8] sm:$0xf0]  ;;  %v12790_v12 = vor.u32 %v16895_v62, %v12787_v63  ;;  %v12670_v62 = vor.u32 %v16865_v47, %v12667_v32  ;;  %v11990_v63 = vor.u32 %v16695_v0, %v11987_v49  ;;  %v17156_v49 = vld [vmem:[#allocation7 + $0x704] sm:$0xf0] }
 0x1dc   :  { %3869 = vmatpush.bf16.msra.mxu3 %v12266_v9  ;;  %v12470_v8 = vor.u32 %v16815_v58, %v12467_v59  ;;  %v16635_v9 = vld [vmem:[#allocation2 + $0x614] sm:$0xf]  ;;  %v12307_v58 = vld [vmem:[#allocation2 + $0xa98] sm:$0xf0] }
 0x1dd   :  { %3907 = vmatpush.bf16.msra.mxu0 %v11030_v14  ;;  %v3626_v5 = vpop.f32.mrf.mxu3  ;;  %v16805_v14 = vld [vmem:[#allocation2 + $0xb64] sm:$0xf]  ;;  %v18195_v22 = vpop.f32.mrf.mxu0  ;;  %v13803_v0 = vld [vmem:[#allocation7 + $0x6e0] sm:$0xf] }
 0x1de   :  { %3882 = vmatpush.bf16.msrb.mxu1 %v12586_v20  ;;  %v12067_v20 = vld [vmem:[#allocation2 + $0x8b8] sm:$0xf0]  ;;  %v12430_v21 = vor.u32 %v16805_v14, %v12427_v15 }
 0x1df   :  { %3920 = vmatpush.bf16.msra.mxu2 %v11350_v18  ;;  %3870 = vmatmul.bf16.vlgmr.msra.gmra.mxu3 %v18077_v30  ;;  %v16715_v18 = vld [vmem:[#allocation2 + $0x894] sm:$0xf]  ;;  %v12627_v5 = vld [vmem:[#allocation2 + $0xd18] sm:$0xf0] }
 0x1e0   :  { %3927 = vmatpush.bf16.msrb.mxu3 %v11910_v13  ;;  %v12110_v13 = vor.u32 %v16725_v1, %v12107_v3  ;;  %v12070_v25 = vor.u32 %v16715_v18, %v12067_v20  ;;  %v16855_v1 = vld [vmem:[#allocation2 + $0xcf4] sm:$0xf]  ;;  %v16925_v3 = vld [vmem:[#allocation2 + $0xf24] sm:$0xf] }
 0x1e1   :  { %3908 = vmatpush.bf16.msra.mxu0 %v10990_v36  ;;  %3883 = vmatmul.bf16.vlgmr.msrb.gmra.mxu1 %v18079_v35  ;;  %v12390_v36 = vor.u32 %v16795_v26, %v12387_v27  ;;  %v16765_v18 = vld [vmem:[#allocation2 + $0xa24] sm:$0xf]  ;;  %v13843_v26 = vld [vmem:[#allocation7 + $0x730] sm:$0xf]  ;;  %v17166_v27 = vld [vmem:[#allocation7 + $0x754] sm:$0xf0] }
 0x1e2   :  { %3940 = vmatpush.bf16.msra.mxu1 %v12230_v50  ;;  %v18197_v50 = vpop.f32.mrf.mxu1 }
 0x1e3   :  { %3921 = vmatpush.bf16.msra.mxu2 %v11310_v44  ;;  %v16615_v44 = vld [vmem:[#allocation2 + $0x574] sm:$0xf] }
 0x1e4   :  { %3928 = vmatpush.bf16.msrb.mxu3 %v11870_v34  ;;  %3909 = vmatmul.bf16.vlgmr.msra.gmra.mxu0 %v18051_v60  ;;  %v11750_v60 = vor.u32 %v16635_v9, %v11747_v11  ;;  %v11947_v9 = vld [vmem:[#allocation2 + $0x7c8] sm:$0xf0] }
 0x1e5   :  { %3953 = vmatpush.bf16.msrb.mxu0 %v12550_v39  ;;  %v11667_v39 = vld [vmem:[#allocation2 + $0x598] sm:$0xf0]  ;;  %v18199_v40 = vpop.f32.mrf.mxu3  ;;  %v3665_v55 = vpop.f32.mrf.mxu0 }
 0x1e6   :  { %3941 = vmatpush.bf16.msra.mxu1 %v12190_v10  ;;  %3922 = vmatmul.bf16.vlgmr.msra.gmra.mxu2 %v18059_v7  ;;  %v16625_v7 = vld [vmem:[#allocation2 + $0x5c4] sm:$0xf]  ;;  %v11670_v24 = vor.u32 %v16615_v44, %v11667_v39  ;;  %v13483_v39 = vld [vmem:[#allocation7 + $0x460] sm:$0xf]  ;;  %v13123_v55 = vld [vmem:[#allocation7 + $0x190] sm:$0xf] }
 0x1e7   :  { %3966 = vmatpush.bf16.msrb.mxu2 %v12870_v43  ;;  %v11710_v34 = vor.u32 %v16625_v7, %v11707_v23  ;;  %v12030_v43 = vor.u32 %v16705_v31, %v12027_v33  ;;  %v16785_v10 = vld [vmem:[#allocation2 + $0xac4] sm:$0xf]  ;;  %v12267_v7 = vld [vmem:[#allocation2 + $0xa48] sm:$0xf0]  ;;  %v17246_v31 = vld [vmem:[#allocation7 + $0x9d4] sm:$0xf0] }
 0x1e8   :  { %3929 = vmatpush.bf16.msrb.mxu3 %v11830_v48  ;;  %v16605_v48 = vld [vmem:[#allocation2 + $0x524] sm:$0xf]  ;;  %v12350_v52 = vor.u32 %v16785_v10, %v12347_v46  ;;  %v13163_v33 = vld [vmem:[#allocation7 + $0x1e0] sm:$0xf]  ;;  %v12270_v44 = vor.u32 %v16765_v18, %v12267_v7  ;;  %v13844_v46 = vor.u32 %v17166_v27, %v13843_v26  ;;  %v14164_v47 = vor.u32 %v17246_v31, %v14163_v41  ;;  %v16966_v7 = vld [vmem:[#allocation7 + $0x114] sm:$0xf0] }
 0x1e9   :  { %3954 = vmatpush.bf16.msrb.mxu0 %v12510_v51  ;;  %v18201_v51 = vpop.f32.mrf.mxu2  ;;  %v16845_v23 = vld [vmem:[#allocation2 + $0xca4] sm:$0xf]  ;;  %v13683_v26 = vld [vmem:[#allocation7 + $0x5f0] sm:$0xf]  ;;  %v17126_v27 = vld [vmem:[#allocation7 + $0x614] sm:$0xf0] }
 0x1ea   :  { %3942 = vmatpush.bf16.msra.mxu1 %v12150_v57  ;;  %v16775_v57 = vld [vmem:[#allocation2 + $0xa74] sm:$0xf]  ;;  %v3639_v59 = vpop.f32.mrf.mxu1  ;;  %v17136_v18 = vld [vmem:[#allocation7 + $0x664] sm:$0xf0]  ;;  %v14003_v31 = vld [vmem:[#allocation7 + $0x870] sm:$0xf] }
 0x1eb   :  { %3967 = vmatpush.bf16.msrb.mxu2 %v12830_v56  ;;  %v11627_v56 = vld [vmem:[#allocation2 + $0x548] sm:$0xf0]  ;;  %v12310_v14 = vor.u32 %v16775_v57, %v12307_v58  ;;  %v17066_v58 = vld [vmem:[#allocation7 + $0x434] sm:$0xf0]  ;;  %v13804_v59 = vor.u32 %v17156_v49, %v13803_v0  ;;  %v17116_v0 = vld [vmem:[#allocation7 + $0x5c4] sm:$0xf0] }
 0x1ec   :  { %3930 = vmatpush.bf16.msrb.mxu3 %v11790_v4  ;;  %v12907_v4 = vld [vmem:[#allocation2 + $0xf48] sm:$0xf0]  ;;  %v11630_v11 = vor.u32 %v16605_v48, %v11627_v56  ;;  %v16986_v56 = vld [vmem:[#allocation7 + $0x1b4] sm:$0xf0] }
 0x1ed   :  { %3955 = vmatpush.bf16.msrb.mxu0 %v12470_v8  ;;  %v16685_v8 = vld [vmem:[#allocation2 + $0x7a4] sm:$0xf]  ;;  %v12910_v15 = vor.u32 %v16925_v3, %v12907_v4  ;;  %v3652_v20 = vpop.f32.mrf.mxu3  ;;  %v13443_v57 = vld [vmem:[#allocation7 + $0x410] sm:$0xf] }
 0x1ee   :  { %3943 = vmatpush.bf16.msra.mxu1 %v12110_v13  ;;  %v17006_v13 = vld [vmem:[#allocation7 + $0x254] sm:$0xf0]  ;;  %v14083_v3 = vld [vmem:[#allocation7 + $0x910] sm:$0xf]  ;;  %v13444_v4 = vor.u32 %v17066_v58, %v13443_v57  ;;  %v14043_v20 = vld [vmem:[#allocation7 + $0x8c0] sm:$0xf] }
 0x1ef   :  { %3968 = vmatpush.bf16.msrb.mxu2 %v12790_v12  ;;  %v13203_v12 = vld [vmem:[#allocation7 + $0x230] sm:$0xf]  ;;  %v16946_v57 = vld [vmem:[#allocation7 + $0x74] sm:$0xf0] }
 0x1f0   :  { %3931 = vmatpush.bf16.msrb.mxu3 %v11750_v60  ;;  %v12630_v60 = vor.u32 %v16855_v1, %v12627_v5  ;;  %v17146_v1 = vld [vmem:[#allocation7 + $0x6b4] sm:$0xf0]  ;;  %v13283_v58 = vld [vmem:[#allocation7 + $0x2d0] sm:$0xf] }
 0x1f1   :  { %3956 = vmatpush.bf16.msrb.mxu0 %v12430_v21  ;;  %v11950_v21 = vor.u32 %v16685_v8, %v11947_v9  ;;  %v17226_v5 = vld [vmem:[#allocation7 + $0x934] sm:$0xf0]  ;;  %v13083_v8 = vld [vmem:[#allocation7 + $0x140] sm:$0xf]  ;;  %v16976_v9 = vld [vmem:[#allocation7 + $0x164] sm:$0xf0] }
 0x1f2   :  { %3944 = vmatpush.bf16.msra.mxu1 %v12070_v25  ;;  %v13204_v25 = vor.u32 %v17006_v13, %v13203_v12  ;;  %v13084_v16 = vor.u32 %v16976_v9, %v13083_v8  ;;  %v17186_v8 = vld [vmem:[#allocation7 + $0x7f4] sm:$0xf0]  ;;  %v12923_v9 = vld [vmem:[#allocation7] sm:$0xf] }
 0x1f3   :  { %3969 = vmatpush.bf16.msrb.mxu2 %v12750_v54  ;;  %v12587_v54 = vld [vmem:[#allocation2 + $0xcc8] sm:$0xf0] }
 0x1f4   :  { %3932 = vmatpush.bf16.msrb.mxu3 %v11710_v34  ;;  %v16996_v34 = vld [vmem:[#allocation7 + $0x204] sm:$0xf0]  ;;  %v12590_v10 = vor.u32 %v16845_v23, %v12587_v54  ;;  %v17046_v23 = vld [vmem:[#allocation7 + $0x394] sm:$0xf0]  ;;  %v13724_v54 = vor.u32 %v17136_v18, %v13723_v17  ;;  %v14803_v18 = vld [vmem:[#allocation7 + $0xeb0] sm:$0xf] }
 0x1f5   :  { %3957 = vmatpush.bf16.msrb.mxu0 %v12390_v36  ;;  %v3678_v36 = vpop.f32.mrf.mxu2  ;;  %v13164_v32 = vor.u32 %v16996_v34, %v13163_v33  ;;  %v17206_v33 = vld [vmem:[#allocation7 + $0x894] sm:$0xf0]  ;;  %v13003_v34 = vld [vmem:[#allocation7 + $0xa0] sm:$0xf] }
 0x1f6   :  { %3945 = vmatpush.bf16.msra.mxu1 %v12030_v43  ;;  %v18203_v43 = vpop.f32.mrf.mxu0  ;;  %v17326_v17 = vld [vmem:[#allocation7 + $0xc54] sm:$0xf0] }
 0x1f7   :  { %3970 = vmatpush.bf16.msrb.mxu2 %v12710_v42  ;;  %v17076_v42 = vld [vmem:[#allocation7 + $0x484] sm:$0xf0] }
 0x1f8   :  { %3933 = vmatpush.bf16.msrb.mxu3 %v11670_v24  ;;  %v14123_v24 = vld [vmem:[#allocation7 + $0x960] sm:$0xf]  ;;  %v13484_v48 = vor.u32 %v17076_v42, %v13483_v39  ;;  %v17036_v42 = vld [vmem:[#allocation7 + $0x344] sm:$0xf0] }
 0x1f9   :  { %3958 = vmatpush.bf16.msrb.mxu0 %v12350_v52  ;;  %v17236_v52 = vld [vmem:[#allocation7 + $0x984] sm:$0xf0]  ;;  %v13323_v39 = vld [vmem:[#allocation7 + $0x320] sm:$0xf] }
 0x1fa   :  { %3946 = vmatpush.bf16.msra.mxu1 %v11990_v63  ;;  %v13763_v63 = vld [vmem:[#allocation7 + $0x690] sm:$0xf] }
 0x1fb   :  { %3971 = vmatpush.bf16.msrb.mxu2 %v12670_v62  ;;  %v13124_v62 = vor.u32 %v16986_v56, %v13123_v55  ;;  %v13764_v13 = vor.u32 %v17146_v1, %v13763_v63  ;;  %v17196_v55 = vld [vmem:[#allocation7 + $0x844] sm:$0xf0]  ;;  %v12963_v56 = vld [vmem:[#allocation7 + $0x50] sm:$0xf]  ;;  %v17106_v1 = vld [vmem:[#allocation7 + $0x574] sm:$0xf0] }
 0x1fc   :  { %3934 = vmatpush.bf16.msrb.mxu3 %v11630_v11  ;;  %v17056_v11 = vld [vmem:[#allocation7 + $0x3e4] sm:$0xf0]  ;;  %v13603_v63 = vld [vmem:[#allocation7 + $0x550] sm:$0xf] }
 0x1fd   :  { %3959 = vmatpush.bf16.msrb.mxu0 %v12310_v14  ;;  %v18209_v14 = vpop.f32.mrf.mxu1 }
 0x1fe   :  { %3947 = vmatpush.bf16.msra.mxu1 %v11950_v21  ;;  %v3717_v12 = vpop.f32.mrf.mxu0  ;;  %v13043_v21 = vld [vmem:[#allocation7 + $0xf0] sm:$0xf] }
 0x1ff   :  { %3972 = vmatpush.bf16.msrb.mxu2 %v12630_v60  ;;  %3935 = vmatmul.bf16.vlgmr.msrb.gmra.mxu3 %v18043_v53  ;;  %v14124_v53 = vor.u32 %v17236_v52, %v14123_v24  ;;  %v17216_v60 = vld [vmem:[#allocation7 + $0x8e4] sm:$0xf0]  ;;  %v13044_v41 = vor.u32 %v16966_v7, %v13043_v21  ;;  %v13963_v52 = vld [vmem:[#allocation7 + $0x820] sm:$0xf] }
 0x200   :  { %3986 = vmatpush.bf16.msra.mxu3 %v12910_v15  ;;  %v14084_v15 = vor.u32 %v17226_v5, %v14083_v3  ;;  %v13923_v3 = vld [vmem:[#allocation7 + $0x7d0] sm:$0xf]  ;;  %v17016_v12 = vld [vmem:[#allocation7 + $0x2a4] sm:$0xf0]  ;;  %v13563_v7 = vld [vmem:[#allocation7 + $0x500] sm:$0xf] }
 0x201   :  { %3960 = vmatpush.bf16.msrb.mxu0 %v12270_v44  ;;  %3948 = vmatmul.bf16.vlgmr.msra.gmra.mxu1 %v18053_v61  ;;  %v13403_v61 = vld [vmem:[#allocation7 + $0x3c0] sm:$0xf]  ;;  %v16956_v44 = vld [vmem:[#allocation7 + $0xc4] sm:$0xf0]  ;;  %v13924_v21 = vor.u32 %v17186_v8, %v13923_v3  ;;  %v17306_v3 = vld [vmem:[#allocation7 + $0xbb4] sm:$0xf0] }
 0x202   :  { %8836 = vmatpush.bf16.msrb.mxu1 %v13204_v25  ;;  %v14044_v25 = vor.u32 %v17216_v60, %v14043_v20  ;;  %v18211_v36 = vpop.f32.mrf.mxu3  ;;  %v13004_v24 = vor.u32 %v16956_v44, %v13003_v34  ;;  %v3992_v60 = vmax.f32 %v18111_v38, 0.0  ;;  %v15443_v34 = vld [vmem:[#allocation7 + $0x13b0] sm:$0xf]  ;;  %v17386_v8 = vld [vmem:[#allocation7 + $0xe34] sm:$0xf0] }
 0x203   :  { %3973 = vmatpush.bf16.msrb.mxu2 %v12590_v10  ;;  %v13684_v10 = vor.u32 %v17126_v27, %v13683_v26  ;;  %v13883_v26 = vld [vmem:[#allocation7 + $0x780] sm:$0xf]  ;;  %v17176_v27 = vld [vmem:[#allocation7 + $0x7a4] sm:$0xf0] }
 0x204   :  { %8849 = vmatpush.bf16.msrb.mxu3 %v13524_v28  ;;  %3961 = vmatmul.bf16.vlgmr.msrb.gmra.mxu0 %v18077_v30  ;;  %v13404_v30 = vor.u32 %v17056_v11, %v13403_v61  ;;  %v16936_v61 = vld [vmem:[#allocation7 + $0x24] sm:$0xf0]  ;;  %v13243_v11 = vld [vmem:[#allocation7 + $0x280] sm:$0xf] }
 0x205   :  { %8862 = vmatpush.bf16.msra.mxu0 %v13844_v46  ;;  %v3691_v49 = vpop.f32.mrf.mxu1 }
 0x206   :  { %8837 = vmatpush.bf16.msrb.mxu1 %v13164_v32  ;;  %3974 = vmatmul.bf16.vlgmr.msrb.gmra.mxu2 %v18079_v35  ;;  %v13363_v35 = vld [vmem:[#allocation7 + $0x370] sm:$0xf]  ;;  %v18213_v46 = vpop.f32.mrf.mxu0  ;;  %v13643_v32 = vld [vmem:[#allocation7 + $0x5a0] sm:$0xf]  ;;  %v3995_v49 = vmax.f32 %v18158_v19, 0.0 }
 0x207   :  { %8875 = vmatpush.bf16.msra.mxu2 %v14164_v47  ;;  %v13364_v28 = vor.u32 %v17046_v23, %v13363_v35  ;;  %v14004_v47 = vor.u32 %v17206_v33, %v14003_v31  ;;  %v17096_v35 = vld [vmem:[#allocation7 + $0x524] sm:$0xf0]  ;;  %v3993_v23 = vmax.f32 %v18125_v2, 0.0  ;;  %v15123_v31 = vld [vmem:[#allocation7 + $0x1130] sm:$0xf]  ;;  %v3994_v2 = vmax.f32 %v18147_v6, 0.0 }
 0x208   :  { %8850 = vmatpush.bf16.msrb.mxu3 %v13484_v48  ;;  %v13324_v48 = vor.u32 %v17036_v42, %v13323_v39  ;;  %v17486_v33 = vld [vmem:[#allocation7 + $0x1154] sm:$0xf0]  ;;  %v13564_v38 = vor.u32 %v17096_v35, %v13563_v7  ;;  %v14443_v42 = vld [vmem:[#allocation7 + $0xbe0] sm:$0xf]  ;;  %v17476_v6 = vld [vmem:[#allocation7 + $0x1104] sm:$0xf0] }
 0x209   :  { %8863 = vmatpush.bf16.msra.mxu0 %v13804_v59  ;;  %v17026_v59 = vld [vmem:[#allocation7 + $0x2f4] sm:$0xf0]  ;;  %v14403_v19 = vld [vmem:[#allocation7 + $0xb90] sm:$0xf]  ;;  %v17376_v7 = vld [vmem:[#allocation7 + $0xde4] sm:$0xf0] }
 0x20a   :  { %8838 = vmatpush.bf16.msrb.mxu1 %v13124_v62  ;;  %v13644_v62 = vor.u32 %v17116_v0, %v13643_v32  ;;  %v13284_v5 = vor.u32 %v17026_v59, %v13283_v58  ;;  %v17566_v39 = vld [vmem:[#allocation7 + $0x13d4] sm:$0xf0]  ;;  %v14763_v32 = vld [vmem:[#allocation7 + $0xe60] sm:$0xf]  ;;  %v17396_v0 = vld [vmem:[#allocation7 + $0xe84] sm:$0xf0] }
 0x20b   :  { %8876 = vmatpush.bf16.msra.mxu2 %v14124_v53  ;;  %v18217_v53 = vpop.f32.mrf.mxu2  ;;  %v15444_v58 = vor.u32 %v17566_v39, %v15443_v34  ;;  %v14323_v34 = vld [vmem:[#allocation7 + $0xaf0] sm:$0xf]  ;;  %v17366_v39 = vld [vmem:[#allocation7 + $0xd94] sm:$0xf0] }
 0x20c   :  { %8851 = vmatpush.bf16.msrb.mxu3 %v13444_v4  ;;  %v12964_v4 = vor.u32 %v16946_v57, %v12963_v56  ;;  %v15083_v56 = vld [vmem:[#allocation7 + $0x10e0] sm:$0xf]  ;;  %v18225_v57 = vpack.c.bf16 %v3993_v23, %v3993_v23 }
 0x20d   :  { %8864 = vmatpush.bf16.msra.mxu0 %v13764_v13  ;;  %v14483_v13 = vld [vmem:[#allocation7 + $0xc30] sm:$0xf] }
 0x20e   :  { %8839 = vmatpush.bf16.msrb.mxu1 %v13084_v16  ;;  %v13604_v16 = vor.u32 %v17106_v1, %v13603_v63  ;;  %v3743_v20 = vpop.f32.mrf.mxu0  ;;  %v14764_v63 = vor.u32 %v17396_v0, %v14763_v32  ;;  %v17556_v1 = vld [vmem:[#allocation7 + $0x1384] sm:$0xf0]  ;;  %v14963_v32 = vld [vmem:[#allocation7 + $0xff0] sm:$0xf]  ;;  %v17446_v0 = vld [vmem:[#allocation7 + $0x1014] sm:$0xf0] }
 0x20f   :  { %8877 = vmatpush.bf16.msra.mxu2 %v14084_v15  ;;  %12920 = vmatmul.msk.bf16.vlgmr.msra.gmra.mxu3 %vm3078_vm0, %v18067_v45  ;;  %v13964_v45 = vor.u32 %v17196_v55, %v13963_v52  ;;  %v3704_v15 = vpop.f32.mrf.mxu3  ;;  %v13884_v52 = vor.u32 %v17176_v27, %v13883_v26  ;;  %v15124_v55 = vor.u32 %v17486_v33, %v15123_v31  ;;  %v17546_v20 = vld [vmem:[#allocation7 + $0x1334] sm:$0xf0]  ;;  %v15003_v27 = vld [vmem:[#allocation7 + $0x1040] sm:$0xf]  ;;  %v17536_v33 = vld [vmem:[#allocation7 + $0x12e4] sm:$0xf0] }
 0x210   :  { %8852 = vmatpush.bf16.msrb.mxu3 %v13404_v30  ;;  %v17406_v30 = vld [vmem:[#allocation7 + $0xed4] sm:$0xf0]  ;;  %v14404_v15 = vor.u32 %v17306_v3, %v14403_v19  ;;  %v14923_v3 = vld [vmem:[#allocation7 + $0xfa0] sm:$0xf] }
 0x211   :  { %8865 = vmatpush.bf16.msra.mxu0 %v13724_v54  ;;  %v12924_v54 = vor.u32 %v16936_v61, %v12923_v9  ;;  %v18231_v9 = vpack.c.bf16 %v3995_v49, %v3995_v49  ;;  %v15283_v49 = vld [vmem:[#allocation7 + $0x1270] sm:$0xf] }
 0x212   :  { %8840 = vmatpush.bf16.msrb.mxu1 %v13044_v41  ;;  %v14484_v41 = vor.u32 %v17326_v17, %v14483_v13  ;;  %v17466_v17 = vld [vmem:[#allocation7 + $0x10b4] sm:$0xf0] }
 0x213   :  { %8878 = vmatpush.bf16.msra.mxu2 %v14044_v25  ;;  %v13244_v25 = vor.u32 %v17016_v12, %v13243_v11  ;;  %v3730_v44 = vpop.f32.mrf.mxu2  ;;  %v15084_v11 = vor.u32 %v17476_v6, %v15083_v56  ;;  %v14964_v6 = vor.u32 %v17446_v0, %v14963_v32 }
 0x214   :  { %8853 = vmatpush.bf16.msrb.mxu3 %v13364_v28  ;;  %v14804_v28 = vor.u32 %v17406_v30, %v14803_v18  ;;  %v15363_v18 = vld [vmem:[#allocation7 + $0x1310] sm:$0xf]  ;;  %v17286_v44 = vld [vmem:[#allocation7 + $0xb14] sm:$0xf0] }
 0x215   :  { %8866 = vmatpush.bf16.msra.mxu0 %v13684_v10  ;;  %v17316_v10 = vld [vmem:[#allocation7 + $0xc04] sm:$0xf0] }
 0x216   :  { %8841 = vmatpush.bf16.msrb.mxu1 %v13004_v24  ;;  %v17821_v24 = vld [vmem:[#allocation5] sm:$0xff]  ;;  %v14444_v59 = vor.u32 %v17316_v10, %v14443_v42 }
 0x217   :  { %8879 = vmatpush.bf16.msra.mxu2 %v14004_v47  ;;  %v18221_v47 = vpack.c.bf16 %v3992_v60, %v3992_v60  ;;  %v14363_v60 = vld [vmem:[#allocation7 + $0xb40] sm:$0xf] }
 0x218   :  { %8854 = vmatpush.bf16.msrb.mxu3 %v13324_v48  ;;  %v614_v48 = vperm.slane %v17821_v24, 6 }
 0x219   :  { %8867 = vmatpush.bf16.msra.mxu0 %v13644_v62  ;;  %v615_v62 = vperm.slane %v17821_v24, 7 }
 0x21a   :  { %8842 = vmatpush.bf16.msrb.mxu1 %v12964_v4  ;;  %v18227_v4 = vpack.c.bf16 %v3994_v2, %v3994_v2  ;;  %v3638_v61 = vadd.f32 %v18197_v50, %v614_v48  ;;  %v14683_v50 = vld [vmem:[#allocation7 + $0xdc0] sm:$0xf]  ;;  %v14324_v2 = vor.u32 %v17286_v44, %v14323_v34  ;;  %v17526_v48 = vld [vmem:[#allocation7 + $0x1294] sm:$0xf0] }
 0x21b   :  { %8880 = vmatpush.bf16.msra.mxu2 %v13964_v45  ;;  %v15403_v45 = vld [vmem:[#allocation7 + $0x1360] sm:$0xf]  ;;  %v3729_v12 = vadd.f32 %v18217_v53, %v615_v62  ;;  %v3754_v53 = vpop.f32.mrf.mxu1  ;;  %v14684_v31 = vor.u32 %v17376_v7, %v14683_v50 }
 0x21c   :  { %8855 = vmatpush.bf16.msrb.mxu3 %v13284_v5  ;;  %v14723_v5 = vld [vmem:[#allocation7 + $0xe10] sm:$0xf]  ;;  %v15404_v13 = vor.u32 %v17556_v1, %v15403_v45  ;;  %v3651_v35 = vadd.f32 %v18199_v40, %v3638_v61 }
 0x21d   :  { %8868 = vmatpush.bf16.msra.mxu0 %v13604_v16  ;;  %v15043_v16 = vld [vmem:[#allocation7 + $0x1090] sm:$0xf]  ;;  %v14724_v30 = vor.u32 %v17386_v8, %v14723_v5  ;;  %v17436_v5 = vld [vmem:[#allocation7 + $0xfc4] sm:$0xf0]  ;;  %v15243_v8 = vld [vmem:[#allocation7 + $0x1220] sm:$0xf] }
 0x21e   :  { %8843 = vmatpush.bf16.msrb.mxu1 %v12924_v54  ;;  %v15044_v23 = vor.u32 %v17466_v17, %v15043_v16  ;;  %v3742_v54 = vadd.f32 %v18213_v46, %v3729_v12  ;;  %v3664_v40 = vadd.f32 %v18195_v22, %v3651_v35  ;;  %v14563_v17 = vld [vmem:[#allocation7 + $0xcd0] sm:$0xf] }
 0x21f   :  { %8881 = vmatpush.bf16.msra.mxu2 %v13924_v21  ;;  %v17296_v21 = vld [vmem:[#allocation7 + $0xb64] sm:$0xf0]  ;;  %v15203_v35 = vld [vmem:[#allocation7 + $0x11d0] sm:$0xf] }
 0x220   :  { %8856 = vmatpush.bf16.msrb.mxu3 %v13244_v25  ;;  %v15364_v25 = vor.u32 %v17546_v20, %v15363_v18  ;;  %v14364_v26 = vor.u32 %v17296_v21, %v14363_v60  ;;  %v3755_v10 = vadd.f32 %v3754_v53, %v3742_v54  ;;  %v3677_v22 = vadd.f32 %v18201_v51, %v3664_v40  ;;  %v17266_v51 = vld [vmem:[#allocation7 + $0xa74] sm:$0xf0]  ;;  %v14883_v60 = vld [vmem:[#allocation7 + $0xf50] sm:$0xf]  ;;  %v14203_v54 = vld [vmem:[#allocation7 + $0xa00] sm:$0xf] }
 0x221   :  { %8869 = vmatpush.bf16.msra.mxu0 %v13564_v38  ;;  %8844 = vmatmul.bf16.vlgmr.msrb.gmra.mxu1 %v18221_v47  ;;  %v14643_v38 = vld [vmem:[#allocation7 + $0xd70] sm:$0xf]  ;;  %v3793_v56 = vpop.f32.mrf.mxu0  ;;  %v17346_v18 = vld [vmem:[#allocation7 + $0xcf4] sm:$0xf0]  ;;  %v14924_v20 = vor.u32 %v17436_v5, %v14923_v3  ;;  %v13165_v5 = vld [vmem:[#allocation7 + $0x208] sm:$0xf0] }
 0x222   :  { %8888 = vmatpush.bf16.msra.mxu1 %v14484_v41  ;;  %v17456_v41 = vld [vmem:[#allocation7 + $0x1064] sm:$0xf0]  ;;  %v14644_v24 = vor.u32 %v17366_v39, %v14643_v38  ;;  %v3767_v45 = vpop.f32.mrf.mxu3  ;;  %v3690_v61 = vadd.f32 %v18209_v14, %v3677_v22  ;;  %v17426_v14 = vld [vmem:[#allocation7 + $0xf74] sm:$0xf0]  ;;  %v3997_v39 = vmax.f32 %v18189_v37, 0.0 }
 0x223   :  { %8857 = vmatmul.bf16.vlgmr.msrb.gmra.mxu3 %v18225_v57  ;;  %8882 = vmatpush.bf16.msra.mxu2 %v13884_v52  ;;  %v15004_v42 = vor.u32 %v17456_v41, %v15003_v27  ;;  %v14283_v52 = vld [vmem:[#allocation7 + $0xaa0] sm:$0xf]  ;;  %v3756_v62 = vpop.f32.mrf.mxu1  ;;  %v3768_v19 = vadd.f32 %v3767_v45, %v3755_v10  ;;  %v17506_v53 = vld [vmem:[#allocation7 + $0x11f4] sm:$0xf0]  ;;  %v17336_v41 = vld [vmem:[#allocation7 + $0xca4] sm:$0xf0]  ;;  %v14884_v44 = vor.u32 %v17426_v14, %v14883_v60 }
 0x224   :  { %8901 = vmatpush.bf16.msra.mxu3 %v14804_v28  ;;  %8870 = vmatmul.bf16.vlgmr.msra.gmra.mxu0 %v18227_v4  ;;  %v15323_v28 = vld [vmem:[#allocation7 + $0x12c0] sm:$0xf]  ;;  %v13445_v14 = vld [vmem:[#allocation7 + $0x438] sm:$0xf0] }
 0x225   :  { %8914 = vmatpush.bf16.msrb.mxu0 %v15124_v55  ;;  %v15324_v46 = vor.u32 %v17536_v33, %v15323_v28  ;;  %v17276_v55 = vld [vmem:[#allocation7 + $0xac4] sm:$0xf0]  ;;  %v3780_v12 = vpop.f32.mrf.mxu2  ;;  %v15763_v28 = vld [vmem:[#allocation7 + $0x1630] sm:$0xf] }
 0x226   :  { %8889 = vmatpush.bf16.msra.mxu1 %v14444_v59  ;;  %8883 = vmatmul.bf16.vlgmr.msra.gmra.mxu2 %v18231_v9  ;;  %v17356_v59 = vld [vmem:[#allocation7 + $0xd44] sm:$0xf0]  ;;  %v14284_v1 = vor.u32 %v17276_v55, %v14283_v52  ;;  %v3781_v16 = vadd.f32 %v3780_v12, %v3768_v19  ;;  %v17081_v52 = vld [vmem:[#allocation7 + $0x4b4] sm:$0xf]  ;;  %v13525_v55 = vld [vmem:[#allocation7 + $0x4d8] sm:$0xf0]  ;;  %v18248_v19 = vpack.c.bf16 %v3997_v39, %v3997_v39 }
 0x227   :  { %8927 = vmatpush.bf16.msrb.mxu2 %v15444_v58  ;;  %v14603_v58 = vld [vmem:[#allocation7 + $0xd20] sm:$0xf]  ;;  %v15683_v12 = vld [vmem:[#allocation7 + $0x1590] sm:$0xf]  ;;  %v17706_v39 = vld [vmem:[#allocation7 + $0x1834] sm:$0xf0] }
 0x228   :  { %8902 = vmatpush.bf16.msra.mxu3 %v14764_v63  ;;  %v15284_v63 = vor.u32 %v17526_v48, %v15283_v49  ;;  %v3794_v7 = vadd.f32 %v3793_v56, %v3781_v16  ;;  %v15163_v49 = vld [vmem:[#allocation7 + $0x1180] sm:$0xf]  ;;  %v13205_v48 = vld [vmem:[#allocation7 + $0x258] sm:$0xf0]  ;;  %v16083_v16 = vld [vmem:[#allocation7 + $0x18b0] sm:$0xf] }
 0x229   :  { %8915 = vmatpush.bf16.msrb.mxu0 %v15084_v11  ;;  %v14604_v11 = vor.u32 %v17356_v59, %v14603_v58  ;;  %v3795_v27 = vpop.f32.mrf.mxu0  ;;  %v15723_v58 = vld [vmem:[#allocation7 + $0x15e0] sm:$0xf]  ;;  %v17636_v59 = vld [vmem:[#allocation7 + $0x1604] sm:$0xf0] }
 0x22a   :  { %8890 = vmatpush.bf16.msra.mxu1 %v14404_v15  ;;  %v14243_v15 = vld [vmem:[#allocation7 + $0xa50] sm:$0xf]  ;;  %v3769_v38 = vpop.f32.mrf.mxu3  ;;  %v15724_v3 = vor.u32 %v17636_v59, %v15723_v58  ;;  %v16971_v27 = vld [vmem:[#allocation7 + $0x144] sm:$0xf] }
 0x22b   :  { %8928 = vmatpush.bf16.msrb.mxu2 %v15404_v13  ;;  %v17516_v13 = vld [vmem:[#allocation7 + $0x1244] sm:$0xf0]  ;;  %v14244_v50 = vor.u32 %v17266_v51, %v14243_v15  ;;  %v3806_v34 = vpop.f32.mrf.mxu1  ;;  %v16003_v38 = vld [vmem:[#allocation7 + $0x1810] sm:$0xf]  ;;  %v16951_v59 = vld [vmem:[#allocation7 + $0xa4] sm:$0xf] }
 0x22c   :  { %8903 = vmatpush.bf16.msra.mxu3 %v14724_v30  ;;  %v3703_v30 = vadd.f32 %v18211_v36, %v3690_v61  ;;  %v15244_v21 = vor.u32 %v17516_v13, %v15243_v8  ;;  %v17646_v36 = vld [vmem:[#allocation7 + $0x1654] sm:$0xf0]  ;;  %v3807_v40 = vadd.f32 %v3806_v34, %v3794_v7  ;;  %v17071_v8 = vld [vmem:[#allocation7 + $0x464] sm:$0xf]  ;;  %v13485_v61 = vld [vmem:[#allocation7 + $0x488] sm:$0xf0] }
 0x22d   :  { %8916 = vmatpush.bf16.msrb.mxu0 %v15044_v23  ;;  %v14564_v23 = vor.u32 %v17346_v18, %v14563_v17  ;;  %v15764_v0 = vor.u32 %v17646_v36, %v15763_v28  ;;  %v17626_v13 = vld [vmem:[#allocation7 + $0x15b4] sm:$0xf0]  ;;  %v17061_v7 = vld [vmem:[#allocation7 + $0x414] sm:$0xf]  ;;  %v13085_v36 = vld [vmem:[#allocation7 + $0x168] sm:$0xf0] }
 0x22e   :  { %8891 = vmatpush.bf16.msra.mxu1 %v14364_v26  ;;  %v14523_v26 = vld [vmem:[#allocation7 + $0xc80] sm:$0xf]  ;;  %v3716_v33 = vadd.f32 %v18203_v43, %v3703_v30  ;;  %v3782_v43 = vpop.f32.mrf.mxu2  ;;  %v3999_v56 = vmax.f32 %v3807_v40, 0.0  ;;  %v17726_v17 = vld [vmem:[#allocation7 + $0x18d4] sm:$0xf0]  ;;  %v13488_v30 = vor.u32 %v17071_v8, %v13485_v61  ;;  %v13088_v40 = vor.u32 %v16971_v27, %v13085_v36 }
 0x22f   :  { %8929 = vmatpush.bf16.msrb.mxu2 %v15364_v25  ;;  %v17256_v25 = vld [vmem:[#allocation7 + $0xa24] sm:$0xf0]  ;;  %v14524_v32 = vor.u32 %v17336_v41, %v14523_v26  ;;  %v16084_v60 = vor.u32 %v17726_v17, %v16083_v16  ;;  %v13448_v26 = vor.u32 %v17061_v7, %v13445_v14  ;;  %v15603_v34 = vld [vmem:[#allocation7 + $0x14f0] sm:$0xf]  ;;  %v15563_v43 = vld [vmem:[#allocation7 + $0x14a0] sm:$0xf] }
 0x230   :  { %8904 = vmatpush.bf16.msra.mxu3 %v14684_v31  ;;  %v3996_v31 = vmax.f32 %v18178_v29, 0.0  ;;  %v14204_v10 = vor.u32 %v17256_v25, %v14203_v54  ;;  %v17496_v29 = vld [vmem:[#allocation7 + $0x11a4] sm:$0xf0]  ;;  %v3998_v22 = vmax.f32 %v3716_v33, 0.0  ;;  %v13405_v33 = vld [vmem:[#allocation7 + $0x3e8] sm:$0xf0] }
 0x231   :  { %8917 = vmatpush.bf16.msrb.mxu0 %v15004_v42  ;;  %v15204_v42 = vor.u32 %v17506_v53, %v15203_v35  ;;  %v15164_v62 = vor.u32 %v17496_v29, %v15163_v49  ;;  %v15643_v35 = vld [vmem:[#allocation7 + $0x1540] sm:$0xf]  ;;  %v17616_v53 = vld [vmem:[#allocation7 + $0x1564] sm:$0xf0]  ;;  %v13365_v49 = vld [vmem:[#allocation7 + $0x398] sm:$0xf0] }
 0x232   :  { %8892 = vmatpush.bf16.msra.mxu1 %v14324_v2  ;;  %v17416_v2 = vld [vmem:[#allocation7 + $0xf24] sm:$0xf0]  ;;  %v18253_v51 = vpack.c.bf16 %v3998_v22, %v3998_v22  ;;  %v15644_v28 = vor.u32 %v17616_v53, %v15643_v35  ;;  %v17586_v8 = vld [vmem:[#allocation7 + $0x1474] sm:$0xf0]  ;;  %v15923_v61 = vld [vmem:[#allocation7 + $0x1770] sm:$0xf] }
 0x233   :  { %8930 = vmatpush.bf16.msrb.mxu2 %v15324_v46  ;;  %v14843_v46 = vld [vmem:[#allocation7 + $0xf00] sm:$0xf]  ;;  %v3808_v15 = vpop.f32.mrf.mxu1  ;;  %v17716_v54 = vld [vmem:[#allocation7 + $0x1884] sm:$0xf0]  ;;  %v16941_v17 = vld [vmem:[#allocation7 + $0x54] sm:$0xf] }
 0x234   :  { %8905 = vmatpush.bf16.msra.mxu3 %v14644_v24  ;;  %v17001_v24 = vld [vmem:[#allocation7 + $0x234] sm:$0xf]  ;;  %v14844_v37 = vor.u32 %v17416_v2, %v14843_v46  ;;  %v16004_v46 = vor.u32 %v17706_v39, %v16003_v38  ;;  %v15483_v14 = vld [vmem:[#allocation7 + $0x1400] sm:$0xf]  ;;  %v17576_v35 = vld [vmem:[#allocation7 + $0x1424] sm:$0xf0] }
 0x235   :  { %8918 = vmatpush.bf16.msrb.mxu0 %v14964_v6  ;;  %v18246_v6 = vpack.c.bf16 %v3996_v31, %v3996_v31  ;;  %v13208_v45 = vor.u32 %v17001_v24, %v13205_v48  ;;  %v17051_v31 = vld [vmem:[#allocation7 + $0x3c4] sm:$0xf]  ;;  %v17596_v48 = vld [vmem:[#allocation7 + $0x14c4] sm:$0xf0]  ;;  %v17161_v53 = vld [vmem:[#allocation7 + $0x734] sm:$0xf] }
 0x236   :  { %8893 = vmatpush.bf16.msra.mxu1 %v14284_v1  ;;  %v16991_v1 = vld [vmem:[#allocation7 + $0x1e4] sm:$0xf]  ;;  %v13245_v39 = vld [vmem:[#allocation7 + $0x2a8] sm:$0xf0] }
 0x237   :  { %8931 = vmatpush.bf16.msrb.mxu2 %v15284_v63  ;;  %v13528_v63 = vor.u32 %v17081_v52, %v13525_v55  ;;  %v13168_v18 = vor.u32 %v16991_v1, %v13165_v5  ;;  %v15963_v55 = vld [vmem:[#allocation7 + $0x17c0] sm:$0xf]  ;;  %v17031_v1 = vld [vmem:[#allocation7 + $0x324] sm:$0xf]  ;;  %v15523_v5 = vld [vmem:[#allocation7 + $0x1450] sm:$0xf] }
 0x238   :  { %8906 = vmatpush.bf16.msra.mxu3 %v14604_v11  ;;  %v18250_v11 = vpack.c.bf16 %v3999_v56, %v3999_v56  ;;  %v17696_v56 = vld [vmem:[#allocation7 + $0x17e4] sm:$0xf0]  ;;  %v16931_v36 = vld [vmem:[#allocation7 + $0x4] sm:$0xf] }
 0x239   :  { %8919 = vmatpush.bf16.msrb.mxu0 %v14924_v20  ;;  %v16981_v20 = vld [vmem:[#allocation7 + $0x194] sm:$0xf]  ;;  %v15964_v22 = vor.u32 %v17696_v56, %v15963_v55  ;;  %v17011_v38 = vld [vmem:[#allocation7 + $0x284] sm:$0xf]  ;;  %v17666_v55 = vld [vmem:[#allocation7 + $0x16f4] sm:$0xf0] }
 0x23a   :  { %8894 = vmatpush.bf16.msra.mxu1 %v14244_v50  ;;  %v13125_v50 = vld [vmem:[#allocation7 + $0x1b8] sm:$0xf0] }
 0x23b   :  { %8932 = vmatpush.bf16.msrb.mxu2 %v15244_v21  ;;  %v15684_v21 = vor.u32 %v17626_v13, %v15683_v12  ;;  %v13128_v25 = vor.u32 %v16981_v20, %v13125_v50  ;;  %v17686_v12 = vld [vmem:[#allocation7 + $0x1794] sm:$0xf0]  ;;  %v18266_v13 = vld [vmem:[#allocation5 + $0x8] sm:$0x3] }
 0x23c   :  { %8907 = vmatpush.bf16.msra.mxu3 %v14564_v23  ;;  %v16043_v23 = vld [vmem:[#allocation7 + $0x1860] sm:$0xf]  ;;  %v12965_v20 = vld [vmem:[#allocation7 + $0x78] sm:$0xf0]  ;;  %v616_v27 = vperm.slane %v18266_v13, 0 }
 0x23d   :  { %8920 = vmatpush.bf16.msrb.mxu0 %v14884_v44  ;;  %v16044_v41 = vor.u32 %v17716_v54, %v16043_v23  ;;  %v17606_v44 = vld [vmem:[#allocation7 + $0x1514] sm:$0xf0]  ;;  %v13845_v23 = vld [vmem:[#allocation7 + $0x758] sm:$0xf0] }
 0x23e   :  { %8895 = vmatpush.bf16.msra.mxu1 %v14204_v10  ;;  %v16961_v10 = vld [vmem:[#allocation7 + $0xf4] sm:$0xf]  ;;  %v15604_v2 = vor.u32 %v17606_v44, %v15603_v34  ;;  %v18258_v29 = vpop.f32.mrf.mxu1  ;;  %v15484_v44 = vor.u32 %v17576_v35, %v15483_v14  ;;  %v14725_v14 = vld [vmem:[#allocation7 + $0xe38] sm:$0xf0] }
 0x23f   :  { %8933 = vmatpush.bf16.msrb.mxu2 %v15204_v42  ;;  %v13408_v42 = vor.u32 %v17051_v31, %v13405_v33  ;;  %v12925_v31 = vld [vmem:[#allocation7 + $0x28] sm:$0xf0] }
 0x240   :  { %8908 = vmatpush.bf16.msra.mxu3 %v14524_v32  ;;  %v13045_v32 = vld [vmem:[#allocation7 + $0x118] sm:$0xf0] }
 0x241   :  { %8896 = vmatmul.bf16.vlgmr.msra.gmra.mxu1 %v18246_v6  ;;  %8921 = vmatpush.bf16.msrb.mxu0 %v14844_v37  ;;  %v18260_v24 = vpop.f32.mrf.mxu0  ;;  %v13048_v37 = vor.u32 %v16961_v10, %v13045_v32  ;;  %v14485_v10 = vld [vmem:[#allocation7 + $0xc58] sm:$0xf0]  ;;  %v17151_v32 = vld [vmem:[#allocation7 + $0x6e4] sm:$0xf] }
 0x242   :  { %8940 = vmatpush.bf16.msrb.mxu1 %v15764_v0  ;;  %v17041_v0 = vld [vmem:[#allocation7 + $0x374] sm:$0xf]  ;;  %v18262_v52 = vpop.f32.mrf.mxu3 }
 0x243   :  { %8909 = vmatmul.bf16.vlgmr.msra.gmra.mxu3 %v18248_v19  ;;  %8934 = vmatpush.bf16.msrb.mxu2 %v15164_v62  ;;  %v13368_v58 = vor.u32 %v17041_v0, %v13365_v49  ;;  %v13805_v0 = vld [vmem:[#allocation7 + $0x708] sm:$0xf0]  ;;  %v15843_v49 = vld [vmem:[#allocation7 + $0x16d0] sm:$0xf] }
 0x244   :  { %8922 = vmatmul.bf16.vlgmr.msrb.gmra.mxu0 %v18253_v51  ;;  %8953 = vmatpush.bf16.msrb.mxu3 %v16084_v60  ;;  %v17021_v60 = vld [vmem:[#allocation7 + $0x2d4] sm:$0xf] }
 0x245   :  { %8966 = vmatpush.bf16.msra.mxu0 %v13208_v45  ;;  %v18264_v62 = vpop.f32.mrf.mxu2  ;;  %v15564_v45 = vor.u32 %v17596_v48, %v15563_v43  ;;  %v12928_v43 = vor.u32 %v16931_v36, %v12925_v31  ;;  %v13248_v48 = vor.u32 %v17011_v38, %v13245_v39  ;;  %v14365_v36 = vld [vmem:[#allocation7 + $0xb68] sm:$0xf0]  ;;  %v17371_v31 = vld [vmem:[#allocation7 + $0xdc4] sm:$0xf]  ;;  %v13685_v38 = vld [vmem:[#allocation7 + $0x618] sm:$0xf0] }
 0x246   :  { %8941 = vmatpush.bf16.msrb.mxu1 %v15724_v3  ;;  %8935 = vmatmul.bf16.vlgmr.msrb.gmra.mxu2 %v18250_v11  ;;  %v13325_v3 = vld [vmem:[#allocation7 + $0x348] sm:$0xf0]  ;;  %v3834_v50 = vpop.f32.mrf.mxu1 }
 0x247   :  { %8979 = vmatpush.bf16.msra.mxu2 %v13528_v63  ;;  %v13005_v63 = vld [vmem:[#allocation7 + $0xc8] sm:$0xf0]  ;;  %v13328_v16 = vor.u32 %v17031_v1, %v13325_v3  ;;  %v17391_v1 = vld [vmem:[#allocation7 + $0xe64] sm:$0xf]  ;;  %v14405_v50 = vld [vmem:[#allocation7 + $0xbb8] sm:$0xf0] }
 0x248   :  { %8954 = vmatpush.bf16.msrb.mxu3 %v16044_v41  ;;  %v13008_v15 = vor.u32 %v16951_v59, %v13005_v63  ;;  %v12968_v41 = vor.u32 %v16941_v17, %v12965_v20  ;;  %v14445_v59 = vld [vmem:[#allocation7 + $0xc08] sm:$0xf0]  ;;  %v13808_v63 = vor.u32 %v17151_v32, %v13805_v0  ;;  %v14165_v20 = vld [vmem:[#allocation7 + $0x9d8] sm:$0xf0] }
 0x249   :  { %8967 = vmatpush.bf16.msra.mxu0 %v13168_v18  ;;  %v15924_v18 = vor.u32 %v17686_v12, %v15923_v61  ;;  %v3860_v7 = vpop.f32.mrf.mxu0  ;;  %v14765_v3 = vld [vmem:[#allocation7 + $0xe88] sm:$0xf0]  ;;  %v15803_v61 = vld [vmem:[#allocation7 + $0x1680] sm:$0xf]  ;;  %v17656_v12 = vld [vmem:[#allocation7 + $0x16a4] sm:$0xf0] }
 0x24a   :  { %8942 = vmatpush.bf16.msrb.mxu1 %v15684_v21  ;;  %v13285_v21 = vld [vmem:[#allocation7 + $0x2f8] sm:$0xf0]  ;;  %v3821_v54 = vpop.f32.mrf.mxu3  ;;  %v14768_v17 = vor.u32 %v17391_v1, %v14765_v3  ;;  %v17381_v7 = vld [vmem:[#allocation7 + $0xe14] sm:$0xf]  ;;  %v17271_v1 = vld [vmem:[#allocation7 + $0xaa4] sm:$0xf] }
 0x24b   :  { %8980 = vmatpush.bf16.msra.mxu2 %v13488_v30  ;;  %v15524_v30 = vor.u32 %v17586_v8, %v15523_v5  ;;  %v17141_v5 = vld [vmem:[#allocation7 + $0x694] sm:$0xf]  ;;  %v13765_v8 = vld [vmem:[#allocation7 + $0x6b8] sm:$0xf0]  ;;  %v17231_v54 = vld [vmem:[#allocation7 + $0x964] sm:$0xf] }
 0x24c   :  { %8955 = vmatpush.bf16.msrb.mxu3 %v16004_v46  ;;  %v17401_v46 = vld [vmem:[#allocation7 + $0xeb4] sm:$0xf]  ;;  %v14045_v3 = vld [vmem:[#allocation7 + $0x8e8] sm:$0xf0] }
 0x24d   :  { %8968 = vmatpush.bf16.msra.mxu0 %v13128_v25  ;;  %v15883_v25 = vld [vmem:[#allocation7 + $0x1720] sm:$0xf]  ;;  %v3847_v34 = vpop.f32.mrf.mxu2 }
 0x24e   :  { %8943 = vmatpush.bf16.msrb.mxu1 %v15644_v28  ;;  %v13288_v28 = vor.u32 %v17021_v60, %v13285_v21  ;;  %v13768_v21 = vor.u32 %v17141_v5, %v13765_v8 }
 0x24f   :  { %8981 = vmatpush.bf16.msra.mxu2 %v13448_v26  ;;  %v17676_v26 = vld [vmem:[#allocation7 + $0x1744] sm:$0xf0] }
 0x250   :  { %8956 = vmatpush.bf16.msrb.mxu3 %v15964_v22  ;;  %v15884_v33 = vor.u32 %v17676_v26, %v15883_v25  ;;  %v15844_v22 = vor.u32 %v17666_v55, %v15843_v49  ;;  %v14125_v25 = vld [vmem:[#allocation7 + $0x988] sm:$0xf0]  ;;  %v14325_v49 = vld [vmem:[#allocation7 + $0xb18] sm:$0xf0] }
 0x251   :  { %8969 = vmatpush.bf16.msra.mxu0 %v13088_v40  ;;  %v17321_v40 = vld [vmem:[#allocation7 + $0xc34] sm:$0xf]  ;;  %v14128_v34 = vor.u32 %v17231_v54, %v14125_v25  ;;  %v14565_v25 = vld [vmem:[#allocation7 + $0xcf8] sm:$0xf0] }
 0x252   :  { %8944 = vmatpush.bf16.msrb.mxu1 %v15604_v2  ;;  %v14805_v2 = vld [vmem:[#allocation7 + $0xed8] sm:$0xf0]  ;;  %v14488_v56 = vor.u32 %v17321_v40, %v14485_v10  ;;  %v17341_v54 = vld [vmem:[#allocation7 + $0xcd4] sm:$0xf] }
 0x253   :  { %8982 = vmatpush.bf16.msra.mxu2 %v13408_v42  ;;  %v13848_v42 = vor.u32 %v17161_v53, %v13845_v23  ;;  %v17131_v53 = vld [vmem:[#allocation7 + $0x644] sm:$0xf]  ;;  %v13725_v23 = vld [vmem:[#allocation7 + $0x668] sm:$0xf0] }
 0x254   :  { %8957 = vmatpush.bf16.msrb.mxu3 %v15924_v18  ;;  %v17301_v18 = vld [vmem:[#allocation7 + $0xb94] sm:$0xf] }
 0x255   :  { %8970 = vmatpush.bf16.msra.mxu0 %v13048_v37  ;;  %v14808_v37 = vor.u32 %v17401_v46, %v14805_v2  ;;  %v14408_v26 = vor.u32 %v17301_v18, %v14405_v50  ;;  %v17221_v46 = vld [vmem:[#allocation7 + $0x914] sm:$0xf]  ;;  %v14085_v2 = vld [vmem:[#allocation7 + $0x938] sm:$0xf0] }
 0x256   :  { %8945 = vmatpush.bf16.msrb.mxu1 %v15564_v45  ;;  %v3820_v45 = vadd.f32 %v18262_v52, %v616_v27  ;;  %v17241_v52 = vld [vmem:[#allocation7 + $0x9b4] sm:$0xf]  ;;  %v14728_v27 = vor.u32 %v17381_v7, %v14725_v14  ;;  %v13605_v18 = vld [vmem:[#allocation7 + $0x578] sm:$0xf0] }
 0x257   :  { %8983 = vmatpush.bf16.msra.mxu2 %v13368_v58  ;;  %v17311_v58 = vld [vmem:[#allocation7 + $0xbe4] sm:$0xf]  ;;  %v14168_v35 = vor.u32 %v17241_v52, %v14165_v20  ;;  %v17261_v20 = vld [vmem:[#allocation7 + $0xa54] sm:$0xf]  ;;  %v14245_v50 = vld [vmem:[#allocation7 + $0xa78] sm:$0xf0] }
 0x258   :  { %8958 = vmatpush.bf16.msrb.mxu3 %v15884_v33  ;;  %v3833_v60 = vadd.f32 %v18258_v29, %v3820_v45  ;;  %v17291_v29 = vld [vmem:[#allocation7 + $0xb44] sm:$0xf]  ;;  %v14685_v33 = vld [vmem:[#allocation7 + $0xde8] sm:$0xf0]  ;;  %v17201_v14 = vld [vmem:[#allocation7 + $0x874] sm:$0xf] }
 0x259   :  { %8971 = vmatpush.bf16.msra.mxu0 %v13008_v15  ;;  %v15804_v15 = vor.u32 %v17656_v12, %v15803_v61  ;;  %v14368_v39 = vor.u32 %v17291_v29, %v14365_v36  ;;  %v14688_v40 = vor.u32 %v17371_v31, %v14685_v33  ;;  %v14285_v61 = vld [vmem:[#allocation7 + $0xac8] sm:$0xf0]  ;;  %v17351_v12 = vld [vmem:[#allocation7 + $0xd24] sm:$0xf]  ;;  %v17481_v31 = vld [vmem:[#allocation7 + $0x1134] sm:$0xf] }
 0x25a   :  { %8946 = vmatpush.bf16.msrb.mxu1 %v15524_v30  ;;  %v18270_v30 = vpop.f32.mrf.mxu2  ;;  %v15125_v33 = vld [vmem:[#allocation7 + $0x1158] sm:$0xf0] }
 0x25b   :  { %8984 = vmatpush.bf16.msra.mxu2 %v13328_v16  ;;  %v14448_v16 = vor.u32 %v17311_v58, %v14445_v59  ;;  %v17111_v58 = vld [vmem:[#allocation7 + $0x5a4] sm:$0xf]  ;;  %v13645_v59 = vld [vmem:[#allocation7 + $0x5c8] sm:$0xf0] }
 0x25c   :  { %8959 = vmatpush.bf16.msrb.mxu3 %v15844_v22  ;;  %v13648_v8 = vor.u32 %v17111_v58, %v13645_v59 }
 0x25d   :  { %8972 = vmatpush.bf16.msra.mxu0 %v12968_v41  ;;  %v3846_v41 = vadd.f32 %v18264_v62, %v3833_v60  ;;  %v14288_v60 = vor.u32 %v17271_v1, %v14285_v61  ;;  %v17711_v61 = vld [vmem:[#allocation7 + $0x1864] sm:$0xf] }
 0x25e   :  { %8947 = vmatpush.bf16.msrb.mxu1 %v15484_v44  ;;  %v17121_v44 = vld [vmem:[#allocation7 + $0x5f4] sm:$0xf]  ;;  %v3884_v62 = vpop.f32.mrf.mxu1 }
 0x25f   :  { %8985 = vmatpush.bf16.msra.mxu2 %v13288_v28  ;;  %v13728_v28 = vor.u32 %v17131_v53, %v13725_v23  ;;  %v3859_v32 = vadd.f32 %v18260_v24, %v3846_v41  ;;  %v13688_v0 = vor.u32 %v17121_v44, %v13685_v38  ;;  %v17211_v24 = vld [vmem:[#allocation7 + $0x8c4] sm:$0xf]  ;;  %v14248_v44 = vor.u32 %v17261_v20, %v14245_v50  ;;  %v17621_v50 = vld [vmem:[#allocation7 + $0x1594] sm:$0xf] }
 0x260   :  { %8960 = vmatpush.bf16.msrb.mxu3 %v15804_v15  ;;  %v14605_v15 = vld [vmem:[#allocation7 + $0xd48] sm:$0xf0]  ;;  %v17091_v41 = vld [vmem:[#allocation7 + $0x504] sm:$0xf]  ;;  %v14568_v38 = vor.u32 %v17341_v54, %v14565_v25  ;;  %v617_v20 = vperm.slane %v18266_v13, 1 }
 0x261   :  { %8973 = vmatpush.bf16.msra.mxu0 %v12928_v43  ;;  %v17361_v43 = vld [vmem:[#allocation7 + $0xd74] sm:$0xf]  ;;  %v18277_v55 = vpop.f32.mrf.mxu0  ;;  %v17451_v25 = vld [vmem:[#allocation7 + $0x1044] sm:$0xf] }
 0x262   :  { %8992 = vmatpush.bf16.msra.mxu1 %v13848_v42  ;;  %v17281_v42 = vld [vmem:[#allocation7 + $0xaf4] sm:$0xf]  ;;  %v3899_v10 = vpop.f32.mrf.mxu2 }
 0x263   :  { %8986 = vmatpush.bf16.msra.mxu2 %v13248_v48  ;;  %v14645_v48 = vld [vmem:[#allocation7 + $0xd98] sm:$0xf0]  ;;  %v14328_v45 = vor.u32 %v17281_v42, %v14325_v49  ;;  %v13965_v42 = vld [vmem:[#allocation7 + $0x848] sm:$0xf0] }
 0x264   :  { %8974 = vmatmul.bf16.vlgmr.msra.gmra.mxu0 %v18221_v47  ;;  %9005 = vmatpush.bf16.msra.mxu3 %v14168_v35  ;;  %v14005_v35 = vld [vmem:[#allocation7 + $0x898] sm:$0xf0] }
 0x265   :  { %9018 = vmatpush.bf16.msrb.mxu0 %v14488_v56  ;;  %v14088_v56 = vor.u32 %v17221_v46, %v14085_v2  ;;  %v14008_v29 = vor.u32 %v17201_v14, %v14005_v35  ;;  %v17331_v46 = vld [vmem:[#allocation7 + $0xc84] sm:$0xf]  ;;  %v14525_v2 = vld [vmem:[#allocation7 + $0xca8] sm:$0xf0]  ;;  %v15765_v49 = vld [vmem:[#allocation7 + $0x1658] sm:$0xf0] }
 0x266   :  { %8993 = vmatpush.bf16.msra.mxu1 %v13808_v63  ;;  %8987 = vmatmul.bf16.vlgmr.msra.gmra.mxu2 %v18225_v57  ;;  %v14648_v63 = vor.u32 %v17361_v43, %v14645_v48  ;;  %v17721_v43 = vld [vmem:[#allocation7 + $0x18b4] sm:$0xf]  ;;  %v16085_v48 = vld [vmem:[#allocation7 + $0x18d8] sm:$0xf0]  ;;  %v14528_v59 = vor.u32 %v17331_v46, %v14525_v2 }
 0x267   :  { %9031 = vmatpush.bf16.msrb.mxu2 %v14808_v37  ;;  %v3871_v37 = vpop.f32.mrf.mxu3  ;;  %v15685_v35 = vld [vmem:[#allocation7 + $0x15b8] sm:$0xf0]  ;;  %v17681_v2 = vld [vmem:[#allocation7 + $0x1774] sm:$0xf] }
 0x268   :  { %9006 = vmatpush.bf16.msra.mxu3 %v14128_v34  ;;  %v3872_v22 = vadd.f32 %v3871_v37, %v3859_v32  ;;  %v17251_v34 = vld [vmem:[#allocation7 + $0xa04] sm:$0xf]  ;;  %v17641_v32 = vld [vmem:[#allocation7 + $0x1634] sm:$0xf]  ;;  %v15085_v37 = vld [vmem:[#allocation7 + $0x1108] sm:$0xf0]  ;;  %v15688_v13 = vor.u32 %v17621_v50, %v15685_v35 }
 0x269   :  { %9019 = vmatpush.bf16.msrb.mxu0 %v14448_v16  ;;  %v14048_v16 = vor.u32 %v17211_v24, %v14045_v3  ;;  %v15768_v1 = vor.u32 %v17641_v32, %v15765_v49  ;;  %v16088_v24 = vor.u32 %v17721_v43, %v16085_v48  ;;  %v17631_v3 = vld [vmem:[#allocation7 + $0x15e4] sm:$0xf]  ;;  %v15925_v32 = vld [vmem:[#allocation7 + $0x1798] sm:$0xf0]  ;;  %v14925_v43 = vld [vmem:[#allocation7 + $0xfc8] sm:$0xf0] }
 0x26a   :  { %8994 = vmatpush.bf16.msra.mxu1 %v13768_v21  ;;  %v3885_v5 = vadd.f32 %v3884_v62, %v3872_v22  ;;  %v14608_v21 = vor.u32 %v17351_v12, %v14605_v15  ;;  %v18280_v7 = vpop.f32.mrf.mxu2  ;;  %v16045_v12 = vld [vmem:[#allocation7 + $0x1888] sm:$0xf0]  ;;  %v17431_v49 = vld [vmem:[#allocation7 + $0xfa4] sm:$0xf]  ;;  %v13211_v35 = vld [vmem:[#allocation7 + $0x238] sm:$0xf] }
 0x26b   :  { %9032 = vmatpush.bf16.msrb.mxu2 %v14768_v17  ;;  %v17101_v17 = vld [vmem:[#allocation7 + $0x554] sm:$0xf] }
 0x26c   :  { %9007 = vmatpush.bf16.msra.mxu3 %v14088_v56  ;;  %v3898_v52 = vadd.f32 %v18270_v30, %v3885_v5  ;;  %v13608_v23 = vor.u32 %v17101_v17, %v13605_v18  ;;  %v17471_v56 = vld [vmem:[#allocation7 + $0x10e4] sm:$0xf]  ;;  %v15045_v17 = vld [vmem:[#allocation7 + $0x10b8] sm:$0xf0] }
 0x26d   :  { %9020 = vmatpush.bf16.msrb.mxu0 %v14408_v26  ;;  %v3886_v26 = vpop.f32.mrf.mxu1  ;;  %v15088_v5 = vor.u32 %v17471_v56, %v15085_v37  ;;  %v17171_v18 = vld [vmem:[#allocation7 + $0x784] sm:$0xf]  ;;  %v15928_v56 = vor.u32 %v17681_v2, %v15925_v32  ;;  %v17157_v2 = vld [vmem:[#allocation7 + $0x70c] sm:$0xf0]  ;;  %v14131_v32 = vld [vmem:[#allocation7 + $0x968] sm:$0xf] }
 0x26e   :  { %8995 = vmatpush.bf16.msra.mxu1 %v13728_v28  ;;  %v4000_v53 = vmax.f32 %v3898_v52, 0.0  ;;  %v13565_v28 = vld [vmem:[#allocation7 + $0x528] sm:$0xf0]  ;;  %v17591_v37 = vld [vmem:[#allocation7 + $0x14a4] sm:$0xf] }
 0x26f   :  { %9033 = vmatpush.bf16.msrb.mxu2 %v14728_v27  ;;  %v3912_v27 = vpop.f32.mrf.mxu0  ;;  %v3873_v30 = vpop.f32.mrf.mxu3  ;;  %v13568_v10 = vor.u32 %v17091_v41, %v13565_v28  ;;  %v13885_v52 = vld [vmem:[#allocation7 + $0x7a8] sm:$0xf0]  ;;  %v17691_v28 = vld [vmem:[#allocation7 + $0x17c4] sm:$0xf] }
 0x270   :  { %9008 = vmatpush.bf16.msra.mxu3 %v14048_v16  ;;  %v18282_v36 = vpack.c.bf16 %v4000_v53, %v4000_v53  ;;  %v17461_v16 = vld [vmem:[#allocation7 + $0x1094] sm:$0xf]  ;;  %v13888_v54 = vor.u32 %v17171_v18, %v13885_v52  ;;  %v15005_v26 = vld [vmem:[#allocation7 + $0x1068] sm:$0xf0]  ;;  %v3911_v30 = vadd.f32 %v18277_v55, %v617_v20  ;;  %v15605_v55 = vld [vmem:[#allocation7 + $0x1518] sm:$0xf0] }
 0x271   :  { %9021 = vmatpush.bf16.msrb.mxu0 %v14368_v39  ;;  %v14205_v39 = vld [vmem:[#allocation7 + $0xa28] sm:$0xf0]  ;;  %v15048_v14 = vor.u32 %v17461_v16, %v15045_v17  ;;  %v17701_v53 = vld [vmem:[#allocation7 + $0x1814] sm:$0xf]  ;;  %v15525_v16 = vld [vmem:[#allocation7 + $0x1478] sm:$0xf0] }
 0x272   :  { %8996 = vmatpush.bf16.msra.mxu1 %v13688_v0  ;;  %v15128_v0 = vor.u32 %v17481_v31, %v15125_v33  ;;  %v14208_v58 = vor.u32 %v17251_v34, %v14205_v39  ;;  %v3925_v22 = vpop.f32.mrf.mxu2  ;;  %v15645_v41 = vld [vmem:[#allocation7 + $0x1568] sm:$0xf0]  ;;  %v15008_v33 = vor.u32 %v17451_v25, %v15005_v26  ;;  %v17661_v17 = vld [vmem:[#allocation7 + $0x16d4] sm:$0xf]  ;;  %v15845_v18 = vld [vmem:[#allocation7 + $0x16f8] sm:$0xf0] }
 0x273   :  { %9034 = vmatpush.bf16.msrb.mxu2 %v14688_v40  ;;  %v17191_v40 = vld [vmem:[#allocation7 + $0x824] sm:$0xf]  ;;  %8948 = vmatmul.bf16.vlgmr.msrb.gmra.mxu1 %v18282_v36  ;;  %v15965_v31 = vld [vmem:[#allocation7 + $0x17e8] sm:$0xf0] }
 0x274   :  { %9009 = vmatpush.bf16.msra.mxu3 %v14008_v29  ;;  %v13968_v62 = vor.u32 %v17191_v40, %v13965_v42  ;;  %v17611_v29 = vld [vmem:[#allocation7 + $0x1544] sm:$0xf]  ;;  %v15968_v40 = vor.u32 %v17691_v28, %v15965_v31  ;;  %v17601_v42 = vld [vmem:[#allocation7 + $0x14f4] sm:$0xf]  ;;  %v15485_v25 = vld [vmem:[#allocation7 + $0x1428] sm:$0xf0] }
 0x275   :  { %9022 = vmatpush.bf16.msrb.mxu0 %v14328_v45  ;;  %v17181_v45 = vld [vmem:[#allocation7 + $0x7d4] sm:$0xf]  ;;  %v15648_v39 = vor.u32 %v17611_v29, %v15645_v41  ;;  %v15608_v48 = vor.u32 %v17601_v42, %v15605_v55  ;;  %v17671_v22 = vld [vmem:[#allocation7 + $0x1724] sm:$0xf]  ;;  %v13851_v29 = vld [vmem:[#allocation7 + $0x738] sm:$0xf] }
 0x276   :  { %8997 = vmatpush.bf16.msra.mxu1 %v13648_v8  ;;  %v15725_v8 = vld [vmem:[#allocation7 + $0x1608] sm:$0xf0]  ;;  %v17651_v26 = vld [vmem:[#allocation7 + $0x1684] sm:$0xf]  ;;  %v14171_v28 = vld [vmem:[#allocation7 + $0x9b8] sm:$0xf] }
 0x277   :  { %9035 = vmatpush.bf16.msrb.mxu2 %v14648_v63  ;;  %v13925_v63 = vld [vmem:[#allocation7 + $0x7f8] sm:$0xf0]  ;;  %v17247_v31 = vld [vmem:[#allocation7 + $0x9dc] sm:$0xf0]  ;;  %v13811_v55 = vld [vmem:[#allocation7 + $0x6e8] sm:$0xf] }
 0x278   :  { %9010 = vmatpush.bf16.msra.mxu3 %v13968_v62  ;;  %v13928_v15 = vor.u32 %v17181_v45, %v13925_v63  ;;  %v14928_v45 = vor.u32 %v17431_v49, %v14925_v43  ;;  %v17237_v49 = vld [vmem:[#allocation7 + $0x98c] sm:$0xf0]  ;;  %v17561_v43 = vld [vmem:[#allocation7 + $0x13b4] sm:$0xf] }
 0x279   :  { %9023 = vmatpush.bf16.msrb.mxu0 %v14288_v60  ;;  %v15728_v60 = vor.u32 %v17631_v3, %v15725_v8 }
 0x27a   :  { %8998 = vmatpush.bf16.msra.mxu1 %v13608_v23  ;;  %v16005_v23 = vld [vmem:[#allocation7 + $0x1838] sm:$0xf0] }
 0x27b   :  { %9036 = vmatpush.bf16.msrb.mxu2 %v14608_v21  ;;  %v16048_v21 = vor.u32 %v17711_v61, %v16045_v12  ;;  %v16008_v27 = vor.u32 %v17701_v53, %v16005_v23  ;;  %v17581_v61 = vld [vmem:[#allocation7 + $0x1454] sm:$0xf]  ;;  %v17007_v53 = vld [vmem:[#allocation7 + $0x25c] sm:$0xf0]  ;;  %v17571_v23 = vld [vmem:[#allocation7 + $0x1404] sm:$0xf] }
 0x27c   :  { %9011 = vmatpush.bf16.msra.mxu3 %v13928_v15  ;;  %v15528_v50 = vor.u32 %v17581_v61, %v15525_v16  ;;  %v13212_v41 = vor.u32 %v17007_v53, %v13211_v35  ;;  %v15405_v61 = vld [vmem:[#allocation7 + $0x1388] sm:$0xf0]  ;;  %v18296_v16 = vld [vmem:[#allocation8] sm:$0xff]  ;;  %v17217_v35 = vld [vmem:[#allocation7 + $0x8ec] sm:$0xf0] }
 0x27d   :  { %9024 = vmatpush.bf16.msrb.mxu0 %v14248_v44  ;;  %v17441_v44 = vld [vmem:[#allocation7 + $0xff4] sm:$0xf] }
 0x27e   :  { %8999 = vmatpush.bf16.msra.mxu1 %v13568_v10  ;;  %v3949_v34 = vpop.f32.mrf.mxu1  ;;  %v3924_v10 = vadd.f32 %v18280_v7, %v3911_v30  ;;  %v15885_v7 = vld [vmem:[#allocation7 + $0x1748] sm:$0xf0]  ;;  %v17167_v30 = vld [vmem:[#allocation7 + $0x75c] sm:$0xf0]  ;;  %v17541_v53 = vld [vmem:[#allocation7 + $0x1314] sm:$0xf] }
 0x27f   :  { %9037 = vmatpush.bf16.msrb.mxu2 %v14568_v38  ;;  %v14965_v38 = vld [vmem:[#allocation7 + $0x1018] sm:$0xf0]  ;;  %v15888_v8 = vor.u32 %v17671_v22, %v15885_v7  ;;  %v13852_v42 = vor.u32 %v17167_v30, %v13851_v29  ;;  %v14132_v22 = vor.u32 %v17237_v49, %v14131_v32  ;;  %v13971_v49 = vld [vmem:[#allocation7 + $0x828] sm:$0xf] }
 0x280   :  { %9012 = vmatpush.bf16.msra.mxu3 %v13888_v54 }
 0x281   :  { %9025 = vmatpush.bf16.msrb.mxu0 %v14208_v58  ;;  %v3962_v46 = vpop.f32.mrf.mxu0 }
 0x282   :  { %9044 = vmatpush.bf16.msrb.mxu1 %v15128_v0  ;;  %v3936_v62 = vpop.f32.mrf.mxu3  ;;  %v14968_v0 = vor.u32 %v17441_v44, %v14965_v38  ;;  %v13171_v38 = vld [vmem:[#allocation7 + $0x1e8] sm:$0xf] }
 0x283   :  { %9038 = vmatpush.bf16.msrb.mxu2 %v14528_v59  ;;  %9000 = vmatmul.bf16.vlgmr.msra.gmra.mxu1 %v18227_v4  ;;  %v3937_v58 = vadd.f32 %v3936_v62, %v3924_v10  ;;  %v15565_v59 = vld [vmem:[#allocation7 + $0x14c8] sm:$0xf0] }
 0x284   :  { %9026 = vmatmul.bf16.vlgmr.msrb.gmra.mxu0 %v18246_v6 }
 0x285   :  { %9070 = vmatpush.bf16.msra.mxu0 %v15768_v1  ;;  %v17421_v1 = vld [vmem:[#allocation7 + $0xf54] sm:$0xf]  ;;  %v3950_v12 = vadd.f32 %v3949_v34, %v3937_v58  ;;  %v15488_v34 = vor.u32 %v17571_v23, %v15485_v25  ;;  %v15365_v23 = vld [vmem:[#allocation7 + $0x1338] sm:$0xf0]  ;;  %v13051_v25 = vld [vmem:[#allocation7 + $0xf8] sm:$0xf] }
 0x286   :  { %9045 = vmatpush.bf16.msrb.mxu1 %v15088_v5  ;;  %9039 = vmatmul.bf16.vlgmr.msrb.gmra.mxu2 %v18248_v19  ;;  %v3951_v63 = vpop.f32.mrf.mxu1  ;;  %v15568_v5 = vor.u32 %v17591_v37, %v15565_v59  ;;  %v16987_v37 = vld [vmem:[#allocation7 + $0x1bc] sm:$0xf0]  ;;  %v13812_v59 = vor.u32 %v17157_v2, %v13811_v55  ;;  %v15368_v30 = vor.u32 %v17541_v53, %v15365_v23 }
 0x287   :  { %9083 = vmatpush.bf16.msra.mxu2 %v16088_v24  ;;  %v14885_v24 = vld [vmem:[#allocation7 + $0xf78] sm:$0xf0]  ;;  %v3963_v54 = vadd.f32 %v3962_v46, %v3950_v12  ;;  %v14172_v46 = vor.u32 %v17247_v31, %v14171_v28  ;;  %v17147_v63 = vld [vmem:[#allocation7 + $0x6bc] sm:$0xf0]  ;;  %v13091_v12 = vld [vmem:[#allocation7 + $0x148] sm:$0xf] }
 0x288   :  { %v14888_v20 = vor.u32 %v17421_v1, %v14885_v24  ;;  %v14091_v1 = vld [vmem:[#allocation7 + $0x918] sm:$0xf]  ;;  %v17127_v28 = vld [vmem:[#allocation7 + $0x61c] sm:$0xf0] }
 0x289   :  { %9071 = vmatpush.bf16.msra.mxu0 %v15728_v60  ;;  %v3975_v3 = vpop.f32.mrf.mxu2  ;;  %v3964_v15 = vpop.f32.mrf.mxu0  ;;  %v17411_v60 = vld [vmem:[#allocation7 + $0xf04] sm:$0xf]  ;;  %v14011_v31 = vld [vmem:[#allocation7 + $0x878] sm:$0xf]  ;;  %v17327_v53 = vld [vmem:[#allocation7 + $0xc5c] sm:$0xf0] }
 0x28a   :  { %9046 = vmatpush.bf16.msrb.mxu1 %v15048_v14  ;;  %v3938_v52 = vpop.f32.mrf.mxu3  ;;  %v15848_v14 = vor.u32 %v17661_v17, %v15845_v18  ;;  %v16977_v15 = vld [vmem:[#allocation7 + $0x16c] sm:$0xf0] }
 0x28b   :  { %9084 = vmatpush.bf16.msra.mxu2 %v16048_v21  ;;  %v14845_v21 = vld [vmem:[#allocation7 + $0xf28] sm:$0xf0] }
 0x28d   :  { %9072 = vmatpush.bf16.msra.mxu0 %v15688_v13  ;;  %v15805_v13 = vld [vmem:[#allocation7 + $0x16a8] sm:$0xf0] }
 0x28e   :  { %9047 = vmatpush.bf16.msrb.mxu1 %v15008_v33  ;;  %v15808_v44 = vor.u32 %v17651_v26, %v15805_v13  ;;  %v16967_v26 = vld [vmem:[#allocation7 + $0x11c] sm:$0xf0]  ;;  %v4816_v13 = vperm.slane %v18296_v16, 0 }
 0x28f   :  { %9085 = vmatpush.bf16.msra.mxu2 %v16008_v27  ;;  %v14848_v27 = vor.u32 %v17411_v60, %v14845_v21  ;;  %v13731_v60 = vld [vmem:[#allocation7 + $0x648] sm:$0xf]  ;;  %v17137_v21 = vld [vmem:[#allocation7 + $0x66c] sm:$0xf0] }
 0x291   :  { %9073 = vmatpush.bf16.msra.mxu0 %v15648_v39  ;;  %v3977_v33 = vpop.f32.mrf.mxu2  ;;  %v16997_v39 = vld [vmem:[#allocation7 + $0x20c] sm:$0xf0] }
 0x292   :  { %9048 = vmatpush.bf16.msrb.mxu1 %v14968_v0  ;;  %v3988_v10 = vpop.f32.mrf.mxu3  ;;  %v13172_v0 = vor.u32 %v16997_v39, %v13171_v38  ;;  %v17531_v38 = vld [vmem:[#allocation7 + $0x12c4] sm:$0xf]  ;;  %v15325_v39 = vld [vmem:[#allocation7 + $0x12e8] sm:$0xf0] }
 0x293   :  { %9086 = vmatpush.bf16.msra.mxu2 %v15968_v40  ;;  %v3976_v40 = vadd.f32 %v3975_v3, %v3963_v54  ;;  %v15328_v32 = vor.u32 %v17531_v38, %v15325_v39  ;;  %v17567_v39 = vld [vmem:[#allocation7 + $0x13dc] sm:$0xf0] }
 0x295   :  { %9074 = vmatpush.bf16.msra.mxu0 %v15608_v48  ;;  %v3989_v62 = vadd.f32 %v3988_v10, %v3976_v40  ;;  %v15445_v48 = vld [vmem:[#allocation7 + $0x13d8] sm:$0xf0]  ;;  %v13011_v40 = vld [vmem:[#allocation7 + $0xa8] sm:$0xf] }
 0x296   :  { %9049 = vmatpush.bf16.msrb.mxu1 %v14928_v45  ;;  %v15448_v7 = vor.u32 %v17561_v43, %v15445_v48  ;;  %v13771_v45 = vld [vmem:[#allocation7 + $0x698] sm:$0xf] }
 0x297   :  { %9087 = vmatpush.bf16.msra.mxu2 %v15928_v56  ;;  %v13131_v56 = vld [vmem:[#allocation7 + $0x198] sm:$0xf]  ;;  %v4001_v58 = vmax.f32 %v3989_v62, 0.0  ;;  %v13772_v17 = vor.u32 %v17147_v63, %v13771_v45  ;;  %v13651_v62 = vld [vmem:[#allocation7 + $0x5a8] sm:$0xf] }
 0x298   :  { %v13132_v3 = vor.u32 %v16987_v37, %v13131_v56  ;;  %v17197_v56 = vld [vmem:[#allocation7 + $0x84c] sm:$0xf0]  ;;  %v17521_v37 = vld [vmem:[#allocation7 + $0x1274] sm:$0xf] }
 0x299   :  { %9075 = vmatpush.bf16.msra.mxu0 %v15568_v5  ;;  %v18292_v24 = vpack.c.bf16 %v4001_v58, %v4001_v58  ;;  %v17227_v5 = vld [vmem:[#allocation7 + $0x93c] sm:$0xf0]  ;;  %v15285_v58 = vld [vmem:[#allocation7 + $0x1298] sm:$0xf0] }
 0x29a   :  { %9050 = vmatpush.bf16.msrb.mxu1 %v14888_v20  ;;  %v3990_v18 = vpop.f32.mrf.mxu3  ;;  %v14092_v52 = vor.u32 %v17227_v5, %v14091_v1  ;;  %v15288_v5 = vor.u32 %v17521_v37, %v15285_v58  ;;  %v17557_v37 = vld [vmem:[#allocation7 + $0x138c] sm:$0xf0]  ;;  %v13531_v58 = vld [vmem:[#allocation7 + $0x4b8] sm:$0xf] }
 0x29b   :  { %9088 = vmatpush.bf16.msra.mxu2 %v15888_v8  ;;  %v17551_v8 = vld [vmem:[#allocation7 + $0x1364] sm:$0xf]  ;;  %8961 = vmatmul.bf16.vlgmr.msrb.gmra.mxu3 %v18292_v24 }
 0x29c   :  { %9057 = vmatpush.bf16.msrb.mxu3 %v15448_v7  ;;  %v15408_v20 = vor.u32 %v17551_v8, %v15405_v61  ;;  %v16947_v7 = vld [vmem:[#allocation7 + $0x7c] sm:$0xf0]  ;;  %v13611_v8 = vld [vmem:[#allocation7 + $0x558] sm:$0xf] }
 0x29d   :  { %9076 = vmatpush.bf16.msra.mxu0 %v15528_v50  ;;  %v14051_v50 = vld [vmem:[#allocation7 + $0x8c8] sm:$0xf]  ;;  %v17107_v61 = vld [vmem:[#allocation7 + $0x57c] sm:$0xf0] }
 0x29e   :  { %9051 = vmatpush.bf16.msrb.mxu1 %v14848_v27  ;;  %v8845_v54 = vpop.f32.mrf.mxu1  ;;  %v13732_v27 = vor.u32 %v17137_v21, %v13731_v60  ;;  %v14052_v29 = vor.u32 %v17217_v35, %v14051_v50  ;;  %v15245_v60 = vld [vmem:[#allocation7 + $0x1248] sm:$0xf0]  ;;  %v12931_v21 = vld [vmem:[#allocation7 + $0x8] sm:$0xf]  ;;  %v16937_v50 = vld [vmem:[#allocation7 + $0x2c] sm:$0xf0] }
 0x29f   :  { %9089 = vmatpush.bf16.msra.mxu2 %v15848_v14  ;;  %v13092_v14 = vor.u32 %v16977_v15, %v13091_v12  ;;  %v8846_v10 = vadd.f32 %v8845_v54, %v4816_v13  ;;  %v13931_v12 = vld [vmem:[#allocation7 + $0x7d8] sm:$0xf]  ;;  %v17097_v13 = vld [vmem:[#allocation7 + $0x52c] sm:$0xf0] }
 0x2a0   :  { %9058 = vmatpush.bf16.msrb.mxu3 %v15408_v20  ;;  %v17511_v20 = vld [vmem:[#allocation7 + $0x1224] sm:$0xf]  ;;  %v14491_v35 = vld [vmem:[#allocation7 + $0xc38] sm:$0xf] }
 0x2a1   :  { %9077 = vmatpush.bf16.msra.mxu0 %v15488_v34  ;;  %9052 = vmatmul.bf16.vlgmr.msrb.gmra.mxu1 %v18253_v51  ;;  %v8871_v33 = vpop.f32.mrf.mxu0  ;;  %v13052_v34 = vor.u32 %v16967_v26, %v13051_v25  ;;  %v15248_v25 = vor.u32 %v17511_v20, %v15245_v60  ;;  %v13571_v26 = vld [vmem:[#allocation7 + $0x508] sm:$0xf]  ;;  %v17297_v60 = vld [vmem:[#allocation7 + $0xb6c] sm:$0xf0] }
 0x2a2   :  { %9096 = vmatpush.bf16.msra.mxu1 %v13212_v41  ;;  %v13691_v41 = vld [vmem:[#allocation7 + $0x5f8] sm:$0xf]  ;;  %v13572_v38 = vor.u32 %v17097_v13, %v13571_v26  ;;  %v14371_v20 = vld [vmem:[#allocation7 + $0xb48] sm:$0xf]  ;;  %v17537_v26 = vld [vmem:[#allocation7 + $0x12ec] sm:$0xf0] }
 0x2a3   :  { %9090 = vmatpush.bf16.msra.mxu2 %v15808_v44  ;;  %v17207_v44 = vld [vmem:[#allocation7 + $0x89c] sm:$0xf0]  ;;  %v13451_v13 = vld [vmem:[#allocation7 + $0x418] sm:$0xf] }
 0x2a4   :  { %9078 = vmatmul.bf16.vlgmr.msra.gmra.mxu0 %v18282_v36  ;;  %9059 = vmatpush.bf16.msrb.mxu3 %v15368_v30  ;;  %v14012_v2 = vor.u32 %v17207_v44, %v14011_v31  ;;  %v17177_v30 = vld [vmem:[#allocation7 + $0x7ac] sm:$0xf0]  ;;  %v14492_v31 = vor.u32 %v17327_v53, %v14491_v35  ;;  %v15451_v44 = vld [vmem:[#allocation7 + $0x13b8] sm:$0xf]  ;;  %v15011_v35 = vld [vmem:[#allocation7 + $0x1048] sm:$0xf] }
 0x2a5   :  { %9122 = vmatpush.bf16.msrb.mxu0 %v13852_v42  ;;  %v16957_v42 = vld [vmem:[#allocation7 + $0xcc] sm:$0xf0] }
 0x2a6   :  { %9097 = vmatpush.bf16.msra.mxu1 %v13172_v0  ;;  %9091 = vmatmul.bf16.vlgmr.msra.gmra.mxu2 %v18292_v24  ;;  %v8858_v55 = vpop.f32.mrf.mxu3  ;;  %v17117_v0 = vld [vmem:[#allocation7 + $0x5cc] sm:$0xf0]  ;;  %v13012_v48 = vor.u32 %v16957_v42, %v13011_v40  ;;  %v14451_v40 = vld [vmem:[#allocation7 + $0xbe8] sm:$0xf] }
 0x2a7   :  { %9135 = vmatpush.bf16.msrb.mxu2 %v14172_v46  ;;  %v13692_v46 = vor.u32 %v17127_v28, %v13691_v41  ;;  %v8859_v43 = vadd.f32 %v8858_v55, %v8846_v10  ;;  %v13652_v63 = vor.u32 %v17117_v0, %v13651_v62  ;;  %v17501_v41 = vld [vmem:[#allocation7 + $0x11d4] sm:$0xf]  ;;  %v15205_v28 = vld [vmem:[#allocation7 + $0x11f8] sm:$0xf0]  ;;  %v17317_v42 = vld [vmem:[#allocation7 + $0xc0c] sm:$0xf0]  ;;  %v15452_v0 = vor.u32 %v17567_v39, %v15451_v44 }
 0x2a8   :  { %9060 = vmatpush.bf16.msrb.mxu3 %v15328_v32  ;;  %v15208_v55 = vor.u32 %v17501_v41, %v15205_v28  ;;  %v17491_v32 = vld [vmem:[#allocation7 + $0x1184] sm:$0xf]  ;;  %v15165_v62 = vld [vmem:[#allocation7 + $0x11a8] sm:$0xf0]  ;;  %v17457_v53 = vld [vmem:[#allocation7 + $0x106c] sm:$0xf0] }
 0x2a9   :  { %9123 = vmatpush.bf16.msrb.mxu0 %v13812_v59  ;;  %v8847_v59 = vpop.f32.mrf.mxu1  ;;  %v8872_v45 = vadd.f32 %v8871_v33, %v8859_v43  ;;  %v8884_v1 = vpop.f32.mrf.mxu2  ;;  %v15131_v33 = vld [vmem:[#allocation7 + $0x1138] sm:$0xf]  ;;  %v15091_v43 = vld [vmem:[#allocation7 + $0x10e8] sm:$0xf]  ;;  %v17287_v41 = vld [vmem:[#allocation7 + $0xb1c] sm:$0xf0]  ;;  %v15012_v28 = vor.u32 %v17457_v53, %v15011_v35 }
 0x2aa   :  { %9098 = vmatpush.bf16.msra.mxu1 %v13132_v3  ;;  %v13972_v3 = vor.u32 %v17197_v56, %v13971_v49  ;;  %v14452_v49 = vor.u32 %v17317_v42, %v14451_v40  ;;  %v15411_v56 = vld [vmem:[#allocation7 + $0x1368] sm:$0xf]  ;;  %v17087_v59 = vld [vmem:[#allocation7 + $0x4dc] sm:$0xf0]  ;;  %v14971_v44 = vld [vmem:[#allocation7 + $0xff8] sm:$0xf] }
 0x2ab   :  { %9136 = vmatpush.bf16.msrb.mxu2 %v14132_v22  ;;  %v12971_v22 = vld [vmem:[#allocation7 + $0x58] sm:$0xf]  ;;  %v18300_v15 = vadd.f32 %v8884_v1, %v8872_v45  ;;  %9013 = vmatmul.bf16.vlgmr.msra.gmra.mxu3 %v18231_v9  ;;  %v15168_v45 = vor.u32 %v17491_v32, %v15165_v62  ;;  %v15412_v1 = vor.u32 %v17557_v37, %v15411_v56  ;;  %v17527_v42 = vld [vmem:[#allocation7 + $0x129c] sm:$0xf0]  ;;  %v14211_v35 = vld [vmem:[#allocation7 + $0xa08] sm:$0xf] }
 0x2ac   :  { %v12972_v18 = vor.u32 %v16947_v7, %v12971_v22  ;;  %9061 = vmatpush.bf16.msrb.mxu3 %v15288_v5  ;;  %v14411_v22 = vld [vmem:[#allocation7 + $0xb98] sm:$0xf]  ;;  %v17307_v7 = vld [vmem:[#allocation7 + $0xbbc] sm:$0xf0]  ;;  %v17257_v53 = vld [vmem:[#allocation7 + $0xa2c] sm:$0xf0] }
 0x2ad   :  { %9124 = vmatpush.bf16.msrb.mxu0 %v13772_v17  ;;  %v8873_v17 = vpop.f32.mrf.mxu0  ;;  %v15051_v5 = vld [vmem:[#allocation7 + $0x1098] sm:$0xf] }
 0x2ae   :  { %9099 = vmatpush.bf16.msra.mxu1 %v13092_v14  ;;  %v13612_v14 = vor.u32 %v17107_v61, %v13611_v8  ;;  %v8860_v23 = vpop.f32.mrf.mxu3  ;;  %v17467_v8 = vld [vmem:[#allocation7 + $0x10bc] sm:$0xf0]  ;;  %v15371_v61 = vld [vmem:[#allocation7 + $0x1318] sm:$0xf] }
 0x2af   :  { %9137 = vmatpush.bf16.msrb.mxu2 %v14092_v52  ;;  %v17187_v52 = vld [vmem:[#allocation7 + $0x7fc] sm:$0xf0]  ;;  %v15331_v23 = vld [vmem:[#allocation7 + $0x12c8] sm:$0xf]  ;;  %v15291_v39 = vld [vmem:[#allocation7 + $0x1278] sm:$0xf] }
 0x2b0   :  { %v13932_v54 = vor.u32 %v17187_v52, %v13931_v12  ;;  %9062 = vmatpush.bf16.msrb.mxu3 %v15248_v25  ;;  %v14412_v12 = vor.u32 %v17307_v7, %v14411_v22  ;;  %v17547_v17 = vld [vmem:[#allocation7 + $0x133c] sm:$0xf0]  ;;  %v17077_v52 = vld [vmem:[#allocation7 + $0x48c] sm:$0xf0]  ;;  %v14372_v25 = vor.u32 %v17297_v60, %v14371_v20  ;;  %v15292_v62 = vor.u32 %v17527_v42, %v15291_v39  ;;  %v13371_v22 = vld [vmem:[#allocation7 + $0x378] sm:$0xf] }
 0x2b1   :  { %9125 = vmatpush.bf16.msrb.mxu0 %v13732_v27  ;;  %v13891_v27 = vld [vmem:[#allocation7 + $0x788] sm:$0xf]  ;;  %v8886_v10 = vpop.f32.mrf.mxu2  ;;  %v17047_v7 = vld [vmem:[#allocation7 + $0x39c] sm:$0xf0]  ;;  %v13213_v39 = vld [vmem:[#allocation7 + $0x260] sm:$0xf0] }
 0x2b2   :  { %9100 = vmatpush.bf16.msra.mxu1 %v13052_v34  ;;  %v17487_v34 = vld [vmem:[#allocation7 + $0x115c] sm:$0xf0]  ;;  %v13411_v10 = vld [vmem:[#allocation7 + $0x3c8] sm:$0xf] }
 0x2b3   :  { %9138 = vmatpush.bf16.msrb.mxu2 %v14052_v29  ;;  %v12932_v29 = vor.u32 %v16937_v50, %v12931_v21  ;;  %v15052_v21 = vor.u32 %v17467_v8, %v15051_v5  ;;  %v15372_v50 = vor.u32 %v17547_v17, %v15371_v61  ;;  %v14891_v17 = vld [vmem:[#allocation7 + $0xf58] sm:$0xf] }
 0x2b4   :  { %9063 = vmatpush.bf16.msrb.mxu3 %v15208_v55  ;;  %v17277_v55 = vld [vmem:[#allocation7 + $0xacc] sm:$0xf0] }
 0x2b5   :  { %9126 = vmatpush.bf16.msrb.mxu0 %v13692_v46  ;;  %v13892_v46 = vor.u32 %v17177_v30, %v13891_v27  ;;  %v17067_v27 = vld [vmem:[#allocation7 + $0x43c] sm:$0xf0]  ;;  %v14331_v30 = vld [vmem:[#allocation7 + $0xaf8] sm:$0xf] }
 0x2b6   :  { %9101 = vmatpush.bf16.msra.mxu1 %v13012_v48  ;;  %v17477_v48 = vld [vmem:[#allocation7 + $0x110c] sm:$0xf0]  ;;  %v14332_v40 = vor.u32 %v17287_v41, %v14331_v30  ;;  %v15171_v41 = vld [vmem:[#allocation7 + $0x1188] sm:$0xf] }
 0x2b7   :  { %9139 = vmatpush.bf16.msrb.mxu2 %v14012_v2  ;;  %v15132_v2 = vor.u32 %v17487_v34, %v15131_v33  ;;  %v15332_v33 = vor.u32 %v17537_v26, %v15331_v23  ;;  %v13452_v34 = vor.u32 %v17067_v27, %v13451_v13  ;;  %v17417_v30 = vld [vmem:[#allocation7 + $0xf2c] sm:$0xf0] }
 0x2b8   :  { %9064 = vmatpush.bf16.msrb.mxu3 %v15168_v45  ;;  %v14251_v45 = vld [vmem:[#allocation7 + $0xa58] sm:$0xf] }
 0x2b9   :  { %9127 = vmatpush.bf16.msrb.mxu0 %v13652_v63  ;;  %v15092_v63 = vor.u32 %v17477_v48, %v15091_v43  ;;  %v17437_v43 = vld [vmem:[#allocation7 + $0xfcc] sm:$0xf0]  ;;  %v15251_v48 = vld [vmem:[#allocation7 + $0x1228] sm:$0xf] }
 0x2ba   :  { %9102 = vmatpush.bf16.msra.mxu1 %v12972_v18  ;;  %v13491_v18 = vld [vmem:[#allocation7 + $0x468] sm:$0xf] }
 0x2bb   :  { %9140 = vmatpush.bf16.msrb.mxu2 %v13972_v3  ;;  %v13532_v3 = vor.u32 %v17087_v59, %v13531_v58  ;;  %9065 = vmatmul.bf16.vlgmr.msrb.gmra.mxu3 %v18250_v11  ;;  %v17517_v59 = vld [vmem:[#allocation7 + $0x124c] sm:$0xf0] }
 0x2bc   :  { %v15252_v61 = vor.u32 %v17517_v59, %v15251_v48  ;;  %v13493_v59 = vld [vmem:[#allocation7 + $0x490] sm:$0xf0] }
 0x2bd   :  { %9128 = vmatpush.bf16.msrb.mxu0 %v13612_v14  ;;  %9109 = vmatpush.bf16.msra.mxu3 %v13532_v3  ;;  %v13492_v14 = vor.u32 %v17077_v52, %v13491_v18  ;;  %v17427_v18 = vld [vmem:[#allocation7 + $0xf7c] sm:$0xf0]  ;;  %v15211_v52 = vld [vmem:[#allocation7 + $0x11d8] sm:$0xf] }
 0x2be   :  { %9103 = vmatpush.bf16.msra.mxu1 %v12932_v29  ;;  %v14892_v23 = vor.u32 %v17427_v18, %v14891_v17  ;;  %v17062_v17 = vld [vmem:[#allocation7 + $0x41c] sm:$0xf] }
 0x2bf   :  { %9141 = vmatpush.bf16.msrb.mxu2 %v13932_v54  ;;  %v8897_v54 = vpop.f32.mrf.mxu1 }
 0x2c0   :  { %v8898_v29 = vadd.f32 %v8897_v54, %v18300_v15  ;;  %v14291_v15 = vld [vmem:[#allocation7 + $0xaa8] sm:$0xf]  ;;  %v15771_v54 = vld [vmem:[#allocation7 + $0x1638] sm:$0xf] }
 0x2c1   :  { %9129 = vmatpush.bf16.msrb.mxu0 %v13572_v38  ;;  %9104 = vmatmul.bf16.vlgmr.msra.gmra.mxu1 %v18221_v47  ;;  %v17447_v38 = vld [vmem:[#allocation7 + $0x101c] sm:$0xf0]  ;;  %v14292_v58 = vor.u32 %v17277_v55, %v14291_v15  ;;  %v15731_v15 = vld [vmem:[#allocation7 + $0x15e8] sm:$0xf]  ;;  %v17637_v55 = vld [vmem:[#allocation7 + $0x160c] sm:$0xf0] }
 0x2c2   :  { %9148 = vmatpush.bf16.msrb.mxu1 %v14492_v31  ;;  %9110 = vmatpush.bf16.msra.mxu3 %v13492_v14  ;;  %v8923_v31 = vpop.f32.mrf.mxu0  ;;  %v17037_v14 = vld [vmem:[#allocation7 + $0x34c] sm:$0xf0]  ;;  %v15732_v48 = vor.u32 %v17637_v55, %v15731_v15  ;;  %v14691_v15 = vld [vmem:[#allocation7 + $0xdc8] sm:$0xf] }
 0x2c3   :  { %9142 = vmatpush.bf16.msrb.mxu2 %v13892_v46  ;;  %v17057_v46 = vld [vmem:[#allocation7 + $0x3ec] sm:$0xf0] }
 0x2c4   :  { %9130 = vmatmul.bf16.vlgmr.msrb.gmra.mxu0 %v18227_v4  ;;  %v17377_v55 = vld [vmem:[#allocation7 + $0xdec] sm:$0xf0] }
 0x2c5   :  { %9174 = vmatpush.bf16.msra.mxu0 %v15132_v2  ;;  %v14972_v2 = vor.u32 %v17447_v38, %v14971_v44  ;;  %v17002_v38 = vld [vmem:[#allocation7 + $0x23c] sm:$0xf] }
 0x2c6   :  { %9149 = vmatpush.bf16.msrb.mxu1 %v14452_v49  ;;  %9143 = vmatmul.bf16.vlgmr.msrb.gmra.mxu2 %v18231_v9  ;;  %v8910_v32 = vpop.f32.mrf.mxu3  ;;  %v14931_v49 = vld [vmem:[#allocation7 + $0xfa8] sm:$0xf] }
 0x2c7   :  { %9187 = vmatpush.bf16.msra.mxu2 %v15452_v0  ;;  %9111 = vmatpush.bf16.msra.mxu3 %v13452_v34  ;;  %v13412_v0 = vor.u32 %v17057_v46, %v13411_v10  ;;  %v8911_v56 = vadd.f32 %v8910_v32, %v8898_v29  ;;  %v8899_v37 = vpop.f32.mrf.mxu1  ;;  %v14932_v5 = vor.u32 %v17437_v43, %v14931_v49  ;;  %v14851_v29 = vld [vmem:[#allocation7 + $0xf08] sm:$0xf]  ;;  %v17027_v34 = vld [vmem:[#allocation7 + $0x2fc] sm:$0xf0]  ;;  %v13533_v46 = vld [vmem:[#allocation7 + $0x4e0] sm:$0xf0] }
 0x2c8   :  { %v14852_v10 = vor.u32 %v17417_v30, %v14851_v29  ;;  %v17017_v49 = vld [vmem:[#allocation7 + $0x2ac] sm:$0xf0]  ;;  %v13173_v37 = vld [vmem:[#allocation7 + $0x210] sm:$0xf0]  ;;  %v14731_v29 = vld [vmem:[#allocation7 + $0xe18] sm:$0xf] }
 0x2c9   :  { %9175 = vmatpush.bf16.msra.mxu0 %v15092_v63  ;;  %v17267_v63 = vld [vmem:[#allocation7 + $0xa7c] sm:$0xf0]  ;;  %v8936_v3 = vpop.f32.mrf.mxu2 }
 0x2ca   :  { %9150 = vmatpush.bf16.msrb.mxu1 %v14412_v12  ;;  %v8925_v8 = vpop.f32.mrf.mxu0  ;;  %v13372_v12 = vor.u32 %v17047_v7, %v13371_v22  ;;  %v14252_v60 = vor.u32 %v17267_v63, %v14251_v45  ;;  %v14811_v22 = vld [vmem:[#allocation7 + $0xeb8] sm:$0xf]  ;;  %v17407_v7 = vld [vmem:[#allocation7 + $0xedc] sm:$0xf0] }
 0x2cb   :  { %9188 = vmatpush.bf16.msra.mxu2 %v15412_v1  ;;  %v8924_v1 = vadd.f32 %v8923_v31, %v8911_v56  ;;  %9112 = vmatpush.bf16.msra.mxu3 %v13412_v0  ;;  %v17497_v31 = vld [vmem:[#allocation7 + $0x11ac] sm:$0xf0]  ;;  %v13251_v0 = vld [vmem:[#allocation7 + $0x288] sm:$0xf]  ;;  %v16992_v56 = vld [vmem:[#allocation7 + $0x1ec] sm:$0xf]  ;;  %v14812_v8 = vor.u32 %v17407_v7, %v14811_v22 }
 0x2cc   :  { %v15691_v45 = vld [vmem:[#allocation7 + $0x1598] sm:$0xf]  ;;  %v17627_v63 = vld [vmem:[#allocation7 + $0x15bc] sm:$0xf0] }
 0x2cd   :  { %9176 = vmatpush.bf16.msra.mxu0 %v15052_v21  ;;  %v18308_v20 = vadd.f32 %v8936_v3, %v8924_v1  ;;  %v17507_v21 = vld [vmem:[#allocation7 + $0x11fc] sm:$0xf0]  ;;  %v13252_v1 = vor.u32 %v17017_v49, %v13251_v0  ;;  %v13176_v3 = vor.u32 %v16992_v56, %v13173_v37  ;;  %v15692_v18 = vor.u32 %v17627_v63, %v15691_v45  ;;  %v16952_v49 = vld [vmem:[#allocation7 + $0xac] sm:$0xf]  ;;  %v15531_v45 = vld [vmem:[#allocation7 + $0x1458] sm:$0xf] }
 0x2ce   :  { %9151 = vmatpush.bf16.msrb.mxu1 %v14372_v25  ;;  %v17647_v25 = vld [vmem:[#allocation7 + $0x165c] sm:$0xf0]  ;;  %v8912_v26 = vpop.f32.mrf.mxu3  ;;  %v15212_v13 = vor.u32 %v17507_v21, %v15211_v52  ;;  %v13453_v52 = vld [vmem:[#allocation7 + $0x440] sm:$0xf0]  ;;  %v17397_v21 = vld [vmem:[#allocation7 + $0xe8c] sm:$0xf0]  ;;  %v14692_v0 = vor.u32 %v17377_v55, %v14691_v15 }
 0x2cf   :  { %9189 = vmatpush.bf16.msra.mxu2 %v15372_v50  ;;  %v13331_v50 = vld [vmem:[#allocation7 + $0x328] sm:$0xf]  ;;  %9113 = vmatpush.bf16.msra.mxu3 %v13372_v12  ;;  %v15772_v44 = vor.u32 %v17647_v25, %v15771_v54  ;;  %v13133_v12 = vld [vmem:[#allocation7 + $0x1c0] sm:$0xf0]  ;;  %v16972_v54 = vld [vmem:[#allocation7 + $0x14c] sm:$0xf] }
 0x2d0   :  { %v13332_v27 = vor.u32 %v17037_v14, %v13331_v50  ;;  %v15651_v50 = vld [vmem:[#allocation7 + $0x1548] sm:$0xf]  ;;  %v17617_v14 = vld [vmem:[#allocation7 + $0x156c] sm:$0xf0]  ;;  %v13093_v25 = vld [vmem:[#allocation7 + $0x170] sm:$0xf0] }
 0x2d1   :  { %9177 = vmatpush.bf16.msra.mxu0 %v15012_v28  ;;  %v14212_v28 = vor.u32 %v17257_v53, %v14211_v35  ;;  %v8938_v42 = vpop.f32.mrf.mxu2  ;;  %v13456_v53 = vor.u32 %v17062_v17, %v13453_v52  ;;  %v17052_v26 = vld [vmem:[#allocation7 + $0x3cc] sm:$0xf]  ;;  %v17387_v30 = vld [vmem:[#allocation7 + $0xe3c] sm:$0xf0]  ;;  %v12973_v17 = vld [vmem:[#allocation7 + $0x80] sm:$0xf0] }
 0x2d2   :  { %9152 = vmatpush.bf16.msrb.mxu1 %v14332_v40  ;;  %v17082_v40 = vld [vmem:[#allocation7 + $0x4bc] sm:$0xf]  ;;  %v17367_v22 = vld [vmem:[#allocation7 + $0xd9c] sm:$0xf0] }
 0x2d3   :  { %9190 = vmatpush.bf16.msra.mxu2 %v15332_v33  ;;  %v13291_v33 = vld [vmem:[#allocation7 + $0x2d8] sm:$0xf]  ;;  %9114 = vmatpush.bf16.msra.mxu3 %v13332_v27  ;;  %v13536_v43 = vor.u32 %v17082_v40, %v13533_v46  ;;  %v13413_v27 = vld [vmem:[#allocation7 + $0x3f0] sm:$0xf0]  ;;  %v13053_v40 = vld [vmem:[#allocation7 + $0x120] sm:$0xf0] }
 0x2d4   :  { %v13292_v32 = vor.u32 %v17027_v34, %v13291_v33  ;;  %v13096_v33 = vor.u32 %v16972_v54, %v13093_v25  ;;  %v17042_v42 = vld [vmem:[#allocation7 + $0x37c] sm:$0xf]  ;;  %v13373_v46 = vld [vmem:[#allocation7 + $0x3a0] sm:$0xf0]  ;;  %v17587_v63 = vld [vmem:[#allocation7 + $0x147c] sm:$0xf0] }
 0x2d5   :  { %9178 = vmatpush.bf16.msra.mxu0 %v14972_v2  ;;  %v15172_v2 = vor.u32 %v17497_v31, %v15171_v41  ;;  %v15611_v41 = vld [vmem:[#allocation7 + $0x14f8] sm:$0xf]  ;;  %v4817_v31 = vperm.slane %v18296_v16, 1  ;;  %v13376_v16 = vor.u32 %v17042_v42, %v13373_v46  ;;  %v15532_v52 = vor.u32 %v17587_v63, %v15531_v45  ;;  %v13853_v54 = vld [vmem:[#allocation7 + $0x760] sm:$0xf0] }
 0x2d6   :  { %9153 = vmatpush.bf16.msrb.mxu1 %v14292_v58  ;;  %v17072_v58 = vld [vmem:[#allocation7 + $0x46c] sm:$0xf]  ;;  %v14813_v42 = vld [vmem:[#allocation7 + $0xee0] sm:$0xf0]  ;;  %v13813_v46 = vld [vmem:[#allocation7 + $0x710] sm:$0xf0] }
 0x2d7   :  { %9191 = vmatpush.bf16.msra.mxu2 %v15292_v62  ;;  %v13216_v62 = vor.u32 %v17002_v38, %v13213_v39  ;;  %9115 = vmatpush.bf16.msra.mxu3 %v13292_v32  ;;  %v14732_v38 = vor.u32 %v17387_v30, %v14731_v29  ;;  %v16962_v39 = vld [vmem:[#allocation7 + $0xfc] sm:$0xf]  ;;  %v17597_v32 = vld [vmem:[#allocation7 + $0x14cc] sm:$0xf0]  ;;  %v17012_v29 = vld [vmem:[#allocation7 + $0x28c] sm:$0xf] }
 0x2d9   :  { %9179 = vmatpush.bf16.msra.mxu0 %v14932_v5  ;;  %v13496_v5 = vor.u32 %v17072_v58, %v13493_v59  ;;  %v13333_v58 = vld [vmem:[#allocation7 + $0x350] sm:$0xf0]  ;;  %v14651_v59 = vld [vmem:[#allocation7 + $0xd78] sm:$0xf] }
 0x2da   :  { %9154 = vmatpush.bf16.msrb.mxu1 %v14252_v60  ;;  %v14771_v60 = vld [vmem:[#allocation7 + $0xe68] sm:$0xf] }
 0x2db   :  { %9192 = vmatpush.bf16.msra.mxu2 %v15252_v61  ;;  %v16982_v61 = vld [vmem:[#allocation7 + $0x19c] sm:$0xf]  ;;  %9116 = vmatpush.bf16.msra.mxu3 %v13252_v1 }
 0x2dc   :  { %v13136_v35 = vor.u32 %v16982_v61, %v13133_v12  ;;  %v14652_v61 = vor.u32 %v17367_v22, %v14651_v59  ;;  %v16942_v12 = vld [vmem:[#allocation7 + $0x5c] sm:$0xf] }
 0x2dd   :  { %9180 = vmatpush.bf16.msra.mxu0 %v14892_v23  ;;  %v14772_v23 = vor.u32 %v17397_v21, %v14771_v60  ;;  %v13293_v60 = vld [vmem:[#allocation7 + $0x300] sm:$0xf0]  ;;  %v14611_v21 = vld [vmem:[#allocation7 + $0xd28] sm:$0xf]  ;;  %v17142_v22 = vld [vmem:[#allocation7 + $0x69c] sm:$0xf] }
 0x2de   :  { %9155 = vmatpush.bf16.msrb.mxu1 %v14212_v28  ;;  %9117 = vmatmul.bf16.vlgmr.msra.gmra.mxu3 %v18225_v57  ;;  %v17607_v28 = vld [vmem:[#allocation7 + $0x151c] sm:$0xf0] }
 0x2df   :  { %9193 = vmatpush.bf16.msra.mxu2 %v15212_v13  ;;  %9161 = vmatpush.bf16.msrb.mxu3 %v14812_v8  ;;  %v15652_v13 = vor.u32 %v17617_v14, %v15651_v50  ;;  %v17357_v50 = vld [vmem:[#allocation7 + $0xd4c] sm:$0xf0]  ;;  %v15491_v14 = vld [vmem:[#allocation7 + $0x1408] sm:$0xf] }
 0x2e1   :  { %9181 = vmatpush.bf16.msra.mxu0 %v14852_v10  ;;  %9156 = vmatmul.bf16.vlgmr.msrb.gmra.mxu1 %v18246_v6  ;;  %v8975_v34 = vpop.f32.mrf.mxu0  ;;  %v15612_v10 = vor.u32 %v17607_v28, %v15611_v41  ;;  %v13253_v41 = vld [vmem:[#allocation7 + $0x2b0] sm:$0xf0]  ;;  %v14571_v28 = vld [vmem:[#allocation7 + $0xcd8] sm:$0xf] }
 0x2e2   :  { %9200 = vmatpush.bf16.msra.mxu1 %v15772_v44  ;;  %v13416_v44 = vor.u32 %v17052_v26, %v13413_v27  ;;  %v8976_v56 = vadd.f32 %v8975_v34, %v4817_v31  ;;  %v14612_v26 = vor.u32 %v17357_v50, %v14611_v21  ;;  %v12933_v27 = vld [vmem:[#allocation7 + $0x30] sm:$0xf0]  ;;  %v17347_v31 = vld [vmem:[#allocation7 + $0xcfc] sm:$0xf0]  ;;  %v13256_v15 = vor.u32 %v17012_v29, %v13253_v41  ;;  %v17717_v21 = vld [vmem:[#allocation7 + $0x188c] sm:$0xf0] }
 0x2e3   :  { %9194 = vmatpush.bf16.msra.mxu2 %v15172_v2  ;;  %9162 = vmatpush.bf16.msrb.mxu3 %v14772_v23  ;;  %v15571_v2 = vld [vmem:[#allocation7 + $0x14a8] sm:$0xf]  ;;  %v17162_v23 = vld [vmem:[#allocation7 + $0x73c] sm:$0xf]  ;;  %v14572_v55 = vor.u32 %v17347_v31, %v14571_v28  ;;  %v17132_v50 = vld [vmem:[#allocation7 + $0x64c] sm:$0xf] }
 0x2e4   :  { %9182 = vmatmul.bf16.vlgmr.msra.gmra.mxu0 %v18253_v51  ;;  %v15572_v37 = vor.u32 %v17597_v32, %v15571_v2  ;;  %v13856_v34 = vor.u32 %v17162_v23, %v13853_v54  ;;  %v14531_v32 = vld [vmem:[#allocation7 + $0xc88] sm:$0xf]  ;;  %v17292_v23 = vld [vmem:[#allocation7 + $0xb4c] sm:$0xf]  ;;  %v14373_v54 = vld [vmem:[#allocation7 + $0xb70] sm:$0xf0] }
 0x2e5   :  { %9226 = vmatpush.bf16.msrb.mxu0 %v13216_v62  ;;  %v13056_v62 = vor.u32 %v16962_v39, %v13053_v40  ;;  %v17402_v39 = vld [vmem:[#allocation7 + $0xebc] sm:$0xf]  ;;  %v17707_v29 = vld [vmem:[#allocation7 + $0x183c] sm:$0xf0]  ;;  %v13693_v28 = vld [vmem:[#allocation7 + $0x620] sm:$0xf0] }
 0x2e6   :  { %9201 = vmatpush.bf16.msra.mxu1 %v15732_v48  ;;  %9195 = vmatmul.bf16.vlgmr.msra.gmra.mxu2 %v18250_v11  ;;  %v17032_v48 = vld [vmem:[#allocation7 + $0x32c] sm:$0xf]  ;;  %v17122_v41 = vld [vmem:[#allocation7 + $0x5fc] sm:$0xf] }
 0x2e7   :  { %9239 = vmatpush.bf16.msrb.mxu2 %v13536_v43  ;;  %9163 = vmatpush.bf16.msrb.mxu3 %v14732_v38  ;;  %v13013_v43 = vld [vmem:[#allocation7 + $0xd0] sm:$0xf0]  ;;  %v13336_v8 = vor.u32 %v17032_v48, %v13333_v58  ;;  %v14493_v38 = vld [vmem:[#allocation7 + $0xc60] sm:$0xf0]  ;;  %v17392_v48 = vld [vmem:[#allocation7 + $0xe6c] sm:$0xf] }
 0x2e8   :  { %v17727_v58 = vld [vmem:[#allocation7 + $0x18dc] sm:$0xf0] }
 0x2e9   :  { %9227 = vmatpush.bf16.msrb.mxu0 %v13176_v3  ;;  %v8988_v7 = vpop.f32.mrf.mxu2  ;;  %v13016_v3 = vor.u32 %v16952_v49, %v13013_v43  ;;  %v17312_v49 = vld [vmem:[#allocation7 + $0xbec] sm:$0xf]  ;;  %v14453_v43 = vld [vmem:[#allocation7 + $0xc10] sm:$0xf0] }
 0x2ea   :  { %9202 = vmatpush.bf16.msra.mxu1 %v15692_v18  ;;  %v18315_v1 = vadd.f32 %v8988_v7, %v8976_v56  ;;  %v17022_v18 = vld [vmem:[#allocation7 + $0x2dc] sm:$0xf]  ;;  %v14773_v56 = vld [vmem:[#allocation7 + $0xe90] sm:$0xf0]  ;;  %v13773_v7 = vld [vmem:[#allocation7 + $0x6c0] sm:$0xf0] }
 0x2eb   :  { %9240 = vmatpush.bf16.msrb.mxu2 %v13496_v5  ;;  %9164 = vmatpush.bf16.msrb.mxu3 %v14692_v0  ;;  %v8977_v5 = vpop.f32.mrf.mxu0  ;;  %v13296_v25 = vor.u32 %v17022_v18, %v13293_v60  ;;  %v13776_v18 = vor.u32 %v17142_v22, %v13773_v7  ;;  %v16051_v60 = vld [vmem:[#allocation7 + $0x1868] sm:$0xf]  ;;  %v17102_v7 = vld [vmem:[#allocation7 + $0x55c] sm:$0xf] }
 0x2ec   :  { %v14776_v5 = vor.u32 %v17392_v48, %v14773_v56 }
 0x2ed   :  { %9228 = vmatpush.bf16.msrb.mxu0 %v13136_v35  ;;  %v17577_v35 = vld [vmem:[#allocation7 + $0x142c] sm:$0xf0] }
 0x2ee   :  { %9203 = vmatpush.bf16.msra.mxu1 %v15652_v13  ;;  %v16932_v13 = vld [vmem:[#allocation7 + $0xc] sm:$0xf]  ;;  %v15492_v30 = vor.u32 %v17577_v35, %v15491_v14 }
 0x2ef   :  { %9241 = vmatpush.bf16.msrb.mxu2 %v13456_v53  ;;  %v12976_v53 = vor.u32 %v16942_v12, %v12973_v17  ;;  %9165 = vmatpush.bf16.msrb.mxu3 %v14652_v61  ;;  %v12936_v40 = vor.u32 %v16932_v13, %v12933_v27  ;;  %v17302_v61 = vld [vmem:[#allocation7 + $0xb9c] sm:$0xf]  ;;  %v14413_v12 = vld [vmem:[#allocation7 + $0xbc0] sm:$0xf0]  ;;  %v14693_v13 = vld [vmem:[#allocation7 + $0xdf0] sm:$0xf0] }
 0x2f0   :  { %v8949_v59 = vpop.f32.mrf.mxu1  ;;  %v17382_v17 = vld [vmem:[#allocation7 + $0xe1c] sm:$0xf]  ;;  %v14416_v14 = vor.u32 %v17302_v61, %v14413_v12  ;;  %v16011_v27 = vld [vmem:[#allocation7 + $0x1818] sm:$0xf] }
 0x2f1   :  { %9229 = vmatpush.bf16.msrb.mxu0 %v13096_v33  ;;  %v8990_v33 = vpop.f32.mrf.mxu2  ;;  %v18319_v45 = vadd.f32 %v8949_v59, %v18308_v20  ;;  %v13733_v20 = vld [vmem:[#allocation7 + $0x670] sm:$0xf0]  ;;  %v17687_v59 = vld [vmem:[#allocation7 + $0x179c] sm:$0xf0] }
 0x2f2   :  { %9204 = vmatpush.bf16.msra.mxu1 %v15612_v10  ;;  %v17152_v10 = vld [vmem:[#allocation7 + $0x6ec] sm:$0xf]  ;;  %v14376_v33 = vor.u32 %v17292_v23, %v14373_v54  ;;  %v15133_v23 = vld [vmem:[#allocation7 + $0x1160] sm:$0xf0] }
 0x2f3   :  { %9242 = vmatpush.bf16.msrb.mxu2 %v13416_v44  ;;  %v17322_v44 = vld [vmem:[#allocation7 + $0xc3c] sm:$0xf]  ;;  %9166 = vmatpush.bf16.msrb.mxu3 %v14612_v26  ;;  %v13816_v0 = vor.u32 %v17152_v10, %v13813_v46  ;;  %v13736_v26 = vor.u32 %v17132_v50, %v13733_v20  ;;  %v14653_v10 = vld [vmem:[#allocation7 + $0xda0] sm:$0xf0]  ;;  %v15971_v46 = vld [vmem:[#allocation7 + $0x17c8] sm:$0xf] }
 0x2f4   :  { %v14496_v2 = vor.u32 %v17322_v44, %v14493_v38  ;;  %v16012_v44 = vor.u32 %v17707_v29, %v16011_v27  ;;  %v17282_v38 = vld [vmem:[#allocation7 + $0xafc] sm:$0xf]  ;;  %v15891_v50 = vld [vmem:[#allocation7 + $0x1728] sm:$0xf]  ;;  %v17677_v20 = vld [vmem:[#allocation7 + $0x174c] sm:$0xf0] }
 0x2f5   :  { %9230 = vmatpush.bf16.msrb.mxu0 %v13056_v62  ;;  %v17337_v62 = vld [vmem:[#allocation7 + $0xcac] sm:$0xf0]  ;;  %v17332_v27 = vld [vmem:[#allocation7 + $0xc8c] sm:$0xf] }
 0x2f6   :  { %9205 = vmatpush.bf16.msra.mxu1 %v15572_v37  ;;  %v16091_v37 = vld [vmem:[#allocation7 + $0x18b8] sm:$0xf]  ;;  %v14532_v63 = vor.u32 %v17337_v62, %v14531_v32 }
 0x2f7   :  { %9243 = vmatpush.bf16.msrb.mxu2 %v13376_v16  ;;  %v14816_v16 = vor.u32 %v17402_v39, %v14813_v42  ;;  %9167 = vmatpush.bf16.msrb.mxu3 %v14572_v55  ;;  %v14333_v39 = vld [vmem:[#allocation7 + $0xb20] sm:$0xf0]  ;;  %v13696_v42 = vor.u32 %v17122_v41, %v13693_v28  ;;  %v17112_v55 = vld [vmem:[#allocation7 + $0x5ac] sm:$0xf]  ;;  %v14533_v41 = vld [vmem:[#allocation7 + $0xcb0] sm:$0xf0] }
 0x2f8   :  { %v14336_v32 = vor.u32 %v17282_v38, %v14333_v39  ;;  %v15851_v28 = vld [vmem:[#allocation7 + $0x16d8] sm:$0xf]  ;;  %v17642_v38 = vld [vmem:[#allocation7 + $0x163c] sm:$0xf]  ;;  %v15773_v39 = vld [vmem:[#allocation7 + $0x1660] sm:$0xf0] }
 0x2f9   :  { %9231 = vmatpush.bf16.msrb.mxu0 %v13016_v3  ;;  %v14456_v3 = vor.u32 %v17312_v49, %v14453_v43  ;;  %v14293_v49 = vld [vmem:[#allocation7 + $0xad0] sm:$0xf0]  ;;  %v17352_v43 = vld [vmem:[#allocation7 + $0xd2c] sm:$0xf] }
 0x2fa   :  { %9206 = vmatpush.bf16.msra.mxu1 %v15532_v52  ;;  %v14733_v52 = vld [vmem:[#allocation7 + $0xe40] sm:$0xf0] }
 0x2fb   :  { %9244 = vmatpush.bf16.msrb.mxu2 %v13336_v8  ;;  %v16092_v8 = vor.u32 %v17727_v58, %v16091_v37  ;;  %9168 = vmatpush.bf16.msrb.mxu3 %v14532_v63  ;;  %v14736_v35 = vor.u32 %v17382_v17, %v14733_v52  ;;  %v14613_v37 = vld [vmem:[#allocation7 + $0xd50] sm:$0xf0]  ;;  %v15931_v58 = vld [vmem:[#allocation7 + $0x1778] sm:$0xf]  ;;  %v13613_v63 = vld [vmem:[#allocation7 + $0x580] sm:$0xf0] }
 0x2fc   :  { %v14616_v61 = vor.u32 %v17352_v43, %v14613_v37  ;;  %v15932_v12 = vor.u32 %v17687_v59, %v15931_v58  ;;  %v17262_v17 = vld [vmem:[#allocation7 + $0xa5c] sm:$0xf]  ;;  %v17632_v43 = vld [vmem:[#allocation7 + $0x15ec] sm:$0xf]  ;;  %v16053_v58 = vld [vmem:[#allocation7 + $0x1890] sm:$0xf0] }
 0x2fd   :  { %9232 = vmatpush.bf16.msrb.mxu0 %v12976_v53  ;;  %v16052_v53 = vor.u32 %v17717_v21, %v16051_v60  ;;  %v17342_v52 = vld [vmem:[#allocation7 + $0xcdc] sm:$0xf]  ;;  %v13616_v60 = vor.u32 %v17102_v7, %v13613_v63  ;;  %v14573_v21 = vld [vmem:[#allocation7 + $0xd00] sm:$0xf0]  ;;  %v17712_v37 = vld [vmem:[#allocation7 + $0x186c] sm:$0xf] }
 0x2fe   :  { %9207 = vmatpush.bf16.msra.mxu1 %v15492_v30  ;;  %9169 = vmatmul.bf16.vlgmr.msrb.gmra.mxu3 %v18248_v19  ;;  %v8951_v30 = vpop.f32.mrf.mxu1  ;;  %v14576_v54 = vor.u32 %v17342_v52, %v14573_v21  ;;  %v17242_v59 = vld [vmem:[#allocation7 + $0x9bc] sm:$0xf]  ;;  %v15053_v63 = vld [vmem:[#allocation7 + $0x10c0] sm:$0xf0] }
 0x2ff   :  { %9245 = vmatpush.bf16.msrb.mxu2 %v13296_v25  ;;  %9213 = vmatpush.bf16.msra.mxu3 %v16092_v8  ;;  %v17372_v25 = vld [vmem:[#allocation7 + $0xdcc] sm:$0xf]  ;;  %v17462_v7 = vld [vmem:[#allocation7 + $0x109c] sm:$0xf]  ;;  %v16013_v21 = vld [vmem:[#allocation7 + $0x1840] sm:$0xf0] }
 0x300   :  { %v17702_v52 = vld [vmem:[#allocation7 + $0x181c] sm:$0xf] }
 0x301   :  { %9233 = vmatpush.bf16.msrb.mxu0 %v12936_v40  ;;  %9208 = vmatmul.bf16.vlgmr.msra.gmra.mxu1 %v18282_v36  ;;  %v18324_v31 = vpop.f32.mrf.mxu0  ;;  %v17362_v40 = vld [vmem:[#allocation7 + $0xd7c] sm:$0xf] }
 0x302   :  { %9252 = vmatpush.bf16.msrb.mxu1 %v13856_v34  ;;  %v14696_v34 = vor.u32 %v17372_v25, %v14693_v13  ;;  %v14656_v62 = vor.u32 %v17362_v40, %v14653_v10  ;;  %v15892_v25 = vor.u32 %v17677_v20, %v15891_v50  ;;  %v14213_v13 = vld [vmem:[#allocation7 + $0xa30] sm:$0xf0]  ;;  %v17722_v40 = vld [vmem:[#allocation7 + $0x18bc] sm:$0xf]  ;;  %v16093_v10 = vld [vmem:[#allocation7 + $0x18e0] sm:$0xf0] }
 0x303   :  { %9246 = vmatpush.bf16.msrb.mxu2 %v13256_v15  ;;  %9214 = vmatpush.bf16.msra.mxu3 %v16052_v53  ;;  %v17697_v15 = vld [vmem:[#allocation7 + $0x17ec] sm:$0xf0]  ;;  %v17232_v50 = vld [vmem:[#allocation7 + $0x96c] sm:$0xf]  ;;  %v14133_v20 = vld [vmem:[#allocation7 + $0x990] sm:$0xf0] }
 0x304   :  { %9234 = vmatmul.bf16.vlgmr.msrb.gmra.mxu0 %v18221_v47 }
 0x305   :  { %9278 = vmatpush.bf16.msra.mxu0 %v14496_v2  ;;  %v13653_v2 = vld [vmem:[#allocation7 + $0x5d0] sm:$0xf0] }
 0x306   :  { %9253 = vmatpush.bf16.msrb.mxu1 %v13816_v0  ;;  %9247 = vmatmul.bf16.vlgmr.msrb.gmra.mxu2 %v18225_v57  ;;  %v17272_v0 = vld [vmem:[#allocation7 + $0xaac] sm:$0xf]  ;;  %v13656_v56 = vor.u32 %v17112_v55, %v13653_v2  ;;  %v9001_v22 = vpop.f32.mrf.mxu1  ;;  %v14536_v55 = vor.u32 %v17332_v27, %v14533_v41  ;;  %v14093_v41 = vld [vmem:[#allocation7 + $0x940] sm:$0xf0] }
 0x307   :  { %9291 = vmatpush.bf16.msra.mxu2 %v14816_v16  ;;  %9215 = vmatpush.bf16.msra.mxu3 %v16012_v44  ;;  %v15972_v16 = vor.u32 %v17697_v15, %v15971_v46  ;;  %v14296_v8 = vor.u32 %v17272_v0, %v14293_v49  ;;  %v17472_v46 = vld [vmem:[#allocation7 + $0x10ec] sm:$0xf]  ;;  %v15093_v15 = vld [vmem:[#allocation7 + $0x1110] sm:$0xf0]  ;;  %v16096_v0 = vor.u32 %v17722_v40, %v16093_v10  ;;  %v17602_v40 = vld [vmem:[#allocation7 + $0x14fc] sm:$0xf] }
 0x308   :  { %v15096_v49 = vor.u32 %v17472_v46, %v15093_v15  ;;  %v17682_v10 = vld [vmem:[#allocation7 + $0x177c] sm:$0xf]  ;;  %v15933_v15 = vld [vmem:[#allocation7 + $0x17a0] sm:$0xf0] }
 0x309   :  { %9279 = vmatpush.bf16.msra.mxu0 %v14456_v3  ;;  %v18326_v48 = vpop.f32.mrf.mxu2  ;;  %v18329_v3 = vadd.f32 %v9001_v22, %v18315_v1  ;;  %v17482_v1 = vld [vmem:[#allocation7 + $0x113c] sm:$0xf]  ;;  %v14173_v22 = vld [vmem:[#allocation7 + $0x9e0] sm:$0xf0] }
 0x30a   :  { %9254 = vmatpush.bf16.msrb.mxu1 %v13776_v18  ;;  %v14253_v18 = vld [vmem:[#allocation7 + $0xa80] sm:$0xf0]  ;;  %v15136_v44 = vor.u32 %v17482_v1, %v15133_v23  ;;  %v16016_v23 = vor.u32 %v17702_v52, %v16013_v21 }
 0x30b   :  { %9292 = vmatpush.bf16.msra.mxu2 %v14776_v5  ;;  %v9029_v5 = vpop.f32.mrf.mxu0  ;;  %9216 = vmatpush.bf16.msra.mxu3 %v15972_v16  ;;  %v14256_v53 = vor.u32 %v17262_v17, %v14253_v18  ;;  %v17657_v16 = vld [vmem:[#allocation7 + $0x16ac] sm:$0xf0]  ;;  %v17622_v17 = vld [vmem:[#allocation7 + $0x159c] sm:$0xf]  ;;  %v15693_v18 = vld [vmem:[#allocation7 + $0x15c0] sm:$0xf0] }
 0x30d   :  { %9280 = vmatpush.bf16.msra.mxu0 %v14416_v14  ;;  %v17092_v14 = vld [vmem:[#allocation7 + $0x50c] sm:$0xf] }
 0x30e   :  { %9255 = vmatpush.bf16.msrb.mxu1 %v13736_v26  ;;  %v17252_v26 = vld [vmem:[#allocation7 + $0xa0c] sm:$0xf] }
 0x30f   :  { %9293 = vmatpush.bf16.msra.mxu2 %v14736_v35  ;;  %v13573_v35 = vld [vmem:[#allocation7 + $0x530] sm:$0xf0]  ;;  %9217 = vmatpush.bf16.msra.mxu3 %v15932_v12  ;;  %v14176_v12 = vor.u32 %v17242_v59, %v14173_v22 }
 0x310   :  { %v13576_v30 = vor.u32 %v17092_v14, %v13573_v35  ;;  %v17452_v14 = vld [vmem:[#allocation7 + $0x104c] sm:$0xf]  ;;  %v15013_v35 = vld [vmem:[#allocation7 + $0x1070] sm:$0xf0] }
 0x311   :  { %9281 = vmatpush.bf16.msra.mxu0 %v14376_v33  ;;  %v9042_v29 = vpop.f32.mrf.mxu2  ;;  %v17667_v33 = vld [vmem:[#allocation7 + $0x16fc] sm:$0xf0]  ;;  %v15016_v27 = vor.u32 %v17452_v14, %v15013_v35  ;;  %v15893_v22 = vld [vmem:[#allocation7 + $0x1750] sm:$0xf0]  ;;  %v17662_v14 = vld [vmem:[#allocation7 + $0x16dc] sm:$0xf] }
 0x312   :  { %9256 = vmatpush.bf16.msrb.mxu1 %v13696_v42  ;;  %v14216_v42 = vor.u32 %v17252_v26, %v14213_v13  ;;  %v15852_v2 = vor.u32 %v17667_v33, %v15851_v28  ;;  %v15653_v26 = vld [vmem:[#allocation7 + $0x1570] sm:$0xf0]  ;;  %v17692_v13 = vld [vmem:[#allocation7 + $0x17cc] sm:$0xf]  ;;  %v17442_v33 = vld [vmem:[#allocation7 + $0xffc] sm:$0xf] }
 0x313   :  { %9294 = vmatpush.bf16.msra.mxu2 %v14696_v34  ;;  %v9003_v34 = vpop.f32.mrf.mxu1  ;;  %9218 = vmatpush.bf16.msra.mxu3 %v15892_v25  ;;  %v17612_v25 = vld [vmem:[#allocation7 + $0x154c] sm:$0xf]  ;;  %v15973_v29 = vld [vmem:[#allocation7 + $0x17f0] sm:$0xf0] }
 0x314   :  { %v14973_v34 = vld [vmem:[#allocation7 + $0x1020] sm:$0xf0] }
 0x315   :  { %9282 = vmatpush.bf16.msra.mxu0 %v14336_v32  ;;  %v15776_v32 = vor.u32 %v17642_v38, %v15773_v39  ;;  %v15976_v38 = vor.u32 %v17692_v13, %v15973_v29  ;;  %v14976_v46 = vor.u32 %v17442_v33, %v14973_v34  ;;  %v13219_v13 = vld [vmem:[#allocation7 + $0x240] sm:$0xf]  ;;  %v15493_v33 = vld [vmem:[#allocation7 + $0x1430] sm:$0xf0]  ;;  %v17652_v34 = vld [vmem:[#allocation7 + $0x168c] sm:$0xf] }
 0x316   :  { %9257 = vmatpush.bf16.msrb.mxu1 %v13656_v56  ;;  %v15733_v56 = vld [vmem:[#allocation7 + $0x1610] sm:$0xf0] }
 0x317   :  { %9295 = vmatpush.bf16.msra.mxu2 %v14656_v62  ;;  %v15811_v62 = vld [vmem:[#allocation7 + $0x1688] sm:$0xf]  ;;  %9219 = vmatpush.bf16.msra.mxu3 %v15852_v2  ;;  %v14053_v2 = vld [vmem:[#allocation7 + $0x8f0] sm:$0xf0] }
 0x318   :  { %v15812_v5 = vor.u32 %v17657_v16, %v15811_v62  ;;  %v14933_v62 = vld [vmem:[#allocation7 + $0xfd0] sm:$0xf0] }
 0x319   :  { %9283 = vmatpush.bf16.msra.mxu0 %v14296_v8  ;;  %v15736_v8 = vor.u32 %v17632_v43, %v15733_v56  ;;  %v17592_v56 = vld [vmem:[#allocation7 + $0x14ac] sm:$0xf] }
 0x31a   :  { %9258 = vmatpush.bf16.msrb.mxu1 %v13616_v60  ;;  %v15056_v60 = vor.u32 %v17462_v7, %v15053_v63  ;;  %v17202_v7 = vld [vmem:[#allocation7 + $0x87c] sm:$0xf]  ;;  %v14013_v63 = vld [vmem:[#allocation7 + $0x8a0] sm:$0xf0] }
 0x31b   :  { %9296 = vmatpush.bf16.msra.mxu2 %v14616_v61  ;;  %v16056_v61 = vor.u32 %v17712_v37, %v16053_v58  ;;  %9220 = vmatpush.bf16.msra.mxu3 %v15812_v5  ;;  %v15573_v37 = vld [vmem:[#allocation7 + $0x14d0] sm:$0xf0]  ;;  %v17672_v58 = vld [vmem:[#allocation7 + $0x172c] sm:$0xf]  ;;  %v14016_v21 = vor.u32 %v17202_v7, %v14013_v63  ;;  %v13819_v7 = vld [vmem:[#allocation7 + $0x6f0] sm:$0xf] }
 0x31c   :  { %v17158_v63 = vld [vmem:[#allocation7 + $0x714] sm:$0xf0] }
 0x31d   :  { %9284 = vmatpush.bf16.msra.mxu0 %v14256_v53  ;;  %v15696_v53 = vor.u32 %v17622_v17, %v15693_v18  ;;  %v15576_v18 = vor.u32 %v17592_v56, %v15573_v37  ;;  %v17172_v37 = vld [vmem:[#allocation7 + $0x78c] sm:$0xf] }
 0x31e   :  { %9259 = vmatpush.bf16.msrb.mxu1 %v13576_v30  ;;  %v18334_v1 = vpop.f32.mrf.mxu1  ;;  %v17222_v30 = vld [vmem:[#allocation7 + $0x91c] sm:$0xf]  ;;  %9221 = vmatmul.bf16.vlgmr.msra.gmra.mxu3 %v18292_v24 }
 0x31f   :  { %9297 = vmatpush.bf16.msra.mxu2 %v14576_v54  ;;  %9265 = vmatpush.bf16.msrb.mxu3 %v14176_v12  ;;  %v14136_v54 = vor.u32 %v17232_v50, %v14133_v20  ;;  %v14096_v39 = vor.u32 %v17222_v30, %v14093_v41  ;;  %v14893_v12 = vld [vmem:[#allocation7 + $0xf80] sm:$0xf0]  ;;  %v17582_v50 = vld [vmem:[#allocation7 + $0x145c] sm:$0xf]  ;;  %v17572_v41 = vld [vmem:[#allocation7 + $0x140c] sm:$0xf] }
 0x320   :  { %v15533_v20 = vld [vmem:[#allocation7 + $0x1480] sm:$0xf0] }
 0x321   :  { %9285 = vmatpush.bf16.msra.mxu0 %v14216_v42  ;;  %9260 = vmatmul.bf16.vlgmr.msrb.gmra.mxu1 %v18227_v4  ;;  %v18337_v28 = vpop.f32.mrf.mxu0  ;;  %v15613_v42 = vld [vmem:[#allocation7 + $0x1520] sm:$0xf0] }
 0x322   :  { %9304 = vmatpush.bf16.msra.mxu1 %v15136_v44  ;;  %v15656_v44 = vor.u32 %v17612_v25, %v15653_v26  ;;  %v15616_v16 = vor.u32 %v17602_v40, %v15613_v42  ;;  %v17412_v25 = vld [vmem:[#allocation7 + $0xf0c] sm:$0xf]  ;;  %v14853_v26 = vld [vmem:[#allocation7 + $0xf30] sm:$0xf0]  ;;  %v13933_v40 = vld [vmem:[#allocation7 + $0x800] sm:$0xf0] }
 0x323   :  { %9298 = vmatpush.bf16.msra.mxu2 %v14536_v55  ;;  %9266 = vmatpush.bf16.msrb.mxu3 %v14136_v54  ;;  %v17212_v55 = vld [vmem:[#allocation7 + $0x8cc] sm:$0xf]  ;;  %v13973_v54 = vld [vmem:[#allocation7 + $0x850] sm:$0xf0] }
 0x324   :  { %9286 = vmatmul.bf16.vlgmr.msra.gmra.mxu0 %v18246_v6  ;;  %v14056_v43 = vor.u32 %v17212_v55, %v14053_v2  ;;  %v14179_v55 = vld [vmem:[#allocation7 + $0x9c0] sm:$0xf]  ;;  %v15496_v2 = vor.u32 %v17572_v41, %v15493_v33 }
 0x325   :  { %9330 = vmatpush.bf16.msrb.mxu0 %v15776_v32  ;;  %v17432_v32 = vld [vmem:[#allocation7 + $0xfac] sm:$0xf] }
 0x326   :  { %9305 = vmatpush.bf16.msra.mxu1 %v15096_v49  ;;  %9299 = vmatmul.bf16.vlgmr.msra.gmra.mxu2 %v18248_v19  ;;  %v15936_v49 = vor.u32 %v17682_v10, %v15933_v15  ;;  %v14936_v59 = vor.u32 %v17432_v32, %v14933_v62  ;;  %v17168_v15 = vld [vmem:[#allocation7 + $0x764] sm:$0xf0]  ;;  %v13179_v62 = vld [vmem:[#allocation7 + $0x1f0] sm:$0xf] }
 0x327   :  { %9343 = vmatpush.bf16.msrb.mxu2 %v16096_v0  ;;  %9267 = vmatpush.bf16.msrb.mxu3 %v14096_v39  ;;  %v9055_v0 = vpop.f32.mrf.mxu1  ;;  %v17182_v39 = vld [vmem:[#allocation7 + $0x7dc] sm:$0xf]  ;;  %v17248_v32 = vld [vmem:[#allocation7 + $0x9e4] sm:$0xf0] }
 0x329   :  { %9331 = vmatpush.bf16.msrb.mxu0 %v15736_v8  ;;  %v9081_v5 = vpop.f32.mrf.mxu0  ;;  %v8962_v8 = vpop.f32.mrf.mxu3 }
 0x32a   :  { %9306 = vmatpush.bf16.msra.mxu1 %v15056_v60  ;;  %v18340_v17 = vadd.f32 %v8962_v8, %v18319_v45  ;;  %v18342_v52 = vpop.f32.mrf.mxu2  ;;  %v15896_v60 = vor.u32 %v17672_v58, %v15893_v22  ;;  %v15536_v45 = vor.u32 %v17582_v50, %v15533_v20  ;;  %v13893_v58 = vld [vmem:[#allocation7 + $0x7b0] sm:$0xf0]  ;;  %v14139_v5 = vld [vmem:[#allocation7 + $0x970] sm:$0xf]  ;;  %v17238_v8 = vld [vmem:[#allocation7 + $0x994] sm:$0xf0]  ;;  %v13820_v50 = vor.u32 %v17158_v63, %v13819_v7 }
 0x32b   :  { %9344 = vmatpush.bf16.msrb.mxu2 %v16056_v61  ;;  %v17422_v61 = vld [vmem:[#allocation7 + $0xf5c] sm:$0xf]  ;;  %9268 = vmatpush.bf16.msrb.mxu3 %v14056_v43  ;;  %v13936_v43 = vor.u32 %v17182_v39, %v13933_v40  ;;  %v14140_v20 = vor.u32 %v17238_v8, %v14139_v5  ;;  %v13739_v39 = vld [vmem:[#allocation7 + $0x650] sm:$0xf]  ;;  %v17138_v40 = vld [vmem:[#allocation7 + $0x674] sm:$0xf0] }
 0x32c   :  { %v14896_v35 = vor.u32 %v17422_v61, %v14893_v12  ;;  %v17562_v61 = vld [vmem:[#allocation7 + $0x13bc] sm:$0xf]  ;;  %v15453_v12 = vld [vmem:[#allocation7 + $0x13e0] sm:$0xf0]  ;;  %v15333_v7 = vld [vmem:[#allocation7 + $0x12f0] sm:$0xf0] }
 0x32d   :  { %9332 = vmatpush.bf16.msrb.mxu0 %v15696_v53  ;;  %v15853_v53 = vld [vmem:[#allocation7 + $0x1700] sm:$0xf0]  ;;  %v13019_v63 = vld [vmem:[#allocation7 + $0xb0] sm:$0xf]  ;;  %v16958_v5 = vld [vmem:[#allocation7 + $0xd4] sm:$0xf0] }
 0x32e   :  { %9307 = vmatpush.bf16.msra.mxu1 %v15016_v27  ;;  %v17008_v27 = vld [vmem:[#allocation7 + $0x264] sm:$0xf0]  ;;  %v15856_v29 = vor.u32 %v17662_v14, %v15853_v53  ;;  %v15456_v14 = vor.u32 %v17562_v61, %v15453_v12  ;;  %v13779_v53 = vld [vmem:[#allocation7 + $0x6a0] sm:$0xf] }
 0x32f   :  { %9345 = vmatpush.bf16.msrb.mxu2 %v16016_v23  ;;  %v17192_v23 = vld [vmem:[#allocation7 + $0x82c] sm:$0xf]  ;;  %9269 = vmatpush.bf16.msrb.mxu3 %v14016_v21  ;;  %v13220_v42 = vor.u32 %v17008_v27, %v13219_v13  ;;  %v13896_v21 = vor.u32 %v17172_v37, %v13893_v58  ;;  %v15413_v27 = vld [vmem:[#allocation7 + $0x1390] sm:$0xf0]  ;;  %v17128_v37 = vld [vmem:[#allocation7 + $0x624] sm:$0xf0] }
 0x330   :  { %v13976_v30 = vor.u32 %v17192_v23, %v13973_v54  ;;  %v17148_v23 = vld [vmem:[#allocation7 + $0x6c4] sm:$0xf0]  ;;  %v14099_v54 = vld [vmem:[#allocation7 + $0x920] sm:$0xf]  ;;  %v17552_v13 = vld [vmem:[#allocation7 + $0x136c] sm:$0xf] }
 0x331   :  { %9333 = vmatpush.bf16.msrb.mxu0 %v15656_v44  ;;  %v14856_v44 = vor.u32 %v17412_v25, %v14853_v26  ;;  %v8964_v10 = vpop.f32.mrf.mxu3  ;;  %v14019_v58 = vld [vmem:[#allocation7 + $0x880] sm:$0xf] }
 0x332   :  { %9308 = vmatpush.bf16.msra.mxu1 %v14976_v46  ;;  %v13859_v46 = vld [vmem:[#allocation7 + $0x740] sm:$0xf]  ;;  %v9094_v0 = vpop.f32.mrf.mxu2  ;;  %v17218_v10 = vld [vmem:[#allocation7 + $0x8f4] sm:$0xf0] }
 0x333   :  { %9346 = vmatpush.bf16.msrb.mxu2 %v15976_v38  ;;  %v15813_v38 = vld [vmem:[#allocation7 + $0x16b0] sm:$0xf0]  ;;  %9270 = vmatpush.bf16.msrb.mxu3 %v13976_v30  ;;  %v13860_v56 = vor.u32 %v17168_v15, %v13859_v46  ;;  %v16978_v30 = vld [vmem:[#allocation7 + $0x174] sm:$0xf0]  ;;  %v17542_v46 = vld [vmem:[#allocation7 + $0x131c] sm:$0xf] }
 0x334   :  { %v15373_v15 = vld [vmem:[#allocation7 + $0x1340] sm:$0xf0] }
 0x335   :  { %9334 = vmatpush.bf16.msrb.mxu0 %v15616_v16  ;;  %v16998_v16 = vld [vmem:[#allocation7 + $0x214] sm:$0xf0] }
 0x336   :  { %9309 = vmatpush.bf16.msra.mxu1 %v14936_v59  ;;  %v14180_v59 = vor.u32 %v17248_v32, %v14179_v55  ;;  %v13180_v22 = vor.u32 %v16998_v16, %v13179_v62  ;;  %v16968_v32 = vld [vmem:[#allocation7 + $0x124] sm:$0xf0]  ;;  %v13740_v62 = vor.u32 %v17138_v40, %v13739_v39  ;;  %v15253_v39 = vld [vmem:[#allocation7 + $0x1250] sm:$0xf0] }
 0x337   :  { %9347 = vmatpush.bf16.msrb.mxu2 %v15936_v49  ;;  %v15816_v49 = vor.u32 %v17652_v34, %v15813_v38  ;;  %9271 = vmatpush.bf16.msrb.mxu3 %v13936_v43  ;;  %v13780_v34 = vor.u32 %v17148_v23, %v13779_v53  ;;  %v15416_v38 = vor.u32 %v17552_v13, %v15413_v27  ;;  %v15293_v53 = vld [vmem:[#allocation7 + $0x12a0] sm:$0xf0]  ;;  %v13619_v27 = vld [vmem:[#allocation7 + $0x560] sm:$0xf] }
 0x339   :  { %9335 = vmatpush.bf16.msrb.mxu0 %v15576_v18  ;;  %v13139_v18 = vld [vmem:[#allocation7 + $0x1a0] sm:$0xf] }
 0x33a   :  { %9310 = vmatpush.bf16.msra.mxu1 %v14896_v35  ;;  %v9014_v35 = vpop.f32.mrf.mxu3 }
 0x33b   :  { %9348 = vmatpush.bf16.msrb.mxu2 %v15896_v60  ;;  %v16988_v60 = vld [vmem:[#allocation7 + $0x1c4] sm:$0xf0]  ;;  %v9015_v26 = vadd.f32 %v9014_v35, %v18329_v3  ;;  %9272 = vmatpush.bf16.msrb.mxu3 %v13896_v21  ;;  %v17118_v21 = vld [vmem:[#allocation7 + $0x5d4] sm:$0xf0]  ;;  %v17522_v35 = vld [vmem:[#allocation7 + $0x127c] sm:$0xf] }
 0x33c   :  { %v13140_v25 = vor.u32 %v16988_v60, %v13139_v18  ;;  %v13659_v60 = vld [vmem:[#allocation7 + $0x5b0] sm:$0xf]  ;;  %v15296_v13 = vor.u32 %v17522_v35, %v15293_v53  ;;  %v17478_v53 = vld [vmem:[#allocation7 + $0x1114] sm:$0xf0] }
 0x33d   :  { %9336 = vmatpush.bf16.msrb.mxu0 %v15536_v45  ;;  %v17228_v45 = vld [vmem:[#allocation7 + $0x944] sm:$0xf0]  ;;  %v9028_v41 = vadd.f32 %v18324_v31, %v9015_v26  ;;  %v13660_v26 = vor.u32 %v17118_v21, %v13659_v60  ;;  %v15099_v35 = vld [vmem:[#allocation7 + $0x10f0] sm:$0xf] }
 0x33e   :  { %9311 = vmatpush.bf16.msra.mxu1 %v14856_v44  ;;  %v18349_v33 = vpop.f32.mrf.mxu1  ;;  %v14100_v44 = vor.u32 %v17228_v45, %v14099_v54  ;;  %9273 = vmatmul.bf16.vlgmr.msrb.gmra.mxu3 %v18231_v9  ;;  %v12979_v54 = vld [vmem:[#allocation7 + $0x60] sm:$0xf] }
 0x33f   :  { %9349 = vmatpush.bf16.msrb.mxu2 %v15856_v29  ;;  %v13099_v29 = vld [vmem:[#allocation7 + $0x150] sm:$0xf]  ;;  %9317 = vmatpush.bf16.msra.mxu3 %v15456_v14  ;;  %v9041_v55 = vadd.f32 %v18326_v48, %v9028_v41  ;;  %v17198_v14 = vld [vmem:[#allocation7 + $0x854] sm:$0xf0] }
 0x340   :  { %v13100_v3 = vor.u32 %v16978_v30, %v13099_v29  ;;  %v17108_v29 = vld [vmem:[#allocation7 + $0x584] sm:$0xf0]  ;;  %v13939_v30 = vld [vmem:[#allocation7 + $0x7e0] sm:$0xf] }
 0x341   :  { %9337 = vmatpush.bf16.msrb.mxu0 %v15496_v2  ;;  %9312 = vmatmul.bf16.vlgmr.msra.gmra.mxu1 %v18253_v51  ;;  %v18353_v31 = vpop.f32.mrf.mxu0  ;;  %v13059_v2 = vld [vmem:[#allocation7 + $0x100] sm:$0xf]  ;;  %v9054_v16 = vadd.f32 %v18334_v1, %v9041_v55 }
 0x342   :  { %9356 = vmatpush.bf16.msrb.mxu1 %v13220_v42  ;;  %v14059_v42 = vld [vmem:[#allocation7 + $0x8d0] sm:$0xf]  ;;  %v9016_v43 = vpop.f32.mrf.mxu3  ;;  %v13060_v48 = vor.u32 %v16968_v32, %v13059_v2 }
 0x343   :  { %9350 = vmatpush.bf16.msrb.mxu2 %v15816_v49  ;;  %9318 = vmatpush.bf16.msra.mxu3 %v15416_v38  ;;  %v14060_v0 = vor.u32 %v17218_v10, %v14059_v42  ;;  %v15376_v49 = vor.u32 %v17542_v46, %v15373_v15  ;;  %v17512_v38 = vld [vmem:[#allocation7 + $0x122c] sm:$0xf]  ;;  %v12939_v42 = vld [vmem:[#allocation7 + $0x10] sm:$0xf]  ;;  %v13620_v10 = vor.u32 %v17108_v29, %v13619_v27  ;;  %v14499_v46 = vld [vmem:[#allocation7 + $0xc40] sm:$0xf] }
 0x344   :  { %9338 = vmatmul.bf16.vlgmr.msrb.gmra.mxu0 %v18282_v36  ;;  %v17328_v15 = vld [vmem:[#allocation7 + $0xc64] sm:$0xf0]  ;;  %v13899_v43 = vld [vmem:[#allocation7 + $0x790] sm:$0xf]  ;;  %v15100_v29 = vor.u32 %v17478_v53, %v15099_v35 }
 0x345   :  { %9382 = vmatpush.bf16.msra.mxu0 %v13860_v56  ;;  %v13699_v56 = vld [vmem:[#allocation7 + $0x600] sm:$0xf] }
 0x346   :  { %9357 = vmatpush.bf16.msrb.mxu1 %v13180_v22  ;;  %9351 = vmatmul.bf16.vlgmr.msrb.gmra.mxu2 %v18292_v24  ;;  %v17532_v22 = vld [vmem:[#allocation7 + $0x12cc] sm:$0xf]  ;;  %v9107_v8 = vpop.f32.mrf.mxu1  ;;  %v13700_v61 = vor.u32 %v17128_v37, %v13699_v56  ;;  %v17178_v37 = vld [vmem:[#allocation7 + $0x7b4] sm:$0xf0] }
 0x347   :  { %9395 = vmatpush.bf16.msra.mxu2 %v14180_v59  ;;  %v17208_v59 = vld [vmem:[#allocation7 + $0x8a4] sm:$0xf0]  ;;  %9319 = vmatpush.bf16.msra.mxu3 %v15376_v49  ;;  %v15336_v18 = vor.u32 %v17532_v22, %v15333_v7  ;;  %v17098_v49 = vld [vmem:[#allocation7 + $0x534] sm:$0xf0]  ;;  %v15139_v22 = vld [vmem:[#allocation7 + $0x1140] sm:$0xf] }
 0x348   :  { %v14020_v1 = vor.u32 %v17208_v59, %v14019_v58  ;;  %v15213_v58 = vld [vmem:[#allocation7 + $0x1200] sm:$0xf0]  ;;  %v14500_v59 = vor.u32 %v17328_v15, %v14499_v46  ;;  %v17488_v7 = vld [vmem:[#allocation7 + $0x1164] sm:$0xf0]  ;;  %v14459_v8 = vld [vmem:[#allocation7 + $0xbf0] sm:$0xf] }
 0x349   :  { %9383 = vmatpush.bf16.msra.mxu0 %v13820_v50  ;;  %v18356_v12 = vpop.f32.mrf.mxu2  ;;  %v13979_v50 = vld [vmem:[#allocation7 + $0x830] sm:$0xf]  ;;  %v9133_v23 = vpop.f32.mrf.mxu0  ;;  %v15140_v60 = vor.u32 %v17488_v7, %v15139_v22  ;;  %v17298_v46 = vld [vmem:[#allocation7 + $0xb74] sm:$0xf0]  ;;  %v17288_v22 = vld [vmem:[#allocation7 + $0xb24] sm:$0xf0] }
 0x34a   :  { %9358 = vmatpush.bf16.msrb.mxu1 %v13140_v25  ;;  %v16948_v25 = vld [vmem:[#allocation7 + $0x84] sm:$0xf0]  ;;  %v13980_v45 = vor.u32 %v17198_v14, %v13979_v50  ;;  %v17492_v50 = vld [vmem:[#allocation7 + $0x118c] sm:$0xf]  ;;  %v15419_v23 = vld [vmem:[#allocation7 + $0x1370] sm:$0xf] }
 0x34b   :  { %9396 = vmatpush.bf16.msra.mxu2 %v14140_v20  ;;  %v13020_v20 = vor.u32 %v16958_v5, %v13019_v63  ;;  %9320 = vmatpush.bf16.msra.mxu3 %v15336_v18  ;;  %v12980_v41 = vor.u32 %v16948_v25, %v12979_v54  ;;  %v15459_v63 = vld [vmem:[#allocation7 + $0x13c0] sm:$0xf]  ;;  %v17568_v5 = vld [vmem:[#allocation7 + $0x13e4] sm:$0xf0]  ;;  %v17558_v54 = vld [vmem:[#allocation7 + $0x1394] sm:$0xf0] }
 0x34c   :  { %v13539_v25 = vld [vmem:[#allocation7 + $0x4c0] sm:$0xf] }
 0x34d   :  { %9384 = vmatpush.bf16.msra.mxu0 %v13780_v34  ;;  %v9066_v34 = vpop.f32.mrf.mxu3 }
 0x34e   :  { %9359 = vmatpush.bf16.msrb.mxu1 %v13100_v3  ;;  %v9067_v40 = vadd.f32 %v9066_v34, %v9054_v16  ;;  %v16938_v3 = vld [vmem:[#allocation7 + $0x34] sm:$0xf0]  ;;  %v17502_v16 = vld [vmem:[#allocation7 + $0x11dc] sm:$0xf]  ;;  %v15059_v34 = vld [vmem:[#allocation7 + $0x10a0] sm:$0xf] }
 0x34f   :  { %9397 = vmatpush.bf16.msra.mxu2 %v14100_v44  ;;  %v17188_v44 = vld [vmem:[#allocation7 + $0x804] sm:$0xf0]  ;;  %9321 = vmatpush.bf16.msra.mxu3 %v15296_v13  ;;  %v12940_v56 = vor.u32 %v16938_v3, %v12939_v42  ;;  %v15216_v18 = vor.u32 %v17502_v16, %v15213_v58  ;;  %v13499_v42 = vld [vmem:[#allocation7 + $0x470] sm:$0xf]  ;;  %v17078_v3 = vld [vmem:[#allocation7 + $0x494] sm:$0xf0] }
 0x350   :  { %v9080_v55 = vadd.f32 %v18337_v28, %v9067_v40  ;;  %v13940_v2 = vor.u32 %v17188_v44, %v13939_v30  ;;  %v17308_v13 = vld [vmem:[#allocation7 + $0xbc4] sm:$0xf0]  ;;  %v15420_v30 = vor.u32 %v17558_v54, %v15419_v23 }
 0x351   :  { %9385 = vmatpush.bf16.msra.mxu0 %v13740_v62  ;;  %v9146_v32 = vpop.f32.mrf.mxu2  ;;  %v15256_v62 = vor.u32 %v17512_v38, %v15253_v39  ;;  %v17468_v44 = vld [vmem:[#allocation7 + $0x10c4] sm:$0xf0]  ;;  %v15379_v38 = vld [vmem:[#allocation7 + $0x1320] sm:$0xf] }
 0x352   :  { %9360 = vmatpush.bf16.msrb.mxu1 %v13060_v48  ;;  %v18360_v48 = vadd.f32 %v18342_v52, %v9080_v55  ;;  %v15460_v52 = vor.u32 %v17568_v5, %v15459_v63  ;;  %v17548_v40 = vld [vmem:[#allocation7 + $0x1344] sm:$0xf0]  ;;  %v15060_v55 = vor.u32 %v17468_v44, %v15059_v34  ;;  %v13500_v32 = vor.u32 %v17078_v3, %v13499_v42  ;;  %v14979_v5 = vld [vmem:[#allocation7 + $0x1000] sm:$0xf] }
 0x353   :  { %9398 = vmatpush.bf16.msra.mxu2 %v14060_v0  ;;  %v13579_v0 = vld [vmem:[#allocation7 + $0x510] sm:$0xf]  ;;  %9322 = vmatpush.bf16.msra.mxu3 %v15256_v62  ;;  %v17068_v16 = vld [vmem:[#allocation7 + $0x444] sm:$0xf0]  ;;  %v14259_v44 = vld [vmem:[#allocation7 + $0xa60] sm:$0xf] }
 0x354   :  { %v13580_v28 = vor.u32 %v17098_v49, %v13579_v0  ;;  %v15019_v62 = vld [vmem:[#allocation7 + $0x1050] sm:$0xf]  ;;  %v17458_v0 = vld [vmem:[#allocation7 + $0x1074] sm:$0xf0] }
 0x355   :  { %9386 = vmatpush.bf16.msra.mxu0 %v13700_v61  ;;  %v17318_v61 = vld [vmem:[#allocation7 + $0xc14] sm:$0xf0]  ;;  %v9068_v21 = vpop.f32.mrf.mxu3  ;;  %v15339_v49 = vld [vmem:[#allocation7 + $0x12d0] sm:$0xf]  ;;  %v15020_v7 = vor.u32 %v17458_v0, %v15019_v62  ;;  %v17508_v62 = vld [vmem:[#allocation7 + $0x1204] sm:$0xf0] }
 0x356   :  { %9361 = vmatpush.bf16.msrb.mxu1 %v13020_v20  ;;  %v15173_v20 = vld [vmem:[#allocation7 + $0x11b0] sm:$0xf0]  ;;  %v14460_v14 = vor.u32 %v17318_v61, %v14459_v8  ;;  %v17448_v8 = vld [vmem:[#allocation7 + $0x1024] sm:$0xf0]  ;;  %v15299_v61 = vld [vmem:[#allocation7 + $0x1280] sm:$0xf] }
 0x357   :  { %9399 = vmatpush.bf16.msra.mxu2 %v14020_v1  ;;  %v13900_v1 = vor.u32 %v17178_v37, %v13899_v43  ;;  %9323 = vmatpush.bf16.msra.mxu3 %v15216_v18  ;;  %v15176_v27 = vor.u32 %v17492_v50, %v15173_v20  ;;  %v13459_v37 = vld [vmem:[#allocation7 + $0x420] sm:$0xf]  ;;  %v17528_v18 = vld [vmem:[#allocation7 + $0x12a4] sm:$0xf0]  ;;  %v17058_v21 = vld [vmem:[#allocation7 + $0x3f4] sm:$0xf0]  ;;  %v14980_v53 = vor.u32 %v17448_v8, %v14979_v5 }
 0x358   :  { %v14299_v50 = vld [vmem:[#allocation7 + $0xab0] sm:$0xf]  ;;  %v17278_v20 = vld [vmem:[#allocation7 + $0xad4] sm:$0xf0]  ;;  %v15300_v23 = vor.u32 %v17528_v18, %v15299_v61 }
 0x359   :  { %9387 = vmatpush.bf16.msra.mxu0 %v13660_v26  ;;  %v17088_v26 = vld [vmem:[#allocation7 + $0x4e4] sm:$0xf0]  ;;  %v13339_v0 = vld [vmem:[#allocation7 + $0x330] sm:$0xf]  ;;  %v17418_v8 = vld [vmem:[#allocation7 + $0xf34] sm:$0xf0] }
 0x35a   :  { %9362 = vmatpush.bf16.msrb.mxu1 %v12980_v41  ;;  %v13540_v41 = vor.u32 %v17088_v26, %v13539_v25  ;;  %v14939_v26 = vld [vmem:[#allocation7 + $0xfb0] sm:$0xf]  ;;  %v17498_v18 = vld [vmem:[#allocation7 + $0x11b4] sm:$0xf0] }
 0x35b   :  { %9400 = vmatpush.bf16.msra.mxu2 %v13980_v45  ;;  %v14419_v45 = vld [vmem:[#allocation7 + $0xba0] sm:$0xf]  ;;  %9324 = vmatpush.bf16.msra.mxu3 %v15176_v27  ;;  %v14300_v27 = vor.u32 %v17278_v20, %v14299_v50  ;;  %v14859_v5 = vld [vmem:[#allocation7 + $0xf10] sm:$0xf]  ;;  %v17003_v20 = vld [vmem:[#allocation7 + $0x244] sm:$0xf] }
 0x35c   :  { %v14420_v39 = vor.u32 %v17308_v13, %v14419_v45  ;;  %v17438_v45 = vld [vmem:[#allocation7 + $0xfd4] sm:$0xf0]  ;;  %v15259_v13 = vld [vmem:[#allocation7 + $0x1230] sm:$0xf] }
 0x35d   :  { %9388 = vmatpush.bf16.msra.mxu0 %v13620_v10  ;;  %v14379_v10 = vld [vmem:[#allocation7 + $0xb50] sm:$0xf] }
 0x35e   :  { %9363 = vmatpush.bf16.msrb.mxu1 %v12940_v56  ;;  %v18365_v15 = vpop.f32.mrf.mxu1  ;;  %v14380_v43 = vor.u32 %v17298_v46, %v14379_v10  ;;  %v17538_v56 = vld [vmem:[#allocation7 + $0x12f4] sm:$0xf0]  ;;  %9325 = vmatmul.bf16.vlgmr.msra.gmra.mxu3 %v18250_v11  ;;  %v14899_v10 = vld [vmem:[#allocation7 + $0xf60] sm:$0xf]  ;;  %v17428_v46 = vld [vmem:[#allocation7 + $0xf84] sm:$0xf0] }
 0x35f   :  { %9401 = vmatpush.bf16.msra.mxu2 %v13940_v2  ;;  %9369 = vmatpush.bf16.msrb.mxu3 %v13540_v41  ;;  %v15380_v2 = vor.u32 %v17548_v40, %v15379_v38  ;;  %v15340_v63 = vor.u32 %v17538_v56, %v15339_v49  ;;  %v17048_v41 = vld [vmem:[#allocation7 + $0x3a4] sm:$0xf0]  ;;  %v17038_v49 = vld [vmem:[#allocation7 + $0x354] sm:$0xf0]  ;;  %v14219_v56 = vld [vmem:[#allocation7 + $0xa10] sm:$0xf] }
 0x360   :  { %v17268_v38 = vld [vmem:[#allocation7 + $0xa84] sm:$0xf0]  ;;  %v15179_v61 = vld [vmem:[#allocation7 + $0x1190] sm:$0xf] }
 0x361   :  { %9389 = vmatpush.bf16.msra.mxu0 %v13580_v28  ;;  %9364 = vmatmul.bf16.vlgmr.msrb.gmra.mxu1 %v18221_v47  ;;  %v18368_v58 = vpop.f32.mrf.mxu0  ;;  %v13460_v28 = vor.u32 %v17068_v16, %v13459_v37  ;;  %v17258_v37 = vld [vmem:[#allocation7 + $0xa34] sm:$0xf0]  ;;  %v14900_v16 = vor.u32 %v17428_v46, %v14899_v10  ;;  %v17408_v10 = vld [vmem:[#allocation7 + $0xee4] sm:$0xf0] }
 0x362   :  { %9408 = vmatpush.bf16.msra.mxu1 %v14500_v59  ;;  %v14339_v59 = vld [vmem:[#allocation7 + $0xb00] sm:$0xf]  ;;  %v17628_v46 = vld [vmem:[#allocation7 + $0x15c4] sm:$0xf0] }
 0x363   :  { %9402 = vmatpush.bf16.msra.mxu2 %v13900_v1  ;;  %9370 = vmatpush.bf16.msrb.mxu3 %v13500_v32  ;;  %v14340_v1 = vor.u32 %v17288_v22, %v14339_v59  ;;  %v9118_v32 = vpop.f32.mrf.mxu3  ;;  %v15779_v59 = vld [vmem:[#allocation7 + $0x1640] sm:$0xf] }
 0x364   :  { %9390 = vmatmul.bf16.vlgmr.msra.gmra.mxu0 %v18227_v4 }
 0x365   :  { %9434 = vmatpush.bf16.msrb.mxu0 %v15140_v60  ;;  %v13419_v60 = vld [vmem:[#allocation7 + $0x3d0] sm:$0xf] }
 0x366   :  { %9409 = vmatpush.bf16.msra.mxu1 %v14460_v14  ;;  %9403 = vmatmul.bf16.vlgmr.msra.gmra.mxu2 %v18231_v9  ;;  %v9159_v35 = vpop.f32.mrf.mxu1  ;;  %v13420_v25 = vor.u32 %v17058_v21, %v13419_v60  ;;  %v13299_v60 = vld [vmem:[#allocation7 + $0x2e0] sm:$0xf]  ;;  %v17028_v21 = vld [vmem:[#allocation7 + $0x304] sm:$0xf0] }
 0x367   :  { %9447 = vmatpush.bf16.msrb.mxu2 %v15460_v52  ;;  %v18370_v52 = vld [vmem:[#allocation8] sm:$0xff]  ;;  %9371 = vmatpush.bf16.msrb.mxu3 %v13460_v28  ;;  %v13340_v28 = vor.u32 %v17038_v49, %v13339_v0  ;;  %v13141_v49 = vld [vmem:[#allocation7 + $0x1c8] sm:$0xf0] }
 0x368   :  { %v4818_v14 = vperm.slane %v18370_v52, 2  ;;  %v17083_v35 = vld [vmem:[#allocation7 + $0x4c4] sm:$0xf] }
 0x369   :  { %9435 = vmatpush.bf16.msrb.mxu0 %v15100_v29  ;;  %v18373_v54 = vpop.f32.mrf.mxu2  ;;  %v17518_v29 = vld [vmem:[#allocation7 + $0x1254] sm:$0xf0]  ;;  %v9185_v34 = vpop.f32.mrf.mxu0  ;;  %v16983_v0 = vld [vmem:[#allocation7 + $0x1a4] sm:$0xf] }
 0x36a   :  { %9410 = vmatpush.bf16.msra.mxu1 %v14420_v39  ;;  %v14940_v39 = vor.u32 %v17438_v45, %v14939_v26  ;;  %v9106_v40 = vadd.f32 %v18349_v33, %v4818_v14  ;;  %v15260_v42 = vor.u32 %v17518_v29, %v15259_v13  ;;  %v17648_v33 = vld [vmem:[#allocation7 + $0x1664] sm:$0xf0]  ;;  %v13221_v14 = vld [vmem:[#allocation7 + $0x268] sm:$0xf0]  ;;  %v17638_v26 = vld [vmem:[#allocation7 + $0x1614] sm:$0xf0]  ;;  %v15180_v45 = vor.u32 %v17498_v18, %v15179_v61 }
 0x36b   :  { %9448 = vmatpush.bf16.msrb.mxu2 %v15420_v30  ;;  %v13379_v30 = vld [vmem:[#allocation7 + $0x380] sm:$0xf]  ;;  %9372 = vmatpush.bf16.msrb.mxu3 %v13420_v25  ;;  %v15780_v50 = vor.u32 %v17648_v33, %v15779_v59  ;;  %v15739_v25 = vld [vmem:[#allocation7 + $0x15f0] sm:$0xf]  ;;  %v13224_v29 = vor.u32 %v17003_v20, %v13221_v14  ;;  %v17018_v34 = vld [vmem:[#allocation7 + $0x2b4] sm:$0xf0] }
 0x36c   :  { %v13380_v3 = vor.u32 %v17048_v41, %v13379_v30  ;;  %v9120_v30 = vpop.f32.mrf.mxu3  ;;  %v13259_v41 = vld [vmem:[#allocation7 + $0x290] sm:$0xf]  ;;  %v17398_v59 = vld [vmem:[#allocation7 + $0xe94] sm:$0xf0]  ;;  %v13101_v61 = vld [vmem:[#allocation7 + $0x178] sm:$0xf0] }
 0x36d   :  { %9436 = vmatpush.bf16.msrb.mxu0 %v15060_v55  ;;  %v15219_v55 = vld [vmem:[#allocation7 + $0x11e0] sm:$0xf]  ;;  %v15659_v33 = vld [vmem:[#allocation7 + $0x1550] sm:$0xf]  ;;  %v13381_v30 = vld [vmem:[#allocation7 + $0x3a8] sm:$0xf0] }
 0x36e   :  { %9411 = vmatpush.bf16.msra.mxu1 %v14380_v43  ;;  %v9119_v43 = vadd.f32 %v9118_v32, %v9106_v40  ;;  %v17073_v40 = vld [vmem:[#allocation7 + $0x474] sm:$0xf]  ;;  %v15619_v14 = vld [vmem:[#allocation7 + $0x1500] sm:$0xf] }
 0x36f   :  { %9449 = vmatpush.bf16.msrb.mxu2 %v15380_v2  ;;  %v14260_v2 = vor.u32 %v17268_v38, %v14259_v44  ;;  %9373 = vmatpush.bf16.msrb.mxu3 %v13380_v3  ;;  %v16993_v38 = vld [vmem:[#allocation7 + $0x1f4] sm:$0xf]  ;;  %v14819_v3 = vld [vmem:[#allocation7 + $0xec0] sm:$0xf] }
 0x370   :  { %v9132_v22 = vadd.f32 %v18353_v31, %v9119_v43  ;;  %v13541_v31 = vld [vmem:[#allocation7 + $0x4e8] sm:$0xf0]  ;;  %v17063_v43 = vld [vmem:[#allocation7 + $0x424] sm:$0xf] }
 0x371   :  { %9437 = vmatpush.bf16.msrb.mxu0 %v15020_v7  ;;  %v15220_v7 = vor.u32 %v17508_v62, %v15219_v55  ;;  %v13544_v44 = vor.u32 %v17083_v35, %v13541_v31  ;;  %v13260_v55 = vor.u32 %v17018_v34, %v13259_v41  ;;  %v14820_v62 = vor.u32 %v17408_v10, %v14819_v3  ;;  %v17608_v35 = vld [vmem:[#allocation7 + $0x1524] sm:$0xf0]  ;;  %v14699_v41 = vld [vmem:[#allocation7 + $0xdd0] sm:$0xf]  ;;  %v17378_v34 = vld [vmem:[#allocation7 + $0xdf4] sm:$0xf0] }
 0x372   :  { %9412 = vmatpush.bf16.msra.mxu1 %v14340_v1  ;;  %v14220_v1 = vor.u32 %v17258_v37, %v14219_v56  ;;  %v13461_v37 = vld [vmem:[#allocation7 + $0x448] sm:$0xf0]  ;;  %v14700_v3 = vor.u32 %v17378_v34, %v14699_v41  ;;  %v16953_v10 = vld [vmem:[#allocation7 + $0xb4] sm:$0xf]  ;;  %v17323_v34 = vld [vmem:[#allocation7 + $0xc44] sm:$0xf] }
 0x373   :  { %9450 = vmatpush.bf16.msrb.mxu2 %v15340_v63  ;;  %v9198_v63 = vpop.f32.mrf.mxu2  ;;  %9374 = vmatpush.bf16.msrb.mxu3 %v13340_v28  ;;  %v13464_v28 = vor.u32 %v17063_v43, %v13461_v37  ;;  %v15539_v43 = vld [vmem:[#allocation7 + $0x1460] sm:$0xf] }
 0x374   :  { %v13144_v63 = vor.u32 %v16983_v0, %v13141_v49  ;;  %v17368_v0 = vld [vmem:[#allocation7 + $0xda4] sm:$0xf0] }
 0x375   :  { %9438 = vmatpush.bf16.msrb.mxu0 %v14980_v53  ;;  %v9145_v53 = vadd.f32 %v18356_v12, %v9132_v22  ;;  %v15740_v12 = vor.u32 %v17638_v26, %v15739_v25  ;;  %v17618_v22 = vld [vmem:[#allocation7 + $0x1574] sm:$0xf0]  ;;  %v16963_v26 = vld [vmem:[#allocation7 + $0x104] sm:$0xf] }
 0x376   :  { %9413 = vmatpush.bf16.msra.mxu1 %v14300_v27  ;;  %v13300_v27 = vor.u32 %v17028_v21, %v13299_v60  ;;  %v15660_v18 = vor.u32 %v17618_v22, %v15659_v33  ;;  %v13421_v60 = vld [vmem:[#allocation7 + $0x3f8] sm:$0xf0]  ;;  %v14739_v21 = vld [vmem:[#allocation7 + $0xe20] sm:$0xf]  ;;  %v16943_v33 = vld [vmem:[#allocation7 + $0x64] sm:$0xf] }
 0x377   :  { %9451 = vmatpush.bf16.msrb.mxu2 %v15300_v23  ;;  %v14860_v23 = vor.u32 %v17418_v8, %v14859_v5  ;;  %v18379_v13 = vadd.f32 %v18365_v15, %v9145_v53  ;;  %v15699_v15 = vld [vmem:[#allocation7 + $0x15a0] sm:$0xf]  ;;  %v16973_v8 = vld [vmem:[#allocation7 + $0x154] sm:$0xf]  ;;  %v4819_v53 = vperm.slane %v18370_v52, 3 }
 0x378   :  { %9375 = vmatpush.bf16.msrb.mxu3 %v13300_v27  ;;  %v15700_v56 = vor.u32 %v17628_v46, %v15699_v15  ;;  %v17043_v27 = vld [vmem:[#allocation7 + $0x384] sm:$0xf]  ;;  %v13021_v15 = vld [vmem:[#allocation7 + $0xd8] sm:$0xf0]  ;;  %v17033_v46 = vld [vmem:[#allocation7 + $0x334] sm:$0xf] }
 0x379   :  { %9439 = vmatpush.bf16.msrb.mxu0 %v14940_v39  ;;  %v13181_v39 = vld [vmem:[#allocation7 + $0x218] sm:$0xf0]  ;;  %v13384_v52 = vor.u32 %v17043_v27, %v13381_v30  ;;  %v13024_v37 = vor.u32 %v16953_v10, %v13021_v15  ;;  %v12981_v22 = vld [vmem:[#allocation7 + $0x88] sm:$0xf0]  ;;  %v17348_v30 = vld [vmem:[#allocation7 + $0xd04] sm:$0xf0] }
 0x37a   :  { %9414 = vmatpush.bf16.msra.mxu1 %v14260_v2  ;;  %v13184_v2 = vor.u32 %v16993_v38, %v13181_v39 }
 0x37b   :  { %9452 = vmatpush.bf16.msrb.mxu2 %v15260_v42  ;;  %v13501_v42 = vld [vmem:[#allocation7 + $0x498] sm:$0xf0] }
 0x37c   :  { %v13504_v32 = vor.u32 %v17073_v40, %v13501_v42  ;;  %9376 = vmatpush.bf16.msrb.mxu3 %v13260_v55 }
 0x37d   :  { %9440 = vmatpush.bf16.msrb.mxu0 %v14900_v16  ;;  %v14779_v16 = vld [vmem:[#allocation7 + $0xe70] sm:$0xf] }
 0x37e   :  { %9415 = vmatpush.bf16.msra.mxu1 %v14220_v1  ;;  %v14780_v5 = vor.u32 %v17398_v59, %v14779_v16  ;;  %v17053_v1 = vld [vmem:[#allocation7 + $0x3d4] sm:$0xf] }
 0x37f   :  { %9453 = vmatpush.bf16.msrb.mxu2 %v15220_v7  ;;  %v18384_v7 = vpop.f32.mrf.mxu1  ;;  %9377 = vmatmul.bf16.vlgmr.msrb.gmra.mxu3 %v18225_v57  ;;  %v13424_v31 = vor.u32 %v17053_v1, %v13421_v60  ;;  %v17358_v1 = vld [vmem:[#allocation7 + $0xd54] sm:$0xf0]  ;;  %v15499_v60 = vld [vmem:[#allocation7 + $0x1410] sm:$0xf] }
 0x380   :  { %9421 = vmatpush.bf16.msra.mxu3 %v14820_v62  ;;  %v14659_v62 = vld [vmem:[#allocation7 + $0xd80] sm:$0xf] }
 0x381   :  { %9441 = vmatpush.bf16.msrb.mxu0 %v14860_v23  ;;  %9416 = vmatmul.bf16.vlgmr.msra.gmra.mxu1 %v18246_v6  ;;  %v9235_v20 = vpop.f32.mrf.mxu0  ;;  %v13104_v23 = vor.u32 %v16973_v8, %v13101_v61  ;;  %v14660_v59 = vor.u32 %v17368_v0, %v14659_v62  ;;  %v13301_v8 = vld [vmem:[#allocation7 + $0x308] sm:$0xf0]  ;;  %v14619_v61 = vld [vmem:[#allocation7 + $0xd30] sm:$0xf]  ;;  %v17313_v0 = vld [vmem:[#allocation7 + $0xbf4] sm:$0xf] }
 0x382   :  { %9460 = vmatpush.bf16.msrb.mxu1 %v15780_v50  ;;  %v17388_v50 = vld [vmem:[#allocation7 + $0xe44] sm:$0xf0]  ;;  %v9236_v38 = vadd.f32 %v9235_v20, %v4819_v53  ;;  %v17163_v20 = vld [vmem:[#allocation7 + $0x744] sm:$0xf] }
 0x383   :  { %9454 = vmatpush.bf16.msrb.mxu2 %v15180_v45  ;;  %v14740_v25 = vor.u32 %v17388_v50, %v14739_v21  ;;  %v13061_v45 = vld [vmem:[#allocation7 + $0x128] sm:$0xf0]  ;;  %v17578_v21 = vld [vmem:[#allocation7 + $0x1434] sm:$0xf0]  ;;  %v12984_v50 = vor.u32 %v16943_v33, %v12981_v22 }
 0x384   :  { %9442 = vmatmul.bf16.vlgmr.msrb.gmra.mxu0 %v18253_v51  ;;  %9422 = vmatpush.bf16.msra.mxu3 %v14780_v5  ;;  %v13064_v40 = vor.u32 %v16963_v26, %v13061_v45  ;;  %v9170_v5 = vpop.f32.mrf.mxu3  ;;  %v12941_v26 = vld [vmem:[#allocation7 + $0x38] sm:$0xf0]  ;;  %v17013_v45 = vld [vmem:[#allocation7 + $0x294] sm:$0xf]  ;;  %v15500_v27 = vor.u32 %v17578_v21, %v15499_v60  ;;  %v16059_v60 = vld [vmem:[#allocation7 + $0x1870] sm:$0xf] }
 0x385   :  { %9486 = vmatpush.bf16.msra.mxu0 %v13224_v29  ;;  %v15620_v29 = vor.u32 %v17608_v35, %v15619_v14  ;;  %v13861_v14 = vld [vmem:[#allocation7 + $0x768] sm:$0xf0]  ;;  %v17718_v21 = vld [vmem:[#allocation7 + $0x1894] sm:$0xf0] }
 0x386   :  { %9461 = vmatpush.bf16.msrb.mxu1 %v15740_v12  ;;  %9455 = vmatmul.bf16.vlgmr.msrb.gmra.mxu2 %v18250_v11  ;;  %v17598_v12 = vld [vmem:[#allocation7 + $0x14d4] sm:$0xf0]  ;;  %v13864_v41 = vor.u32 %v17163_v20, %v13861_v14  ;;  %v13741_v20 = vld [vmem:[#allocation7 + $0x678] sm:$0xf0] }
 0x387   :  { %9499 = vmatpush.bf16.msra.mxu2 %v13544_v44  ;;  %v15579_v44 = vld [vmem:[#allocation7 + $0x14b0] sm:$0xf]  ;;  %v9211_v39 = vpop.f32.mrf.mxu1 }
 0x388   :  { %9423 = vmatpush.bf16.msra.mxu3 %v14740_v25  ;;  %v16933_v25 = vld [vmem:[#allocation7 + $0x14] sm:$0xf] }
 0x389   :  { %9487 = vmatpush.bf16.msra.mxu0 %v13184_v2  ;;  %v9248_v42 = vpop.f32.mrf.mxu2  ;;  %v15580_v2 = vor.u32 %v17598_v12, %v15579_v44  ;;  %v9237_v49 = vpop.f32.mrf.mxu0  ;;  %v14501_v44 = vld [vmem:[#allocation7 + $0xc68] sm:$0xf0]  ;;  %v17403_v12 = vld [vmem:[#allocation7 + $0xec4] sm:$0xf]  ;;  %v12944_v39 = vor.u32 %v16933_v25, %v12941_v26  ;;  %v17293_v25 = vld [vmem:[#allocation7 + $0xb54] sm:$0xf] }
 0x38a   :  { %9462 = vmatpush.bf16.msrb.mxu1 %v15700_v56  ;;  %v18388_v55 = vadd.f32 %v9248_v42, %v9236_v38  ;;  %v17588_v56 = vld [vmem:[#allocation7 + $0x1484] sm:$0xf0]  ;;  %v14504_v15 = vor.u32 %v17323_v34, %v14501_v44  ;;  %v14461_v49 = vld [vmem:[#allocation7 + $0xc18] sm:$0xf0]  ;;  %v17123_v34 = vld [vmem:[#allocation7 + $0x604] sm:$0xf] }
 0x38b   :  { %9500 = vmatpush.bf16.msra.mxu2 %v13504_v32  ;;  %v13341_v32 = vld [vmem:[#allocation7 + $0x358] sm:$0xf0]  ;;  %v14464_v22 = vor.u32 %v17313_v0, %v14461_v49  ;;  %v13701_v44 = vld [vmem:[#allocation7 + $0x628] sm:$0xf0] }
 0x38c   :  { %9424 = vmatpush.bf16.msra.mxu3 %v14700_v3  ;;  %v13344_v16 = vor.u32 %v17033_v46, %v13341_v32  ;;  %v9172_v46 = vpop.f32.mrf.mxu3  ;;  %v17338_v32 = vld [vmem:[#allocation7 + $0xcb4] sm:$0xf0]  ;;  %v14381_v26 = vld [vmem:[#allocation7 + $0xb78] sm:$0xf0] }
 0x38d   :  { %9488 = vmatpush.bf16.msra.mxu0 %v13144_v63  ;;  %v17023_v63 = vld [vmem:[#allocation7 + $0x2e4] sm:$0xf]  ;;  %v17113_v46 = vld [vmem:[#allocation7 + $0x5b4] sm:$0xf] }
 0x38e   :  { %9463 = vmatpush.bf16.msrb.mxu1 %v15660_v18  ;;  %v9171_v18 = vadd.f32 %v9170_v5, %v18379_v13  ;;  %v13304_v53 = vor.u32 %v17023_v63, %v13301_v8  ;;  %v14579_v13 = vld [vmem:[#allocation7 + $0xce0] sm:$0xf]  ;;  %v17303_v5 = vld [vmem:[#allocation7 + $0xba4] sm:$0xf]  ;;  %v14421_v8 = vld [vmem:[#allocation7 + $0xbc8] sm:$0xf0] }
 0x38f   :  { %9501 = vmatpush.bf16.msra.mxu2 %v13464_v28  ;;  %v15540_v28 = vor.u32 %v17588_v56, %v15539_v43  ;;  %v14580_v10 = vor.u32 %v17348_v30, %v14579_v13  ;;  %v17393_v43 = vld [vmem:[#allocation7 + $0xe74] sm:$0xf]  ;;  %v14781_v56 = vld [vmem:[#allocation7 + $0xe98] sm:$0xf0]  ;;  %v16019_v13 = vld [vmem:[#allocation7 + $0x1820] sm:$0xf] }
 0x390   :  { %9425 = vmatpush.bf16.msra.mxu3 %v14660_v59  ;;  %v9184_v35 = vadd.f32 %v18368_v58, %v9171_v18  ;;  %v14821_v58 = vld [vmem:[#allocation7 + $0xee8] sm:$0xf0]  ;;  %v14784_v63 = vor.u32 %v17393_v43, %v14781_v56  ;;  %v17708_v30 = vld [vmem:[#allocation7 + $0x1844] sm:$0xf0]  ;;  %v17273_v43 = vld [vmem:[#allocation7 + $0xab4] sm:$0xf] }
 0x391   :  { %9489 = vmatpush.bf16.msra.mxu0 %v13104_v23  ;;  %v9250_v23 = vpop.f32.mrf.mxu2  ;;  %v14824_v62 = vor.u32 %v17403_v12, %v14821_v58  ;;  %v13781_v59 = vld [vmem:[#allocation7 + $0x6c8] sm:$0xf0]  ;;  %v14384_v12 = vor.u32 %v17293_v25, %v14381_v26  ;;  %v14301_v56 = vld [vmem:[#allocation7 + $0xad8] sm:$0xf0] }
 0x392   :  { %9464 = vmatpush.bf16.msrb.mxu1 %v15620_v29  ;;  %v13261_v29 = vld [vmem:[#allocation7 + $0x2b8] sm:$0xf0]  ;;  %v9197_v38 = vadd.f32 %v18373_v54, %v9184_v35  ;;  %v14741_v18 = vld [vmem:[#allocation7 + $0xe48] sm:$0xf0]  ;;  %v14424_v35 = vor.u32 %v17303_v5, %v14421_v8  ;;  %v14304_v5 = vor.u32 %v17273_v43, %v14301_v56  ;;  %v15819_v43 = vld [vmem:[#allocation7 + $0x1690] sm:$0xf] }
 0x393   :  { %9502 = vmatpush.bf16.msra.mxu2 %v13424_v31  ;;  %v14620_v31 = vor.u32 %v17358_v1, %v14619_v61  ;;  %v13264_v42 = vor.u32 %v17013_v45, %v13261_v29  ;;  %v17383_v61 = vld [vmem:[#allocation7 + $0xe24] sm:$0xf]  ;;  %v17373_v45 = vld [vmem:[#allocation7 + $0xdd4] sm:$0xf]  ;;  %v14701_v29 = vld [vmem:[#allocation7 + $0xdf8] sm:$0xf0] }
 0x394   :  { %v18394_v3 = vadd.f32 %v18384_v7, %v9197_v38  ;;  %v17143_v7 = vld [vmem:[#allocation7 + $0x6a4] sm:$0xf]  ;;  %v14744_v23 = vor.u32 %v17383_v61, %v14741_v18  ;;  %v16020_v38 = vor.u32 %v17708_v30, %v16019_v13  ;;  %v14341_v58 = vld [vmem:[#allocation7 + $0xb28] sm:$0xf0]  ;;  %v13581_v25 = vld [vmem:[#allocation7 + $0x538] sm:$0xf0] }
 0x395   :  { %9490 = vmatpush.bf16.msra.mxu0 %v13064_v40  ;;  %v17153_v40 = vld [vmem:[#allocation7 + $0x6f4] sm:$0xf]  ;;  %9426 = vmatpush.bf16.msra.mxu3 %v14620_v31  ;;  %v13784_v1 = vor.u32 %v17143_v7, %v13781_v59  ;;  %v16060_v31 = vor.u32 %v17718_v21, %v16059_v60  ;;  %v14621_v7 = vld [vmem:[#allocation7 + $0xd58] sm:$0xf0]  ;;  %v15939_v59 = vld [vmem:[#allocation7 + $0x1780] sm:$0xf] }
 0x396   :  { %9465 = vmatpush.bf16.msrb.mxu1 %v15580_v2  ;;  %v14539_v2 = vld [vmem:[#allocation7 + $0xc90] sm:$0xf]  ;;  %v14261_v18 = vld [vmem:[#allocation7 + $0xa88] sm:$0xf0]  ;;  %v17343_v60 = vld [vmem:[#allocation7 + $0xce4] sm:$0xf] }
 0x397   :  { %9503 = vmatpush.bf16.msra.mxu2 %v13384_v52  ;;  %v13821_v52 = vld [vmem:[#allocation7 + $0x718] sm:$0xf0]  ;;  %v14540_v33 = vor.u32 %v17338_v32, %v14539_v2  ;;  %v17658_v56 = vld [vmem:[#allocation7 + $0x16b4] sm:$0xf0] }
 0x398   :  { %v13824_v54 = vor.u32 %v17153_v40, %v13821_v52  ;;  %v17363_v40 = vld [vmem:[#allocation7 + $0xd84] sm:$0xf]  ;;  %v13704_v52 = vor.u32 %v17123_v34, %v13701_v44  ;;  %v13661_v2 = vld [vmem:[#allocation7 + $0x5d8] sm:$0xf0]  ;;  %v17253_v34 = vld [vmem:[#allocation7 + $0xa14] sm:$0xf] }
 0x399   :  { %9491 = vmatpush.bf16.msra.mxu0 %v13024_v37  ;;  %v16099_v37 = vld [vmem:[#allocation7 + $0x18c0] sm:$0xf]  ;;  %9427 = vmatpush.bf16.msra.mxu3 %v14580_v10  ;;  %v15979_v10 = vld [vmem:[#allocation7 + $0x17d0] sm:$0xf]  ;;  %v14221_v44 = vld [vmem:[#allocation7 + $0xa38] sm:$0xf0] }
 0x39a   :  { %9466 = vmatpush.bf16.msrb.mxu1 %v15540_v28 }
 0x39b   :  { %9504 = vmatpush.bf16.msra.mxu2 %v13344_v16  ;;  %v17728_v16 = vld [vmem:[#allocation7 + $0x18e4] sm:$0xf0] }
 0x39c   :  { %v16100_v28 = vor.u32 %v17728_v16, %v16099_v37  ;;  %v17353_v37 = vld [vmem:[#allocation7 + $0xd34] sm:$0xf]  ;;  %v13664_v16 = vor.u32 %v17113_v46, %v13661_v2  ;;  %v15101_v2 = vld [vmem:[#allocation7 + $0x1118] sm:$0xf0] }
 0x39d   :  { %9492 = vmatpush.bf16.msra.mxu0 %v12984_v50  ;;  %v17133_v50 = vld [vmem:[#allocation7 + $0x654] sm:$0xf]  ;;  %9428 = vmatpush.bf16.msra.mxu3 %v14540_v33  ;;  %v17688_v33 = vld [vmem:[#allocation7 + $0x17a4] sm:$0xf0]  ;;  %v14624_v8 = vor.u32 %v17353_v37, %v14621_v7 }
 0x39e   :  { %9467 = vmatpush.bf16.msrb.mxu1 %v15500_v27  ;;  %v9261_v14 = vpop.f32.mrf.mxu1  ;;  %v13744_v27 = vor.u32 %v17133_v50, %v13741_v20  ;;  %v15940_v61 = vor.u32 %v17688_v33, %v15939_v59  ;;  %v14581_v20 = vld [vmem:[#allocation7 + $0xd08] sm:$0xf0]  ;;  %v17473_v46 = vld [vmem:[#allocation7 + $0x10f4] sm:$0xf]  ;;  %v15741_v59 = vld [vmem:[#allocation7 + $0x1618] sm:$0xf0] }
 0x39f   :  { %9505 = vmatpush.bf16.msra.mxu2 %v13304_v53  ;;  %v18400_v53 = vadd.f32 %v9261_v14, %v18388_v55  ;;  %v14704_v55 = vor.u32 %v17373_v45, %v14701_v29  ;;  %v15899_v14 = vld [vmem:[#allocation7 + $0x1730] sm:$0xf]  ;;  %v17483_v45 = vld [vmem:[#allocation7 + $0x1144] sm:$0xf]  ;;  %v14584_v29 = vor.u32 %v17343_v60, %v14581_v20  ;;  %v17633_v7 = vld [vmem:[#allocation7 + $0x15f4] sm:$0xf] }
 0x3a0   :  { %9429 = vmatmul.bf16.vlgmr.msra.gmra.mxu3 %v18248_v19  ;;  %v17713_v33 = vld [vmem:[#allocation7 + $0x1874] sm:$0xf]  ;;  %v17703_v20 = vld [vmem:[#allocation7 + $0x1824] sm:$0xf] }
 0x3a1   :  { %9493 = vmatpush.bf16.msra.mxu0 %v12944_v39  ;;  %9468 = vmatmul.bf16.vlgmr.msrb.gmra.mxu1 %v18282_v36  ;;  %v17283_v39 = vld [vmem:[#allocation7 + $0xb04] sm:$0xf]  ;;  %v9222_v50 = vpop.f32.mrf.mxu3 }
 0x3a2   :  { %9512 = vmatpush.bf16.msra.mxu1 %v13864_v41  ;;  %9473 = vmatpush.bf16.msrb.mxu3 %v16100_v28  ;;  %v18403_v41 = vpop.f32.mrf.mxu0  ;;  %v13621_v28 = vld [vmem:[#allocation7 + $0x588] sm:$0xf0] }
 0x3a3   :  { %9506 = vmatpush.bf16.msra.mxu2 %v13264_v42  ;;  %v14661_v42 = vld [vmem:[#allocation7 + $0xda8] sm:$0xf0] }
 0x3a4   :  { %9494 = vmatmul.bf16.vlgmr.msra.gmra.mxu0 %v18221_v47 }
 0x3a5   :  { %9538 = vmatpush.bf16.msrb.mxu0 %v14504_v15  ;;  %v17698_v15 = vld [vmem:[#allocation7 + $0x17f4] sm:$0xf0] }
 0x3a6   :  { %9513 = vmatpush.bf16.msra.mxu1 %v13824_v54  ;;  %9507 = vmatmul.bf16.vlgmr.msra.gmra.mxu2 %v18225_v57  ;;  %v9263_v32 = vpop.f32.mrf.mxu1  ;;  %v14664_v54 = vor.u32 %v17363_v40, %v14661_v42  ;;  %v15980_v49 = vor.u32 %v17698_v15, %v15979_v10  ;;  %v17643_v40 = vld [vmem:[#allocation7 + $0x1644] sm:$0xf]  ;;  %v14224_v10 = vor.u32 %v17253_v34, %v14221_v44  ;;  %v16101_v15 = vld [vmem:[#allocation7 + $0x18e8] sm:$0xf0]  ;;  %v17613_v34 = vld [vmem:[#allocation7 + $0x1554] sm:$0xf] }
 0x3a7   :  { %9551 = vmatpush.bf16.msrb.mxu2 %v14824_v62  ;;  %9474 = vmatpush.bf16.msrb.mxu3 %v16060_v31  ;;  %v14344_v62 = vor.u32 %v17283_v39, %v14341_v58  ;;  %v17093_v31 = vld [vmem:[#allocation7 + $0x514] sm:$0xf]  ;;  %v15859_v39 = vld [vmem:[#allocation7 + $0x16e0] sm:$0xf]  ;;  %v17723_v42 = vld [vmem:[#allocation7 + $0x18c4] sm:$0xf] }
 0x3a8   :  { %v16104_v37 = vor.u32 %v17723_v42, %v16101_v15  ;;  %v15661_v44 = vld [vmem:[#allocation7 + $0x1578] sm:$0xf0] }
 0x3a9   :  { %9539 = vmatpush.bf16.msrb.mxu0 %v14464_v22  ;;  %v18405_v0 = vpop.f32.mrf.mxu2  ;;  %v15664_v42 = vor.u32 %v17613_v34, %v15661_v44  ;;  %v13981_v34 = vld [vmem:[#allocation7 + $0x858] sm:$0xf0] }
 0x3aa   :  { %9514 = vmatpush.bf16.msra.mxu1 %v13784_v1  ;;  %v9289_v22 = vpop.f32.mrf.mxu0  ;;  %v17263_v1 = vld [vmem:[#allocation7 + $0xa64] sm:$0xf] }
 0x3ab   :  { %9552 = vmatpush.bf16.msrb.mxu2 %v14784_v63  ;;  %9475 = vmatpush.bf16.msrb.mxu3 %v16020_v38  ;;  %v17103_v63 = vld [vmem:[#allocation7 + $0x564] sm:$0xf]  ;;  %v14264_v26 = vor.u32 %v17263_v1, %v14261_v18  ;;  %v14541_v38 = vld [vmem:[#allocation7 + $0xcb8] sm:$0xf0]  ;;  %v15744_v1 = vor.u32 %v17633_v7, %v15741_v59 }
 0x3ac   :  { %v13624_v21 = vor.u32 %v17103_v63, %v13621_v28  ;;  %v16061_v22 = vld [vmem:[#allocation7 + $0x1898] sm:$0xf0]  ;;  %v17243_v63 = vld [vmem:[#allocation7 + $0x9c4] sm:$0xf]  ;;  %v14181_v28 = vld [vmem:[#allocation7 + $0x9e8] sm:$0xf0] }
 0x3ad   :  { %9540 = vmatpush.bf16.msrb.mxu0 %v14424_v35  ;;  %v17678_v35 = vld [vmem:[#allocation7 + $0x1754] sm:$0xf0]  ;;  %v16064_v18 = vor.u32 %v17713_v33, %v16061_v22  ;;  %v14184_v60 = vor.u32 %v17243_v63, %v14181_v28  ;;  %v17593_v63 = vld [vmem:[#allocation7 + $0x14b4] sm:$0xf]  ;;  %v15581_v28 = vld [vmem:[#allocation7 + $0x14d8] sm:$0xf0] }
 0x3ae   :  { %9515 = vmatpush.bf16.msra.mxu1 %v13744_v27  ;;  %v15141_v27 = vld [vmem:[#allocation7 + $0x1168] sm:$0xf0]  ;;  %v15900_v30 = vor.u32 %v17678_v35, %v15899_v14 }
 0x3af   :  { %9553 = vmatpush.bf16.msrb.mxu2 %v14744_v23  ;;  %9476 = vmatpush.bf16.msrb.mxu3 %v15980_v49  ;;  %v18408_v23 = vadd.f32 %v9222_v50, %v18394_v3  ;;  %v17668_v3 = vld [vmem:[#allocation7 + $0x1704] sm:$0xf0]  ;;  %v15144_v58 = vor.u32 %v17483_v45, %v15141_v27  ;;  %v9224_v49 = vpop.f32.mrf.mxu3  ;;  %v15701_v50 = vld [vmem:[#allocation7 + $0x15c8] sm:$0xf0]  ;;  %v15021_v45 = vld [vmem:[#allocation7 + $0x1078] sm:$0xf0] }
 0x3b0   :  { %v16021_v35 = vld [vmem:[#allocation7 + $0x1848] sm:$0xf0]  ;;  %v17213_v49 = vld [vmem:[#allocation7 + $0x8d4] sm:$0xf] }
 0x3b1   :  { %9541 = vmatpush.bf16.msrb.mxu0 %v14384_v12  ;;  %v9302_v13 = vpop.f32.mrf.mxu2  ;;  %v17333_v12 = vld [vmem:[#allocation7 + $0xc94] sm:$0xf] }
 0x3b2   :  { %9516 = vmatpush.bf16.msra.mxu1 %v13704_v52  ;;  %v15781_v52 = vld [vmem:[#allocation7 + $0x1668] sm:$0xf0]  ;;  %v14544_v32 = vor.u32 %v17333_v12, %v14541_v38  ;;  %v16024_v13 = vor.u32 %v17703_v20, %v16021_v35  ;;  %v17693_v12 = vld [vmem:[#allocation7 + $0x17d4] sm:$0xf]  ;;  %v15981_v38 = vld [vmem:[#allocation7 + $0x17f8] sm:$0xf0]  ;;  %v15584_v20 = vor.u32 %v17593_v63, %v15581_v28 }
 0x3b3   :  { %9554 = vmatpush.bf16.msrb.mxu2 %v14704_v55  ;;  %9477 = vmatpush.bf16.msrb.mxu3 %v15940_v61  ;;  %v13584_v55 = vor.u32 %v17093_v31, %v13581_v25  ;;  %v15820_v61 = vor.u32 %v17658_v56, %v15819_v43  ;;  %v17233_v31 = vld [vmem:[#allocation7 + $0x974] sm:$0xf]  ;;  %v14141_v25 = vld [vmem:[#allocation7 + $0x998] sm:$0xf0] }
 0x3b4   :  { %v14061_v43 = vld [vmem:[#allocation7 + $0x8f8] sm:$0xf0]  ;;  %v17433_v56 = vld [vmem:[#allocation7 + $0xfb4] sm:$0xf] }
 0x3b5   :  { %9542 = vmatpush.bf16.msrb.mxu0 %v14344_v62  ;;  %v15860_v62 = vor.u32 %v17668_v3, %v15859_v39  ;;  %v17223_v39 = vld [vmem:[#allocation7 + $0x924] sm:$0xf]  ;;  %v14101_v3 = vld [vmem:[#allocation7 + $0x948] sm:$0xf0]  ;;  %v14064_v22 = vor.u32 %v17213_v49, %v14061_v43  ;;  %v13867_v43 = vld [vmem:[#allocation7 + $0x748] sm:$0xf] }
 0x3b6   :  { %9517 = vmatpush.bf16.msra.mxu1 %v13664_v16  ;;  %v15104_v16 = vor.u32 %v17473_v46, %v15101_v2  ;;  %v14104_v15 = vor.u32 %v17223_v39, %v14101_v3  ;;  %v17603_v46 = vld [vmem:[#allocation7 + $0x1504] sm:$0xf]  ;;  %v15621_v2 = vld [vmem:[#allocation7 + $0x1528] sm:$0xf0]  ;;  %v13227_v39 = vld [vmem:[#allocation7 + $0x248] sm:$0xf] }
 0x3b7   :  { %9555 = vmatpush.bf16.msrb.mxu2 %v14664_v54  ;;  %9478 = vmatpush.bf16.msrb.mxu3 %v15900_v30  ;;  %v15784_v54 = vor.u32 %v17643_v40, %v15781_v52  ;;  %v14144_v30 = vor.u32 %v17233_v31, %v14141_v25  ;;  %v17443_v40 = vld [vmem:[#allocation7 + $0x1004] sm:$0xf]  ;;  %v14981_v52 = vld [vmem:[#allocation7 + $0x1028] sm:$0xf0]  ;;  %v15624_v7 = vor.u32 %v17603_v46, %v15621_v2  ;;  %v17009_v3 = vld [vmem:[#allocation7 + $0x26c] sm:$0xf0] }
 0x3b8   :  { %v17583_v31 = vld [vmem:[#allocation7 + $0x1464] sm:$0xf]  ;;  %v15541_v25 = vld [vmem:[#allocation7 + $0x1488] sm:$0xf0]  ;;  %v15501_v46 = vld [vmem:[#allocation7 + $0x1438] sm:$0xf0]  ;;  %v13228_v49 = vor.u32 %v17009_v3, %v13227_v39 }
 0x3b9   :  { %9543 = vmatpush.bf16.msrb.mxu0 %v14304_v5  ;;  %v17463_v5 = vld [vmem:[#allocation7 + $0x10a4] sm:$0xf]  ;;  %v17653_v2 = vld [vmem:[#allocation7 + $0x1694] sm:$0xf]  ;;  %v15421_v39 = vld [vmem:[#allocation7 + $0x1398] sm:$0xf0] }
 0x3ba   :  { %9518 = vmatpush.bf16.msra.mxu1 %v13624_v21  ;;  %v17623_v21 = vld [vmem:[#allocation7 + $0x15a4] sm:$0xf]  ;;  %v13107_v3 = vld [vmem:[#allocation7 + $0x158] sm:$0xf] }
 0x3bb   :  { %9556 = vmatpush.bf16.msrb.mxu2 %v14624_v8  ;;  %v15061_v8 = vld [vmem:[#allocation7 + $0x10c8] sm:$0xf0]  ;;  %9479 = vmatpush.bf16.msrb.mxu3 %v15860_v62  ;;  %v14984_v62 = vor.u32 %v17443_v40, %v14981_v52 }
 0x3bc   :  { %v15064_v14 = vor.u32 %v17463_v5, %v15061_v8  ;;  %v17673_v5 = vld [vmem:[#allocation7 + $0x1734] sm:$0xf] }
 0x3bd   :  { %9544 = vmatpush.bf16.msrb.mxu0 %v14264_v26  ;;  %v17453_v26 = vld [vmem:[#allocation7 + $0x1054] sm:$0xf] }
 0x3be   :  { %9519 = vmatpush.bf16.msra.mxu1 %v13584_v55  ;;  %v18413_v27 = vpop.f32.mrf.mxu1  ;;  %v15024_v55 = vor.u32 %v17453_v26, %v15021_v45  ;;  %v17663_v26 = vld [vmem:[#allocation7 + $0x16e4] sm:$0xf] }
 0x3bf   :  { %9557 = vmatpush.bf16.msrb.mxu2 %v14584_v29  ;;  %9480 = vmatpush.bf16.msrb.mxu3 %v15820_v61  ;;  %v15704_v29 = vor.u32 %v17623_v21, %v15701_v50  ;;  %v15901_v61 = vld [vmem:[#allocation7 + $0x1758] sm:$0xf0]  ;;  %v17423_v21 = vld [vmem:[#allocation7 + $0xf64] sm:$0xf]  ;;  %v14901_v50 = vld [vmem:[#allocation7 + $0xf88] sm:$0xf0] }
 0x3c0   :  { %v14904_v45 = vor.u32 %v17423_v21, %v14901_v50  ;;  %v13827_v21 = vld [vmem:[#allocation7 + $0x6f8] sm:$0xf]  ;;  %v17159_v50 = vld [vmem:[#allocation7 + $0x71c] sm:$0xf0] }
 0x3c1   :  { %9545 = vmatpush.bf16.msrb.mxu0 %v14224_v10  ;;  %9520 = vmatmul.bf16.vlgmr.msra.gmra.mxu1 %v18227_v4  ;;  %v15984_v10 = vor.u32 %v17693_v12, %v15981_v38  ;;  %v17413_v12 = vld [vmem:[#allocation7 + $0xf14] sm:$0xf]  ;;  %v15544_v38 = vor.u32 %v17583_v31, %v15541_v25  ;;  %v15461_v31 = vld [vmem:[#allocation7 + $0x13e8] sm:$0xf0]  ;;  %v16989_v25 = vld [vmem:[#allocation7 + $0x1cc] sm:$0xf0] }
 0x3c2   :  { %9564 = vmatpush.bf16.msrb.mxu1 %v15144_v58  ;;  %9481 = vmatmul.bf16.vlgmr.msrb.gmra.mxu3 %v18292_v24  ;;  %v18416_v58 = vpop.f32.mrf.mxu0 }
 0x3c3   :  { %9558 = vmatpush.bf16.msrb.mxu2 %v14544_v32  ;;  %9525 = vmatpush.bf16.msra.mxu3 %v14184_v60  ;;  %v17683_v32 = vld [vmem:[#allocation7 + $0x1784] sm:$0xf] }
 0x3c4   :  { %9546 = vmatmul.bf16.vlgmr.msrb.gmra.mxu0 %v18246_v6 }
 0x3c5   :  { %9590 = vmatpush.bf16.msra.mxu0 %v15784_v54  ;;  %v15941_v54 = vld [vmem:[#allocation7 + $0x17a8] sm:$0xf0] }
 0x3c6   :  { %9565 = vmatpush.bf16.msrb.mxu1 %v15104_v16  ;;  %9559 = vmatmul.bf16.vlgmr.msrb.gmra.mxu2 %v18248_v19  ;;  %v9315_v16 = vpop.f32.mrf.mxu1  ;;  %v15944_v59 = vor.u32 %v17683_v32, %v15941_v54  ;;  %v13941_v54 = vld [vmem:[#allocation7 + $0x808] sm:$0xf0] }
 0x3c7   :  { %9603 = vmatpush.bf16.msra.mxu2 %v16104_v37  ;;  %9526 = vmatpush.bf16.msra.mxu3 %v14144_v30  ;;  %v14941_v37 = vld [vmem:[#allocation7 + $0xfd8] sm:$0xf0]  ;;  %v17193_v30 = vld [vmem:[#allocation7 + $0x834] sm:$0xf] }
 0x3c8   :  { %v14944_v8 = vor.u32 %v17433_v56, %v14941_v37  ;;  %v17169_v56 = vld [vmem:[#allocation7 + $0x76c] sm:$0xf0]  ;;  %v14187_v37 = vld [vmem:[#allocation7 + $0x9c8] sm:$0xf] }
 0x3c9   :  { %9591 = vmatpush.bf16.msra.mxu0 %v15744_v1  ;;  %v18418_v33 = vpop.f32.mrf.mxu2  ;;  %v17203_v1 = vld [vmem:[#allocation7 + $0x884] sm:$0xf] }
 0x3ca   :  { %9566 = vmatpush.bf16.msrb.mxu1 %v15064_v14  ;;  %v9341_v60 = vpop.f32.mrf.mxu0  ;;  %v15904_v14 = vor.u32 %v17673_v5, %v15901_v61 }
 0x3cb   :  { %9604 = vmatpush.bf16.msra.mxu2 %v16064_v18  ;;  %9527 = vmatpush.bf16.msra.mxu3 %v14104_v15  ;;  %v14021_v18 = vld [vmem:[#allocation7 + $0x8a8] sm:$0xf0]  ;;  %v17573_v15 = vld [vmem:[#allocation7 + $0x1414] sm:$0xf] }
 0x3cc   :  { %v14024_v35 = vor.u32 %v17203_v1, %v14021_v18  ;;  %v17173_v1 = vld [vmem:[#allocation7 + $0x794] sm:$0xf]  ;;  %v13901_v18 = vld [vmem:[#allocation7 + $0x7b8] sm:$0xf0] }
 0x3cd   :  { %9592 = vmatpush.bf16.msra.mxu0 %v15704_v29  ;;  %v9274_v29 = vpop.f32.mrf.mxu3 }
 0x3ce   :  { %9567 = vmatpush.bf16.msrb.mxu1 %v15024_v55  ;;  %v9275_v44 = vadd.f32 %v9274_v29, %v18400_v53  ;;  %v14861_v55 = vld [vmem:[#allocation7 + $0xf38] sm:$0xf0]  ;;  %v17183_v53 = vld [vmem:[#allocation7 + $0x7e4] sm:$0xf] }
 0x3cf   :  { %9605 = vmatpush.bf16.msra.mxu2 %v16024_v13  ;;  %9528 = vmatpush.bf16.msra.mxu3 %v14064_v22  ;;  %v15861_v13 = vld [vmem:[#allocation7 + $0x1708] sm:$0xf0]  ;;  %v14864_v32 = vor.u32 %v17413_v12, %v14861_v55  ;;  %v16999_v22 = vld [vmem:[#allocation7 + $0x21c] sm:$0xf0]  ;;  %v13944_v5 = vor.u32 %v17183_v53, %v13941_v54  ;;  %v17229_v55 = vld [vmem:[#allocation7 + $0x94c] sm:$0xf0] }
 0x3d0   :  { %v9288_v40 = vadd.f32 %v18403_v41, %v9275_v44  ;;  %v15864_v52 = vor.u32 %v17663_v26, %v15861_v13  ;;  %v17249_v41 = vld [vmem:[#allocation7 + $0x9ec] sm:$0xf0]  ;;  %v13904_v26 = vor.u32 %v17173_v1, %v13901_v18  ;;  %v14107_v44 = vld [vmem:[#allocation7 + $0x928] sm:$0xf]  ;;  %v17219_v53 = vld [vmem:[#allocation7 + $0x8fc] sm:$0xf0] }
 0x3d1   :  { %9593 = vmatpush.bf16.msra.mxu0 %v15664_v42  ;;  %v9354_v42 = vpop.f32.mrf.mxu2  ;;  %v14188_v60 = vor.u32 %v17249_v41, %v14187_v37  ;;  %v17543_v54 = vld [vmem:[#allocation7 + $0x1324] sm:$0xf]  ;;  %v16969_v37 = vld [vmem:[#allocation7 + $0x12c] sm:$0xf0]  ;;  %v15341_v1 = vld [vmem:[#allocation7 + $0x12f8] sm:$0xf0] }
 0x3d2   :  { %9568 = vmatpush.bf16.msrb.mxu1 %v14984_v62  ;;  %v15821_v62 = vld [vmem:[#allocation7 + $0x16b8] sm:$0xf0]  ;;  %v9301_v16 = vadd.f32 %v18405_v0, %v9288_v40  ;;  %v16979_v40 = vld [vmem:[#allocation7 + $0x17c] sm:$0xf0]  ;;  %v13027_v18 = vld [vmem:[#allocation7 + $0xb8] sm:$0xf] }
 0x3d3   :  { %9606 = vmatpush.bf16.msra.mxu2 %v15984_v10  ;;  %9529 = vmatpush.bf16.msra.mxu3 %v14024_v35  ;;  %v13984_v10 = vor.u32 %v17193_v30, %v13981_v34  ;;  %v15824_v63 = vor.u32 %v17653_v2, %v15821_v62  ;;  %v17563_v35 = vld [vmem:[#allocation7 + $0x13c4] sm:$0xf]  ;;  %v13787_v30 = vld [vmem:[#allocation7 + $0x6a8] sm:$0xf]  ;;  %v17149_v34 = vld [vmem:[#allocation7 + $0x6cc] sm:$0xf0]  ;;  %v13108_v62 = vor.u32 %v16979_v40, %v13107_v3 }
 0x3d4   :  { %v18424_v28 = vadd.f32 %v18413_v27, %v9301_v16  ;;  %v13147_v27 = vld [vmem:[#allocation7 + $0x1a8] sm:$0xf]  ;;  %v15464_v13 = vor.u32 %v17563_v35, %v15461_v31  ;;  %v13788_v42 = vor.u32 %v17149_v34, %v13787_v30  ;;  %v17139_v2 = vld [vmem:[#allocation7 + $0x67c] sm:$0xf0]  ;;  %v13667_v35 = vld [vmem:[#allocation7 + $0x5b8] sm:$0xf] }
 0x3d5   :  { %9594 = vmatpush.bf16.msra.mxu0 %v15624_v7  ;;  %v15504_v7 = vor.u32 %v17573_v15, %v15501_v46  ;;  %v9276_v61 = vpop.f32.mrf.mxu3  ;;  %v13148_v12 = vor.u32 %v16989_v25, %v13147_v27  ;;  %v13747_v46 = vld [vmem:[#allocation7 + $0x658] sm:$0xf]  ;;  %v17119_v31 = vld [vmem:[#allocation7 + $0x5dc] sm:$0xf0]  ;;  %v12987_v30 = vld [vmem:[#allocation7 + $0x68] sm:$0xf] }
 0x3d6   :  { %9569 = vmatpush.bf16.msrb.mxu1 %v14944_v8  ;;  %v13868_v8 = vor.u32 %v17169_v56, %v13867_v43  ;;  %v13067_v56 = vld [vmem:[#allocation7 + $0x108] sm:$0xf]  ;;  %v13748_v16 = vor.u32 %v17139_v2, %v13747_v46  ;;  %v17533_v61 = vld [vmem:[#allocation7 + $0x12d4] sm:$0xf]  ;;  %v13987_v27 = vld [vmem:[#allocation7 + $0x838] sm:$0xf] }
 0x3d7   :  { %9607 = vmatpush.bf16.msra.mxu2 %v15944_v59  ;;  %v13187_v59 = vld [vmem:[#allocation7 + $0x1f8] sm:$0xf]  ;;  %9530 = vmatpush.bf16.msra.mxu3 %v13984_v10  ;;  %v14108_v10 = vor.u32 %v17229_v55, %v14107_v44  ;;  %v16949_v34 = vld [vmem:[#allocation7 + $0x8c] sm:$0xf0]  ;;  %v13668_v44 = vor.u32 %v17119_v31, %v13667_v35  ;;  %v13947_v3 = vld [vmem:[#allocation7 + $0x7e8] sm:$0xf] }
 0x3d8   :  { %v13188_v0 = vor.u32 %v16999_v22, %v13187_v59  ;;  %v13707_v59 = vld [vmem:[#allocation7 + $0x608] sm:$0xf]  ;;  %v17129_v22 = vld [vmem:[#allocation7 + $0x62c] sm:$0xf0]  ;;  %v12988_v40 = vor.u32 %v16949_v34, %v12987_v30  ;;  %v15261_v46 = vld [vmem:[#allocation7 + $0x1258] sm:$0xf0] }
 0x3d9   :  { %9595 = vmatpush.bf16.msra.mxu0 %v15584_v20  ;;  %v14147_v20 = vld [vmem:[#allocation7 + $0x978] sm:$0xf]  ;;  %v17479_v30 = vld [vmem:[#allocation7 + $0x111c] sm:$0xf0] }
 0x3da   :  { %9570 = vmatpush.bf16.msrb.mxu1 %v14904_v45  ;;  %v13828_v45 = vor.u32 %v17159_v50, %v13827_v21  ;;  %v13708_v21 = vor.u32 %v17129_v22, %v13707_v59  ;;  %v17099_v59 = vld [vmem:[#allocation7 + $0x53c] sm:$0xf0]  ;;  %v13907_v22 = vld [vmem:[#allocation7 + $0x798] sm:$0xf] }
 0x3db   :  { %9608 = vmatpush.bf16.msra.mxu2 %v15904_v14  ;;  %v17239_v14 = vld [vmem:[#allocation7 + $0x99c] sm:$0xf0]  ;;  %9531 = vmatpush.bf16.msra.mxu3 %v13944_v5  ;;  %v13068_v5 = vor.u32 %v16969_v37, %v13067_v56  ;;  %v15427_v34 = vld [vmem:[#allocation7 + $0x1378] sm:$0xf] }
 0x3dc   :  { %v14148_v29 = vor.u32 %v17239_v14, %v14147_v20  ;;  %v15344_v14 = vor.u32 %v17533_v61, %v15341_v1 }
 0x3dd   :  { %9596 = vmatpush.bf16.msra.mxu0 %v15544_v38  ;;  %v17553_v38 = vld [vmem:[#allocation7 + $0x1374] sm:$0xf] }
 0x3de   :  { %9571 = vmatpush.bf16.msrb.mxu1 %v14864_v32  ;;  %v15424_v15 = vor.u32 %v17553_v38, %v15421_v39  ;;  %v14067_v32 = vld [vmem:[#allocation7 + $0x8d8] sm:$0xf]  ;;  %v13627_v38 = vld [vmem:[#allocation7 + $0x568] sm:$0xf]  ;;  %v17109_v39 = vld [vmem:[#allocation7 + $0x58c] sm:$0xf0] }
 0x3df   :  { %9609 = vmatpush.bf16.msra.mxu2 %v15864_v52  ;;  %9532 = vmatpush.bf16.msra.mxu3 %v13904_v26  ;;  %v18429_v52 = vpop.f32.mrf.mxu1  ;;  %v17199_v26 = vld [vmem:[#allocation7 + $0x85c] sm:$0xf0] }
 0x3e1   :  { %9597 = vmatpush.bf16.msra.mxu0 %v15504_v7  ;;  %9572 = vmatmul.bf16.vlgmr.msrb.gmra.mxu1 %v18253_v51  ;;  %v18432_v43 = vpop.f32.mrf.mxu0  ;;  %v14068_v7 = vor.u32 %v17219_v53, %v14067_v32  ;;  %v12947_v32 = vld [vmem:[#allocation7 + $0x18] sm:$0xf]  ;;  %v13628_v53 = vor.u32 %v17109_v39, %v13627_v38  ;;  %v14427_v38 = vld [vmem:[#allocation7 + $0xba8] sm:$0xf]  ;;  %v17309_v39 = vld [vmem:[#allocation7 + $0xbcc] sm:$0xf0] }
 0x3e2   :  { %9616 = vmatpush.bf16.msra.mxu1 %v13228_v49  ;;  %v15381_v49 = vld [vmem:[#allocation7 + $0x1348] sm:$0xf0]  ;;  %9533 = vmatmul.bf16.vlgmr.msra.gmra.mxu3 %v18231_v9 }
 0x3e3   :  { %9610 = vmatpush.bf16.msra.mxu2 %v15824_v63  ;;  %9577 = vmatpush.bf16.msrb.mxu3 %v15464_v13  ;;  %v15384_v41 = vor.u32 %v17543_v54, %v15381_v49  ;;  %v14027_v63 = vld [vmem:[#allocation7 + $0x888] sm:$0xf]  ;;  %v17329_v49 = vld [vmem:[#allocation7 + $0xc6c] sm:$0xf0] }
 0x3e4   :  { %9598 = vmatmul.bf16.vlgmr.msra.gmra.mxu0 %v18282_v36  ;;  %v14507_v54 = vld [vmem:[#allocation7 + $0xc48] sm:$0xf] }
 0x3e5   :  { %9642 = vmatpush.bf16.msrb.mxu0 %v13868_v8  ;;  %v17209_v8 = vld [vmem:[#allocation7 + $0x8ac] sm:$0xf0]  ;;  %v14508_v1 = vor.u32 %v17329_v49, %v14507_v54  ;;  %v17079_v54 = vld [vmem:[#allocation7 + $0x49c] sm:$0xf0]  ;;  %v14387_v49 = vld [vmem:[#allocation7 + $0xb58] sm:$0xf] }
 0x3e6   :  { %9617 = vmatpush.bf16.msra.mxu1 %v13188_v0  ;;  %9611 = vmatmul.bf16.vlgmr.msra.gmra.mxu2 %v18292_v24  ;;  %v14028_v50 = vor.u32 %v17209_v8, %v14027_v63  ;;  %v15221_v8 = vld [vmem:[#allocation7 + $0x1208] sm:$0xf0] }
 0x3e7   :  { %9655 = vmatpush.bf16.msrb.mxu2 %v14188_v60  ;;  %9578 = vmatpush.bf16.msrb.mxu3 %v15424_v15  ;;  %v16959_v60 = vld [vmem:[#allocation7 + $0xdc] sm:$0xf0]  ;;  %v9367_v0 = vpop.f32.mrf.mxu1  ;;  %v17513_v15 = vld [vmem:[#allocation7 + $0x1234] sm:$0xf] }
 0x3e8   :  { %v13028_v25 = vor.u32 %v16959_v60, %v13027_v18  ;;  %v15147_v18 = vld [vmem:[#allocation7 + $0x1148] sm:$0xf]  ;;  %v17489_v60 = vld [vmem:[#allocation7 + $0x116c] sm:$0xf0] }
 0x3e9   :  { %9643 = vmatpush.bf16.msrb.mxu0 %v13828_v45  ;;  %v18434_v20 = vpop.f32.mrf.mxu2  ;;  %v17523_v45 = vld [vmem:[#allocation7 + $0x1284] sm:$0xf]  ;;  %v9393_v13 = vpop.f32.mrf.mxu0  ;;  %v15467_v0 = vld [vmem:[#allocation7 + $0x13c8] sm:$0xf] }
 0x3ea   :  { %9618 = vmatpush.bf16.msra.mxu1 %v13148_v12  ;;  %v13988_v12 = vor.u32 %v17199_v26, %v13987_v27  ;;  %v15148_v27 = vor.u32 %v17489_v60, %v15147_v18  ;;  %v17493_v26 = vld [vmem:[#allocation7 + $0x1194] sm:$0xf]  ;;  %v15107_v13 = vld [vmem:[#allocation7 + $0x10f8] sm:$0xf]  ;;  %v14347_v60 = vld [vmem:[#allocation7 + $0xb08] sm:$0xf] }
 0x3eb   :  { %9656 = vmatpush.bf16.msrb.mxu2 %v14148_v29  ;;  %9579 = vmatpush.bf16.msrb.mxu3 %v15384_v41  ;;  %v15301_v29 = vld [vmem:[#allocation7 + $0x12a8] sm:$0xf0]  ;;  %v13587_v41 = vld [vmem:[#allocation7 + $0x518] sm:$0xf] }
 0x3ec   :  { %v15304_v55 = vor.u32 %v17523_v45, %v15301_v29  ;;  %v15181_v45 = vld [vmem:[#allocation7 + $0x11b8] sm:$0xf0] }
 0x3ed   :  { %9644 = vmatpush.bf16.msrb.mxu0 %v13788_v42  ;;  %v9326_v42 = vpop.f32.mrf.mxu3 }
 0x3ee   :  { %9619 = vmatpush.bf16.msra.mxu1 %v13108_v62  ;;  %v9327_v2 = vadd.f32 %v9326_v42, %v18424_v28  ;;  %v16939_v62 = vld [vmem:[#allocation7 + $0x3c] sm:$0xf0]  ;;  %v17503_v28 = vld [vmem:[#allocation7 + $0x11e4] sm:$0xf] }
 0x3ef   :  { %9657 = vmatpush.bf16.msrb.mxu2 %v14108_v10  ;;  %9580 = vmatpush.bf16.msrb.mxu3 %v15344_v14  ;;  %v17189_v10 = vld [vmem:[#allocation7 + $0x80c] sm:$0xf0]  ;;  %v12948_v63 = vor.u32 %v16939_v62, %v12947_v32  ;;  %v17319_v14 = vld [vmem:[#allocation7 + $0xc1c] sm:$0xf0]  ;;  %v15224_v31 = vor.u32 %v17503_v28, %v15221_v8  ;;  %v14428_v32 = vor.u32 %v17309_v39, %v14427_v38  ;;  %v13467_v8 = vld [vmem:[#allocation7 + $0x428] sm:$0xf] }
 0x3f0   :  { %v9340_v56 = vadd.f32 %v18416_v58, %v9327_v2  ;;  %v13948_v37 = vor.u32 %v17189_v10, %v13947_v3  ;;  %v13588_v58 = vor.u32 %v17099_v59, %v13587_v41  ;;  %v15184_v3 = vor.u32 %v17493_v26, %v15181_v45  ;;  %v15387_v2 = vld [vmem:[#allocation7 + $0x1328] sm:$0xf]  ;;  %v17549_v62 = vld [vmem:[#allocation7 + $0x134c] sm:$0xf0]  ;;  %v15027_v59 = vld [vmem:[#allocation7 + $0x1058] sm:$0xf] }
 0x3f1   :  { %9645 = vmatpush.bf16.msrb.mxu0 %v13748_v16  ;;  %v9406_v16 = vpop.f32.mrf.mxu2  ;;  %v17539_v28 = vld [vmem:[#allocation7 + $0x12fc] sm:$0xf0]  ;;  %v13427_v26 = vld [vmem:[#allocation7 + $0x3d8] sm:$0xf] }
 0x3f2   :  { %9620 = vmatpush.bf16.msra.mxu1 %v13068_v5  ;;  %v17179_v5 = vld [vmem:[#allocation7 + $0x7bc] sm:$0xf0]  ;;  %v18439_v61 = vadd.f32 %v18418_v33, %v9340_v56  ;;  %v14947_v39 = vld [vmem:[#allocation7 + $0xfb8] sm:$0xf] }
 0x3f3   :  { %9658 = vmatpush.bf16.msrb.mxu2 %v14068_v7  ;;  %9581 = vmatpush.bf16.msrb.mxu3 %v15304_v55  ;;  %v15264_v7 = vor.u32 %v17513_v15, %v15261_v46  ;;  %v13908_v35 = vor.u32 %v17179_v5, %v13907_v22  ;;  %v17089_v55 = vld [vmem:[#allocation7 + $0x4ec] sm:$0xf0]  ;;  %v15067_v15 = vld [vmem:[#allocation7 + $0x10a8] sm:$0xf]  ;;  %v17299_v56 = vld [vmem:[#allocation7 + $0xb7c] sm:$0xf0] }
 0x3f4   :  { %v17469_v46 = vld [vmem:[#allocation7 + $0x10cc] sm:$0xf0]  ;;  %v17459_v22 = vld [vmem:[#allocation7 + $0x107c] sm:$0xf0]  ;;  %v14388_v5 = vor.u32 %v17299_v56, %v14387_v49 }
 0x3f5   :  { %9646 = vmatpush.bf16.msrb.mxu0 %v13708_v21  ;;  %v17569_v21 = vld [vmem:[#allocation7 + $0x13ec] sm:$0xf0]  ;;  %v15068_v16 = vor.u32 %v17469_v46, %v15067_v15  ;;  %v17059_v45 = vld [vmem:[#allocation7 + $0x3fc] sm:$0xf0]  ;;  %v13387_v15 = vld [vmem:[#allocation7 + $0x388] sm:$0xf] }
 0x3f6   :  { %9621 = vmatpush.bf16.msra.mxu1 %v13028_v25  ;;  %v9328_v25 = vpop.f32.mrf.mxu3  ;;  %v15468_v33 = vor.u32 %v17569_v21, %v15467_v0  ;;  %v17289_v0 = vld [vmem:[#allocation7 + $0xb2c] sm:$0xf0]  ;;  %v13428_v38 = vor.u32 %v17059_v45, %v13427_v26  ;;  %v17499_v45 = vld [vmem:[#allocation7 + $0x11bc] sm:$0xf0] }
 0x3f7   :  { %9659 = vmatpush.bf16.msrb.mxu2 %v14028_v50  ;;  %v14467_v50 = vld [vmem:[#allocation7 + $0xbf8] sm:$0xf]  ;;  %9582 = vmatpush.bf16.msrb.mxu3 %v15264_v7  ;;  %v15388_v7 = vor.u32 %v17549_v62, %v15387_v2  ;;  %v17529_v25 = vld [vmem:[#allocation7 + $0x12ac] sm:$0xf0] }
 0x3f8   :  { %v14468_v29 = vor.u32 %v17319_v14, %v14467_v50  ;;  %v14987_v14 = vld [vmem:[#allocation7 + $0x1008] sm:$0xf]  ;;  %v17049_v46 = vld [vmem:[#allocation7 + $0x3ac] sm:$0xf0] }
 0x3f9   :  { %9647 = vmatpush.bf16.msrb.mxu0 %v13668_v44  ;;  %v17559_v44 = vld [vmem:[#allocation7 + $0x139c] sm:$0xf0]  ;;  %v17269_v62 = vld [vmem:[#allocation7 + $0xa8c] sm:$0xf0]  ;;  %v13388_v56 = vor.u32 %v17049_v46, %v13387_v15 }
 0x3fa   :  { %9622 = vmatpush.bf16.msra.mxu1 %v12988_v40  ;;  %v15108_v40 = vor.u32 %v17479_v30, %v15107_v13  ;;  %v15428_v42 = vor.u32 %v17559_v44, %v15427_v34  ;;  %v18449_v13 = vld [vmem:[#allocation8] sm:$0xff] }
 0x3fb   :  { %9660 = vmatpush.bf16.msrb.mxu2 %v13988_v12  ;;  %v13547_v12 = vld [vmem:[#allocation7 + $0x4c8] sm:$0xf]  ;;  %9583 = vmatpush.bf16.msrb.mxu3 %v15224_v31  ;;  %v4820_v30 = vperm.slane %v18449_v13, 4 }
 0x3fc   :  { %v13548_v10 = vor.u32 %v17089_v55, %v13547_v12  ;;  %v15307_v31 = vld [vmem:[#allocation7 + $0x1288] sm:$0xf] }
 0x3fd   :  { %9648 = vmatpush.bf16.msrb.mxu0 %v13628_v53  ;;  %v13507_v53 = vld [vmem:[#allocation7 + $0x478] sm:$0xf]  ;;  %v15308_v12 = vor.u32 %v17529_v25, %v15307_v31 }
 0x3fe   :  { %9623 = vmatpush.bf16.msra.mxu1 %v12948_v63  ;;  %v13508_v41 = vor.u32 %v17079_v54, %v13507_v53  ;;  %v15347_v63 = vld [vmem:[#allocation7 + $0x12d8] sm:$0xf]  ;;  %v9366_v54 = vadd.f32 %v18429_v52, %v4820_v30  ;;  %v17649_v52 = vld [vmem:[#allocation7 + $0x166c] sm:$0xf0] }
 0x3ff   :  { %9661 = vmatpush.bf16.msrb.mxu2 %v13948_v37  ;;  %9584 = vmatpush.bf16.msrb.mxu3 %v15184_v3  ;;  %v18444_v37 = vpop.f32.mrf.mxu1  ;;  %v15348_v21 = vor.u32 %v17539_v28, %v15347_v63  ;;  %v17439_v3 = vld [vmem:[#allocation7 + $0xfdc] sm:$0xf0]  ;;  %v17509_v63 = vld [vmem:[#allocation7 + $0x120c] sm:$0xf0]  ;;  %v14867_v31 = vld [vmem:[#allocation7 + $0xf18] sm:$0xf] }
 0x400   :  { %v14948_v53 = vor.u32 %v17439_v3, %v14947_v39  ;;  %v17039_v28 = vld [vmem:[#allocation7 + $0x35c] sm:$0xf0]  ;;  %v15187_v25 = vld [vmem:[#allocation7 + $0x1198] sm:$0xf] }
 0x401   :  { %9649 = vmatpush.bf16.msrb.mxu0 %v13588_v58  ;;  %9624 = vmatmul.bf16.vlgmr.msra.gmra.mxu1 %v18221_v47  ;;  %v18447_v18 = vpop.f32.mrf.mxu0  ;;  %v15028_v58 = vor.u32 %v17459_v22, %v15027_v59  ;;  %v15747_v3 = vld [vmem:[#allocation7 + $0x15f8] sm:$0xf] }
 0x402   :  { %9668 = vmatpush.bf16.msrb.mxu1 %v14508_v1  ;;  %v17069_v1 = vld [vmem:[#allocation7 + $0x44c] sm:$0xf0]  ;;  %9585 = vmatmul.bf16.vlgmr.msrb.gmra.mxu3 %v18250_v11  ;;  %v9378_v22 = vpop.f32.mrf.mxu3 }
 0x403   :  { %9662 = vmatpush.bf16.msrb.mxu2 %v13908_v35  ;;  %9629 = vmatpush.bf16.msra.mxu3 %v13548_v10  ;;  %v13468_v50 = vor.u32 %v17069_v1, %v13467_v8  ;;  %v17449_v35 = vld [vmem:[#allocation7 + $0x102c] sm:$0xf0]  ;;  %v17519_v10 = vld [vmem:[#allocation7 + $0x125c] sm:$0xf0]  ;;  %v9379_v8 = vadd.f32 %v9378_v22, %v9366_v54  ;;  %v14227_v1 = vld [vmem:[#allocation7 + $0xa18] sm:$0xf] }
 0x404   :  { %9650 = vmatmul.bf16.vlgmr.msrb.gmra.mxu0 %v18227_v4  ;;  %v14988_v44 = vor.u32 %v17449_v35, %v14987_v14  ;;  %v16994_v54 = vld [vmem:[#allocation7 + $0x1fc] sm:$0xf] }
 0x405   :  { %9694 = vmatpush.bf16.msra.mxu0 %v15148_v27  ;;  %v14348_v27 = vor.u32 %v17289_v0, %v14347_v60  ;;  %v17259_v60 = vld [vmem:[#allocation7 + $0xa3c] sm:$0xf0] }
 0x406   :  { %9669 = vmatpush.bf16.msrb.mxu1 %v14468_v29  ;;  %9663 = vmatmul.bf16.vlgmr.msrb.gmra.mxu2 %v18231_v9  ;;  %v17279_v29 = vld [vmem:[#allocation7 + $0xadc] sm:$0xf0]  ;;  %v14228_v26 = vor.u32 %v17259_v60, %v14227_v1  ;;  %v13149_v1 = vld [vmem:[#allocation7 + $0x1d0] sm:$0xf0]  ;;  %v17064_v60 = vld [vmem:[#allocation7 + $0x42c] sm:$0xf] }
 0x407   :  { %9707 = vmatpush.bf16.msra.mxu2 %v15468_v33  ;;  %9630 = vmatpush.bf16.msra.mxu3 %v13508_v41  ;;  %v14307_v33 = vld [vmem:[#allocation7 + $0xab8] sm:$0xf]  ;;  %v9419_v34 = vpop.f32.mrf.mxu1  ;;  %v15227_v41 = vld [vmem:[#allocation7 + $0x11e8] sm:$0xf] }
 0x408   :  { %v17004_v34 = vld [vmem:[#allocation7 + $0x24c] sm:$0xf] }
 0x409   :  { %9695 = vmatpush.bf16.msra.mxu0 %v15108_v40  ;;  %v18452_v55 = vpop.f32.mrf.mxu2  ;;  %v15267_v40 = vld [vmem:[#allocation7 + $0x1238] sm:$0xf]  ;;  %v9445_v2 = vpop.f32.mrf.mxu0 }
 0x40a   :  { %9670 = vmatpush.bf16.msrb.mxu1 %v14428_v32  ;;  %v14267_v32 = vld [vmem:[#allocation7 + $0xa68] sm:$0xf]  ;;  %v15268_v49 = vor.u32 %v17519_v10, %v15267_v40  ;;  %v17639_v40 = vld [vmem:[#allocation7 + $0x161c] sm:$0xf0]  ;;  %v9380_v2 = vpop.f32.mrf.mxu3 }
 0x40b   :  { %9708 = vmatpush.bf16.msra.mxu2 %v15428_v42  ;;  %9631 = vmatpush.bf16.msra.mxu3 %v13468_v50  ;;  %v14308_v42 = vor.u32 %v17279_v29, %v14307_v33  ;;  %v14268_v59 = vor.u32 %v17269_v62, %v14267_v32  ;;  %v15228_v50 = vor.u32 %v17509_v63, %v15227_v41  ;;  %v13307_v33 = vld [vmem:[#allocation7 + $0x2e8] sm:$0xf]  ;;  %v17029_v29 = vld [vmem:[#allocation7 + $0x30c] sm:$0xf0]  ;;  %v13267_v32 = vld [vmem:[#allocation7 + $0x298] sm:$0xf] }
 0x40c   :  { %v13308_v15 = vor.u32 %v17029_v29, %v13307_v33  ;;  %v17019_v62 = vld [vmem:[#allocation7 + $0x2bc] sm:$0xf0]  ;;  %v17409_v41 = vld [vmem:[#allocation7 + $0xeec] sm:$0xf0]  ;;  %v17054_v33 = vld [vmem:[#allocation7 + $0x3dc] sm:$0xf] }
 0x40d   :  { %9696 = vmatpush.bf16.msra.mxu0 %v15068_v16  ;;  %v14907_v16 = vld [vmem:[#allocation7 + $0xf68] sm:$0xf]  ;;  %v13268_v22 = vor.u32 %v17019_v62, %v13267_v32  ;;  %v17044_v2 = vld [vmem:[#allocation7 + $0x38c] sm:$0xf]  ;;  %v13389_v62 = vld [vmem:[#allocation7 + $0x3b0] sm:$0xf0] }
 0x40e   :  { %9671 = vmatpush.bf16.msrb.mxu1 %v14388_v5  ;;  %v13347_v5 = vld [vmem:[#allocation7 + $0x338] sm:$0xf] }
 0x40f   :  { %9709 = vmatpush.bf16.msra.mxu2 %v15388_v7  ;;  %9632 = vmatpush.bf16.msra.mxu3 %v13428_v38  ;;  %v17429_v7 = vld [vmem:[#allocation7 + $0xf8c] sm:$0xf0]  ;;  %v13348_v35 = vor.u32 %v17039_v28, %v13347_v5 }
 0x410   :  { %v14908_v0 = vor.u32 %v17429_v7, %v14907_v16  ;;  %v13509_v16 = vld [vmem:[#allocation7 + $0x4a0] sm:$0xf0]  ;;  %v14827_v7 = vld [vmem:[#allocation7 + $0xec8] sm:$0xf] }
 0x411   :  { %9697 = vmatpush.bf16.msra.mxu0 %v15028_v58  ;;  %v15787_v58 = vld [vmem:[#allocation7 + $0x1648] sm:$0xf]  ;;  %v9458_v14 = vpop.f32.mrf.mxu2  ;;  %v14828_v28 = vor.u32 %v17409_v41, %v14827_v7 }
 0x412   :  { %9672 = vmatpush.bf16.msrb.mxu1 %v14348_v27  ;;  %v17419_v27 = vld [vmem:[#allocation7 + $0xf3c] sm:$0xf0]  ;;  %v15788_v30 = vor.u32 %v17649_v52, %v15787_v58  ;;  %v13469_v58 = vld [vmem:[#allocation7 + $0x450] sm:$0xf0]  ;;  %v14787_v52 = vld [vmem:[#allocation7 + $0xe78] sm:$0xf] }
 0x413   :  { %9710 = vmatpush.bf16.msra.mxu2 %v15348_v21  ;;  %9633 = vmatpush.bf16.msra.mxu3 %v13388_v56  ;;  %v9392_v21 = vadd.f32 %v18432_v43, %v9379_v8  ;;  %v14868_v39 = vor.u32 %v17419_v27, %v14867_v31  ;;  %v13549_v43 = vld [vmem:[#allocation7 + $0x4f0] sm:$0xf0]  ;;  %v17074_v56 = vld [vmem:[#allocation7 + $0x47c] sm:$0xf]  ;;  %v16984_v8 = vld [vmem:[#allocation7 + $0x1ac] sm:$0xf]  ;;  %v13472_v27 = vor.u32 %v17064_v60, %v13469_v58 }
 0x414   :  { %v13512_v5 = vor.u32 %v17074_v56, %v13509_v16  ;;  %v17619_v14 = vld [vmem:[#allocation7 + $0x157c] sm:$0xf0]  ;;  %v13152_v31 = vor.u32 %v16984_v8, %v13149_v1  ;;  %v13349_v8 = vld [vmem:[#allocation7 + $0x360] sm:$0xf0]  ;;  %v14667_v1 = vld [vmem:[#allocation7 + $0xd88] sm:$0xf] }
 0x415   :  { %9698 = vmatpush.bf16.msra.mxu0 %v14988_v44  ;;  %v13229_v44 = vld [vmem:[#allocation7 + $0x270] sm:$0xf0]  ;;  %v9405_v38 = vadd.f32 %v18434_v20, %v9392_v21  ;;  %v15748_v20 = vor.u32 %v17639_v40, %v15747_v3  ;;  %v17399_v21 = vld [vmem:[#allocation7 + $0xe9c] sm:$0xf0]  ;;  %v17369_v60 = vld [vmem:[#allocation7 + $0xdac] sm:$0xf0] }
 0x416   :  { %9673 = vmatpush.bf16.msrb.mxu1 %v14308_v42  ;;  %v15188_v42 = vor.u32 %v17499_v45, %v15187_v25  ;;  %v13232_v46 = vor.u32 %v17004_v34, %v13229_v44  ;;  %v14788_v25 = vor.u32 %v17399_v21, %v14787_v52  ;;  %v13109_v45 = vld [vmem:[#allocation7 + $0x180] sm:$0xf0]  ;;  %v14747_v34 = vld [vmem:[#allocation7 + $0xe28] sm:$0xf]  ;;  %v17389_v44 = vld [vmem:[#allocation7 + $0xe4c] sm:$0xf0] }
 0x417   :  { %9711 = vmatpush.bf16.msra.mxu2 %v15308_v12  ;;  %v17084_v12 = vld [vmem:[#allocation7 + $0x4cc] sm:$0xf]  ;;  %9634 = vmatpush.bf16.msra.mxu3 %v13348_v35  ;;  %v18458_v10 = vadd.f32 %v18444_v37, %v9405_v38  ;;  %v15707_v37 = vld [vmem:[#allocation7 + $0x15a8] sm:$0xf]  ;;  %v17589_v52 = vld [vmem:[#allocation7 + $0x148c] sm:$0xf0] }
 0x418   :  { %v15627_v38 = vld [vmem:[#allocation7 + $0x1508] sm:$0xf] }
 0x419   :  { %9699 = vmatpush.bf16.msra.mxu0 %v14948_v53  ;;  %v13552_v53 = vor.u32 %v17084_v12, %v13549_v43  ;;  %v4821_v43 = vperm.slane %v18449_v13, 5  ;;  %v13392_v13 = vor.u32 %v17044_v2, %v13389_v62  ;;  %v15547_v58 = vld [vmem:[#allocation7 + $0x1468] sm:$0xf]  ;;  %v12949_v2 = vld [vmem:[#allocation7 + $0x40] sm:$0xf0] }
 0x41a   :  { %9674 = vmatpush.bf16.msrb.mxu1 %v14268_v59  ;;  %v17629_v59 = vld [vmem:[#allocation7 + $0x15cc] sm:$0xf0] }
 0x41b   :  { %9712 = vmatpush.bf16.msra.mxu2 %v15268_v49  ;;  %v13189_v49 = vld [vmem:[#allocation7 + $0x220] sm:$0xf0]  ;;  %9635 = vmatpush.bf16.msra.mxu3 %v13308_v15  ;;  %v16964_v15 = vld [vmem:[#allocation7 + $0x10c] sm:$0xf] }
 0x41c   :  { %v13192_v63 = vor.u32 %v16994_v54, %v13189_v49  ;;  %v15587_v54 = vld [vmem:[#allocation7 + $0x14b8] sm:$0xf]  ;;  %v17599_v49 = vld [vmem:[#allocation7 + $0x14dc] sm:$0xf0] }
 0x41d   :  { %9700 = vmatpush.bf16.msra.mxu0 %v14908_v0  ;;  %v15708_v0 = vor.u32 %v17629_v59, %v15707_v37  ;;  %v16954_v59 = vld [vmem:[#allocation7 + $0xbc] sm:$0xf] }
 0x41e   :  { %9675 = vmatpush.bf16.msrb.mxu1 %v14228_v26  ;;  %v18463_v35 = vpop.f32.mrf.mxu1  ;;  %v16974_v26 = vld [vmem:[#allocation7 + $0x15c] sm:$0xf] }
 0x41f   :  { %9713 = vmatpush.bf16.msra.mxu2 %v15228_v50  ;;  %v15667_v50 = vld [vmem:[#allocation7 + $0x1558] sm:$0xf]  ;;  %9636 = vmatpush.bf16.msra.mxu3 %v13268_v22  ;;  %v13112_v3 = vor.u32 %v16974_v26, %v13109_v45  ;;  %v13029_v22 = vld [vmem:[#allocation7 + $0xe0] sm:$0xf0]  ;;  %v15548_v26 = vor.u32 %v17589_v52, %v15547_v58  ;;  %v17314_v58 = vld [vmem:[#allocation7 + $0xbfc] sm:$0xf] }
 0x420   :  { %v15668_v29 = vor.u32 %v17619_v14, %v15667_v50  ;;  %v13032_v21 = vor.u32 %v16954_v59, %v13029_v22  ;;  %v14668_v14 = vor.u32 %v17369_v60, %v14667_v1  ;;  %v14547_v1 = vld [vmem:[#allocation7 + $0xc98] sm:$0xf]  ;;  %v17339_v60 = vld [vmem:[#allocation7 + $0xcbc] sm:$0xf0]  ;;  %v14469_v52 = vld [vmem:[#allocation7 + $0xc20] sm:$0xf0] }
 0x421   :  { %9701 = vmatpush.bf16.msra.mxu0 %v14868_v39  ;;  %9676 = vmatmul.bf16.vlgmr.msrb.gmra.mxu1 %v18246_v6  ;;  %v9495_v12 = vpop.f32.mrf.mxu0  ;;  %v17609_v39 = vld [vmem:[#allocation7 + $0x152c] sm:$0xf0] }
 0x422   :  { %9720 = vmatpush.bf16.msra.mxu1 %v15788_v30  ;;  %v13429_v30 = vld [vmem:[#allocation7 + $0x400] sm:$0xf0]  ;;  %9637 = vmatmul.bf16.vlgmr.msra.gmra.mxu3 %v18225_v57  ;;  %v15628_v32 = vor.u32 %v17609_v39, %v15627_v38  ;;  %v9496_v56 = vadd.f32 %v9495_v12, %v4821_v43  ;;  %v17579_v12 = vld [vmem:[#allocation7 + $0x143c] sm:$0xf0]  ;;  %v17164_v39 = vld [vmem:[#allocation7 + $0x74c] sm:$0xf] }
 0x423   :  { %9714 = vmatpush.bf16.msra.mxu2 %v15188_v42  ;;  %9681 = vmatpush.bf16.msrb.mxu3 %v14828_v28  ;;  %v13432_v40 = vor.u32 %v17054_v33, %v13429_v30  ;;  %v14748_v42 = vor.u32 %v17389_v44, %v14747_v34  ;;  %v15588_v28 = vor.u32 %v17599_v49, %v15587_v54  ;;  %v9430_v45 = vpop.f32.mrf.mxu3  ;;  %v13309_v33 = vld [vmem:[#allocation7 + $0x310] sm:$0xf0]  ;;  %v17359_v30 = vld [vmem:[#allocation7 + $0xd5c] sm:$0xf0]  ;;  %v15507_v44 = vld [vmem:[#allocation7 + $0x1418] sm:$0xf] }
 0x424   :  { %9702 = vmatmul.bf16.vlgmr.msra.gmra.mxu0 %v18253_v51  ;;  %v9431_v34 = vadd.f32 %v9430_v45, %v18458_v10  ;;  %v13869_v43 = vld [vmem:[#allocation7 + $0x770] sm:$0xf0]  ;;  %v15508_v62 = vor.u32 %v17579_v12, %v15507_v44  ;;  %v14587_v10 = vld [vmem:[#allocation7 + $0xce8] sm:$0xf]  ;;  %v17324_v49 = vld [vmem:[#allocation7 + $0xc4c] sm:$0xf] }
 0x425   :  { %9746 = vmatpush.bf16.msrb.mxu0 %v13232_v46  ;;  %v13069_v46 = vld [vmem:[#allocation7 + $0x130] sm:$0xf0]  ;;  %v13872_v54 = vor.u32 %v17164_v39, %v13869_v43  ;;  %v17719_v39 = vld [vmem:[#allocation7 + $0x189c] sm:$0xf0]  ;;  %v17134_v43 = vld [vmem:[#allocation7 + $0x65c] sm:$0xf] }
 0x426   :  { %9721 = vmatpush.bf16.msra.mxu1 %v15748_v20  ;;  %9715 = vmatmul.bf16.vlgmr.msra.gmra.mxu2 %v18250_v11  ;;  %v17379_v20 = vld [vmem:[#allocation7 + $0xdfc] sm:$0xf0]  ;;  %v9471_v16 = vpop.f32.mrf.mxu1  ;;  %v13072_v7 = vor.u32 %v16964_v15, %v13069_v46  ;;  %v16934_v46 = vld [vmem:[#allocation7 + $0x1c] sm:$0xf]  ;;  %v14749_v12 = vld [vmem:[#allocation7 + $0xe50] sm:$0xf0] }
 0x427   :  { %9759 = vmatpush.bf16.msrb.mxu2 %v13552_v53  ;;  %9682 = vmatpush.bf16.msrb.mxu3 %v14788_v25  ;;  %v14707_v53 = vld [vmem:[#allocation7 + $0xdd8] sm:$0xf]  ;;  %v17024_v25 = vld [vmem:[#allocation7 + $0x2ec] sm:$0xf] }
 0x428   :  { %v14708_v37 = vor.u32 %v17379_v20, %v14707_v53  ;;  %v13269_v53 = vld [vmem:[#allocation7 + $0x2c0] sm:$0xf0]  ;;  %v17349_v20 = vld [vmem:[#allocation7 + $0xd0c] sm:$0xf0]  ;;  %v17404_v16 = vld [vmem:[#allocation7 + $0xecc] sm:$0xf] }
 0x429   :  { %9747 = vmatpush.bf16.msrb.mxu0 %v13192_v63  ;;  %v9508_v41 = vpop.f32.mrf.mxu2  ;;  %v17034_v63 = vld [vmem:[#allocation7 + $0x33c] sm:$0xf] }
 0x42a   :  { %9722 = vmatpush.bf16.msra.mxu1 %v15708_v0  ;;  %v9497_v0 = vpop.f32.mrf.mxu0  ;;  %v13352_v50 = vor.u32 %v17034_v63, %v13349_v8  ;;  %v14588_v63 = vor.u32 %v17349_v20, %v14587_v10  ;;  %v14709_v20 = vld [vmem:[#allocation7 + $0xe00] sm:$0xf0] }
 0x42b   :  { %9760 = vmatpush.bf16.msrb.mxu2 %v13512_v5  ;;  %9683 = vmatpush.bf16.msrb.mxu3 %v14748_v42  ;;  %v18467_v5 = vadd.f32 %v9508_v41, %v9496_v56  ;;  %v14509_v56 = vld [vmem:[#allocation7 + $0xc70] sm:$0xf0]  ;;  %v17154_v41 = vld [vmem:[#allocation7 + $0x6fc] sm:$0xf]  ;;  %v9432_v8 = vpop.f32.mrf.mxu3 }
 0x42c   :  { %v15987_v8 = vld [vmem:[#allocation7 + $0x17d8] sm:$0xf] }
 0x42d   :  { %9748 = vmatpush.bf16.msrb.mxu0 %v13152_v31  ;;  %v16944_v31 = vld [vmem:[#allocation7 + $0x6c] sm:$0xf] }
 0x42e   :  { %9723 = vmatpush.bf16.msra.mxu1 %v15668_v29  ;;  %v14627_v29 = vld [vmem:[#allocation7 + $0xd38] sm:$0xf] }
 0x42f   :  { %9761 = vmatpush.bf16.msrb.mxu2 %v13472_v27  ;;  %9684 = vmatpush.bf16.msrb.mxu3 %v14708_v37  ;;  %v12989_v27 = vld [vmem:[#allocation7 + $0x90] sm:$0xf0]  ;;  %v14628_v15 = vor.u32 %v17359_v30, %v14627_v29  ;;  %v13829_v37 = vld [vmem:[#allocation7 + $0x720] sm:$0xf0]  ;;  %v17304_v29 = vld [vmem:[#allocation7 + $0xbac] sm:$0xf] }
 0x430   :  { %v12992_v38 = vor.u32 %v16944_v31, %v12989_v27  ;;  %v17729_v31 = vld [vmem:[#allocation7 + $0x18ec] sm:$0xf0]  ;;  %v13789_v27 = vld [vmem:[#allocation7 + $0x6d0] sm:$0xf0] }
 0x431   :  { %9749 = vmatpush.bf16.msrb.mxu0 %v13112_v3  ;;  %v9444_v3 = vadd.f32 %v18447_v18, %v9431_v34  ;;  %v9510_v42 = vpop.f32.mrf.mxu2  ;;  %v14829_v18 = vld [vmem:[#allocation7 + $0xef0] sm:$0xf0]  ;;  %v17384_v34 = vld [vmem:[#allocation7 + $0xe2c] sm:$0xf] }
 0x432   :  { %9724 = vmatpush.bf16.msra.mxu1 %v15628_v32  ;;  %v17014_v32 = vld [vmem:[#allocation7 + $0x29c] sm:$0xf]  ;;  %v14832_v0 = vor.u32 %v17404_v16, %v14829_v18  ;;  %v14429_v30 = vld [vmem:[#allocation7 + $0xbd0] sm:$0xf0]  ;;  %v17124_v16 = vld [vmem:[#allocation7 + $0x60c] sm:$0xf] }
 0x433   :  { %9762 = vmatpush.bf16.msrb.mxu2 %v13432_v40  ;;  %9685 = vmatpush.bf16.msrb.mxu3 %v14668_v14  ;;  %v13312_v40 = vor.u32 %v17024_v25, %v13309_v33  ;;  %v13272_v59 = vor.u32 %v17014_v32, %v13269_v53  ;;  %v16107_v14 = vld [vmem:[#allocation7 + $0x18c8] sm:$0xf]  ;;  %v14548_v25 = vor.u32 %v17339_v60, %v14547_v1  ;;  %v17294_v32 = vld [vmem:[#allocation7 + $0xb5c] sm:$0xf]  ;;  %v17699_v1 = vld [vmem:[#allocation7 + $0x17fc] sm:$0xf0] }
 0x434   :  { %v16108_v33 = vor.u32 %v17729_v31, %v16107_v14  ;;  %v14432_v42 = vor.u32 %v17304_v29, %v14429_v30  ;;  %v17374_v53 = vld [vmem:[#allocation7 + $0xddc] sm:$0xf]  ;;  %v14309_v31 = vld [vmem:[#allocation7 + $0xae0] sm:$0xf0]  ;;  %v17104_v29 = vld [vmem:[#allocation7 + $0x56c] sm:$0xf] }
 0x435   :  { %9750 = vmatpush.bf16.msrb.mxu0 %v13072_v7  ;;  %v9457_v7 = vadd.f32 %v18452_v55, %v9444_v3  ;;  %v13832_v55 = vor.u32 %v17154_v41, %v13829_v37  ;;  %v13749_v3 = vld [vmem:[#allocation7 + $0x680] sm:$0xf0]  ;;  %v17284_v41 = vld [vmem:[#allocation7 + $0xb0c] sm:$0xf]  ;;  %v14349_v37 = vld [vmem:[#allocation7 + $0xb30] sm:$0xf0] }
 0x436   :  { %9725 = vmatpush.bf16.msra.mxu1 %v15588_v28  ;;  %v14512_v28 = vor.u32 %v17324_v49, %v14509_v56  ;;  %v13752_v10 = vor.u32 %v17134_v43, %v13749_v3  ;;  %v17709_v49 = vld [vmem:[#allocation7 + $0x184c] sm:$0xf0]  ;;  %v17114_v60 = vld [vmem:[#allocation7 + $0x5bc] sm:$0xf]  ;;  %v13629_v30 = vld [vmem:[#allocation7 + $0x590] sm:$0xf0] }
 0x437   :  { %9763 = vmatpush.bf16.msrb.mxu2 %v13392_v13  ;;  %v12952_v13 = vor.u32 %v16934_v46, %v12949_v2  ;;  %9686 = vmatpush.bf16.msrb.mxu3 %v14628_v15  ;;  %v18473_v22 = vadd.f32 %v18463_v35, %v9457_v7  ;;  %v17144_v35 = vld [vmem:[#allocation7 + $0x6ac] sm:$0xf]  ;;  %v14752_v46 = vor.u32 %v17384_v34, %v14749_v12  ;;  %v13709_v7 = vld [vmem:[#allocation7 + $0x630] sm:$0xf0]  ;;  %v17274_v14 = vld [vmem:[#allocation7 + $0xabc] sm:$0xf] }
 0x438   :  { %v13792_v44 = vor.u32 %v17144_v35, %v13789_v27  ;;  %v17354_v35 = vld [vmem:[#allocation7 + $0xd3c] sm:$0xf]  ;;  %v14312_v34 = vor.u32 %v17274_v14, %v14309_v31  ;;  %v17344_v43 = vld [vmem:[#allocation7 + $0xcec] sm:$0xf]  ;;  %v13632_v3 = vor.u32 %v17104_v29, %v13629_v30  ;;  %v16069_v30 = vld [vmem:[#allocation7 + $0x18a0] sm:$0xf0] }
 0x439   :  { %9751 = vmatpush.bf16.msrb.mxu0 %v13032_v21  ;;  %v17394_v21 = vld [vmem:[#allocation7 + $0xe7c] sm:$0xf] }
 0x43a   :  { %9726 = vmatpush.bf16.msra.mxu1 %v15548_v26  ;;  %v14472_v26 = vor.u32 %v17314_v58, %v14469_v52  ;;  %v14352_v58 = vor.u32 %v17284_v41, %v14349_v37  ;;  %v14549_v37 = vld [vmem:[#allocation7 + $0xcc0] sm:$0xf0]  ;;  %v17714_v29 = vld [vmem:[#allocation7 + $0x187c] sm:$0xf] }
 0x43b   :  { %9764 = vmatpush.bf16.msrb.mxu2 %v13352_v50  ;;  %v14789_v50 = vld [vmem:[#allocation7 + $0xea0] sm:$0xf0]  ;;  %9687 = vmatpush.bf16.msrb.mxu3 %v14588_v63  ;;  %v13712_v63 = vor.u32 %v17124_v16, %v13709_v7 }
 0x43c   :  { %v14792_v45 = vor.u32 %v17394_v21, %v14789_v50  ;;  %v15988_v50 = vor.u32 %v17699_v1, %v15987_v8  ;;  %v15789_v8 = vld [vmem:[#allocation7 + $0x1670] sm:$0xf0]  ;;  %v17724_v1 = vld [vmem:[#allocation7 + $0x18cc] sm:$0xf] }
 0x43d   :  { %9752 = vmatpush.bf16.msrb.mxu0 %v12992_v38  ;;  %v16067_v38 = vld [vmem:[#allocation7 + $0x1878] sm:$0xf] }
 0x43e   :  { %9727 = vmatpush.bf16.msra.mxu1 %v15508_v62  ;;  %v16068_v2 = vor.u32 %v17719_v39, %v16067_v38  ;;  %v14389_v62 = vld [vmem:[#allocation7 + $0xb80] sm:$0xf0]  ;;  %v17264_v38 = vld [vmem:[#allocation7 + $0xa6c] sm:$0xf]  ;;  %v14269_v39 = vld [vmem:[#allocation7 + $0xa90] sm:$0xf0] }
 0x43f   :  { %9765 = vmatpush.bf16.msrb.mxu2 %v13312_v40  ;;  %9688 = vmatpush.bf16.msrb.mxu3 %v14548_v25  ;;  %v9521_v40 = vpop.f32.mrf.mxu1  ;;  %v14629_v25 = vld [vmem:[#allocation7 + $0xd60] sm:$0xf0] }
 0x440   :  { %v18479_v15 = vadd.f32 %v9521_v40, %v18467_v5  ;;  %v14712_v5 = vor.u32 %v17374_v53, %v14709_v20  ;;  %v13589_v53 = vld [vmem:[#allocation7 + $0x540] sm:$0xf0]  ;;  %v17484_v20 = vld [vmem:[#allocation7 + $0x114c] sm:$0xf] }
 0x441   :  { %9753 = vmatpush.bf16.msrb.mxu0 %v12952_v13  ;;  %9728 = vmatmul.bf16.vlgmr.msra.gmra.mxu1 %v18282_v36  ;;  %v18482_v56 = vpop.f32.mrf.mxu0  ;;  %v14392_v13 = vor.u32 %v17294_v32, %v14389_v62  ;;  %v17094_v62 = vld [vmem:[#allocation7 + $0x51c] sm:$0xf] }
 0x442   :  { %9772 = vmatpush.bf16.msrb.mxu1 %v13872_v54  ;;  %v16027_v54 = vld [vmem:[#allocation7 + $0x1828] sm:$0xf]  ;;  %9689 = vmatmul.bf16.vlgmr.msrb.gmra.mxu3 %v18248_v19  ;;  %v13592_v41 = vor.u32 %v17094_v62, %v13589_v53  ;;  %v16029_v53 = vld [vmem:[#allocation7 + $0x1850] sm:$0xf0] }
 0x443   :  { %9766 = vmatpush.bf16.msrb.mxu2 %v13272_v59  ;;  %9733 = vmatpush.bf16.msra.mxu3 %v16108_v33  ;;  %v16028_v18 = vor.u32 %v17709_v49, %v16027_v54  ;;  %v17364_v59 = vld [vmem:[#allocation7 + $0xd8c] sm:$0xf]  ;;  %v15149_v54 = vld [vmem:[#allocation7 + $0x1170] sm:$0xf0] }
 0x444   :  { %9754 = vmatmul.bf16.vlgmr.msrb.gmra.mxu0 %v18221_v47 }
 0x445   :  { %9798 = vmatpush.bf16.msra.mxu0 %v14512_v28  ;;  %v14669_v28 = vld [vmem:[#allocation7 + $0xdb0] sm:$0xf0]  ;;  %v9482_v40 = vpop.f32.mrf.mxu3 }
 0x446   :  { %9773 = vmatpush.bf16.msrb.mxu1 %v13832_v55  ;;  %9767 = vmatmul.bf16.vlgmr.msrb.gmra.mxu2 %v18225_v57  ;;  %v14672_v52 = vor.u32 %v17364_v59, %v14669_v28  ;;  %v18487_v32 = vadd.f32 %v9482_v40, %v18473_v22  ;;  %v15867_v59 = vld [vmem:[#allocation7 + $0x16e8] sm:$0xf]  ;;  %v17669_v22 = vld [vmem:[#allocation7 + $0x170c] sm:$0xf0]  ;;  %v17644_v28 = vld [vmem:[#allocation7 + $0x164c] sm:$0xf] }
 0x447   :  { %9811 = vmatpush.bf16.msra.mxu2 %v14832_v0  ;;  %9734 = vmatpush.bf16.msra.mxu3 %v16068_v2  ;;  %v13669_v0 = vld [vmem:[#allocation7 + $0x5e0] sm:$0xf0]  ;;  %v9523_v55 = vpop.f32.mrf.mxu1  ;;  %v17679_v2 = vld [vmem:[#allocation7 + $0x175c] sm:$0xf0]  ;;  %v15792_v14 = vor.u32 %v17644_v28, %v15789_v8  ;;  %v14109_v28 = vld [vmem:[#allocation7 + $0x950] sm:$0xf0] }
 0x448   :  { %v13672_v27 = vor.u32 %v17114_v60, %v13669_v0  ;;  %v16109_v0 = vld [vmem:[#allocation7 + $0x18f0] sm:$0xf0]  ;;  %v17474_v55 = vld [vmem:[#allocation7 + $0x10fc] sm:$0xf] }
 0x449   :  { %9799 = vmatpush.bf16.msra.mxu0 %v14472_v26  ;;  %v18484_v21 = vpop.f32.mrf.mxu2  ;;  %v15947_v26 = vld [vmem:[#allocation7 + $0x1788] sm:$0xf]  ;;  %v9549_v33 = vpop.f32.mrf.mxu0 }
 0x44a   :  { %9774 = vmatpush.bf16.msrb.mxu1 %v13792_v44  ;;  %v14632_v44 = vor.u32 %v17354_v35, %v14629_v25  ;;  %v15827_v35 = vld [vmem:[#allocation7 + $0x1698] sm:$0xf]  ;;  %v16112_v25 = vor.u32 %v17724_v1, %v16109_v0  ;;  %v15749_v33 = vld [vmem:[#allocation7 + $0x1620] sm:$0xf0]  ;;  %v17444_v1 = vld [vmem:[#allocation7 + $0x100c] sm:$0xf] }
 0x44b   :  { %9812 = vmatpush.bf16.msra.mxu2 %v14792_v45  ;;  %9735 = vmatpush.bf16.msra.mxu3 %v16028_v18  ;;  %v17689_v45 = vld [vmem:[#allocation7 + $0x17ac] sm:$0xf0]  ;;  %v17334_v18 = vld [vmem:[#allocation7 + $0xc9c] sm:$0xf] }
 0x44c   :  { %v15948_v12 = vor.u32 %v17689_v45, %v15947_v26  ;;  %v17634_v45 = vld [vmem:[#allocation7 + $0x15fc] sm:$0xf] }
 0x44d   :  { %9800 = vmatpush.bf16.msra.mxu0 %v14432_v42  ;;  %v14589_v42 = vld [vmem:[#allocation7 + $0xd10] sm:$0xf0]  ;;  %v9484_v31 = vpop.f32.mrf.mxu3 }
 0x44e   :  { %9775 = vmatpush.bf16.msrb.mxu1 %v13752_v10  ;;  %v14272_v10 = vor.u32 %v17264_v38, %v14269_v39  ;;  %v14592_v49 = vor.u32 %v17344_v43, %v14589_v42  ;;  %v15069_v38 = vld [vmem:[#allocation7 + $0x10d0] sm:$0xf0]  ;;  %v15752_v43 = vor.u32 %v17634_v45, %v15749_v33  ;;  %v17624_v42 = vld [vmem:[#allocation7 + $0x15ac] sm:$0xf]  ;;  %v14949_v45 = vld [vmem:[#allocation7 + $0xfe0] sm:$0xf0] }
 0x44f   :  { %9813 = vmatpush.bf16.msra.mxu2 %v14752_v46  ;;  %9736 = vmatpush.bf16.msra.mxu3 %v15988_v50  ;;  %v15907_v46 = vld [vmem:[#allocation7 + $0x1738] sm:$0xf]  ;;  %v15868_v50 = vor.u32 %v17669_v22, %v15867_v59  ;;  %v15989_v22 = vld [vmem:[#allocation7 + $0x1800] sm:$0xf0] }
 0x450   :  { %v15908_v7 = vor.u32 %v17679_v2, %v15907_v46  ;;  %v15709_v46 = vld [vmem:[#allocation7 + $0x15d0] sm:$0xf0]  ;;  %v17704_v2 = vld [vmem:[#allocation7 + $0x182c] sm:$0xf] }
 0x451   :  { %9801 = vmatpush.bf16.msra.mxu0 %v14392_v13  ;;  %v9562_v16 = vpop.f32.mrf.mxu2  ;;  %v17254_v13 = vld [vmem:[#allocation7 + $0xa1c] sm:$0xf] }
 0x452   :  { %9776 = vmatpush.bf16.msrb.mxu1 %v13712_v63  ;;  %v15152_v63 = vor.u32 %v17484_v20, %v15149_v54  ;;  %v14149_v20 = vld [vmem:[#allocation7 + $0x9a0] sm:$0xf0]  ;;  %v17454_v54 = vld [vmem:[#allocation7 + $0x105c] sm:$0xf] }
 0x453   :  { %9814 = vmatpush.bf16.msra.mxu2 %v14712_v5  ;;  %9737 = vmatpush.bf16.msra.mxu3 %v15948_v12  ;;  %v14229_v5 = vld [vmem:[#allocation7 + $0xa40] sm:$0xf0]  ;;  %v17464_v12 = vld [vmem:[#allocation7 + $0x10ac] sm:$0xf] }
 0x454   :  { %v14232_v60 = vor.u32 %v17254_v13, %v14229_v5  ;;  %v15072_v62 = vor.u32 %v17464_v12, %v15069_v38  ;;  %v16032_v13 = vor.u32 %v17704_v2, %v16029_v53  ;;  %v17594_v12 = vld [vmem:[#allocation7 + $0x14bc] sm:$0xf]  ;;  %v15589_v38 = vld [vmem:[#allocation7 + $0x14e0] sm:$0xf0]  ;;  %v17424_v2 = vld [vmem:[#allocation7 + $0xf6c] sm:$0xf] }
 0x455   :  { %9802 = vmatpush.bf16.msra.mxu0 %v14352_v58  ;;  %v15109_v58 = vld [vmem:[#allocation7 + $0x1120] sm:$0xf0]  ;;  %v15592_v53 = vor.u32 %v17594_v12, %v15589_v38  ;;  %v13195_v12 = vld [vmem:[#allocation7 + $0x200] sm:$0xf]  ;;  %v17000_v38 = vld [vmem:[#allocation7 + $0x224] sm:$0xf0] }
 0x456   :  { %9777 = vmatpush.bf16.msrb.mxu1 %v13672_v27  ;;  %v17659_v27 = vld [vmem:[#allocation7 + $0x16bc] sm:$0xf0]  ;;  %v15112_v26 = vor.u32 %v17474_v55, %v15109_v58 }
 0x457   :  { %9815 = vmatpush.bf16.msra.mxu2 %v14672_v52  ;;  %9738 = vmatpush.bf16.msra.mxu3 %v15908_v7  ;;  %v14552_v52 = vor.u32 %v17334_v18, %v14549_v37  ;;  %v15828_v39 = vor.u32 %v17659_v27, %v15827_v35  ;;  %v15712_v7 = vor.u32 %v17624_v42, %v15709_v46  ;;  %v17614_v18 = vld [vmem:[#allocation7 + $0x155c] sm:$0xf]  ;;  %v15949_v35 = vld [vmem:[#allocation7 + $0x17b0] sm:$0xf0] }
 0x458   :  { %v17694_v37 = vld [vmem:[#allocation7 + $0x17dc] sm:$0xf]  ;;  %v14029_v42 = vld [vmem:[#allocation7 + $0x8b0] sm:$0xf0] }
 0x459   :  { %9803 = vmatpush.bf16.msra.mxu0 %v14312_v34  ;;  %v17244_v34 = vld [vmem:[#allocation7 + $0x9cc] sm:$0xf]  ;;  %v15992_v55 = vor.u32 %v17694_v37, %v15989_v22  ;;  %v17214_v27 = vld [vmem:[#allocation7 + $0x8dc] sm:$0xf]  ;;  %v13989_v37 = vld [vmem:[#allocation7 + $0x860] sm:$0xf0] }
 0x45a   :  { %9778 = vmatpush.bf16.msrb.mxu1 %v13632_v3  ;;  %v16072_v3 = vor.u32 %v17714_v29, %v16069_v30  ;;  %v17414_v22 = vld [vmem:[#allocation7 + $0xf1c] sm:$0xf] }
 0x45b   :  { %9816 = vmatpush.bf16.msra.mxu2 %v14632_v44  ;;  %v14189_v44 = vld [vmem:[#allocation7 + $0x9f0] sm:$0xf0]  ;;  %9739 = vmatpush.bf16.msra.mxu3 %v15868_v50 }
 0x45c   :  { %v14192_v40 = vor.u32 %v17244_v34, %v14189_v44  ;;  %v15629_v50 = vld [vmem:[#allocation7 + $0x1530] sm:$0xf0] }
 0x45d   :  { %9804 = vmatpush.bf16.msra.mxu0 %v14272_v10  ;;  %v17234_v10 = vld [vmem:[#allocation7 + $0x97c] sm:$0xf] }
 0x45e   :  { %9779 = vmatpush.bf16.msrb.mxu1 %v13592_v41  ;;  %v18492_v16 = vpop.f32.mrf.mxu1  ;;  %v14152_v5 = vor.u32 %v17234_v10, %v14149_v20  ;;  %v15669_v41 = vld [vmem:[#allocation7 + $0x1580] sm:$0xf0] }
 0x45f   :  { %9817 = vmatpush.bf16.msra.mxu2 %v14592_v49  ;;  %v15029_v49 = vld [vmem:[#allocation7 + $0x1080] sm:$0xf0]  ;;  %9740 = vmatpush.bf16.msra.mxu3 %v15828_v39  ;;  %v15672_v0 = vor.u32 %v17614_v18, %v15669_v41  ;;  %v17674_v39 = vld [vmem:[#allocation7 + $0x173c] sm:$0xf]  ;;  %v15869_v18 = vld [vmem:[#allocation7 + $0x1710] sm:$0xf0] }
 0x460   :  { %v15032_v59 = vor.u32 %v17454_v54, %v15029_v49  ;;  %v17584_v54 = vld [vmem:[#allocation7 + $0x146c] sm:$0xf]  ;;  %v15549_v49 = vld [vmem:[#allocation7 + $0x1490] sm:$0xf0]  ;;  %v17194_v41 = vld [vmem:[#allocation7 + $0x83c] sm:$0xf] }
 0x461   :  { %9805 = vmatpush.bf16.msra.mxu0 %v14232_v60  ;;  %9780 = vmatmul.bf16.vlgmr.msrb.gmra.mxu1 %v18227_v4  ;;  %v18495_v8 = vpop.f32.mrf.mxu0  ;;  %v14989_v60 = vld [vmem:[#allocation7 + $0x1030] sm:$0xf0] }
 0x462   :  { %9824 = vmatpush.bf16.msra.mxu1 %v15152_v63  ;;  %v17224_v63 = vld [vmem:[#allocation7 + $0x92c] sm:$0xf]  ;;  %9741 = vmatmul.bf16.vlgmr.msra.gmra.mxu3 %v18292_v24  ;;  %v14992_v31 = vor.u32 %v17444_v1, %v14989_v60  ;;  %v13235_v1 = vld [vmem:[#allocation7 + $0x250] sm:$0xf]  ;;  %v17010_v60 = vld [vmem:[#allocation7 + $0x274] sm:$0xf0] }
 0x463   :  { %9818 = vmatpush.bf16.msra.mxu2 %v14552_v52  ;;  %9785 = vmatpush.bf16.msrb.mxu3 %v14192_v40  ;;  %v14112_v58 = vor.u32 %v17224_v63, %v14109_v28  ;;  %v17604_v52 = vld [vmem:[#allocation7 + $0x150c] sm:$0xf]  ;;  %v14869_v63 = vld [vmem:[#allocation7 + $0xf40] sm:$0xf0]  ;;  %v15552_v28 = vor.u32 %v17584_v54, %v15549_v49  ;;  %v17240_v54 = vld [vmem:[#allocation7 + $0x9a4] sm:$0xf0] }
 0x464   :  { %9806 = vmatmul.bf16.vlgmr.msra.gmra.mxu0 %v18246_v6  ;;  %v15632_v29 = vor.u32 %v17604_v52, %v15629_v50  ;;  %v17204_v40 = vld [vmem:[#allocation7 + $0x88c] sm:$0xf]  ;;  %v13992_v52 = vor.u32 %v17194_v41, %v13989_v37  ;;  %v17574_v50 = vld [vmem:[#allocation7 + $0x141c] sm:$0xf] }
 0x465   :  { %9850 = vmatpush.bf16.msrb.mxu0 %v15792_v14  ;;  %v17684_v14 = vld [vmem:[#allocation7 + $0x178c] sm:$0xf]  ;;  %v14032_v20 = vor.u32 %v17204_v40, %v14029_v42 }
 0x466   :  { %9825 = vmatpush.bf16.msra.mxu1 %v15112_v26  ;;  %9819 = vmatmul.bf16.vlgmr.msra.gmra.mxu2 %v18248_v19  ;;  %v17434_v26 = vld [vmem:[#allocation7 + $0xfbc] sm:$0xf]  ;;  %v9575_v33 = vpop.f32.mrf.mxu1  ;;  %v15952_v30 = vor.u32 %v17684_v14, %v15949_v35  ;;  %v15509_v14 = vld [vmem:[#allocation7 + $0x1440] sm:$0xf0]  ;;  %v14872_v35 = vor.u32 %v17414_v22, %v14869_v63  ;;  %v17564_v49 = vld [vmem:[#allocation7 + $0x13cc] sm:$0xf] }
 0x467   :  { %9863 = vmatpush.bf16.msrb.mxu2 %v16112_v25  ;;  %9786 = vmatpush.bf16.msrb.mxu3 %v14152_v5  ;;  %v14069_v25 = vld [vmem:[#allocation7 + $0x900] sm:$0xf0]  ;;  %v9534_v5 = vpop.f32.mrf.mxu3  ;;  %v17170_v33 = vld [vmem:[#allocation7 + $0x774] sm:$0xf0]  ;;  %v14115_v63 = vld [vmem:[#allocation7 + $0x930] sm:$0xf] }
 0x468   :  { %v14072_v44 = vor.u32 %v17214_v27, %v14069_v25  ;;  %v15829_v27 = vld [vmem:[#allocation7 + $0x16c0] sm:$0xf0]  ;;  %v13949_v25 = vld [vmem:[#allocation7 + $0x810] sm:$0xf0]  ;;  %v17150_v22 = vld [vmem:[#allocation7 + $0x6d4] sm:$0xf0] }
 0x469   :  { %9851 = vmatpush.bf16.msrb.mxu0 %v15752_v43  ;;  %v18497_v34 = vpop.f32.mrf.mxu2  ;;  %v14952_v43 = vor.u32 %v17434_v26, %v14949_v45  ;;  %v9601_v46 = vpop.f32.mrf.mxu0  ;;  %v13236_v26 = vor.u32 %v17010_v60, %v13235_v1  ;;  %v13875_v45 = vld [vmem:[#allocation7 + $0x750] sm:$0xf]  ;;  %v17230_v1 = vld [vmem:[#allocation7 + $0x954] sm:$0xf0]  ;;  %v17554_v60 = vld [vmem:[#allocation7 + $0x137c] sm:$0xf] }
 0x46a   :  { %9826 = vmatpush.bf16.msra.mxu1 %v15072_v62  ;;  %v14909_v62 = vld [vmem:[#allocation7 + $0xf90] sm:$0xf0]  ;;  %v13876_v40 = vor.u32 %v17170_v33, %v13875_v45  ;;  %v17174_v46 = vld [vmem:[#allocation7 + $0x79c] sm:$0xf]  ;;  %v17544_v45 = vld [vmem:[#allocation7 + $0x132c] sm:$0xf] }
 0x46b   :  { %9864 = vmatpush.bf16.msrb.mxu2 %v16072_v3  ;;  %9787 = vmatpush.bf16.msrb.mxu3 %v14112_v58  ;;  %v15909_v3 = vld [vmem:[#allocation7 + $0x1760] sm:$0xf0]  ;;  %v15389_v33 = vld [vmem:[#allocation7 + $0x1350] sm:$0xf0] }
 0x46c   :  { %v15912_v10 = vor.u32 %v17674_v39, %v15909_v3 }
 0x46d   :  { %9852 = vmatpush.bf16.msrb.mxu0 %v15712_v7  ;;  %v17664_v7 = vld [vmem:[#allocation7 + $0x16ec] sm:$0xf] }
 0x46e   :  { %9827 = vmatpush.bf16.msra.mxu1 %v15032_v59  ;;  %v9535_v59 = vadd.f32 %v9534_v5, %v18479_v15  ;;  %v17184_v15 = vld [vmem:[#allocation7 + $0x7ec] sm:$0xf] }
 0x46f   :  { %9865 = vmatpush.bf16.msrb.mxu2 %v16032_v13  ;;  %9788 = vmatpush.bf16.msrb.mxu3 %v14072_v44  ;;  %v14912_v13 = vor.u32 %v17424_v2, %v14909_v62  ;;  %v15512_v44 = vor.u32 %v17574_v50, %v15509_v14  ;;  %v13952_v3 = vor.u32 %v17184_v15, %v13949_v25  ;;  %v9536_v42 = vpop.f32.mrf.mxu3  ;;  %v13909_v2 = vld [vmem:[#allocation7 + $0x7c0] sm:$0xf0]  ;;  %v14075_v15 = vld [vmem:[#allocation7 + $0x8e0] sm:$0xf] }
 0x470   :  { %v13912_v5 = vor.u32 %v17174_v46, %v13909_v2  ;;  %v14116_v14 = vor.u32 %v17230_v1, %v14115_v63  ;;  %v17210_v46 = vld [vmem:[#allocation7 + $0x8b4] sm:$0xf0]  ;;  %v17534_v2 = vld [vmem:[#allocation7 + $0x12dc] sm:$0xf]  ;;  %v12995_v63 = vld [vmem:[#allocation7 + $0x70] sm:$0xf] }
 0x471   :  { %9853 = vmatpush.bf16.msrb.mxu0 %v15672_v0  ;;  %v9548_v0 = vadd.f32 %v18482_v56, %v9535_v59  ;;  %v9614_v58 = vpop.f32.mrf.mxu2  ;;  %v17250_v56 = vld [vmem:[#allocation7 + $0x9f4] sm:$0xf0]  ;;  %v13795_v59 = vld [vmem:[#allocation7 + $0x6b0] sm:$0xf] }
 0x472   :  { %9828 = vmatpush.bf16.msra.mxu1 %v14992_v31  ;;  %v17654_v31 = vld [vmem:[#allocation7 + $0x169c] sm:$0xf]  ;;  %v16980_v58 = vld [vmem:[#allocation7 + $0x184] sm:$0xf0]  ;;  %v13796_v50 = vor.u32 %v17150_v22, %v13795_v59  ;;  %v15309_v59 = vld [vmem:[#allocation7 + $0x12b0] sm:$0xf0] }
 0x473   :  { %9866 = vmatpush.bf16.msrb.mxu2 %v15992_v55  ;;  %9789 = vmatpush.bf16.msrb.mxu3 %v14032_v20  ;;  %v15872_v55 = vor.u32 %v17664_v7, %v15869_v18  ;;  %v15832_v39 = vor.u32 %v17654_v31, %v15829_v27  ;;  %v14155_v20 = vld [vmem:[#allocation7 + $0x980] sm:$0xf]  ;;  %v15469_v7 = vld [vmem:[#allocation7 + $0x13f0] sm:$0xf0]  ;;  %v17140_v27 = vld [vmem:[#allocation7 + $0x684] sm:$0xf0] }
 0x474   :  { %v14156_v41 = vor.u32 %v17240_v54, %v14155_v20  ;;  %v15472_v37 = vor.u32 %v17564_v49, %v15469_v7 }
 0x475   :  { %9854 = vmatpush.bf16.msrb.mxu0 %v15632_v29  ;;  %v14195_v29 = vld [vmem:[#allocation7 + $0x9d0] sm:$0xf] }
 0x476   :  { %9829 = vmatpush.bf16.msra.mxu1 %v14952_v43  ;;  %v14196_v62 = vor.u32 %v17250_v56, %v14195_v29 }
 0x477   :  { %9867 = vmatpush.bf16.msrb.mxu2 %v15952_v30  ;;  %v9561_v30 = vadd.f32 %v18484_v21, %v9548_v0  ;;  %9790 = vmatpush.bf16.msrb.mxu3 %v13992_v52  ;;  %v13196_v21 = vor.u32 %v17000_v38, %v13195_v12  ;;  %v15429_v0 = vld [vmem:[#allocation7 + $0x13a0] sm:$0xf0]  ;;  %v15392_v38 = vor.u32 %v17544_v45, %v15389_v33  ;;  %v16940_v45 = vld [vmem:[#allocation7 + $0x44] sm:$0xf0] }
 0x478   :  { %v15432_v31 = vor.u32 %v17554_v60, %v15429_v0 }
 0x479   :  { %9855 = vmatpush.bf16.msrb.mxu0 %v15592_v53  ;;  %v18503_v43 = vadd.f32 %v18492_v16, %v9561_v30  ;;  %v13835_v53 = vld [vmem:[#allocation7 + $0x700] sm:$0xf]  ;;  %v13155_v16 = vld [vmem:[#allocation7 + $0x1b0] sm:$0xf] }
 0x47a   :  { %9830 = vmatpush.bf16.msra.mxu1 %v14912_v13  ;;  %v16990_v13 = vld [vmem:[#allocation7 + $0x1d4] sm:$0xf0]  ;;  %v13075_v30 = vld [vmem:[#allocation7 + $0x110] sm:$0xf] }
 0x47b   :  { %9868 = vmatpush.bf16.msrb.mxu2 %v15912_v10  ;;  %v17160_v10 = vld [vmem:[#allocation7 + $0x724] sm:$0xf0]  ;;  %9791 = vmatpush.bf16.msrb.mxu3 %v13952_v3  ;;  %v17130_v3 = vld [vmem:[#allocation7 + $0x634] sm:$0xf0] }
 0x47c   :  { %v13836_v18 = vor.u32 %v17160_v10, %v13835_v53  ;;  %v16960_v53 = vld [vmem:[#allocation7 + $0xe4] sm:$0xf0] }
 0x47d   :  { %9856 = vmatpush.bf16.msrb.mxu0 %v15552_v28  ;;  %v13156_v28 = vor.u32 %v16990_v13, %v13155_v16  ;;  %v13675_v16 = vld [vmem:[#allocation7 + $0x5c0] sm:$0xf]  ;;  %v17120_v13 = vld [vmem:[#allocation7 + $0x5e4] sm:$0xf0] }
 0x47e   :  { %9831 = vmatpush.bf16.msra.mxu1 %v14872_v35  ;;  %v18508_v52 = vpop.f32.mrf.mxu1  ;;  %v13755_v35 = vld [vmem:[#allocation7 + $0x660] sm:$0xf]  ;;  %v13676_v1 = vor.u32 %v17120_v13, %v13675_v16  ;;  %v17320_v13 = vld [vmem:[#allocation7 + $0xc24] sm:$0xf0] }
 0x47f   :  { %9869 = vmatpush.bf16.msrb.mxu2 %v15872_v55  ;;  %v13115_v55 = vld [vmem:[#allocation7 + $0x160] sm:$0xf]  ;;  %9792 = vmatpush.bf16.msrb.mxu3 %v13912_v5  ;;  %v13756_v56 = vor.u32 %v17140_v27, %v13755_v35  ;;  %v17190_v35 = vld [vmem:[#allocation7 + $0x814] sm:$0xf0]  ;;  %v17514_v27 = vld [vmem:[#allocation7 + $0x123c] sm:$0xf] }
 0x480   :  { %v13116_v25 = vor.u32 %v16980_v58, %v13115_v55  ;;  %v13995_v5 = vld [vmem:[#allocation7 + $0x840] sm:$0xf]  ;;  %v13635_v55 = vld [vmem:[#allocation7 + $0x570] sm:$0xf]  ;;  %v17110_v58 = vld [vmem:[#allocation7 + $0x594] sm:$0xf0] }
 0x481   :  { %9857 = vmatpush.bf16.msrb.mxu0 %v15512_v44  ;;  %9832 = vmatmul.bf16.vlgmr.msra.gmra.mxu1 %v18253_v51  ;;  %v18511_v29 = vpop.f32.mrf.mxu0  ;;  %v16970_v44 = vld [vmem:[#allocation7 + $0x134] sm:$0xf0]  ;;  %v13636_v33 = vor.u32 %v17110_v58, %v13635_v55  ;;  %v14475_v16 = vld [vmem:[#allocation7 + $0xc00] sm:$0xf]  ;;  %v13555_v55 = vld [vmem:[#allocation7 + $0x4d0] sm:$0xf] }
 0x482   :  { %9876 = vmatpush.bf16.msrb.mxu1 %v13236_v26  ;;  %v17220_v26 = vld [vmem:[#allocation7 + $0x904] sm:$0xf0]  ;;  %9793 = vmatmul.bf16.vlgmr.msrb.gmra.mxu3 %v18231_v9  ;;  %v13076_v42 = vor.u32 %v16970_v44, %v13075_v30  ;;  %v14515_v30 = vld [vmem:[#allocation7 + $0xc50] sm:$0xf]  ;;  %v17330_v44 = vld [vmem:[#allocation7 + $0xc74] sm:$0xf0] }
 0x483   :  { %9870 = vmatpush.bf16.msrb.mxu2 %v15832_v39  ;;  %9837 = vmatpush.bf16.msra.mxu3 %v15472_v37  ;;  %v14076_v12 = vor.u32 %v17220_v26, %v14075_v15  ;;  %v13715_v39 = vld [vmem:[#allocation7 + $0x610] sm:$0xf]  ;;  %v17524_v37 = vld [vmem:[#allocation7 + $0x128c] sm:$0xf]  ;;  %v15269_v15 = vld [vmem:[#allocation7 + $0x1260] sm:$0xf0] }
 0x484   :  { %9858 = vmatmul.bf16.vlgmr.msrb.gmra.mxu0 %v18282_v36  ;;  %v13716_v20 = vor.u32 %v17130_v3, %v13715_v39  ;;  %v15312_v0 = vor.u32 %v17524_v37, %v15309_v59  ;;  %v12955_v26 = vld [vmem:[#allocation7 + $0x20] sm:$0xf]  ;;  %v15272_v39 = vor.u32 %v17514_v27, %v15269_v15  ;;  %v17494_v59 = vld [vmem:[#allocation7 + $0x119c] sm:$0xf]  ;;  %v17090_v58 = vld [vmem:[#allocation7 + $0x4f4] sm:$0xf0] }
 0x485   :  { %9902 = vmatpush.bf16.msra.mxu0 %v13876_v40  ;;  %v14035_v40 = vld [vmem:[#allocation7 + $0x890] sm:$0xf]  ;;  %v13595_v3 = vld [vmem:[#allocation7 + $0x520] sm:$0xf]  ;;  %v13556_v15 = vor.u32 %v17090_v58, %v13555_v55 }
 0x486   :  { %9877 = vmatpush.bf16.msrb.mxu1 %v13196_v21  ;;  %9871 = vmatmul.bf16.vlgmr.msrb.gmra.mxu2 %v18292_v24  ;;  %v13035_v21 = vld [vmem:[#allocation7 + $0xc0] sm:$0xf]  ;;  %v9627_v10 = vpop.f32.mrf.mxu1  ;;  %v14036_v54 = vor.u32 %v17210_v46, %v14035_v40  ;;  %v17100_v40 = vld [vmem:[#allocation7 + $0x544] sm:$0xf0]  ;;  %v12956_v46 = vor.u32 %v16940_v45, %v12955_v26  ;;  %v17470_v26 = vld [vmem:[#allocation7 + $0x10d4] sm:$0xf0] }
 0x487   :  { %9915 = vmatpush.bf16.msra.mxu2 %v14196_v62  ;;  %9838 = vmatpush.bf16.msra.mxu3 %v15432_v31  ;;  %v15349_v62 = vld [vmem:[#allocation7 + $0x1300] sm:$0xf0]  ;;  %v9586_v31 = vpop.f32.mrf.mxu3  ;;  %v15155_v10 = vld [vmem:[#allocation7 + $0x1150] sm:$0xf] }
 0x488   :  { %v15352_v7 = vor.u32 %v17534_v2, %v15349_v62  ;;  %v17180_v2 = vld [vmem:[#allocation7 + $0x7c4] sm:$0xf0]  ;;  %v15229_v62 = vld [vmem:[#allocation7 + $0x1210] sm:$0xf0]  ;;  %v15395_v45 = vld [vmem:[#allocation7 + $0x1330] sm:$0xf] }
 0x489   :  { %9903 = vmatpush.bf16.msra.mxu0 %v13836_v18  ;;  %v18513_v49 = vpop.f32.mrf.mxu2  ;;  %v13036_v18 = vor.u32 %v16960_v53, %v13035_v21  ;;  %v9653_v22 = vpop.f32.mrf.mxu0  ;;  %v14516_v53 = vor.u32 %v17330_v44, %v14515_v30  ;;  %v17550_v30 = vld [vmem:[#allocation7 + $0x1354] sm:$0xf0]  ;;  %v13515_v44 = vld [vmem:[#allocation7 + $0x480] sm:$0xf] }
 0x48a   :  { %9878 = vmatpush.bf16.msrb.mxu1 %v13156_v28  ;;  %v16950_v28 = vld [vmem:[#allocation7 + $0x94] sm:$0xf0]  ;;  %v15189_v22 = vld [vmem:[#allocation7 + $0x11c0] sm:$0xf0] }
 0x48b   :  { %9916 = vmatpush.bf16.msra.mxu2 %v14156_v41  ;;  %9839 = vmatpush.bf16.msra.mxu3 %v15392_v38  ;;  %v17200_v41 = vld [vmem:[#allocation7 + $0x864] sm:$0xf0] }
 0x48c   :  { %v13996_v60 = vor.u32 %v17200_v41, %v13995_v5 }
 0x48d   :  { %9904 = vmatpush.bf16.msra.mxu0 %v13796_v50  ;;  %v13955_v50 = vld [vmem:[#allocation7 + $0x7f0] sm:$0xf] }
 0x48e   :  { %9879 = vmatpush.bf16.msrb.mxu1 %v13116_v25  ;;  %v9587_v25 = vadd.f32 %v9586_v31, %v18503_v43  ;;  %v17504_v43 = vld [vmem:[#allocation7 + $0x11ec] sm:$0xf]  ;;  %v15192_v31 = vor.u32 %v17494_v59, %v15189_v22  ;;  %v17530_v22 = vld [vmem:[#allocation7 + $0x12b4] sm:$0xf0] }
 0x48f   :  { %9917 = vmatpush.bf16.msra.mxu2 %v14116_v14  ;;  %9840 = vmatpush.bf16.msra.mxu3 %v15352_v7  ;;  %v12996_v14 = vor.u32 %v16950_v28, %v12995_v63  ;;  %v17570_v7 = vld [vmem:[#allocation7 + $0x13f4] sm:$0xf0]  ;;  %v9588_v37 = vpop.f32.mrf.mxu3  ;;  %v14476_v63 = vor.u32 %v17320_v13, %v14475_v16  ;;  %v15115_v28 = vld [vmem:[#allocation7 + $0x1100] sm:$0xf] }
 0x490   :  { %v15315_v37 = vld [vmem:[#allocation7 + $0x1290] sm:$0xf] }
 0x491   :  { %9905 = vmatpush.bf16.msra.mxu0 %v13756_v56  ;;  %v9600_v56 = vadd.f32 %v18495_v8, %v9587_v25  ;;  %v9666_v38 = vpop.f32.mrf.mxu2  ;;  %v13596_v8 = vor.u32 %v17100_v40, %v13595_v3  ;;  %v15075_v25 = vld [vmem:[#allocation7 + $0x10b0] sm:$0xf]  ;;  %v15396_v40 = vor.u32 %v17550_v30, %v15395_v45 }
 0x492   :  { %9880 = vmatpush.bf16.msrb.mxu1 %v13076_v42  ;;  %v13915_v42 = vld [vmem:[#allocation7 + $0x7a0] sm:$0xf]  ;;  %v17300_v38 = vld [vmem:[#allocation7 + $0xb84] sm:$0xf0]  ;;  %v15076_v3 = vor.u32 %v17470_v26, %v15075_v25  ;;  %v13395_v45 = vld [vmem:[#allocation7 + $0x390] sm:$0xf] }
 0x493   :  { %9918 = vmatpush.bf16.msra.mxu2 %v14076_v12  ;;  %9841 = vmatpush.bf16.msra.mxu3 %v15312_v0  ;;  %v13956_v12 = vor.u32 %v17190_v35, %v13955_v50  ;;  %v18518_v21 = vadd.f32 %v18497_v34, %v9600_v56  ;;  %v13916_v5 = vor.u32 %v17180_v2, %v13915_v42  ;;  %v17560_v0 = vld [vmem:[#allocation7 + $0x13a4] sm:$0xf0]  ;;  %v14435_v50 = vld [vmem:[#allocation7 + $0xbb0] sm:$0xf] }
 0x494   :  { %v17080_v56 = vld [vmem:[#allocation7 + $0x4a4] sm:$0xf0] }
 0x495   :  { %9906 = vmatpush.bf16.msra.mxu0 %v13716_v20  ;;  %v17490_v20 = vld [vmem:[#allocation7 + $0x1174] sm:$0xf0]  ;;  %v13516_v42 = vor.u32 %v17080_v56, %v13515_v44  ;;  %v17460_v2 = vld [vmem:[#allocation7 + $0x1084] sm:$0xf0]  ;;  %v14275_v44 = vld [vmem:[#allocation7 + $0xa70] sm:$0xf] }
 0x496   :  { %9881 = vmatpush.bf16.msrb.mxu1 %v13036_v18  ;;  %v15232_v18 = vor.u32 %v17504_v43, %v15229_v62  ;;  %v15156_v41 = vor.u32 %v17490_v20, %v15155_v10  ;;  %v15355_v43 = vld [vmem:[#allocation7 + $0x12e0] sm:$0xf]  ;;  %v13475_v10 = vld [vmem:[#allocation7 + $0x430] sm:$0xf]  ;;  %v17070_v20 = vld [vmem:[#allocation7 + $0x454] sm:$0xf0] }
 0x497   :  { %9919 = vmatpush.bf16.msra.mxu2 %v14036_v54  ;;  %v15475_v54 = vld [vmem:[#allocation7 + $0x13d0] sm:$0xf]  ;;  %9842 = vmatpush.bf16.msra.mxu3 %v15272_v39  ;;  %v17520_v26 = vld [vmem:[#allocation7 + $0x1264] sm:$0xf0]  ;;  %v17270_v56 = vld [vmem:[#allocation7 + $0xa94] sm:$0xf0] }
 0x498   :  { %v15476_v34 = vor.u32 %v17570_v7, %v15475_v54  ;;  %v17290_v7 = vld [vmem:[#allocation7 + $0xb34] sm:$0xf0] }
 0x499   :  { %9907 = vmatpush.bf16.msra.mxu0 %v13676_v1  ;;  %v17480_v1 = vld [vmem:[#allocation7 + $0x1124] sm:$0xf0] }
 0x49a   :  { %9882 = vmatpush.bf16.msrb.mxu1 %v12996_v14  ;;  %v17310_v14 = vld [vmem:[#allocation7 + $0xbd4] sm:$0xf0]  ;;  %v15116_v35 = vor.u32 %v17480_v1, %v15115_v28  ;;  %v14315_v28 = vld [vmem:[#allocation7 + $0xac0] sm:$0xf]  ;;  %v17280_v1 = vld [vmem:[#allocation7 + $0xae4] sm:$0xf0] }
 0x49b   :  { %9920 = vmatpush.bf16.msra.mxu2 %v13996_v60  ;;  %v15435_v60 = vld [vmem:[#allocation7 + $0x1380] sm:$0xf]  ;;  %9843 = vmatpush.bf16.msra.mxu3 %v15232_v18  ;;  %v14995_v18 = vld [vmem:[#allocation7 + $0x1010] sm:$0xf]  ;;  %v14316_v25 = vor.u32 %v17280_v1, %v14315_v28  ;;  %v17500_v1 = vld [vmem:[#allocation7 + $0x11c4] sm:$0xf0] }
 0x49c   :  { %v15436_v27 = vor.u32 %v17560_v0, %v15435_v60  ;;  %v18528_v60 = vld [vmem:[#allocation8] sm:$0xff] }
 0x49d   :  { %9908 = vmatpush.bf16.msra.mxu0 %v13636_v33  ;;  %v14436_v33 = vor.u32 %v17310_v14, %v14435_v50  ;;  %v4822_v0 = vperm.slane %v18528_v60, 6  ;;  %v15316_v50 = vor.u32 %v17530_v22, %v15315_v37  ;;  %v14875_v22 = vld [vmem:[#allocation7 + $0xf20] sm:$0xf] }
 0x49e   :  { %9883 = vmatpush.bf16.msrb.mxu1 %v12956_v46  ;;  %v18523_v39 = vpop.f32.mrf.mxu1  ;;  %v15035_v46 = vld [vmem:[#allocation7 + $0x1060] sm:$0xf] }
 0x49f   :  { %9921 = vmatpush.bf16.msra.mxu2 %v13956_v12  ;;  %v14395_v12 = vld [vmem:[#allocation7 + $0xb60] sm:$0xf]  ;;  %9844 = vmatpush.bf16.msra.mxu3 %v15192_v31  ;;  %v15036_v16 = vor.u32 %v17460_v2, %v15035_v46  ;;  %v17430_v46 = vld [vmem:[#allocation7 + $0xf94] sm:$0xf0]  ;;  %v15235_v2 = vld [vmem:[#allocation7 + $0x11f0] sm:$0xf] }
 0x4a0   :  { %v14396_v62 = vor.u32 %v17300_v38, %v14395_v12  ;;  %v9626_v38 = vadd.f32 %v18508_v52, %v4822_v0  ;;  %v17650_v52 = vld [vmem:[#allocation7 + $0x1674] sm:$0xf0]  ;;  %v13315_v0 = vld [vmem:[#allocation7 + $0x2f0] sm:$0xf] }
 0x4a1   :  { %9909 = vmatpush.bf16.msra.mxu0 %v13596_v8  ;;  %9884 = vmatmul.bf16.vlgmr.msrb.gmra.mxu1 %v18221_v47  ;;  %v18526_v54 = vpop.f32.mrf.mxu0  ;;  %v14355_v8 = vld [vmem:[#allocation7 + $0xb10] sm:$0xf] }
 0x4a2   :  { %9928 = vmatpush.bf16.msra.mxu1 %v14516_v53  ;;  %v17540_v53 = vld [vmem:[#allocation7 + $0x1304] sm:$0xf0]  ;;  %9845 = vmatmul.bf16.vlgmr.msra.gmra.mxu3 %v18250_v11  ;;  %v14356_v59 = vor.u32 %v17290_v7, %v14355_v8  ;;  %v14235_v7 = vld [vmem:[#allocation7 + $0xa20] sm:$0xf] }
 0x4a3   :  { %9922 = vmatpush.bf16.msra.mxu2 %v13916_v5  ;;  %9889 = vmatpush.bf16.msrb.mxu3 %v13556_v15  ;;  %v15356_v13 = vor.u32 %v17540_v53, %v15355_v43  ;;  %v13476_v5 = vor.u32 %v17070_v20, %v13475_v10  ;;  %v15275_v15 = vld [vmem:[#allocation7 + $0x1240] sm:$0xf]  ;;  %v14276_v43 = vor.u32 %v17270_v56, %v14275_v44  ;;  %v17510_v53 = vld [vmem:[#allocation7 + $0x1214] sm:$0xf0]  ;;  %v17040_v20 = vld [vmem:[#allocation7 + $0x364] sm:$0xf0] }
 0x4a4   :  { %9910 = vmatmul.bf16.vlgmr.msra.gmra.mxu0 %v18227_v4  ;;  %v13355_v10 = vld [vmem:[#allocation7 + $0x340] sm:$0xf] }
 0x4a5   :  { %9954 = vmatpush.bf16.msrb.mxu0 %v15156_v41  ;;  %v17450_v41 = vld [vmem:[#allocation7 + $0x1034] sm:$0xf0] }
 0x4a6   :  { %9929 = vmatpush.bf16.msra.mxu1 %v14476_v63  ;;  %9923 = vmatmul.bf16.vlgmr.msra.gmra.mxu2 %v18231_v9  ;;  %v17060_v63 = vld [vmem:[#allocation7 + $0x404] sm:$0xf0]  ;;  %v9679_v55 = vpop.f32.mrf.mxu1  ;;  %v14996_v58 = vor.u32 %v17450_v41, %v14995_v18  ;;  %v15236_v41 = vor.u32 %v17510_v53, %v15235_v2  ;;  %v13517_v2 = vld [vmem:[#allocation7 + $0x4a8] sm:$0xf0]  ;;  %v17630_v53 = vld [vmem:[#allocation7 + $0x15d4] sm:$0xf0] }
 0x4a7   :  { %9967 = vmatpush.bf16.msrb.mxu2 %v15476_v34  ;;  %9890 = vmatpush.bf16.msrb.mxu3 %v13516_v42  ;;  %v13435_v34 = vld [vmem:[#allocation7 + $0x3e0] sm:$0xf]  ;;  %v14915_v42 = vld [vmem:[#allocation7 + $0xf70] sm:$0xf]  ;;  %v17030_v55 = vld [vmem:[#allocation7 + $0x314] sm:$0xf0] }
 0x4a8   :  { %v13436_v31 = vor.u32 %v17060_v63, %v13435_v34  ;;  %v17420_v34 = vld [vmem:[#allocation7 + $0xf44] sm:$0xf0]  ;;  %v15195_v63 = vld [vmem:[#allocation7 + $0x11a0] sm:$0xf] }
 0x4a9   :  { %9955 = vmatpush.bf16.msrb.mxu0 %v15116_v35  ;;  %v18531_v14 = vpop.f32.mrf.mxu2  ;;  %v14955_v35 = vld [vmem:[#allocation7 + $0xfc0] sm:$0xf]  ;;  %v9705_v30 = vpop.f32.mrf.mxu0 }
 0x4aa   :  { %9930 = vmatpush.bf16.msra.mxu1 %v14436_v33  ;;  %v17050_v33 = vld [vmem:[#allocation7 + $0x3b4] sm:$0xf0]  ;;  %v13316_v30 = vor.u32 %v17030_v55, %v13315_v0  ;;  %v16975_v0 = vld [vmem:[#allocation7 + $0x164] sm:$0xf]  ;;  %v13117_v55 = vld [vmem:[#allocation7 + $0x188] sm:$0xf0] }
 0x4ab   :  { %9968 = vmatpush.bf16.msrb.mxu2 %v15436_v27  ;;  %9891 = vmatpush.bf16.msrb.mxu3 %v13476_v5  ;;  %v17440_v27 = vld [vmem:[#allocation7 + $0xfe4] sm:$0xf0]  ;;  %v15795_v5 = vld [vmem:[#allocation7 + $0x1650] sm:$0xf] }
 0x4ac   :  { %v14956_v12 = vor.u32 %v17440_v27, %v14955_v35  ;;  %v17085_v35 = vld [vmem:[#allocation7 + $0x4d4] sm:$0xf] }
 0x4ad   :  { %9956 = vmatpush.bf16.msrb.mxu0 %v15076_v3  ;;  %v15276_v3 = vor.u32 %v17520_v26, %v15275_v15  ;;  %v14876_v15 = vor.u32 %v17420_v34, %v14875_v22  ;;  %v17640_v26 = vld [vmem:[#allocation7 + $0x1624] sm:$0xf0] }
 0x4ae   :  { %9931 = vmatpush.bf16.msra.mxu1 %v14396_v62  ;;  %v9638_v62 = vpop.f32.mrf.mxu3  ;;  %v17620_v22 = vld [vmem:[#allocation7 + $0x1584] sm:$0xf0] }
 0x4af   :  { %9969 = vmatpush.bf16.msrb.mxu2 %v15396_v40  ;;  %9892 = vmatpush.bf16.msrb.mxu3 %v13436_v31  ;;  %v13396_v40 = vor.u32 %v17050_v33, %v13395_v45  ;;  %v9639_v8 = vadd.f32 %v9638_v62, %v9626_v38  ;;  %v13237_v31 = vld [vmem:[#allocation7 + $0x278] sm:$0xf0]  ;;  %v15196_v45 = vor.u32 %v17500_v1, %v15195_v63  ;;  %v17020_v38 = vld [vmem:[#allocation7 + $0x2c4] sm:$0xf0]  ;;  %v17410_v62 = vld [vmem:[#allocation7 + $0xef4] sm:$0xf0] }
 0x4b1   :  { %9957 = vmatpush.bf16.msrb.mxu0 %v15036_v16  ;;  %v17260_v16 = vld [vmem:[#allocation7 + $0xa44] sm:$0xf0]  ;;  %v9652_v18 = vadd.f32 %v18511_v29, %v9639_v8  ;;  %v9718_v37 = vpop.f32.mrf.mxu2  ;;  %v13557_v29 = vld [vmem:[#allocation7 + $0x4f8] sm:$0xf0] }
 0x4b2   :  { %9932 = vmatpush.bf16.msra.mxu1 %v14356_v59  ;;  %v13356_v59 = vor.u32 %v17040_v20, %v13355_v10  ;;  %v14236_v28 = vor.u32 %v17260_v16, %v14235_v7  ;;  %v16985_v16 = vld [vmem:[#allocation7 + $0x1b4] sm:$0xf]  ;;  %v17400_v37 = vld [vmem:[#allocation7 + $0xea4] sm:$0xf0] }
 0x4b3   :  { %9970 = vmatpush.bf16.msrb.mxu2 %v15356_v13  ;;  %v14916_v13 = vor.u32 %v17430_v46, %v14915_v42  ;;  %9893 = vmatpush.bf16.msrb.mxu3 %v13396_v40  ;;  %v9665_v27 = vadd.f32 %v18513_v49, %v9652_v18  ;;  %v16995_v40 = vld [vmem:[#allocation7 + $0x204] sm:$0xf]  ;;  %v13197_v42 = vld [vmem:[#allocation7 + $0x228] sm:$0xf0]  ;;  %v13477_v18 = vld [vmem:[#allocation7 + $0x458] sm:$0xf0] }
 0x4b4   :  { %v17075_v46 = vld [vmem:[#allocation7 + $0x484] sm:$0xf]  ;;  %v13200_v20 = vor.u32 %v16995_v40, %v13197_v42  ;;  %v14715_v40 = vld [vmem:[#allocation7 + $0xde0] sm:$0xf]  ;;  %v17380_v42 = vld [vmem:[#allocation7 + $0xe04] sm:$0xf0] }
 0x4b5   :  { %9958 = vmatpush.bf16.msrb.mxu0 %v14996_v58  ;;  %v15796_v58 = vor.u32 %v17650_v52, %v15795_v5  ;;  %v18537_v33 = vadd.f32 %v18523_v39, %v9665_v27  ;;  %v15715_v39 = vld [vmem:[#allocation7 + $0x15b0] sm:$0xf]  ;;  %v13520_v8 = vor.u32 %v17075_v46, %v13517_v2  ;;  %v17065_v5 = vld [vmem:[#allocation7 + $0x434] sm:$0xf]  ;;  %v17390_v27 = vld [vmem:[#allocation7 + $0xe54] sm:$0xf0] }
 0x4b6   :  { %9933 = vmatpush.bf16.msra.mxu1 %v14316_v25  ;;  %v15755_v25 = vld [vmem:[#allocation7 + $0x1600] sm:$0xf]  ;;  %v9640_v56 = vpop.f32.mrf.mxu3  ;;  %v15716_v52 = vor.u32 %v17630_v53, %v15715_v39  ;;  %v17600_v2 = vld [vmem:[#allocation7 + $0x14e4] sm:$0xf0] }
 0x4b7   :  { %9971 = vmatpush.bf16.msrb.mxu2 %v15316_v50  ;;  %v17005_v50 = vld [vmem:[#allocation7 + $0x254] sm:$0xf]  ;;  %9894 = vmatpush.bf16.msrb.mxu3 %v13356_v59  ;;  %v15756_v49 = vor.u32 %v17640_v26, %v15755_v25  ;;  %v15675_v59 = vld [vmem:[#allocation7 + $0x1560] sm:$0xf]  ;;  %v17610_v25 = vld [vmem:[#allocation7 + $0x1534] sm:$0xf0] }
 0x4b8   :  { %v13240_v44 = vor.u32 %v17005_v50, %v13237_v31  ;;  %v15676_v50 = vor.u32 %v17620_v22, %v15675_v59  ;;  %v13437_v31 = vld [vmem:[#allocation7 + $0x408] sm:$0xf0]  ;;  %v4823_v26 = vperm.slane %v18528_v60, 7  ;;  %v16965_v56 = vld [vmem:[#allocation7 + $0x114] sm:$0xf] }
 0x4b9   :  { %9959 = vmatpush.bf16.msrb.mxu0 %v14956_v12  ;;  %v13275_v12 = vld [vmem:[#allocation7 + $0x2a0] sm:$0xf]  ;;  %v17590_v59 = vld [vmem:[#allocation7 + $0x1494] sm:$0xf0] }
 0x4ba   :  { %9934 = vmatpush.bf16.msra.mxu1 %v14276_v43  ;;  %v14835_v43 = vld [vmem:[#allocation7 + $0xed0] sm:$0xf]  ;;  %v13276_v10 = vor.u32 %v17020_v38, %v13275_v12  ;;  %v13077_v12 = vld [vmem:[#allocation7 + $0x138] sm:$0xf0]  ;;  %v17045_v38 = vld [vmem:[#allocation7 + $0x394] sm:$0xf] }
 0x4bb   :  { %9972 = vmatpush.bf16.msrb.mxu2 %v15276_v3  ;;  %v13560_v3 = vor.u32 %v17085_v35, %v13557_v29  ;;  %9895 = vmatpush.bf16.msrb.mxu3 %v13316_v30  ;;  %v14836_v7 = vor.u32 %v17410_v62, %v14835_v43  ;;  %v14755_v35 = vld [vmem:[#allocation7 + $0xe30] sm:$0xf]  ;;  %v15595_v46 = vld [vmem:[#allocation7 + $0x14c0] sm:$0xf]  ;;  %v13080_v39 = vor.u32 %v16965_v56, %v13077_v12 }
 0x4bc   :  { %v15635_v29 = vld [vmem:[#allocation7 + $0x1510] sm:$0xf] }
 0x4bd   :  { %9960 = vmatpush.bf16.msrb.mxu0 %v14916_v13  ;;  %v13157_v13 = vld [vmem:[#allocation7 + $0x1d8] sm:$0xf0] }
 0x4be   :  { %9935 = vmatpush.bf16.msra.mxu1 %v14236_v28  ;;  %v18542_v34 = vpop.f32.mrf.mxu1  ;;  %v13160_v63 = vor.u32 %v16985_v16, %v13157_v13  ;;  %v13480_v28 = vor.u32 %v17065_v5, %v13477_v18  ;;  %v15596_v13 = vor.u32 %v17600_v2, %v15595_v46  ;;  %v13357_v5 = vld [vmem:[#allocation7 + $0x368] sm:$0xf0]  ;;  %v17370_v18 = vld [vmem:[#allocation7 + $0xdb4] sm:$0xf0] }
 0x4bf   :  { %9973 = vmatpush.bf16.msrb.mxu2 %v15236_v41  ;;  %v14795_v41 = vld [vmem:[#allocation7 + $0xe80] sm:$0xf]  ;;  %9896 = vmatpush.bf16.msrb.mxu3 %v13276_v10  ;;  %v14716_v10 = vor.u32 %v17380_v42, %v14715_v40  ;;  %v17015_v40 = vld [vmem:[#allocation7 + $0x2a4] sm:$0xf]  ;;  %v13277_v46 = vld [vmem:[#allocation7 + $0x2c8] sm:$0xf0] }
 0x4c0   :  { %v14796_v1 = vor.u32 %v17400_v37, %v14795_v41  ;;  %v15555_v37 = vld [vmem:[#allocation7 + $0x1470] sm:$0xf]  ;;  %v17350_v2 = vld [vmem:[#allocation7 + $0xd14] sm:$0xf0] }
 0x4c1   :  { %9961 = vmatpush.bf16.msrb.mxu0 %v14876_v15  ;;  %9936 = vmatmul.bf16.vlgmr.msra.gmra.mxu1 %v18246_v6  ;;  %v9755_v15 = vpop.f32.mrf.mxu0 }
 0x4c2   :  { %9980 = vmatpush.bf16.msrb.mxu1 %v15796_v58  ;;  %v17055_v58 = vld [vmem:[#allocation7 + $0x3e4] sm:$0xf]  ;;  %9897 = vmatmul.bf16.vlgmr.msrb.gmra.mxu3 %v18225_v57  ;;  %v9756_v43 = vadd.f32 %v9755_v15, %v4823_v26 }
 0x4c3   :  { %9974 = vmatpush.bf16.msrb.mxu2 %v15196_v45  ;;  %9941 = vmatpush.bf16.msra.mxu3 %v14836_v7  ;;  %v13120_v45 = vor.u32 %v16975_v0, %v13117_v55  ;;  %v13440_v30 = vor.u32 %v17055_v58, %v13437_v31  ;;  %v17035_v7 = vld [vmem:[#allocation7 + $0x344] sm:$0xf]  ;;  %v12997_v0 = vld [vmem:[#allocation7 + $0x98] sm:$0xf0]  ;;  %v17025_v55 = vld [vmem:[#allocation7 + $0x2f4] sm:$0xf]  ;;  %v15556_v58 = vor.u32 %v17590_v59, %v15555_v37 }
 0x4c4   :  { %9962 = vmatmul.bf16.vlgmr.msrb.gmra.mxu0 %v18253_v51  ;;  %v13317_v31 = vld [vmem:[#allocation7 + $0x318] sm:$0xf0]  ;;  %v17340_v37 = vld [vmem:[#allocation7 + $0xcc4] sm:$0xf0] }
 0x4c5   :  { %10006 = vmatpush.bf16.msra.mxu0 %v13240_v44  ;;  %v14756_v44 = vor.u32 %v17390_v27, %v14755_v35  ;;  %v14635_v35 = vld [vmem:[#allocation7 + $0xd40] sm:$0xf]  ;;  %v17360_v27 = vld [vmem:[#allocation7 + $0xd64] sm:$0xf0]  ;;  %v13320_v56 = vor.u32 %v17025_v55, %v13317_v31  ;;  %v17730_v55 = vld [vmem:[#allocation7 + $0x18f4] sm:$0xf0] }
 0x4c6   :  { %9981 = vmatpush.bf16.msrb.mxu1 %v15756_v49  ;;  %9975 = vmatmul.bf16.vlgmr.msrb.gmra.mxu2 %v18250_v11  ;;  %v13397_v49 = vld [vmem:[#allocation7 + $0x3b8] sm:$0xf0]  ;;  %v9731_v62 = vpop.f32.mrf.mxu1 }
 0x4c7   :  { %10019 = vmatpush.bf16.msra.mxu2 %v13560_v3  ;;  %9942 = vmatpush.bf16.msra.mxu3 %v14796_v1  ;;  %v15636_v3 = vor.u32 %v17610_v25, %v15635_v29  ;;  %v13400_v60 = vor.u32 %v17045_v38, %v13397_v49  ;;  %v16945_v1 = vld [vmem:[#allocation7 + $0x74] sm:$0xf]  ;;  %v15515_v29 = vld [vmem:[#allocation7 + $0x1420] sm:$0xf]  ;;  %v17580_v25 = vld [vmem:[#allocation7 + $0x1444] sm:$0xf0]  ;;  %v14636_v38 = vor.u32 %v17360_v27, %v14635_v35 }
 0x4c8   :  { %v13000_v26 = vor.u32 %v16945_v1, %v12997_v0  ;;  %v12957_v49 = vld [vmem:[#allocation7 + $0x48] sm:$0xf0]  ;;  %v15516_v42 = vor.u32 %v17580_v25, %v15515_v29  ;;  %v17325_v62 = vld [vmem:[#allocation7 + $0xc54] sm:$0xf]  ;;  %v16115_v0 = vld [vmem:[#allocation7 + $0x18d0] sm:$0xf] }
 0x4c9   :  { %10007 = vmatpush.bf16.msra.mxu0 %v13200_v20  ;;  %v9768_v53 = vpop.f32.mrf.mxu2  ;;  %v16955_v20 = vld [vmem:[#allocation7 + $0xc4] sm:$0xf]  ;;  %v9757_v41 = vpop.f32.mrf.mxu0  ;;  %v14797_v1 = vld [vmem:[#allocation7 + $0xea8] sm:$0xf0]  ;;  %v16116_v27 = vor.u32 %v17730_v55, %v16115_v0  ;;  %v14437_v29 = vld [vmem:[#allocation7 + $0xbd8] sm:$0xf0] }
 0x4ca   :  { %9982 = vmatpush.bf16.msrb.mxu1 %v15716_v52  ;;  %v18546_v16 = vadd.f32 %v9768_v53, %v9756_v43  ;;  %v14675_v52 = vld [vmem:[#allocation7 + $0xd90] sm:$0xf]  ;;  %v14555_v41 = vld [vmem:[#allocation7 + $0xca0] sm:$0xf]  ;;  %v17385_v25 = vld [vmem:[#allocation7 + $0xe34] sm:$0xf] }
 0x4cb   :  { %10020 = vmatpush.bf16.msra.mxu2 %v13520_v8  ;;  %9943 = vmatpush.bf16.msra.mxu3 %v14756_v44  ;;  %v13037_v8 = vld [vmem:[#allocation7 + $0xe8] sm:$0xf0]  ;;  %v17275_v0 = vld [vmem:[#allocation7 + $0xac4] sm:$0xf] }
 0x4cc   :  { %v13040_v22 = vor.u32 %v16955_v20, %v13037_v8  ;;  %v17155_v20 = vld [vmem:[#allocation7 + $0x704] sm:$0xf]  ;;  %v13837_v8 = vld [vmem:[#allocation7 + $0x728] sm:$0xf0] }
 0x4cd   :  { %10008 = vmatpush.bf16.msra.mxu0 %v13160_v63  ;;  %v13360_v63 = vor.u32 %v17035_v7, %v13357_v5  ;;  %v13280_v7 = vor.u32 %v17015_v40, %v13277_v46  ;;  %v14397_v46 = vld [vmem:[#allocation7 + $0xb88] sm:$0xf0] }
 0x4ce   :  { %9983 = vmatpush.bf16.msrb.mxu1 %v15676_v50  ;;  %v9690_v50 = vpop.f32.mrf.mxu3  ;;  %v14317_v55 = vld [vmem:[#allocation7 + $0xae8] sm:$0xf0] }
 0x4cf   :  { %10021 = vmatpush.bf16.msra.mxu2 %v13480_v28  ;;  %9944 = vmatpush.bf16.msra.mxu3 %v14716_v10  ;;  %v14676_v28 = vor.u32 %v17370_v18, %v14675_v52  ;;  %v9691_v15 = vadd.f32 %v9690_v50, %v18537_v33  ;;  %v14595_v33 = vld [vmem:[#allocation7 + $0xcf0] sm:$0xf]  ;;  %v14556_v50 = vor.u32 %v17340_v37, %v14555_v41  ;;  %v17700_v41 = vld [vmem:[#allocation7 + $0x1804] sm:$0xf0]  ;;  %v17115_v37 = vld [vmem:[#allocation7 + $0x5c4] sm:$0xf] }
 0x4d0   :  { %v14596_v5 = vor.u32 %v17350_v2, %v14595_v33  ;;  %v14717_v2 = vld [vmem:[#allocation7 + $0xe08] sm:$0xf0] }
 0x4d1   :  { %10009 = vmatpush.bf16.msra.mxu0 %v13120_v45  ;;  %v17165_v45 = vld [vmem:[#allocation7 + $0x754] sm:$0xf]  ;;  %v9704_v44 = vadd.f32 %v18526_v54, %v9691_v15  ;;  %v9770_v12 = vpop.f32.mrf.mxu2  ;;  %v14837_v54 = vld [vmem:[#allocation7 + $0xef8] sm:$0xf0] }
 0x4d2   :  { %9984 = vmatpush.bf16.msrb.mxu1 %v15636_v3  ;;  %v16935_v3 = vld [vmem:[#allocation7 + $0x24] sm:$0xf]  ;;  %v17305_v15 = vld [vmem:[#allocation7 + $0xbb4] sm:$0xf]  ;;  %v13757_v12 = vld [vmem:[#allocation7 + $0x688] sm:$0xf0] }
 0x4d3   :  { %10022 = vmatpush.bf16.msra.mxu2 %v13440_v30  ;;  %v13877_v30 = vld [vmem:[#allocation7 + $0x778] sm:$0xf0]  ;;  %9945 = vmatpush.bf16.msra.mxu3 %v14676_v28  ;;  %v9717_v53 = vadd.f32 %v18531_v14, %v9704_v44  ;;  %v12960_v10 = vor.u32 %v16935_v3, %v12957_v49  ;;  %v13840_v14 = vor.u32 %v17155_v20, %v13837_v8  ;;  %v17395_v28 = vld [vmem:[#allocation7 + $0xe84] sm:$0xf]  ;;  %v17720_v44 = vld [vmem:[#allocation7 + $0x18a4] sm:$0xf0] }
 0x4d4   :  { %v13880_v43 = vor.u32 %v17165_v45, %v13877_v30  ;;  %v14800_v35 = vor.u32 %v17395_v28, %v14797_v1  ;;  %v14757_v45 = vld [vmem:[#allocation7 + $0xe58] sm:$0xf0]  ;;  %v16075_v30 = vld [vmem:[#allocation7 + $0x1880] sm:$0xf]  ;;  %v14440_v3 = vor.u32 %v17305_v15, %v14437_v29  ;;  %v17285_v20 = vld [vmem:[#allocation7 + $0xb14] sm:$0xf] }
 0x4d5   :  { %10010 = vmatpush.bf16.msra.mxu0 %v13080_v39  ;;  %v14517_v39 = vld [vmem:[#allocation7 + $0xc78] sm:$0xf0]  ;;  %v14760_v40 = vor.u32 %v17385_v25, %v14757_v45  ;;  %v17105_v15 = vld [vmem:[#allocation7 + $0x574] sm:$0xf]  ;;  %v14320_v25 = vor.u32 %v17275_v0, %v14317_v55 }
 0x4d6   :  { %9985 = vmatpush.bf16.msrb.mxu1 %v15596_v13  ;;  %v18552_v13 = vadd.f32 %v18542_v34, %v9717_v53  ;;  %v14520_v52 = vor.u32 %v17325_v62, %v14517_v39  ;;  %v9692_v18 = vpop.f32.mrf.mxu3  ;;  %v17145_v34 = vld [vmem:[#allocation7 + $0x6b4] sm:$0xf]  ;;  %v17710_v62 = vld [vmem:[#allocation7 + $0x1854] sm:$0xf0]  ;;  %v13717_v53 = vld [vmem:[#allocation7 + $0x638] sm:$0xf0] }
 0x4d7   :  { %10023 = vmatpush.bf16.msra.mxu2 %v13400_v60  ;;  %v17405_v60 = vld [vmem:[#allocation7 + $0xed4] sm:$0xf]  ;;  %9946 = vmatpush.bf16.msra.mxu3 %v14636_v38  ;;  %v14357_v8 = vld [vmem:[#allocation7 + $0xb38] sm:$0xf0]  ;;  %v15995_v18 = vld [vmem:[#allocation7 + $0x17e0] sm:$0xf] }
 0x4d8   :  { %v14840_v59 = vor.u32 %v17405_v60, %v14837_v54  ;;  %v17125_v60 = vld [vmem:[#allocation7 + $0x614] sm:$0xf]  ;;  %v15996_v1 = vor.u32 %v17700_v41, %v15995_v18  ;;  %v13637_v29 = vld [vmem:[#allocation7 + $0x598] sm:$0xf0] }
 0x4d9   :  { %10011 = vmatpush.bf16.msra.mxu0 %v13040_v22  ;;  %v17315_v22 = vld [vmem:[#allocation7 + $0xc04] sm:$0xf]  ;;  %v15797_v18 = vld [vmem:[#allocation7 + $0x1678] sm:$0xf0]  ;;  %v17725_v41 = vld [vmem:[#allocation7 + $0x18d4] sm:$0xf] }
 0x4da   :  { %9986 = vmatpush.bf16.msrb.mxu1 %v15556_v58  ;;  %v13797_v58 = vld [vmem:[#allocation7 + $0x6d8] sm:$0xf0] }
 0x4db   :  { %10024 = vmatpush.bf16.msra.mxu2 %v13360_v63  ;;  %v14477_v63 = vld [vmem:[#allocation7 + $0xc28] sm:$0xf0]  ;;  %9947 = vmatpush.bf16.msra.mxu3 %v14596_v5  ;;  %v13720_v5 = vor.u32 %v17125_v60, %v13717_v53 }
 0x4dc   :  { %v14480_v31 = vor.u32 %v17315_v22, %v14477_v63  ;;  %v14360_v22 = vor.u32 %v17285_v20, %v14357_v8  ;;  %v14557_v8 = vld [vmem:[#allocation7 + $0xcc8] sm:$0xf0] }
 0x4dd   :  { %10012 = vmatpush.bf16.msra.mxu0 %v13000_v26  ;;  %v13800_v26 = vor.u32 %v17145_v34, %v13797_v58  ;;  %v17355_v34 = vld [vmem:[#allocation7 + $0xd44] sm:$0xf] }
 0x4de   :  { %9987 = vmatpush.bf16.msrb.mxu1 %v15516_v42  ;;  %v9781_v38 = vpop.f32.mrf.mxu1  ;;  %v16076_v42 = vor.u32 %v17720_v44, %v16075_v30  ;;  %v17265_v30 = vld [vmem:[#allocation7 + $0xa74] sm:$0xf]  ;;  %v14277_v44 = vld [vmem:[#allocation7 + $0xa98] sm:$0xf0] }
 0x4df   :  { %10025 = vmatpush.bf16.msra.mxu2 %v13320_v56  ;;  %v17135_v56 = vld [vmem:[#allocation7 + $0x664] sm:$0xf]  ;;  %9948 = vmatpush.bf16.msra.mxu3 %v14556_v50  ;;  %v18558_v49 = vadd.f32 %v9781_v38, %v18546_v16  ;;  %v14637_v50 = vld [vmem:[#allocation7 + $0xd68] sm:$0xf0] }
 0x4e0   :  { %v13760_v33 = vor.u32 %v17135_v56, %v13757_v12  ;;  %v17345_v56 = vld [vmem:[#allocation7 + $0xcf4] sm:$0xf]  ;;  %v13640_v12 = vor.u32 %v17105_v15, %v13637_v29  ;;  %v17715_v15 = vld [vmem:[#allocation7 + $0x1884] sm:$0xf]  ;;  %v16077_v29 = vld [vmem:[#allocation7 + $0x18a8] sm:$0xf0] }
 0x4e1   :  { %10013 = vmatpush.bf16.msra.mxu0 %v12960_v10  ;;  %9988 = vmatmul.bf16.vlgmr.msrb.gmra.mxu1 %v18282_v36  ;;  %v18561_v39 = vpop.f32.mrf.mxu0 }
 0x4e2   :  { %10032 = vmatpush.bf16.msra.mxu1 %v13880_v43  ;;  %v16035_v43 = vld [vmem:[#allocation7 + $0x1830] sm:$0xf]  ;;  %9949 = vmatmul.bf16.vlgmr.msra.gmra.mxu3 %v18248_v19 }
 0x4e3   :  { %10026 = vmatpush.bf16.msra.mxu2 %v13280_v7  ;;  %9993 = vmatpush.bf16.msrb.mxu3 %v16116_v27  ;;  %v16036_v54 = vor.u32 %v17710_v62, %v16035_v43  ;;  %v17365_v7 = vld [vmem:[#allocation7 + $0xd94] sm:$0xf]  ;;  %v15157_v43 = vld [vmem:[#allocation7 + $0x1178] sm:$0xf0] }
 0x4e4   :  { %10014 = vmatmul.bf16.vlgmr.msra.gmra.mxu0 %v18221_v47  ;;  %v17295_v47 = vld [vmem:[#allocation7 + $0xb64] sm:$0xf] }
 0x4e5   :  { %10058 = vmatpush.bf16.msrb.mxu0 %v14520_v52  ;;  %v14400_v10 = vor.u32 %v17295_v47, %v14397_v46  ;;  %v14677_v52 = vld [vmem:[#allocation7 + $0xdb8] sm:$0xf0]  ;;  %v9742_v38 = vpop.f32.mrf.mxu3  ;;  %v17095_v46 = vld [vmem:[#allocation7 + $0x524] sm:$0xf] }
 0x4e6   :  { %10033 = vmatpush.bf16.msra.mxu1 %v13840_v14  ;;  %10027 = vmatmul.bf16.vlgmr.msra.gmra.mxu2 %v18225_v57  ;;  %v17375_v57 = vld [vmem:[#allocation7 + $0xde4] sm:$0xf]  ;;  %v9783_v14 = vpop.f32.mrf.mxu1  ;;  %v14680_v63 = vor.u32 %v17365_v7, %v14677_v52  ;;  %v18566_v47 = vadd.f32 %v9742_v38, %v18552_v13  ;;  %v15875_v7 = vld [vmem:[#allocation7 + $0x16f0] sm:$0xf]  ;;  %v17670_v13 = vld [vmem:[#allocation7 + $0x1714] sm:$0xf0] }
 0x4e7   :  { %10071 = vmatpush.bf16.msrb.mxu2 %v14840_v59  ;;  %9994 = vmatpush.bf16.msrb.mxu3 %v16076_v42  ;;  %v14720_v16 = vor.u32 %v17375_v57, %v14717_v2  ;;  %v13677_v59 = vld [vmem:[#allocation7 + $0x5e8] sm:$0xf0]  ;;  %v17680_v42 = vld [vmem:[#allocation7 + $0x1764] sm:$0xf0]  ;;  %v17485_v2 = vld [vmem:[#allocation7 + $0x1154] sm:$0xf] }
 0x4e8   :  { %v13680_v58 = vor.u32 %v17115_v37, %v13677_v59  ;;  %v13597_v57 = vld [vmem:[#allocation7 + $0x548] sm:$0xf0]  ;;  %v17645_v52 = vld [vmem:[#allocation7 + $0x1654] sm:$0xf]  ;;  %v16117_v59 = vld [vmem:[#allocation7 + $0x18f8] sm:$0xf0] }
 0x4e9   :  { %10059 = vmatpush.bf16.msrb.mxu0 %v14480_v31  ;;  %v18563_v28 = vpop.f32.mrf.mxu2  ;;  %v15955_v31 = vld [vmem:[#allocation7 + $0x1790] sm:$0xf]  ;;  %v9809_v27 = vpop.f32.mrf.mxu0  ;;  %v13600_v20 = vor.u32 %v17095_v46, %v13597_v57  ;;  %v17475_v14 = vld [vmem:[#allocation7 + $0x1104] sm:$0xf]  ;;  %v15800_v0 = vor.u32 %v17645_v52, %v15797_v18  ;;  %v14997_v52 = vld [vmem:[#allocation7 + $0x1038] sm:$0xf0] }
 0x4ea   :  { %10034 = vmatpush.bf16.msra.mxu1 %v13800_v26  ;;  %v14640_v26 = vor.u32 %v17355_v34, %v14637_v50  ;;  %v15835_v34 = vld [vmem:[#allocation7 + $0x16a0] sm:$0xf]  ;;  %v16120_v50 = vor.u32 %v17725_v41, %v16117_v59  ;;  %v15757_v27 = vld [vmem:[#allocation7 + $0x1628] sm:$0xf0]  ;;  %v17235_v57 = vld [vmem:[#allocation7 + $0x984] sm:$0xf] }
 0x4eb   :  { %10072 = vmatpush.bf16.msrb.mxu2 %v14800_v35  ;;  %9995 = vmatpush.bf16.msrb.mxu3 %v16036_v54  ;;  %v17690_v35 = vld [vmem:[#allocation7 + $0x17b4] sm:$0xf0]  ;;  %v17335_v54 = vld [vmem:[#allocation7 + $0xca4] sm:$0xf]  ;;  %v17605_v59 = vld [vmem:[#allocation7 + $0x1514] sm:$0xf] }
 0x4ec   :  { %v15956_v45 = vor.u32 %v17690_v35, %v15955_v31  ;;  %v17635_v35 = vld [vmem:[#allocation7 + $0x1604] sm:$0xf] }
 0x4ed   :  { %10060 = vmatpush.bf16.msrb.mxu0 %v14440_v3  ;;  %v14597_v3 = vld [vmem:[#allocation7 + $0xd18] sm:$0xf0]  ;;  %v9744_v55 = vpop.f32.mrf.mxu3 }
 0x4ee   :  { %10035 = vmatpush.bf16.msra.mxu1 %v13760_v33  ;;  %v14280_v33 = vor.u32 %v17265_v30, %v14277_v44  ;;  %v14600_v62 = vor.u32 %v17345_v56, %v14597_v3  ;;  %v15077_v30 = vld [vmem:[#allocation7 + $0x10d8] sm:$0xf0]  ;;  %v15760_v56 = vor.u32 %v17635_v35, %v15757_v27  ;;  %v17625_v3 = vld [vmem:[#allocation7 + $0x15b4] sm:$0xf]  ;;  %v14077_v55 = vld [vmem:[#allocation7 + $0x908] sm:$0xf0] }
 0x4ef   :  { %10073 = vmatpush.bf16.msrb.mxu2 %v14760_v40  ;;  %9996 = vmatpush.bf16.msrb.mxu3 %v15996_v1  ;;  %v15915_v40 = vld [vmem:[#allocation7 + $0x1740] sm:$0xf]  ;;  %v15876_v1 = vor.u32 %v17670_v13, %v15875_v7  ;;  %v14117_v7 = vld [vmem:[#allocation7 + $0x958] sm:$0xf0] }
 0x4f0   :  { %v15916_v53 = vor.u32 %v17680_v42, %v15915_v40  ;;  %v15717_v40 = vld [vmem:[#allocation7 + $0x15d8] sm:$0xf0]  ;;  %v17705_v42 = vld [vmem:[#allocation7 + $0x1834] sm:$0xf] }
 0x4f1   :  { %10061 = vmatpush.bf16.msrb.mxu0 %v14400_v10  ;;  %v9822_v60 = vpop.f32.mrf.mxu2  ;;  %v17255_v10 = vld [vmem:[#allocation7 + $0xa24] sm:$0xf] }
 0x4f2   :  { %10036 = vmatpush.bf16.msra.mxu1 %v13720_v5  ;;  %v15160_v5 = vor.u32 %v17485_v2, %v15157_v43  ;;  %v17455_v2 = vld [vmem:[#allocation7 + $0x1064] sm:$0xf]  ;;  %v15037_v43 = vld [vmem:[#allocation7 + $0x1088] sm:$0xf0]  ;;  %v15720_v60 = vor.u32 %v17625_v3, %v15717_v40  ;;  %v14917_v3 = vld [vmem:[#allocation7 + $0xf98] sm:$0xf0] }
 0x4f3   :  { %10074 = vmatpush.bf16.msrb.mxu2 %v14720_v16  ;;  %9997 = vmatpush.bf16.msrb.mxu3 %v15956_v45  ;;  %v14237_v16 = vld [vmem:[#allocation7 + $0xa48] sm:$0xf0]  ;;  %v17465_v45 = vld [vmem:[#allocation7 + $0x10b4] sm:$0xf] }
 0x4f4   :  { %v14240_v37 = vor.u32 %v17255_v10, %v14237_v16  ;;  %v15080_v46 = vor.u32 %v17465_v45, %v15077_v30  ;;  %v17615_v16 = vld [vmem:[#allocation7 + $0x1564] sm:$0xf]  ;;  %v15917_v30 = vld [vmem:[#allocation7 + $0x1768] sm:$0xf0] }
 0x4f5   :  { %10062 = vmatpush.bf16.msrb.mxu0 %v14360_v22  ;;  %v15117_v22 = vld [vmem:[#allocation7 + $0x1128] sm:$0xf0] }
 0x4f6   :  { %10037 = vmatpush.bf16.msra.mxu1 %v13680_v58  ;;  %v17660_v58 = vld [vmem:[#allocation7 + $0x16c4] sm:$0xf0]  ;;  %v15120_v31 = vor.u32 %v17475_v14, %v15117_v22  ;;  %v15637_v14 = vld [vmem:[#allocation7 + $0x1538] sm:$0xf0]  ;;  %v17685_v22 = vld [vmem:[#allocation7 + $0x1794] sm:$0xf] }
 0x4f7   :  { %10075 = vmatpush.bf16.msrb.mxu2 %v14680_v63  ;;  %9998 = vmatpush.bf16.msrb.mxu3 %v15916_v53  ;;  %v14560_v63 = vor.u32 %v17335_v54, %v14557_v8  ;;  %v15836_v44 = vor.u32 %v17660_v58, %v15835_v34  ;;  %v15677_v54 = vld [vmem:[#allocation7 + $0x1588] sm:$0xf0]  ;;  %v17225_v8 = vld [vmem:[#allocation7 + $0x934] sm:$0xf]  ;;  %v17435_v34 = vld [vmem:[#allocation7 + $0xfc4] sm:$0xf] }
 0x4f8   :  { %v15680_v18 = vor.u32 %v17615_v16, %v15677_v54  ;;  %v14957_v58 = vld [vmem:[#allocation7 + $0xfe8] sm:$0xf0]  ;;  %v17415_v54 = vld [vmem:[#allocation7 + $0xf24] sm:$0xf] }
 0x4f9   :  { %10063 = vmatpush.bf16.msrb.mxu0 %v14320_v25  ;;  %v17245_v25 = vld [vmem:[#allocation7 + $0x9d4] sm:$0xf]  ;;  %v14960_v45 = vor.u32 %v17435_v34, %v14957_v58  ;;  %v17754_v34 = vld [vmem:[%s18869_s5 + $0xb8] sm:$0xff] }
 0x4fa   :  { %10038 = vmatpush.bf16.msra.mxu1 %v13640_v12  ;;  %v16080_v12 = vor.u32 %v17715_v15, %v16077_v29  ;;  %v17595_v29 = vld [vmem:[#allocation7 + $0x14c4] sm:$0xf] }
 0x4fb   :  { %10076 = vmatpush.bf16.msrb.mxu2 %v14640_v26  ;;  %v14197_v26 = vld [vmem:[#allocation7 + $0x9f8] sm:$0xf0]  ;;  %9999 = vmatpush.bf16.msrb.mxu3 %v15876_v1 }
 0x4fc   :  { %v14200_v38 = vor.u32 %v17245_v25, %v14197_v26  ;;  %v15957_v1 = vld [vmem:[#allocation7 + $0x17b8] sm:$0xf0]  ;;  %v15597_v25 = vld [vmem:[#allocation7 + $0x14e8] sm:$0xf0]  ;;  %v17675_v26 = vld [vmem:[#allocation7 + $0x1744] sm:$0xf] }
 0x4fd   :  { %10064 = vmatpush.bf16.msrb.mxu0 %v14280_v33  ;;  %v14157_v33 = vld [vmem:[#allocation7 + $0x9a8] sm:$0xf0]  ;;  %v15960_v35 = vor.u32 %v17685_v22, %v15957_v1  ;;  %v15600_v40 = vor.u32 %v17595_v29, %v15597_v25  ;;  %v13957_v22 = vld [vmem:[#allocation7 + $0x818] sm:$0xf0] }
 0x4fe   :  { %10039 = vmatpush.bf16.msra.mxu1 %v13600_v20  ;;  %v14160_v10 = vor.u32 %v17235_v57, %v14157_v33  ;;  %v15997_v20 = vld [vmem:[#allocation7 + $0x1808] sm:$0xf0]  ;;  %v15557_v57 = vld [vmem:[#allocation7 + $0x1498] sm:$0xf0]  ;;  %v17665_v33 = vld [vmem:[#allocation7 + $0x16f4] sm:$0xf] }
 0x4ff   :  { %10077 = vmatpush.bf16.msrb.mxu2 %v14600_v62  ;;  %10000 = vmatpush.bf16.msrb.mxu3 %v15836_v44  ;;  %v18571_v62 = vpop.f32.mrf.mxu1  ;;  %v17205_v44 = vld [vmem:[#allocation7 + $0x894] sm:$0xf]  ;;  %v17762_v58 = vld [vmem:[%s18869_s5 + $0xf8] sm:$0xff] }
 0x500   :  { %v17753_v25 = vld [vmem:[%s18869_s5 + $0xb0] sm:$0xff] }
 0x501   :  { %10065 = vmatpush.bf16.msrb.mxu0 %v14240_v37  ;;  %10040 = vmatmul.bf16.vlgmr.msra.gmra.mxu1 %v18227_v4  ;;  %v16037_v4 = vld [vmem:[#allocation7 + $0x1858] sm:$0xf0]  ;;  %v18574_v13 = vpop.f32.mrf.mxu0  ;;  %v14120_v37 = vor.u32 %v17225_v8, %v14117_v7 }
 0x502   :  { %10084 = vmatpush.bf16.msrb.mxu1 %v15160_v5  ;;  %v16040_v53 = vor.u32 %v17705_v42, %v16037_v4  ;;  %10001 = vmatmul.bf16.vlgmr.msrb.gmra.mxu3 %v18292_v24  ;;  %v17445_v5 = vld [vmem:[#allocation7 + $0x1014] sm:$0xf]  ;;  %v15920_v42 = vor.u32 %v17675_v26, %v15917_v30  ;;  %v17555_v30 = vld [vmem:[#allocation7 + $0x1384] sm:$0xf] }
 0x503   :  { %10078 = vmatpush.bf16.msrb.mxu2 %v14560_v63  ;;  %10045 = vmatpush.bf16.msra.mxu3 %v14200_v38  ;;  %v15000_v63 = vor.u32 %v17445_v5, %v14997_v52  ;;  %v17425_v38 = vld [vmem:[#allocation7 + $0xf74] sm:$0xf]  ;;  %v17575_v52 = vld [vmem:[#allocation7 + $0x1424] sm:$0xf] }
 0x504   :  { %10066 = vmatmul.bf16.vlgmr.msrb.gmra.mxu0 %v18246_v6  ;;  %v17695_v6 = vld [vmem:[#allocation7 + $0x17e4] sm:$0xf]  ;;  %v17585_v4 = vld [vmem:[#allocation7 + $0x1474] sm:$0xf] }
 0x505   :  { %10110 = vmatpush.bf16.msra.mxu0 %v15800_v0  ;;  %v16000_v41 = vor.u32 %v17695_v6, %v15997_v20  ;;  %v17215_v0 = vld [vmem:[#allocation7 + $0x8e4] sm:$0xf]  ;;  %v14877_v6 = vld [vmem:[#allocation7 + $0xf48] sm:$0xf0]  ;;  %v17761_v26 = vld [vmem:[%s18869_s5 + $0xf0] sm:$0xff] }
 0x506   :  { %10085 = vmatpush.bf16.msrb.mxu1 %v15120_v31  ;;  %10079 = vmatmul.bf16.vlgmr.msrb.gmra.mxu2 %v18248_v19  ;;  %v15040_v19 = vor.u32 %v17455_v2, %v15037_v43  ;;  %v15640_v31 = vor.u32 %v17605_v59, %v15637_v14  ;;  %v14080_v15 = vor.u32 %v17215_v0, %v14077_v55  ;;  %v9794_v43 = vpop.f32.mrf.mxu3  ;;  %v15837_v59 = vld [vmem:[#allocation7 + $0x16c8] sm:$0xf0]  ;;  %v17185_v14 = vld [vmem:[#allocation7 + $0x7f4] sm:$0xf] }
 0x507   :  { %10123 = vmatpush.bf16.msra.mxu2 %v16120_v50  ;;  %10046 = vmatpush.bf16.msra.mxu3 %v14160_v10  ;;  %v9835_v50 = vpop.f32.mrf.mxu1  ;;  %v14920_v2 = vor.u32 %v17425_v38, %v14917_v3  ;;  %v13997_v10 = vld [vmem:[#allocation7 + $0x868] sm:$0xf0]  ;;  %v9795_v16 = vadd.f32 %v9794_v43, %v18558_v49  ;;  %v17738_v49 = vld [vmem:[%s18869_s5 + $0x38] sm:$0xff]  ;;  %v13960_v55 = vor.u32 %v17185_v14, %v13957_v22  ;;  %v17545_v3 = vld [vmem:[#allocation7 + $0x1334] sm:$0xf] }
 0x508   :  { %v17735_v38 = vld [vmem:[%s18869_s5 + $0x20] sm:$0xff]  ;;  %v17756_v22 = vld [vmem:[%s18869_s5 + $0xc8] sm:$0xff] }
 0x509   :  { %10111 = vmatpush.bf16.msra.mxu0 %v15760_v56  ;;  %v18576_v27 = vpop.f32.mrf.mxu2  ;;  %v14037_v56 = vld [vmem:[#allocation7 + $0x8b8] sm:$0xf0]  ;;  %v9808_v20 = vadd.f32 %v18561_v39, %v9795_v16 }
 0x50a   :  { %10086 = vmatpush.bf16.msrb.mxu1 %v15080_v46  ;;  %v14040_v46 = vor.u32 %v17205_v44, %v14037_v56  ;;  %v15437_v44 = vld [vmem:[#allocation7 + $0x13a8] sm:$0xf0] }
 0x50b   :  { %10124 = vmatpush.bf16.msra.mxu2 %v16080_v12  ;;  %10047 = vmatpush.bf16.msra.mxu3 %v14120_v37  ;;  %v9861_v12 = vpop.f32.mrf.mxu0  ;;  %v17655_v37 = vld [vmem:[#allocation7 + $0x16a4] sm:$0xf] }
 0x50c   :  { %v15840_v39 = vor.u32 %v17655_v37, %v15837_v59  ;;  %v17752_v12 = vld [vmem:[%s18869_s5 + $0xa8] sm:$0xff] }
 0x50d   :  { %10112 = vmatpush.bf16.msra.mxu0 %v15720_v60  ;;  %v15877_v60 = vld [vmem:[#allocation7 + $0x1718] sm:$0xf0]  ;;  %v15277_v37 = vld [vmem:[#allocation7 + $0x1268] sm:$0xf0] }
 0x50e   :  { %10087 = vmatpush.bf16.msrb.mxu1 %v15040_v19  ;;  %v15560_v19 = vor.u32 %v17585_v4, %v15557_v57  ;;  %v15880_v8 = vor.u32 %v17665_v33, %v15877_v60  ;;  %v9796_v50 = vpop.f32.mrf.mxu3  ;;  %v17759_v4 = vld [vmem:[%s18869_s5 + $0xe0] sm:$0xff]  ;;  %v17734_v33 = vld [vmem:[%s18869_s5 + $0x18] sm:$0xff] }
 0x50f   :  { %10125 = vmatpush.bf16.msra.mxu2 %v16040_v53  ;;  %10048 = vmatpush.bf16.msra.mxu3 %v14080_v15  ;;  %v17195_v53 = vld [vmem:[#allocation7 + $0x844] sm:$0xf]  ;;  %v15477_v15 = vld [vmem:[#allocation7 + $0x13f8] sm:$0xf0] }
 0x510   :  { %v14000_v5 = vor.u32 %v17195_v53, %v13997_v10  ;;  %v17750_v60 = vld [vmem:[%s18869_s5 + $0x98] sm:$0xff]  ;;  %v17747_v50 = vld [vmem:[%s18869_s5 + $0x80] sm:$0xff] }
 0x511   :  { %10113 = vmatpush.bf16.msra.mxu0 %v15680_v18  ;;  %v9874_v7 = vpop.f32.mrf.mxu2  ;;  %v15517_v18 = vld [vmem:[#allocation7 + $0x1448] sm:$0xf0]  ;;  %v17758_v53 = vld [vmem:[%s18869_s5 + $0xd8] sm:$0xff] }
 0x512   :  { %10088 = vmatpush.bf16.msrb.mxu1 %v15000_v63  ;;  %v9821_v63 = vadd.f32 %v18563_v28, %v9808_v20  ;;  %v15520_v1 = vor.u32 %v17575_v52, %v15517_v18  ;;  %v17737_v28 = vld [vmem:[%s18869_s5 + $0x30] sm:$0xff]  ;;  %v17732_v52 = vld [vmem:[%s18869_s5 + $0x8] sm:$0xff] }
 0x513   :  { %10126 = vmatpush.bf16.msra.mxu2 %v16000_v41  ;;  %10049 = vmatpush.bf16.msra.mxu3 %v14040_v46  ;;  %v14880_v41 = vor.u32 %v17415_v54, %v14877_v6  ;;  %v17751_v46 = vld [vmem:[%s18869_s5 + $0xa0] sm:$0xff]  ;;  %v17733_v54 = vld [vmem:[%s18869_s5 + $0x10] sm:$0xff] }
 0x514   :  { %v18585_v0 = vadd.f32 %v18571_v62, %v9821_v63  ;;  %v17565_v62 = vld [vmem:[#allocation7 + $0x13d4] sm:$0xf] }
 0x515   :  { %10114 = vmatpush.bf16.msra.mxu0 %v15640_v31  ;;  %v17175_v31 = vld [vmem:[#allocation7 + $0x7a4] sm:$0xf]  ;;  %v17525_v6 = vld [vmem:[#allocation7 + $0x1294] sm:$0xf] }
 0x516   :  { %10089 = vmatpush.bf16.msrb.mxu1 %v14960_v45  ;;  %v15480_v45 = vor.u32 %v17565_v62, %v15477_v15  ;;  %v17757_v7 = vld [vmem:[%s18869_s5 + $0xd0] sm:$0xff]  ;;  %v17794_v62 = vld [vmem:[%s18869_s5 + $0x1f8] sm:$0xff] }
 0x517   :  { %10127 = vmatpush.bf16.msra.mxu2 %v15960_v35  ;;  %10050 = vmatpush.bf16.msra.mxu3 %v14000_v5  ;;  %v13917_v35 = vld [vmem:[#allocation7 + $0x7c8] sm:$0xf0] }
 0x518   :  { %v13920_v29 = vor.u32 %v17175_v31, %v13917_v35  ;;  %v17786_v35 = vld [vmem:[%s18869_s5 + $0x1b8] sm:$0xff] }
 0x519   :  { %10115 = vmatpush.bf16.msra.mxu0 %v15600_v40  ;;  %v15397_v40 = vld [vmem:[#allocation7 + $0x1358] sm:$0xf0] }
 0x51a   :  { %10090 = vmatpush.bf16.msrb.mxu1 %v14920_v2  ;;  %v15400_v57 = vor.u32 %v17545_v3, %v15397_v40  ;;  %v15357_v2 = vld [vmem:[#allocation7 + $0x1308] sm:$0xf0]  ;;  %v17745_v40 = vld [vmem:[%s18869_s5 + $0x70] sm:$0xff] }
 0x51b   :  { %10128 = vmatpush.bf16.msra.mxu2 %v15920_v42  ;;  %10051 = vmatpush.bf16.msra.mxu3 %v13960_v55  ;;  %v17792_v3 = vld [vmem:[%s18869_s5 + $0x1e8] sm:$0xff] }
 0x51d   :  { %10116 = vmatpush.bf16.msra.mxu0 %v15560_v19  ;;  %v15317_v19 = vld [vmem:[#allocation7 + $0x12b8] sm:$0xf0] }
 0x51e   :  { %10091 = vmatpush.bf16.msrb.mxu1 %v14880_v41  ;;  %v18608_v56 = vpop.f32.mrf.mxu1  ;;  %v15320_v5 = vor.u32 %v17525_v6, %v15317_v19  ;;  %v17515_v41 = vld [vmem:[#allocation7 + $0x1244] sm:$0xf]  ;;  %v17765_v19 = vld [vmem:[%s18869_s5 + $0x110] sm:$0xff] }
 0x51f   :  { %10129 = vmatpush.bf16.msra.mxu2 %v15880_v8  ;;  %10052 = vmatpush.bf16.msra.mxu3 %v13920_v29  ;;  %v17749_v8 = vld [vmem:[%s18869_s5 + $0x90] sm:$0xff]  ;;  %v17743_v6 = vld [vmem:[%s18869_s5 + $0x60] sm:$0xff] }
 0x521   :  { %10117 = vmatpush.bf16.msra.mxu0 %v15520_v1  ;;  %10092 = vmatmul.bf16.vlgmr.msrb.gmra.mxu1 %v18253_v51  ;;  %v17736_v51 = vld [vmem:[%s18869_s5 + $0x28] sm:$0xff]  ;;  %v18620_v42 = vpop.f32.mrf.mxu0  ;;  %v15280_v1 = vor.u32 %v17515_v41, %v15277_v37 }
 0x522   :  { %10800 = vmatpush.bf16.msra.mxu1 %v17738_v49  ;;  %10053 = vmatmul.bf16.vlgmr.msra.gmra.mxu3 %v18231_v9  ;;  %v17535_v9 = vld [vmem:[#allocation7 + $0x12e4] sm:$0xf]  ;;  %v17748_v49 = vld [vmem:[%s18869_s5 + $0x88] sm:$0xff] }
 0x523   :  { %10130 = vmatpush.bf16.msra.mxu2 %v15840_v39  ;;  %10097 = vmatpush.bf16.msrb.mxu3 %v15480_v45  ;;  %v15360_v16 = vor.u32 %v17535_v9, %v15357_v2  ;;  %v17731_v39 = vld [vmem:[%s18869_s5] sm:$0xff]  ;;  %v17744_v9 = vld [vmem:[%s18869_s5 + $0x68] sm:$0xff] }
 0x524   :  { %10118 = vmatmul.bf16.vlgmr.msra.gmra.mxu0 %v18282_v36  ;;  %v17760_v36 = vld [vmem:[%s18869_s5 + $0xe8] sm:$0xff]  ;;  %v18722_v2 = vld [vmem:[#allocation8 + $0x8] sm:$0x3] }
 0x525   :  { %10826 = vmatpush.bf16.msrb.mxu0 %v17754_v34  ;;  %v9846_v18 = vpop.f32.mrf.mxu3  ;;  %v17505_v34 = vld [vmem:[#allocation7 + $0x11f4] sm:$0xf] }
 0x526   :  { %10801 = vmatpush.bf16.msra.mxu1 %v17737_v28  ;;  %10131 = vmatmul.bf16.vlgmr.msra.gmra.mxu2 %v18292_v24  ;;  %v15440_v24 = vor.u32 %v17555_v30, %v15437_v44  ;;  %v9887_v43 = vpop.f32.mrf.mxu1  ;;  %v9847_v59 = vadd.f32 %v9846_v18, %v18585_v0  ;;  %v10136_v0 = vmax.f32 %v18340_v17, 0.0  ;;  %v17755_v17 = vld [vmem:[%s18869_s5 + $0xc0] sm:$0xff]  ;;  %v10139_v28 = vmax.f32 %v18439_v61, 0.0  ;;  %v17785_v30 = vld [vmem:[%s18869_s5 + $0x1b0] sm:$0xff]  ;;  %v17764_v18 = vld [vmem:[%s18869_s5 + $0x108] sm:$0xff] }
 0x527   :  { %10839 = vmatpush.bf16.msrb.mxu2 %v17762_v58  ;;  %v15237_v58 = vld [vmem:[#allocation7 + $0x1218] sm:$0xf0] }
 0x528   :  { %10098 = vmatpush.bf16.msrb.mxu3 %v15440_v24  ;;  %v9860_v14 = vadd.f32 %v18574_v13, %v9847_v59  ;;  %v17770_v13 = vld [vmem:[%s18869_s5 + $0x138] sm:$0xff]  ;;  %v15240_v31 = vor.u32 %v17505_v34, %v15237_v58  ;;  %v10146_v29 = vpack.c.bf16 %v10136_v0, %v10136_v0  ;;  %v10149_v45 = vpack.c.bf16 %v10139_v28, %v10139_v28  ;;  %v17793_v44 = vld [vmem:[%s18869_s5 + $0x1f0] sm:$0xff]  ;;  %v17779_v0 = vld [vmem:[%s18869_s5 + $0x180] sm:$0xff] }
 0x529   :  { %10827 = vmatpush.bf16.msrb.mxu0 %v17753_v25  ;;  %v18637_v10 = vpop.f32.mrf.mxu2  ;;  %v9913_v20 = vpop.f32.mrf.mxu0  ;;  %v17769_v25 = vld [vmem:[%s18869_s5 + $0x130] sm:$0xff]  ;;  %v17787_v34 = vld [vmem:[%s18869_s5 + $0x1c0] sm:$0xff]  ;;  %v17740_v58 = vld [vmem:[%s18869_s5 + $0x48] sm:$0xff] }
 0x52a   :  { %10802 = vmatpush.bf16.msra.mxu1 %v17736_v51  ;;  %v18664_v55 = vadd.f32 %v18576_v27, %v9860_v14  ;;  %v10138_v27 = vmax.f32 %v18408_v23, 0.0  ;;  %v17495_v23 = vld [vmem:[#allocation7 + $0x11a4] sm:$0xf] }
 0x52b   :  { %10840 = vmatpush.bf16.msrb.mxu2 %v17761_v26  ;;  %v15197_v26 = vld [vmem:[#allocation7 + $0x11c8] sm:$0xf0] }
 0x52c   :  { %10099 = vmatpush.bf16.msrb.mxu3 %v15400_v57  ;;  %v10148_v61 = vpack.c.bf16 %v10138_v27, %v10138_v27  ;;  %v15200_v51 = vor.u32 %v17495_v23, %v15197_v26  ;;  %v17783_v57 = vld [vmem:[%s18869_s5 + $0x1a0] sm:$0xff] }
 0x52d   :  { %10828 = vmatpush.bf16.msrb.mxu0 %v17752_v12  ;;  %v9848_v15 = vpop.f32.mrf.mxu3  ;;  %v17746_v12 = vld [vmem:[%s18869_s5 + $0x78] sm:$0xff]  ;;  %v17799_v23 = vld [vmem:[%s18869_s5 + $0x220] sm:$0xff] }
 0x52e   :  { %10803 = vmatpush.bf16.msra.mxu1 %v17735_v38  ;;  %v17784_v38 = vld [vmem:[%s18869_s5 + $0x1a8] sm:$0xff] }
 0x52f   :  { %10841 = vmatpush.bf16.msrb.mxu2 %v17760_v36  ;;  %v17768_v36 = vld [vmem:[%s18869_s5 + $0x128] sm:$0xff] }
 0x530   :  { %10100 = vmatpush.bf16.msrb.mxu3 %v15360_v16  ;;  %v17790_v16 = vld [vmem:[%s18869_s5 + $0x1d8] sm:$0xff] }
 0x531   :  { %10829 = vmatpush.bf16.msrb.mxu0 %v17751_v46  ;;  %v9926_v63 = vpop.f32.mrf.mxu2  ;;  %v17767_v46 = vld [vmem:[%s18869_s5 + $0x120] sm:$0xff] }
 0x532   :  { %10804 = vmatpush.bf16.msra.mxu1 %v17734_v33  ;;  %v17791_v33 = vld [vmem:[%s18869_s5 + $0x1e0] sm:$0xff] }
 0x533   :  { %10842 = vmatpush.bf16.msrb.mxu2 %v17759_v4  ;;  %v17763_v63 = vld [vmem:[%s18869_s5 + $0x100] sm:$0xff] }
 0x534   :  { %10101 = vmatpush.bf16.msrb.mxu3 %v15320_v5  ;;  %v17789_v5 = vld [vmem:[%s18869_s5 + $0x1d0] sm:$0xff] }
 0x535   :  { %10830 = vmatpush.bf16.msrb.mxu0 %v17750_v60  ;;  %v17782_v60 = vld [vmem:[%s18869_s5 + $0x198] sm:$0xff] }
 0x536   :  { %10805 = vmatpush.bf16.msra.mxu1 %v17733_v54 }
 0x537   :  { %10843 = vmatpush.bf16.msrb.mxu2 %v17758_v53  ;;  %v4824_v53 = vperm.slane %v18722_v2, 0 }
 0x538   :  { %10102 = vmatpush.bf16.msrb.mxu3 %v15280_v1  ;;  %v10140_v1 = vmax.f32 %v18487_v32, 0.0 }
 0x539   :  { %10831 = vmatpush.bf16.msrb.mxu0 %v17749_v8  ;;  %v17781_v8 = vld [vmem:[%s18869_s5 + $0x190] sm:$0xff] }
 0x53a   :  { %10806 = vmatpush.bf16.msra.mxu1 %v17732_v52  ;;  %v17742_v52 = vld [vmem:[%s18869_s5 + $0x58] sm:$0xff] }
 0x53b   :  { %10844 = vmatpush.bf16.msrb.mxu2 %v17757_v7  ;;  %v9886_v7 = vadd.f32 %v18608_v56, %v4824_v53  ;;  %v17780_v56 = vld [vmem:[%s18869_s5 + $0x188] sm:$0xff]  ;;  %v10141_v53 = vmax.f32 %v18518_v21, 0.0  ;;  %v17810_v21 = vld [vmem:[%s18869_s5 + $0x278] sm:$0xff] }
 0x53c   :  { %10103 = vmatpush.bf16.msrb.mxu3 %v15240_v31  ;;  %v10137_v31 = vmax.f32 %v18360_v48, 0.0  ;;  %v17777_v48 = vld [vmem:[%s18869_s5 + $0x170] sm:$0xff] }
 0x53d   :  { %10832 = vmatpush.bf16.msrb.mxu0 %v17748_v49  ;;  %v17788_v49 = vld [vmem:[%s18869_s5 + $0x1c8] sm:$0xff] }
 0x53e   :  { %10807 = vmatpush.bf16.msra.mxu1 %v17731_v39  ;;  %v9937_v24 = vpop.f32.mrf.mxu1 }
 0x53f   :  { %10845 = vmatpush.bf16.msrb.mxu2 %v17756_v22  ;;  %v17741_v22 = vld [vmem:[%s18869_s5 + $0x50] sm:$0xff] }
 0x540   :  { %10104 = vmatpush.bf16.msrb.mxu3 %v15200_v51  ;;  %v17798_v51 = vld [vmem:[%s18869_s5 + $0x218] sm:$0xff] }
 0x541   :  { %10833 = vmatpush.bf16.msrb.mxu0 %v17747_v50  ;;  %10808 = vmatmul.bf16.vlgmr.msra.gmra.mxu1 %v10146_v29  ;;  %v18711_v4 = vpop.f32.mrf.mxu0  ;;  %v4825_v29 = vperm.slane %v18722_v2, 1  ;;  %v17773_v2 = vld [vmem:[%s18869_s5 + $0x150] sm:$0xff] }
 0x542   :  { %10852 = vmatpush.bf16.msrb.mxu1 %v17770_v13  ;;  %v10142_v13 = vmax.f32 %v18566_v47, 0.0  ;;  %v17801_v47 = vld [vmem:[%s18869_s5 + $0x230] sm:$0xff] }
 0x543   :  { %10846 = vmatpush.bf16.msrb.mxu2 %v17755_v17  ;;  %10105 = vmatmul.bf16.vlgmr.msrb.gmra.mxu3 %v18250_v11  ;;  %v17766_v11 = vld [vmem:[%s18869_s5 + $0x118] sm:$0xff]  ;;  %v10150_v17 = vpack.c.bf16 %v10140_v1, %v10140_v1  ;;  %v17807_v1 = vld [vmem:[%s18869_s5 + $0x260] sm:$0xff] }
 0x544   :  { %10834 = vmatmul.bf16.vlgmr.msrb.gmra.mxu0 %v10148_v61  ;;  %10813 = vmatpush.bf16.msra.mxu3 %v17746_v12  ;;  %v10152_v27 = vpack.c.bf16 %v10142_v13, %v10142_v13  ;;  %v17775_v12 = vld [vmem:[%s18869_s5 + $0x160] sm:$0xff] }
 0x545   :  { %10878 = vmatpush.bf16.msra.mxu0 %v17786_v35  ;;  %v9898_v41 = vpop.f32.mrf.mxu3  ;;  %v17778_v35 = vld [vmem:[%s18869_s5 + $0x178] sm:$0xff] }
 0x546   :  { %10853 = vmatpush.bf16.msrb.mxu1 %v17769_v25  ;;  %10847 = vmatmul.bf16.vlgmr.msrb.gmra.mxu2 %v10149_v45  ;;  %v9939_v43 = vpop.f32.mrf.mxu1  ;;  %v9899_v37 = vadd.f32 %v9898_v41, %v9886_v7  ;;  %v10147_v25 = vpack.c.bf16 %v10137_v31, %v10137_v31  ;;  %v17776_v45 = vld [vmem:[%s18869_s5 + $0x168] sm:$0xff] }
 0x547   :  { %10891 = vmatpush.bf16.msra.mxu2 %v17794_v62  ;;  %v17800_v62 = vld [vmem:[%s18869_s5 + $0x228] sm:$0xff] }
 0x548   :  { %10814 = vmatpush.bf16.msra.mxu3 %v17745_v40  ;;  %v9912_v59 = vadd.f32 %v18620_v42, %v9899_v37  ;;  %v17802_v42 = vld [vmem:[%s18869_s5 + $0x238] sm:$0xff]  ;;  %v17796_v40 = vld [vmem:[%s18869_s5 + $0x208] sm:$0xff] }
 0x549   :  { %10879 = vmatpush.bf16.msra.mxu0 %v17785_v30  ;;  %v18734_v54 = vpop.f32.mrf.mxu2  ;;  %v9965_v20 = vpop.f32.mrf.mxu0  ;;  %v17772_v43 = vld [vmem:[%s18869_s5 + $0x148] sm:$0xff] }
 0x54a   :  { %10854 = vmatpush.bf16.msrb.mxu1 %v17768_v36  ;;  %v9925_v39 = vadd.f32 %v18637_v10, %v9912_v59  ;;  %v10143_v10 = vmax.f32 %v18664_v55, 0.0  ;;  %v17739_v55 = vld [vmem:[%s18869_s5 + $0x40] sm:$0xff]  ;;  %v17797_v36 = vld [vmem:[%s18869_s5 + $0x210] sm:$0xff] }
 0x54b   :  { %10892 = vmatpush.bf16.msra.mxu2 %v17793_v44 }
 0x54c   :  { %10815 = vmatpush.bf16.msra.mxu3 %v17744_v9  ;;  %v9938_v32 = vadd.f32 %v9937_v24, %v9925_v39  ;;  %v10153_v28 = vpack.c.bf16 %v10143_v10, %v10143_v10 }
 0x54d   :  { %10880 = vmatpush.bf16.msra.mxu0 %v17784_v38  ;;  %v9900_v50 = vpop.f32.mrf.mxu3 }
 0x54e   :  { %10855 = vmatpush.bf16.msrb.mxu1 %v17767_v46  ;;  %v17804_v50 = vld [vmem:[%s18869_s5 + $0x248] sm:$0xff] }
 0x54f   :  { %10893 = vmatpush.bf16.msra.mxu2 %v17792_v3  ;;  %v17774_v3 = vld [vmem:[%s18869_s5 + $0x158] sm:$0xff] }
 0x550   :  { %10816 = vmatpush.bf16.msra.mxu3 %v17743_v6 }
 0x551   :  { %10881 = vmatpush.bf16.msra.mxu0 %v17783_v57  ;;  %v9978_v14 = vpop.f32.mrf.mxu2 }
 0x552   :  { %10856 = vmatpush.bf16.msrb.mxu1 %v17766_v11  ;;  %v17795_v11 = vld [vmem:[%s18869_s5 + $0x200] sm:$0xff] }
 0x553   :  { %10894 = vmatpush.bf16.msra.mxu2 %v17791_v33 }
 0x554   :  { %10817 = vmatpush.bf16.msra.mxu3 %v17742_v52 }
 0x555   :  { %10882 = vmatpush.bf16.msra.mxu0 %v17782_v60 }
 0x556   :  { %10857 = vmatpush.bf16.msrb.mxu1 %v17765_v19 }
 0x557   :  { %10895 = vmatpush.bf16.msra.mxu2 %v17790_v16  ;;  %v10151_v16 = vpack.c.bf16 %v10141_v53, %v10141_v53 }
 0x558   :  { %10818 = vmatpush.bf16.msra.mxu3 %v17741_v22  ;;  %v17809_v22 = vld [vmem:[%s18869_s5 + $0x270] sm:$0xff] }
 0x559   :  { %10883 = vmatpush.bf16.msra.mxu0 %v17781_v8 }
 0x55a   :  { %10858 = vmatpush.bf16.msrb.mxu1 %v17764_v18 }
 0x55b   :  { %10896 = vmatpush.bf16.msra.mxu2 %v17789_v5 }
 0x55c   :  { %10819 = vmatpush.bf16.msra.mxu3 %v17740_v58 }
 0x55d   :  { %10884 = vmatpush.bf16.msra.mxu0 %v17780_v56 }
 0x55e   :  { %10859 = vmatpush.bf16.msrb.mxu1 %v17763_v63  ;;  %v9989_v15 = vpop.f32.mrf.mxu1 }
 0x55f   :  { %10897 = vmatpush.bf16.msra.mxu2 %v17788_v49 }
 0x560   :  { %10820 = vmatpush.bf16.msra.mxu3 %v17739_v55 }
 0x561   :  { %10885 = vmatpush.bf16.msra.mxu0 %v17779_v0  ;;  %10860 = vmatmul.bf16.vlgmr.msrb.gmra.mxu1 %v10150_v17  ;;  %v10015_v26 = vpop.f32.mrf.mxu0 }
 0x562   :  { %10904 = vmatpush.bf16.msra.mxu1 %v17802_v42  ;;  %v10016_v61 = vadd.f32 %v10015_v26, %v4825_v29  ;;  %v17806_v42 = vld [vmem:[%s18869_s5 + $0x258] sm:$0xff] }
 0x563   :  { %10898 = vmatpush.bf16.msra.mxu2 %v17787_v34  ;;  %10821 = vmatmul.bf16.vlgmr.msra.gmra.mxu3 %v10147_v25 }
 0x564   :  { %10886 = vmatmul.bf16.vlgmr.msra.gmra.mxu0 %v10152_v27  ;;  %10865 = vmatpush.bf16.msrb.mxu3 %v17778_v35  ;;  %v17803_v27 = vld [vmem:[%s18869_s5 + $0x240] sm:$0xff] }
 0x565   :  { %v9950_v46 = vpop.f32.mrf.mxu3 }
 0x566   :  { %10905 = vmatpush.bf16.msra.mxu1 %v17801_v47  ;;  %10899 = vmatmul.bf16.vlgmr.msra.gmra.mxu2 %v10153_v28  ;;  %v9991_v30 = vpop.f32.mrf.mxu1  ;;  %v9951_v57 = vadd.f32 %v9950_v46, %v9938_v32  ;;  %v17805_v32 = vld [vmem:[%s18869_s5 + $0x250] sm:$0xff] }
 0x568   :  { %10866 = vmatpush.bf16.msrb.mxu3 %v17777_v48  ;;  %v9964_v33 = vadd.f32 %v18711_v4, %v9951_v57  ;;  %v17771_v4 = vld [vmem:[%s18869_s5 + $0x140] sm:$0xff] }
 0x569   :  { %v10028_v44 = vpop.f32.mrf.mxu2  ;;  %v10017_v38 = vpop.f32.mrf.mxu0 }
 0x56a   :  { %10906 = vmatpush.bf16.msra.mxu1 %v17800_v62  ;;  %v10029_v24 = vadd.f32 %v10028_v44, %v10016_v61  ;;  %v9977_v5 = vadd.f32 %v18734_v54, %v9964_v33  ;;  %v17808_v54 = vld [vmem:[%s18869_s5 + $0x268] sm:$0xff]  ;;  %v17819_v38 = vld [vmem:[#allocation10] ss:$0 sm:$0xff]  ;;  %s17984_s5 = smov [#allocation11]  }
 0x56b   :  { %s10937_s3 = sshll.u32 %s17984_s5, 4  ;;  %s10938_s3 = int_to_ptr.vmem [resolvable:$true] %s10937_s3 }
 0x56c   :  { %10867 = vmatpush.bf16.msrb.mxu3 %v17776_v45  ;;  %v9990_v18 = vadd.f32 %v9989_v15, %v9977_v5 }
 0x56d   :  { %v9952_v60 = vpop.f32.mrf.mxu3 }
 0x56e   :  { %10907 = vmatpush.bf16.msra.mxu1 %v17799_v23 }
 0x570   :  { %10868 = vmatpush.bf16.msrb.mxu3 %v17775_v12 }
 0x571   :  { %v10030_v9 = vpop.f32.mrf.mxu2 }
 0x572   :  { %10908 = vmatpush.bf16.msra.mxu1 %v17798_v51 }
 0x574   :  { %10869 = vmatpush.bf16.msrb.mxu3 %v17774_v3 }
 0x576   :  { %10909 = vmatpush.bf16.msra.mxu1 %v17797_v36 }
 0x578   :  { %10870 = vmatpush.bf16.msrb.mxu3 %v17773_v2 }
 0x57a   :  { %10910 = vmatpush.bf16.msra.mxu1 %v17796_v40 }
 0x57c   :  { %10871 = vmatpush.bf16.msrb.mxu3 %v17772_v43 }
 0x57e   :  { %10911 = vmatpush.bf16.msra.mxu1 %v17795_v11  ;;  %v10041_v6 = vpop.f32.mrf.mxu1 }
 0x57f   :  { %v10042_v19 = vadd.f32 %v10041_v6, %v10029_v24 }
 0x580   :  { %10872 = vmatpush.bf16.msrb.mxu3 %v17771_v4 }
 0x581   :  { %v10067_v20 = vpop.f32.mrf.mxu0 }
 0x583   :  { %10873 = vmatmul.bf16.vlgmr.msrb.gmra.mxu3 %v10151_v16 }
 0x584   :  { %10917 = vmatpush.bf16.msra.mxu3 %v17810_v21 }
 0x585   :  { %v10002_v41 = vpop.f32.mrf.mxu3 }
 0x586   :  { %v10043_v8 = vpop.f32.mrf.mxu1  ;;  %v10003_v37 = vadd.f32 %v10002_v41, %v9990_v18 }
 0x588   :  { %v10144_v56 = vmax.f32 %v10003_v37, 0.0  ;;  %10918 = vmatpush.bf16.msra.mxu3 %v17809_v22 }
 0x589   :  { %v10080_v7 = vpop.f32.mrf.mxu2  ;;  %v10069_v52 = vpop.f32.mrf.mxu0 }
 0x58a   :  { %v10154_v49 = vpack.c.bf16 %v10144_v56, %v10144_v56 }
 0x58c   :  { %10912 = vmatmul.bf16.vlgmr.msra.gmra.mxu1 %v10154_v49  ;;  %10919 = vmatpush.bf16.msra.mxu3 %v17808_v54 }
 0x58d   :  { %v10004_v14 = vpop.f32.mrf.mxu3 }
 0x590   :  { %10920 = vmatpush.bf16.msra.mxu3 %v17807_v1 }
 0x591   :  { %v10082_v59 = vpop.f32.mrf.mxu2 }
 0x594   :  { %10921 = vmatpush.bf16.msra.mxu3 %v17806_v42 }
 0x598   :  { %10922 = vmatpush.bf16.msra.mxu3 %v17805_v32 }
 0x59c   :  { %10923 = vmatpush.bf16.msra.mxu3 %v17804_v50 }
 0x59e   :  { %v10093_v63 = vpop.f32.mrf.mxu1 }
 0x5a0   :  { %10924 = vmatpush.bf16.msra.mxu3 %v17803_v27 }
 0x5a1   :  { %v10119_v39 = vpop.f32.mrf.mxu0 }
 0x5a5   :  { %v10054_v10 = vpop.f32.mrf.mxu3 }
 0x5a6   :  { %v10095_v0 = vpop.f32.mrf.mxu1  ;;  %v10055_v58 = vadd.f32 %v10054_v10, %v10042_v19 }
 0x5a8   :  { %v10068_v17 = vadd.f32 %v10067_v20, %v10055_v58 }
 0x5a9   :  { %v10132_v13 = vpop.f32.mrf.mxu2  ;;  %v10121_v34 = vpop.f32.mrf.mxu0 }
 0x5aa   :  { %v10081_v15 = vadd.f32 %v10080_v7, %v10068_v17 }
 0x5ac   :  { %v10094_v25 = vadd.f32 %v10093_v63, %v10081_v15 }
 0x5ad   :  { %v10056_v28 = vpop.f32.mrf.mxu3 }
 0x5b1   :  { %v10134_v47 = vpop.f32.mrf.mxu2 }
 0x5be   :  { %v10809_v55 = vpop.f32.mrf.mxu1 }
 0x5bf   :  { %v10810_v46 = vadd.f32 %v17819_v38, %v10809_v55 }
 0x5c1   :  { %v10835_v31 = vpop.f32.mrf.mxu0 }
 0x5c6   :  { %v10811_v35 = vpop.f32.mrf.mxu1  ;;  %v10106_v48 = vpop.f32.mrf.mxu3 }
 0x5c7   :  { %v10107_v23 = vadd.f32 %v10106_v48, %v10094_v25 }
 0x5c9   :  { %v10848_v62 = vpop.f32.mrf.mxu2  ;;  %v10837_v29 = vpop.f32.mrf.mxu0  ;;  %v10120_v26 = vadd.f32 %v10119_v39, %v10107_v23 }
 0x5cb   :  { %v10133_v45 = vadd.f32 %v10132_v13, %v10120_v26 }
 0x5cd   :  { %v10145_v51 = vmax.f32 %v10133_v45, 0.0 }
 0x5ce   :  { %v10108_v30 = vpop.f32.mrf.mxu3 }
 0x5cf   :  { %v10155_v44 = vpack.c.bf16 %v10145_v51, %v10145_v51 }
 0x5d1   :  { %v10850_v61 = vpop.f32.mrf.mxu2  ;;  %10925 = vmatmul.bf16.vlgmr.msra.gmra.mxu3 %v10155_v44 }
 0x5de   :  { %v10861_v12 = vpop.f32.mrf.mxu1 }
 0x5e1   :  { %v10887_v36 = vpop.f32.mrf.mxu0 }
 0x5e6   :  { %v10863_v24 = vpop.f32.mrf.mxu1  ;;  %v10822_v57 = vpop.f32.mrf.mxu3 }
 0x5e7   :  { %v10823_v33 = vadd.f32 %v10822_v57, %v10810_v46 }
 0x5e9   :  { %v10900_v3 = vpop.f32.mrf.mxu2  ;;  %v10889_v40 = vpop.f32.mrf.mxu0  ;;  %v10836_v9 = vadd.f32 %v10835_v31, %v10823_v33 }
 0x5eb   :  { %v10849_v11 = vadd.f32 %v10848_v62, %v10836_v9 }
 0x5ed   :  { %v10862_v43 = vadd.f32 %v10861_v12, %v10849_v11 }
 0x5ee   :  { %v10824_v60 = vpop.f32.mrf.mxu3 }
 0x5f1   :  { %v10902_v2 = vpop.f32.mrf.mxu2 }
 0x606   :  { %v10874_v4 = vpop.f32.mrf.mxu3 }
 0x607   :  { %v10875_v53 = vadd.f32 %v10874_v4, %v10862_v43 }
 0x609   :  { %v10888_v16 = vadd.f32 %v10887_v36, %v10875_v53  ;;  %v10913_v20 = vpop.f32.mrf.mxu1 }
 0x60b   :  { %v10901_v6 = vadd.f32 %v10900_v3, %v10888_v16 }
 0x60d   :  { %v10914_v8 = vadd.f32 %v10913_v20, %v10901_v6 }
 0x60e   :  { %v10876_v19 = vpop.f32.mrf.mxu3 }
 0x611   :  { %v10915_v7 = vpop.f32.mrf.mxu1 }
 0x654   :  { %v10926_v5 = vpop.f32.mrf.mxu3 }
 0x655   :  { %v10927_v52 = vadd.f32 %v10926_v5, %v10914_v8 }
 0x657   :  { %10931 = vst.msk [vmem:[#allocation11] sm:$0xff] %vm10930_vm1, %v10927_v52 }
 0x658   :  { %10942 = dma.vmem_to_hbm [thread:$0]  %s10938_s3, 128, %s10940_s26, [#allocation4]  }
 0x65c   :  { %v10928_v18 = vpop.f32.mrf.mxu3 }
 0x65d   :  { %17975 = dma.done.wait [#allocation4], 128  }
 0x65e   :  { %17976 = vsyncadd [#allocation4], 4294967168 }
 0x65f   :  { %10947 = vsyncpa [#allocation3], 1 }
 0x660   :  { %10948 = vsyncpa [#allocation6], 1 }
 0x661   :  { %10949 = vsyncpa [#allocation9], 1 }
 0x662   :  { %10950 = vsyncpa [#allocation4], 1 }

</bundles_post_ra>
